<compile_context>
chip_gen: v7x
topology: tpu7x:2x2x1
jax: 0.10.0
libtpu: 0.0.40
codegen_flags: <defaults>
</compile_context>

<pallas_src>
import math

import jax
import jax.numpy as jnp
from jax.experimental import pallas as pl
from jax.experimental.pallas import tpu as pltpu


# ----------------------------- fused Pallas kernel -----------------------------

def _make_ngae_kernel(max_n, nvt, hs, nz, bb, beta):
    """Whole NGAE.forward for one block of `bb` graphs (everything unrolled)."""
    f32 = jnp.float32

    def kernel(x_ref, adj_ref, eps_ref,
               wih_e, whh_e, bih_e, bhh_e,          # grue_forward  (r|z|n combined)
               wih_d, whh_d, bih_d, bhh_d,          # grud
               wfc1, bfc1, wfc2, bfc2, wfc3, bfc3,  # fc1 / fc2 / fc3
               wav1, bav1, wav2, bav2,              # add_vertex MLP
               wae1a, wae1b, bae1, wae2, bae2,      # add_edge MLP (layer-1 split)
               wg_h, bg, wg_id, wm_h, wm_id,        # gate_forward / mapper_forward
               out_ref, gm_ref, ea_ref):

        # ---- hoist every weight load (VMEM ref -> value) exactly once ----
        wih_e_v, whh_e_v = wih_e[...], whh_e[...]
        bih_e_v, bhh_e_v = bih_e[...], bhh_e[...]
        wih_d_v, whh_d_v = wih_d[...], whh_d[...]
        bih_d_v, bhh_d_v = bih_d[...], bhh_d[...]
        wfc1_v, bfc1_v = wfc1[...], bfc1[...]
        wfc2_v, bfc2_v = wfc2[...], bfc2[...]
        wfc3_v, bfc3_v = wfc3[...], bfc3[...]
        wav1_v, bav1_v = wav1[...], bav1[...]
        wav2_v, bav2_v = wav2[...], bav2[...]
        wae1a_v, wae1b_v, bae1_v = wae1a[...], wae1b[...], bae1[...]
        wae2_v, bae2_v = wae2[...], bae2[...]
        wg_h_v, bg_v, wg_id_v = wg_h[...], bg[...], wg_id[...]
        wm_h_v, wm_id_v = wm_h[...], wm_id[...]

        zeros_h = jnp.zeros((bb, hs), f32)

        def dot(a, b):
            return jnp.dot(a, b, preferred_element_type=f32)

        def gru_core(gi, h, gh):
            # PyTorch nn.GRUCell, gate order (r, z, n); gi = x@Wih+bih, gh = h@Whh+bhh.
            r = jax.nn.sigmoid(gi[:, :hs] + gh[:, :hs])
            z = jax.nn.sigmoid(gi[:, hs:2 * hs] + gh[:, hs:2 * hs])
            n = jnp.tanh(gi[:, 2 * hs:] + r * gh[:, 2 * hs:])
            return (1.0 - z) * n + z * h

        def gate_map(h, u):
            # gate([h, onehot(u)]) * mapper([h, onehot(u)]): one-hot block == row u of
            # the id part of the weights (no eye() ever materialized).
            g = jax.nn.sigmoid(dot(h, wg_h_v) + bg_v + wg_id_v[u:u + 1, :])
            m = dot(h, wm_h_v) + wm_id_v[u:u + 1, :]
            return g * m

        # -------------------------------- encode --------------------------------
        gi = dot(x_ref[0, 0], wih_e_v) + bih_e_v            # vertex 0, H0 = 0
        hv = gru_core(gi, zeros_h, bhh_e_v)
        gm_ref[0] = gate_map(hv, 0)
        for v in range(1, max_n):
            adjcol = adj_ref[v, 0]                          # [bb, max_n], col u = edge u->v
            agg = zeros_h
            for u in range(v):                              # masked sum of cached messages
                agg = agg + adjcol[:, u:u + 1] * gm_ref[u]
            gi = dot(x_ref[v, 0], wih_e_v) + bih_e_v
            gh = dot(agg, whh_e_v) + bhh_e_v
            hv = gru_core(gi, agg, gh)
            if v < max_n - 1:                               # last vertex is never a predecessor
                gm_ref[v] = gate_map(hv, v)

        hg = hv                                             # graph state = last vertex
        mu = dot(hg, wfc1_v) + bfc1_v
        logvar = dot(hg, wfc2_v) + bfc2_v

        # ---------------------- reparameterize + decode init ----------------------
        std = jnp.exp(0.5 * logvar)
        z = eps_ref[0] * 0.01 * std + mu                    # eps_scale = 0.01
        h0 = jnp.tanh(dot(z, wfc3_v) + bfc3_v)

        x0 = x_ref[0, 0]
        gi = dot(x0, wih_d_v) + bih_d_v
        gh = dot(h0, whh_d_v) + bhh_d_v
        hprev = gru_core(gi, h0, gh)                        # DH[0]
        gm_ref[0] = gate_map(hprev, 0)                      # gm scratch now holds decode rows
        ea_ref[0] = dot(hprev, wae1a_v)                     # edge-MLP left term (loop-invariant)

        res = jnp.zeros((1, 1), f32)

        # ---------------------- teacher-forced decode loss ----------------------
        for v in range(1, max_n):
            xv = x_ref[v, 0]                                # one-hot of true type of v
            adjcol = adj_ref[v, 0]                          # true in-edges of v (cols u < v)

            # add_vertex log-likelihood from decode-graph state DH[v-1]
            hmid = jnp.maximum(dot(hprev, wav1_v) + bav1_v, 0.0)
            ts = dot(hmid, wav2_v) + bav2_v
            ts = ts - jnp.max(ts, axis=-1, keepdims=True)
            logp = ts - jnp.log(jnp.sum(jnp.exp(ts), axis=-1, keepdims=True))
            res = res + jnp.sum(logp * xv, keepdims=True)

            # add vertex v (true type); no incoming edges yet -> H = 0
            gi_v = dot(xv, wih_d_v) + bih_d_v               # hoisted: xv fixed in inner loop
            hcur = gru_core(gi_v, zeros_h, bhh_d_v)
            agg = zeros_h
            for vi in range(v - 1, -1, -1):
                # edge score uses DH[v] as updated by the previous teacher-forced edge
                e_h = jnp.maximum(ea_ref[vi] + dot(hcur, wae1b_v) + bae1_v, 0.0)
                elogit = jnp.sum(e_h * wae2_v, axis=-1, keepdims=True) + bae2_v
                # BCE(sigmoid(elogit), gt) with log terms clamped at -100 (PyTorch parity)
                t = jnp.exp(-jnp.abs(elogit))
                log_p = jnp.maximum(jnp.minimum(elogit, 0.0) - jnp.log(1.0 + t), -100.0)
                log_1mp = jnp.maximum(jnp.minimum(-elogit, 0.0) - jnp.log(1.0 + t), -100.0)
                gt = adjcol[:, vi:vi + 1]
                res = res + jnp.sum(gt * log_p + (1.0 - gt) * log_1mp, keepdims=True)
                # teacher forcing: add true edge vi->v (if present), re-update DH[v]
                agg = agg + gt * gm_ref[vi]
                gh = dot(agg, whh_d_v) + bhh_d_v
                hcur = gru_core(gi_v, agg, gh)
            hprev = hcur                                    # DH[v] final
            if v < max_n - 1:
                gm_ref[v] = gate_map(hprev, v)
                ea_ref[v] = dot(hprev, wae1a_v)

        kld = -0.5 * jnp.sum(1.0 + logvar - mu * mu - jnp.exp(logvar), keepdims=True)
        total = -res + beta * kld                           # (1, 1)
        out_ref[0] = jnp.zeros((8, 128), f32) + total       # lane-dense output tile

    return kernel


# --------------------------------- wrapper ---------------------------------

def ngae_forward(params, types, adj, eps, cfg, bb=1, beta=0.005):
    B, max_n = types.shape
    hs, nz, nvt = cfg["hs"], cfg["nz"], cfg["nvt"]
    assert B % bb == 0
    nb = B // bb
    f32 = jnp.float32

    # ---- data layout: batch-blocked so the grid axis can run 'parallel' ----
    X = jax.nn.one_hot(types, nvt, dtype=f32)                 # [B, max_n, nvt]
    x4 = jnp.transpose(X, (1, 0, 2)).reshape(max_n, nb, bb, nvt)

    # only u < v can be a true in-edge (topological order); mask for safety
    tri = (jnp.arange(max_n)[:, None] < jnp.arange(max_n)[None, :]).astype(f32)
    a_vbu = jnp.transpose(adj * tri[None], (2, 0, 1))         # [v, b, u] = adj[b, u, v]
    adj4 = a_vbu.reshape(max_n, nb, bb, max_n)

    eps3 = eps.reshape(nb, bb, nz)

    # ---- weights (all pre-transposed [in, out]; gate/mapper split hidden vs id rows)
    ge, gd = params["grue_forward"], params["grud"]
    wfc1, bfc1 = params["fc1"]
    wfc2, bfc2 = params["fc2"]
    wfc3, bfc3 = params["fc3"]
    wav1, bav1, wav2, bav2 = params["add_vertex"]
    wae1, bae1, wae2, bae2 = params["add_edge"]
    wg_full, bg = params["gate_forward"]
    wm_full = params["mapper_forward"]
    weights = [
        ge["w_ih"], ge["w_hh"], ge["b_ih"], ge["b_hh"],
        gd["w_ih"], gd["w_hh"], gd["b_ih"], gd["b_hh"],
        wfc1, bfc1, wfc2, bfc2, wfc3, bfc3,
        wav1, bav1, wav2, bav2,
        wae1[:hs], wae1[hs:], bae1, wae2, bae2,
        wg_full[:hs], bg, wg_full[hs:],
        wm_full[:hs], wm_full[hs:],
    ]

    kernel = _make_ngae_kernel(max_n, nvt, hs, nz, bb, beta)
    out = pl.pallas_call(
        kernel,
        out_shape=jax.ShapeDtypeStruct((nb, 8, 128), f32),
        grid=(nb,),
        in_specs=[
            pl.BlockSpec((max_n, 1, bb, nvt), lambda i: (0, i, 0, 0)),    # x4
            pl.BlockSpec((max_n, 1, bb, max_n), lambda i: (0, i, 0, 0)),  # adj4
            pl.BlockSpec((1, bb, nz), lambda i: (i, 0, 0)),               # eps3
        ] + [pl.BlockSpec(w.shape, lambda i: (0, 0)) for w in weights],   # all 2-D
        out_specs=pl.BlockSpec((1, 8, 128), lambda i: (i, 0, 0)),
        scratch_shapes=[pltpu.VMEM((max_n, bb, hs), f32),       # cached gated messages gm
                        pltpu.VMEM((max_n, bb, 4 * hs), f32)],  # cached DH[u] @ Wae1[:hs]
        compiler_params=pltpu.CompilerParams(dimension_semantics=("parallel",)),
    )(x4, adj4, eps3, *weights)
    return jnp.sum(out[:, 0, 0])


# ------------------------- parameter initialization ------------------------

def _uniform(key, shape, bound):
    return jax.random.uniform(key, shape, jnp.float32, -bound, bound)


def init_linear(key, in_f, out_f, bias=True):
    k1, k2 = jax.random.split(key)
    bound = 1.0 / math.sqrt(in_f)
    w = _uniform(k1, (in_f, out_f), bound)
    if not bias:
        return w
    return w, _uniform(k2, (1, out_f), bound)


def init_gru(key, in_f, hsz):
    ks = jax.random.split(key, 4)
    bound = 1.0 / math.sqrt(hsz)
    return dict(w_ih=_uniform(ks[0], (in_f, 3 * hsz), bound),   # columns ordered r|z|n
                w_hh=_uniform(ks[1], (hsz, 3 * hsz), bound),
                b_ih=_uniform(ks[2], (1, 3 * hsz), bound),
                b_hh=_uniform(ks[3], (1, 3 * hsz), bound))


def init_params(key, cfg):
    hs, nz, nvt, max_n = cfg["hs"], cfg["nz"], cfg["nvt"], cfg["max_n"]
    vs = hs + max_n  # vid=True
    ks = jax.random.split(key, 11)
    p = {}
    p["grue_forward"] = init_gru(ks[0], nvt, hs)
    p["grud"] = init_gru(ks[1], nvt, hs)
    p["fc1"] = init_linear(ks[2], hs, nz)
    p["fc2"] = init_linear(ks[3], hs, nz)
    p["fc3"] = init_linear(ks[4], nz, hs)
    w1, b1 = init_linear(ks[5], hs, 2 * hs)
    w2, b2 = init_linear(ks[6], 2 * hs, nvt)
    p["add_vertex"] = (w1, b1, w2, b2)
    w1, b1 = init_linear(ks[7], 2 * hs, 4 * hs)
    w2, b2 = init_linear(ks[8], 4 * hs, 1)
    p["add_edge"] = (w1, b1, jnp.transpose(w2), b2)   # final layer kept as a [1, 4hs] row
    p["gate_forward"] = init_linear(ks[9], vs, hs)
    p["mapper_forward"] = init_linear(ks[10], vs, hs, bias=False)
    # TODO(synk): grue_backward / gate_backward / mapper_backward / hv_unify / hg_unify
    # are unused by forward() when bidirectional=False and are omitted.
    return p


# ----------------------------------- main -----------------------------------

if __name__ == "__main__":
    cfg = dict(max_n=6, nvt=5, START_TYPE=0, END_TYPE=1, hs=32, nz=16)
    B = 2
    key = jax.random.PRNGKey(0)
    k_param, k_types, k_adj, k_eps = jax.random.split(key, 4)
    params = init_params(k_param, cfg)

    max_n, nvt = cfg["max_n"], cfg["nvt"]
    # synthetic DAG batch (topological order): START at vertex 0, END at max_n-1,
    # chain edge (v-1 -> v) always present, plus random edges u -> v with u <= v-2.
    mid = jax.random.randint(k_types, (B, max_n - 2), 1, nvt).astype(jnp.int32)
    types = jnp.concatenate(
        [jnp.zeros((B, 1), jnp.int32), mid,
         jnp.full((B, 1), cfg["END_TYPE"], jnp.int32)], axis=1)
    rand = jax.random.bernoulli(k_adj, 0.5, (B, max_n, max_n)).astype(jnp.float32)
    upper = jnp.triu(jnp.ones((max_n, max_n), jnp.float32), 2)
    chain = jnp.eye(max_n, k=1, dtype=jnp.float32)
    adj = rand * upper[None] + chain[None]

    eps = jax.random.normal(k_eps, (B, cfg["nz"]), jnp.float32)   # reparameterization noise

    # one jit around the whole forward; bb=1 -> grid=(B,), batch-parallel across cores (v7x)
    fwd = jax.jit(lambda p, t, a, e: ngae_forward(p, t, a, e, cfg, bb=1))
    loss = jax.block_until_ready(fwd(params, types, adj, eps))
    assert bool(jnp.isfinite(loss))
    print("KERNEL_OK")
</pallas_src>

<mosaic_0001>
module attributes {stable_mosaic.version = 11 : i64} {
  func.func @kernel(%arg0: i32, %arg1: memref<6x1x1x5xf32, #tpu.memory_space<vmem>>, %arg2: memref<6x1x1x6xf32, #tpu.memory_space<vmem>>, %arg3: memref<1x1x16xf32, #tpu.memory_space<vmem>>, %arg4: memref<5x96xf32, #tpu.memory_space<vmem>>, %arg5: memref<32x96xf32, #tpu.memory_space<vmem>>, %arg6: memref<1x96xf32, #tpu.memory_space<vmem>>, %arg7: memref<1x96xf32, #tpu.memory_space<vmem>>, %arg8: memref<5x96xf32, #tpu.memory_space<vmem>>, %arg9: memref<32x96xf32, #tpu.memory_space<vmem>>, %arg10: memref<1x96xf32, #tpu.memory_space<vmem>>, %arg11: memref<1x96xf32, #tpu.memory_space<vmem>>, %arg12: memref<32x16xf32, #tpu.memory_space<vmem>>, %arg13: memref<1x16xf32, #tpu.memory_space<vmem>>, %arg14: memref<32x16xf32, #tpu.memory_space<vmem>>, %arg15: memref<1x16xf32, #tpu.memory_space<vmem>>, %arg16: memref<16x32xf32, #tpu.memory_space<vmem>>, %arg17: memref<1x32xf32, #tpu.memory_space<vmem>>, %arg18: memref<32x64xf32, #tpu.memory_space<vmem>>, %arg19: memref<1x64xf32, #tpu.memory_space<vmem>>, %arg20: memref<64x5xf32, #tpu.memory_space<vmem>>, %arg21: memref<1x5xf32, #tpu.memory_space<vmem>>, %arg22: memref<32x128xf32, #tpu.memory_space<vmem>>, %arg23: memref<32x128xf32, #tpu.memory_space<vmem>>, %arg24: memref<1x128xf32, #tpu.memory_space<vmem>>, %arg25: memref<1x128xf32, #tpu.memory_space<vmem>>, %arg26: memref<1x1xf32, #tpu.memory_space<vmem>>, %arg27: memref<32x32xf32, #tpu.memory_space<vmem>>, %arg28: memref<1x32xf32, #tpu.memory_space<vmem>>, %arg29: memref<6x32xf32, #tpu.memory_space<vmem>>, %arg30: memref<32x32xf32, #tpu.memory_space<vmem>>, %arg31: memref<6x32xf32, #tpu.memory_space<vmem>>, %arg32: memref<1x8x128xf32, #tpu.memory_space<vmem>>, %arg33: memref<6x1x32xf32, #tpu.memory_space<vmem>>, %arg34: memref<6x1x128xf32, #tpu.memory_space<vmem>>) attributes {dimension_semantics = [#tpu.dimension_semantics<parallel>], iteration_bounds = array<i64: 2>, scalar_prefetch = 0 : i64, scratch_operands = 2 : i64, tpu.core_type = #tpu.core_type<tc>, window_params = [{transform_indices = @transform_0, window_bounds = array<i64: 6, 1, 1, 5>}, {transform_indices = @transform_1, window_bounds = array<i64: 6, 1, 1, 6>}, {transform_indices = @transform_2, window_bounds = array<i64: 1, 1, 16>}, {pipeline_mode = #tpu.pipeline_mode<synchronous>, transform_indices = @transform_3, window_bounds = array<i64: 5, 96>}, {pipeline_mode = #tpu.pipeline_mode<synchronous>, transform_indices = @transform_4, window_bounds = array<i64: 32, 96>}, {pipeline_mode = #tpu.pipeline_mode<synchronous>, transform_indices = @transform_5, window_bounds = array<i64: 1, 96>}, {pipeline_mode = #tpu.pipeline_mode<synchronous>, transform_indices = @transform_6, window_bounds = array<i64: 1, 96>}, {pipeline_mode = #tpu.pipeline_mode<synchronous>, transform_indices = @transform_7, window_bounds = array<i64: 5, 96>}, {pipeline_mode = #tpu.pipeline_mode<synchronous>, transform_indices = @transform_8, window_bounds = array<i64: 32, 96>}, {pipeline_mode = #tpu.pipeline_mode<synchronous>, transform_indices = @transform_9, window_bounds = array<i64: 1, 96>}, {pipeline_mode = #tpu.pipeline_mode<synchronous>, transform_indices = @transform_10, window_bounds = array<i64: 1, 96>}, {pipeline_mode = #tpu.pipeline_mode<synchronous>, transform_indices = @transform_11, window_bounds = array<i64: 32, 16>}, {pipeline_mode = #tpu.pipeline_mode<synchronous>, transform_indices = @transform_12, window_bounds = array<i64: 1, 16>}, {pipeline_mode = #tpu.pipeline_mode<synchronous>, transform_indices = @transform_13, window_bounds = array<i64: 32, 16>}, {pipeline_mode = #tpu.pipeline_mode<synchronous>, transform_indices = @transform_14, window_bounds = array<i64: 1, 16>}, {pipeline_mode = #tpu.pipeline_mode<synchronous>, transform_indices = @transform_15, window_bounds = array<i64: 16, 32>}, {pipeline_mode = #tpu.pipeline_mode<synchronous>, transform_indices = @transform_16, window_bounds = array<i64: 1, 32>}, {pipeline_mode = #tpu.pipeline_mode<synchronous>, transform_indices = @transform_17, window_bounds = array<i64: 32, 64>}, {pipeline_mode = #tpu.pipeline_mode<synchronous>, transform_indices = @transform_18, window_bounds = array<i64: 1, 64>}, {pipeline_mode = #tpu.pipeline_mode<synchronous>, transform_indices = @transform_19, window_bounds = array<i64: 64, 5>}, {pipeline_mode = #tpu.pipeline_mode<synchronous>, transform_indices = @transform_20, window_bounds = array<i64: 1, 5>}, {pipeline_mode = #tpu.pipeline_mode<synchronous>, transform_indices = @transform_21, window_bounds = array<i64: 32, 128>}, {pipeline_mode = #tpu.pipeline_mode<synchronous>, transform_indices = @transform_22, window_bounds = array<i64: 32, 128>}, {pipeline_mode = #tpu.pipeline_mode<synchronous>, transform_indices = @transform_23, window_bounds = array<i64: 1, 128>}, {pipeline_mode = #tpu.pipeline_mode<synchronous>, transform_indices = @transform_24, window_bounds = array<i64: 1, 128>}, {pipeline_mode = #tpu.pipeline_mode<synchronous>, transform_indices = @transform_25, window_bounds = array<i64: 1, 1>}, {pipeline_mode = #tpu.pipeline_mode<synchronous>, transform_indices = @transform_26, window_bounds = array<i64: 32, 32>}, {pipeline_mode = #tpu.pipeline_mode<synchronous>, transform_indices = @transform_27, window_bounds = array<i64: 1, 32>}, {pipeline_mode = #tpu.pipeline_mode<synchronous>, transform_indices = @transform_28, window_bounds = array<i64: 6, 32>}, {pipeline_mode = #tpu.pipeline_mode<synchronous>, transform_indices = @transform_29, window_bounds = array<i64: 32, 32>}, {pipeline_mode = #tpu.pipeline_mode<synchronous>, transform_indices = @transform_30, window_bounds = array<i64: 6, 32>}, {transform_indices = @transform_31, window_bounds = array<i64: 1, 8, 128>}]} {
    %c0 = arith.constant 0 : index
    %c0_0 = arith.constant 0 : index
    %0 = vector.load %arg4[%c0, %c0_0] : memref<5x96xf32, #tpu.memory_space<vmem>>, vector<5x96xf32>
    %c0_1 = arith.constant 0 : index
    %c0_2 = arith.constant 0 : index
    %1 = vector.load %arg5[%c0_1, %c0_2] : memref<32x96xf32, #tpu.memory_space<vmem>>, vector<32x96xf32>
    %c0_3 = arith.constant 0 : index
    %c0_4 = arith.constant 0 : index
    %2 = vector.load %arg6[%c0_3, %c0_4] : memref<1x96xf32, #tpu.memory_space<vmem>>, vector<1x96xf32>
    %c0_5 = arith.constant 0 : index
    %c0_6 = arith.constant 0 : index
    %3 = vector.load %arg7[%c0_5, %c0_6] : memref<1x96xf32, #tpu.memory_space<vmem>>, vector<1x96xf32>
    %c0_7 = arith.constant 0 : index
    %c0_8 = arith.constant 0 : index
    %4 = vector.load %arg8[%c0_7, %c0_8] : memref<5x96xf32, #tpu.memory_space<vmem>>, vector<5x96xf32>
    %c0_9 = arith.constant 0 : index
    %c0_10 = arith.constant 0 : index
    %5 = vector.load %arg9[%c0_9, %c0_10] : memref<32x96xf32, #tpu.memory_space<vmem>>, vector<32x96xf32>
    %c0_11 = arith.constant 0 : index
    %c0_12 = arith.constant 0 : index
    %6 = vector.load %arg10[%c0_11, %c0_12] : memref<1x96xf32, #tpu.memory_space<vmem>>, vector<1x96xf32>
    %c0_13 = arith.constant 0 : index
    %c0_14 = arith.constant 0 : index
    %7 = vector.load %arg11[%c0_13, %c0_14] : memref<1x96xf32, #tpu.memory_space<vmem>>, vector<1x96xf32>
    %c0_15 = arith.constant 0 : index
    %c0_16 = arith.constant 0 : index
    %8 = vector.load %arg12[%c0_15, %c0_16] : memref<32x16xf32, #tpu.memory_space<vmem>>, vector<32x16xf32>
    %c0_17 = arith.constant 0 : index
    %c0_18 = arith.constant 0 : index
    %9 = vector.load %arg13[%c0_17, %c0_18] : memref<1x16xf32, #tpu.memory_space<vmem>>, vector<1x16xf32>
    %c0_19 = arith.constant 0 : index
    %c0_20 = arith.constant 0 : index
    %10 = vector.load %arg14[%c0_19, %c0_20] : memref<32x16xf32, #tpu.memory_space<vmem>>, vector<32x16xf32>
    %c0_21 = arith.constant 0 : index
    %c0_22 = arith.constant 0 : index
    %11 = vector.load %arg15[%c0_21, %c0_22] : memref<1x16xf32, #tpu.memory_space<vmem>>, vector<1x16xf32>
    %c0_23 = arith.constant 0 : index
    %c0_24 = arith.constant 0 : index
    %12 = vector.load %arg16[%c0_23, %c0_24] : memref<16x32xf32, #tpu.memory_space<vmem>>, vector<16x32xf32>
    %c0_25 = arith.constant 0 : index
    %c0_26 = arith.constant 0 : index
    %13 = vector.load %arg17[%c0_25, %c0_26] : memref<1x32xf32, #tpu.memory_space<vmem>>, vector<1x32xf32>
    %c0_27 = arith.constant 0 : index
    %c0_28 = arith.constant 0 : index
    %14 = vector.load %arg18[%c0_27, %c0_28] : memref<32x64xf32, #tpu.memory_space<vmem>>, vector<32x64xf32>
    %c0_29 = arith.constant 0 : index
    %c0_30 = arith.constant 0 : index
    %15 = vector.load %arg19[%c0_29, %c0_30] : memref<1x64xf32, #tpu.memory_space<vmem>>, vector<1x64xf32>
    %c0_31 = arith.constant 0 : index
    %c0_32 = arith.constant 0 : index
    %16 = vector.load %arg20[%c0_31, %c0_32] : memref<64x5xf32, #tpu.memory_space<vmem>>, vector<64x5xf32>
    %c0_33 = arith.constant 0 : index
    %c0_34 = arith.constant 0 : index
    %17 = vector.load %arg21[%c0_33, %c0_34] : memref<1x5xf32, #tpu.memory_space<vmem>>, vector<1x5xf32>
    %c0_35 = arith.constant 0 : index
    %c0_36 = arith.constant 0 : index
    %18 = vector.load %arg22[%c0_35, %c0_36] : memref<32x128xf32, #tpu.memory_space<vmem>>, vector<32x128xf32>
    %c0_37 = arith.constant 0 : index
    %c0_38 = arith.constant 0 : index
    %19 = vector.load %arg23[%c0_37, %c0_38] : memref<32x128xf32, #tpu.memory_space<vmem>>, vector<32x128xf32>
    %c0_39 = arith.constant 0 : index
    %c0_40 = arith.constant 0 : index
    %20 = vector.load %arg24[%c0_39, %c0_40] : memref<1x128xf32, #tpu.memory_space<vmem>>, vector<1x128xf32>
    %c0_41 = arith.constant 0 : index
    %c0_42 = arith.constant 0 : index
    %21 = vector.load %arg25[%c0_41, %c0_42] : memref<1x128xf32, #tpu.memory_space<vmem>>, vector<1x128xf32>
    %c0_43 = arith.constant 0 : index
    %c0_44 = arith.constant 0 : index
    %22 = vector.load %arg26[%c0_43, %c0_44] : memref<1x1xf32, #tpu.memory_space<vmem>>, vector<1x1xf32>
    %c0_45 = arith.constant 0 : index
    %c0_46 = arith.constant 0 : index
    %23 = vector.load %arg27[%c0_45, %c0_46] : memref<32x32xf32, #tpu.memory_space<vmem>>, vector<32x32xf32>
    %c0_47 = arith.constant 0 : index
    %c0_48 = arith.constant 0 : index
    %24 = vector.load %arg28[%c0_47, %c0_48] : memref<1x32xf32, #tpu.memory_space<vmem>>, vector<1x32xf32>
    %c0_49 = arith.constant 0 : index
    %c0_50 = arith.constant 0 : index
    %25 = vector.load %arg29[%c0_49, %c0_50] : memref<6x32xf32, #tpu.memory_space<vmem>>, vector<6x32xf32>
    %c0_51 = arith.constant 0 : index
    %c0_52 = arith.constant 0 : index
    %26 = vector.load %arg30[%c0_51, %c0_52] : memref<32x32xf32, #tpu.memory_space<vmem>>, vector<32x32xf32>
    %c0_53 = arith.constant 0 : index
    %c0_54 = arith.constant 0 : index
    %27 = vector.load %arg31[%c0_53, %c0_54] : memref<6x32xf32, #tpu.memory_space<vmem>>, vector<6x32xf32>
    %cst = arith.constant 0.000000e+00 : f32
    %28 = vector.broadcast %cst : f32 to vector<1x32xf32>
    %c0_55 = arith.constant 0 : index
    %c0_56 = arith.constant 0 : index
    %c0_57 = arith.constant 0 : index
    %c0_58 = arith.constant 0 : index
    %29 = vector.load %arg1[%c0_55, %c0_56, %c0_57, %c0_58] : memref<6x1x1x5xf32, #tpu.memory_space<vmem>>, vector<1x1x1x5xf32>
    %30 = vector.shape_cast %29 : vector<1x1x1x5xf32> to vector<1x5xf32>
    %cst_59 = arith.constant dense<0.000000e+00> : vector<1x96xf32>
    %31 = tpu.matmul %30, %0, %cst_59 {dimension_numbers = #tpu.dot_dimension_numbers<[1], [0], [0], [1], [0, 0, 1, 1], [], []>} : vector<1x5xf32>, vector<5x96xf32>, vector<1x96xf32> -> vector<1x96xf32>
    %32 = arith.addf %31, %2 : vector<1x96xf32>
    %33 = vector.extract_strided_slice %32 {offsets = [0, 0], sizes = [1, 32], strides = [1, 1]} : vector<1x96xf32> to vector<1x32xf32>
    %34 = vector.extract_strided_slice %3 {offsets = [0, 0], sizes = [1, 32], strides = [1, 1]} : vector<1x96xf32> to vector<1x32xf32>
    %35 = arith.addf %33, %34 : vector<1x32xf32>
    %36 = arith.negf %35 : vector<1x32xf32>
    %37 = math.exp %36 : vector<1x32xf32>
    %cst_60 = arith.constant 1.000000e+00 : f32
    %38 = vector.broadcast %cst_60 : f32 to vector<1x32xf32>
    %39 = arith.addf %38, %37 : vector<1x32xf32>
    %40 = arith.divf %38, %39 : vector<1x32xf32>
    %41 = vector.extract_strided_slice %32 {offsets = [0, 32], sizes = [1, 32], strides = [1, 1]} : vector<1x96xf32> to vector<1x32xf32>
    %42 = vector.extract_strided_slice %3 {offsets = [0, 32], sizes = [1, 32], strides = [1, 1]} : vector<1x96xf32> to vector<1x32xf32>
    %43 = arith.addf %41, %42 : vector<1x32xf32>
    %44 = arith.negf %43 : vector<1x32xf32>
    %45 = math.exp %44 : vector<1x32xf32>
    %cst_61 = arith.constant 1.000000e+00 : f32
    %46 = vector.broadcast %cst_61 : f32 to vector<1x32xf32>
    %47 = arith.addf %46, %45 : vector<1x32xf32>
    %48 = arith.divf %46, %47 : vector<1x32xf32>
    %49 = vector.extract_strided_slice %32 {offsets = [0, 64], sizes = [1, 32], strides = [1, 1]} : vector<1x96xf32> to vector<1x32xf32>
    %50 = vector.extract_strided_slice %3 {offsets = [0, 64], sizes = [1, 32], strides = [1, 1]} : vector<1x96xf32> to vector<1x32xf32>
    %51 = arith.mulf %40, %50 : vector<1x32xf32>
    %52 = arith.addf %49, %51 : vector<1x32xf32>
    %53 = math.tanh %52 : vector<1x32xf32>
    %cst_62 = arith.constant 1.000000e+00 : f32
    %54 = vector.broadcast %cst_62 : f32 to vector<1x32xf32>
    %55 = arith.subf %54, %48 : vector<1x32xf32>
    %56 = arith.mulf %55, %53 : vector<1x32xf32>
    %57 = arith.mulf %48, %28 : vector<1x32xf32>
    %58 = arith.addf %56, %57 : vector<1x32xf32>
    %cst_63 = arith.constant dense<0.000000e+00> : vector<1x32xf32>
    %59 = tpu.matmul %58, %23, %cst_63 {dimension_numbers = #tpu.dot_dimension_numbers<[1], [0], [0], [1], [0, 0, 1, 1], [], []>} : vector<1x32xf32>, vector<32x32xf32>, vector<1x32xf32> -> vector<1x32xf32>
    %60 = arith.addf %59, %24 : vector<1x32xf32>
    %61 = vector.extract_strided_slice %25 {offsets = [0, 0], sizes = [1, 32], strides = [1, 1]} : vector<6x32xf32> to vector<1x32xf32>
    %62 = arith.addf %60, %61 : vector<1x32xf32>
    %63 = arith.negf %62 : vector<1x32xf32>
    %64 = math.exp %63 : vector<1x32xf32>
    %cst_64 = arith.constant 1.000000e+00 : f32
    %65 = vector.broadcast %cst_64 : f32 to vector<1x32xf32>
    %66 = arith.addf %65, %64 : vector<1x32xf32>
    %67 = arith.divf %65, %66 : vector<1x32xf32>
    %cst_65 = arith.constant dense<0.000000e+00> : vector<1x32xf32>
    %68 = tpu.matmul %58, %26, %cst_65 {dimension_numbers = #tpu.dot_dimension_numbers<[1], [0], [0], [1], [0, 0, 1, 1], [], []>} : vector<1x32xf32>, vector<32x32xf32>, vector<1x32xf32> -> vector<1x32xf32>
    %69 = vector.extract_strided_slice %27 {offsets = [0, 0], sizes = [1, 32], strides = [1, 1]} : vector<6x32xf32> to vector<1x32xf32>
    %70 = arith.addf %68, %69 : vector<1x32xf32>
    %71 = arith.mulf %67, %70 : vector<1x32xf32>
    %c0_66 = arith.constant 0 : index
    %c0_67 = arith.constant 0 : index
    %c0_68 = arith.constant 0 : index
    %72 = vector.load %arg33[%c0_66, %c0_67, %c0_68] : memref<6x1x32xf32, #tpu.memory_space<vmem>>, vector<1x1x32xf32>
    %73 = vector.shape_cast %72 : vector<1x1x32xf32> to vector<1x32xf32>
    %74 = vector.shape_cast %71 : vector<1x32xf32> to vector<1x1x32xf32>
    tpu.vector_store %arg33[%c0_66, %c0_67, %c0_68], %74 {strides = array<i32>} : memref<6x1x32xf32, #tpu.memory_space<vmem>>, vector<1x1x32xf32>,
    %c1 = arith.constant 1 : index
    %c0_69 = arith.constant 0 : index
    %c0_70 = arith.constant 0 : index
    %c0_71 = arith.constant 0 : index
    %75 = vector.load %arg2[%c1, %c0_69, %c0_70, %c0_71] : memref<6x1x1x6xf32, #tpu.memory_space<vmem>>, vector<1x1x1x6xf32>
    %76 = vector.shape_cast %75 : vector<1x1x1x6xf32> to vector<1x6xf32>
    %77 = vector.extract_strided_slice %76 {offsets = [0, 0], sizes = [1, 1], strides = [1, 1]} : vector<1x6xf32> to vector<1x1xf32>
    %c0_72 = arith.constant 0 : index
    %c0_73 = arith.constant 0 : index
    %c0_74 = arith.constant 0 : index
    %78 = vector.load %arg33[%c0_72, %c0_73, %c0_74] : memref<6x1x32xf32, #tpu.memory_space<vmem>>, vector<1x1x32xf32>
    %79 = vector.shape_cast %78 : vector<1x1x32xf32> to vector<1x32xf32>
    %80 = vector.broadcast %77 : vector<1x1xf32> to vector<1x32xf32>
    %81 = arith.mulf %80, %79 : vector<1x32xf32>
    %82 = arith.addf %28, %81 : vector<1x32xf32>
    %c1_75 = arith.constant 1 : index
    %c0_76 = arith.constant 0 : index
    %c0_77 = arith.constant 0 : index
    %c0_78 = arith.constant 0 : index
    %83 = vector.load %arg1[%c1_75, %c0_76, %c0_77, %c0_78] : memref<6x1x1x5xf32, #tpu.memory_space<vmem>>, vector<1x1x1x5xf32>
    %84 = vector.shape_cast %83 : vector<1x1x1x5xf32> to vector<1x5xf32>
    %cst_79 = arith.constant dense<0.000000e+00> : vector<1x96xf32>
    %85 = tpu.matmul %84, %0, %cst_79 {dimension_numbers = #tpu.dot_dimension_numbers<[1], [0], [0], [1], [0, 0, 1, 1], [], []>} : vector<1x5xf32>, vector<5x96xf32>, vector<1x96xf32> -> vector<1x96xf32>
    %86 = arith.addf %85, %2 : vector<1x96xf32>
    %cst_80 = arith.constant dense<0.000000e+00> : vector<1x96xf32>
    %87 = tpu.matmul %82, %1, %cst_80 {dimension_numbers = #tpu.dot_dimension_numbers<[1], [0], [0], [1], [0, 0, 1, 1], [], []>} : vector<1x32xf32>, vector<32x96xf32>, vector<1x96xf32> -> vector<1x96xf32>
    %88 = arith.addf %87, %3 : vector<1x96xf32>
    %89 = vector.extract_strided_slice %86 {offsets = [0, 0], sizes = [1, 32], strides = [1, 1]} : vector<1x96xf32> to vector<1x32xf32>
    %90 = vector.extract_strided_slice %88 {offsets = [0, 0], sizes = [1, 32], strides = [1, 1]} : vector<1x96xf32> to vector<1x32xf32>
    %91 = arith.addf %89, %90 : vector<1x32xf32>
    %92 = arith.negf %91 : vector<1x32xf32>
    %93 = math.exp %92 : vector<1x32xf32>
    %cst_81 = arith.constant 1.000000e+00 : f32
    %94 = vector.broadcast %cst_81 : f32 to vector<1x32xf32>
    %95 = arith.addf %94, %93 : vector<1x32xf32>
    %96 = arith.divf %94, %95 : vector<1x32xf32>
    %97 = vector.extract_strided_slice %86 {offsets = [0, 32], sizes = [1, 32], strides = [1, 1]} : vector<1x96xf32> to vector<1x32xf32>
    %98 = vector.extract_strided_slice %88 {offsets = [0, 32], sizes = [1, 32], strides = [1, 1]} : vector<1x96xf32> to vector<1x32xf32>
    %99 = arith.addf %97, %98 : vector<1x32xf32>
    %100 = arith.negf %99 : vector<1x32xf32>
    %101 = math.exp %100 : vector<1x32xf32>
    %cst_82 = arith.constant 1.000000e+00 : f32
    %102 = vector.broadcast %cst_82 : f32 to vector<1x32xf32>
    %103 = arith.addf %102, %101 : vector<1x32xf32>
    %104 = arith.divf %102, %103 : vector<1x32xf32>
    %105 = vector.extract_strided_slice %86 {offsets = [0, 64], sizes = [1, 32], strides = [1, 1]} : vector<1x96xf32> to vector<1x32xf32>
    %106 = vector.extract_strided_slice %88 {offsets = [0, 64], sizes = [1, 32], strides = [1, 1]} : vector<1x96xf32> to vector<1x32xf32>
    %107 = arith.mulf %96, %106 : vector<1x32xf32>
    %108 = arith.addf %105, %107 : vector<1x32xf32>
    %109 = math.tanh %108 : vector<1x32xf32>
    %cst_83 = arith.constant 1.000000e+00 : f32
    %110 = vector.broadcast %cst_83 : f32 to vector<1x32xf32>
    %111 = arith.subf %110, %104 : vector<1x32xf32>
    %112 = arith.mulf %111, %109 : vector<1x32xf32>
    %113 = arith.mulf %104, %82 : vector<1x32xf32>
    %114 = arith.addf %112, %113 : vector<1x32xf32>
    %cst_84 = arith.constant dense<0.000000e+00> : vector<1x32xf32>
    %115 = tpu.matmul %114, %23, %cst_84 {dimension_numbers = #tpu.dot_dimension_numbers<[1], [0], [0], [1], [0, 0, 1, 1], [], []>} : vector<1x32xf32>, vector<32x32xf32>, vector<1x32xf32> -> vector<1x32xf32>
    %116 = arith.addf %115, %24 : vector<1x32xf32>
    %117 = vector.extract_strided_slice %25 {offsets = [1, 0], sizes = [1, 32], strides = [1, 1]} : vector<6x32xf32> to vector<1x32xf32>
    %118 = arith.addf %116, %117 : vector<1x32xf32>
    %119 = arith.negf %118 : vector<1x32xf32>
    %120 = math.exp %119 : vector<1x32xf32>
    %cst_85 = arith.constant 1.000000e+00 : f32
    %121 = vector.broadcast %cst_85 : f32 to vector<1x32xf32>
    %122 = arith.addf %121, %120 : vector<1x32xf32>
    %123 = arith.divf %121, %122 : vector<1x32xf32>
    %cst_86 = arith.constant dense<0.000000e+00> : vector<1x32xf32>
    %124 = tpu.matmul %114, %26, %cst_86 {dimension_numbers = #tpu.dot_dimension_numbers<[1], [0], [0], [1], [0, 0, 1, 1], [], []>} : vector<1x32xf32>, vector<32x32xf32>, vector<1x32xf32> -> vector<1x32xf32>
    %125 = vector.extract_strided_slice %27 {offsets = [1, 0], sizes = [1, 32], strides = [1, 1]} : vector<6x32xf32> to vector<1x32xf32>
    %126 = arith.addf %124, %125 : vector<1x32xf32>
    %127 = arith.mulf %123, %126 : vector<1x32xf32>
    %c1_87 = arith.constant 1 : index
    %c0_88 = arith.constant 0 : index
    %c0_89 = arith.constant 0 : index
    %128 = vector.load %arg33[%c1_87, %c0_88, %c0_89] : memref<6x1x32xf32, #tpu.memory_space<vmem>>, vector<1x1x32xf32>
    %129 = vector.shape_cast %128 : vector<1x1x32xf32> to vector<1x32xf32>
    %130 = vector.shape_cast %127 : vector<1x32xf32> to vector<1x1x32xf32>
    tpu.vector_store %arg33[%c1_87, %c0_88, %c0_89], %130 {strides = array<i32>} : memref<6x1x32xf32, #tpu.memory_space<vmem>>, vector<1x1x32xf32>,
    %c2 = arith.constant 2 : index
    %c0_90 = arith.constant 0 : index
    %c0_91 = arith.constant 0 : index
    %c0_92 = arith.constant 0 : index
    %131 = vector.load %arg2[%c2, %c0_90, %c0_91, %c0_92] : memref<6x1x1x6xf32, #tpu.memory_space<vmem>>, vector<1x1x1x6xf32>
    %132 = vector.shape_cast %131 : vector<1x1x1x6xf32> to vector<1x6xf32>
    %133 = vector.extract_strided_slice %132 {offsets = [0, 0], sizes = [1, 1], strides = [1, 1]} : vector<1x6xf32> to vector<1x1xf32>
    %c0_93 = arith.constant 0 : index
    %c0_94 = arith.constant 0 : index
    %c0_95 = arith.constant 0 : index
    %134 = vector.load %arg33[%c0_93, %c0_94, %c0_95] : memref<6x1x32xf32, #tpu.memory_space<vmem>>, vector<1x1x32xf32>
    %135 = vector.shape_cast %134 : vector<1x1x32xf32> to vector<1x32xf32>
    %136 = vector.broadcast %133 : vector<1x1xf32> to vector<1x32xf32>
    %137 = arith.mulf %136, %135 : vector<1x32xf32>
    %138 = arith.addf %28, %137 : vector<1x32xf32>
    %139 = vector.extract_strided_slice %132 {offsets = [0, 1], sizes = [1, 1], strides = [1, 1]} : vector<1x6xf32> to vector<1x1xf32>
    %c1_96 = arith.constant 1 : index
    %c0_97 = arith.constant 0 : index
    %c0_98 = arith.constant 0 : index
    %140 = vector.load %arg33[%c1_96, %c0_97, %c0_98] : memref<6x1x32xf32, #tpu.memory_space<vmem>>, vector<1x1x32xf32>
    %141 = vector.shape_cast %140 : vector<1x1x32xf32> to vector<1x32xf32>
    %142 = vector.broadcast %139 : vector<1x1xf32> to vector<1x32xf32>
    %143 = arith.mulf %142, %141 : vector<1x32xf32>
    %144 = arith.addf %138, %143 : vector<1x32xf32>
    %c2_99 = arith.constant 2 : index
    %c0_100 = arith.constant 0 : index
    %c0_101 = arith.constant 0 : index
    %c0_102 = arith.constant 0 : index
    %145 = vector.load %arg1[%c2_99, %c0_100, %c0_101, %c0_102] : memref<6x1x1x5xf32, #tpu.memory_space<vmem>>, vector<1x1x1x5xf32>
    %146 = vector.shape_cast %145 : vector<1x1x1x5xf32> to vector<1x5xf32>
    %cst_103 = arith.constant dense<0.000000e+00> : vector<1x96xf32>
    %147 = tpu.matmul %146, %0, %cst_103 {dimension_numbers = #tpu.dot_dimension_numbers<[1], [0], [0], [1], [0, 0, 1, 1], [], []>} : vector<1x5xf32>, vector<5x96xf32>, vector<1x96xf32> -> vector<1x96xf32>
    %148 = arith.addf %147, %2 : vector<1x96xf32>
    %cst_104 = arith.constant dense<0.000000e+00> : vector<1x96xf32>
    %149 = tpu.matmul %144, %1, %cst_104 {dimension_numbers = #tpu.dot_dimension_numbers<[1], [0], [0], [1], [0, 0, 1, 1], [], []>} : vector<1x32xf32>, vector<32x96xf32>, vector<1x96xf32> -> vector<1x96xf32>
    %150 = arith.addf %149, %3 : vector<1x96xf32>
    %151 = vector.extract_strided_slice %148 {offsets = [0, 0], sizes = [1, 32], strides = [1, 1]} : vector<1x96xf32> to vector<1x32xf32>
    %152 = vector.extract_strided_slice %150 {offsets = [0, 0], sizes = [1, 32], strides = [1, 1]} : vector<1x96xf32> to vector<1x32xf32>
    %153 = arith.addf %151, %152 : vector<1x32xf32>
    %154 = arith.negf %153 : vector<1x32xf32>
    %155 = math.exp %154 : vector<1x32xf32>
    %cst_105 = arith.constant 1.000000e+00 : f32
    %156 = vector.broadcast %cst_105 : f32 to vector<1x32xf32>
    %157 = arith.addf %156, %155 : vector<1x32xf32>
    %158 = arith.divf %156, %157 : vector<1x32xf32>
    %159 = vector.extract_strided_slice %148 {offsets = [0, 32], sizes = [1, 32], strides = [1, 1]} : vector<1x96xf32> to vector<1x32xf32>
    %160 = vector.extract_strided_slice %150 {offsets = [0, 32], sizes = [1, 32], strides = [1, 1]} : vector<1x96xf32> to vector<1x32xf32>
    %161 = arith.addf %159, %160 : vector<1x32xf32>
    %162 = arith.negf %161 : vector<1x32xf32>
    %163 = math.exp %162 : vector<1x32xf32>
    %cst_106 = arith.constant 1.000000e+00 : f32
    %164 = vector.broadcast %cst_106 : f32 to vector<1x32xf32>
    %165 = arith.addf %164, %163 : vector<1x32xf32>
    %166 = arith.divf %164, %165 : vector<1x32xf32>
    %167 = vector.extract_strided_slice %148 {offsets = [0, 64], sizes = [1, 32], strides = [1, 1]} : vector<1x96xf32> to vector<1x32xf32>
    %168 = vector.extract_strided_slice %150 {offsets = [0, 64], sizes = [1, 32], strides = [1, 1]} : vector<1x96xf32> to vector<1x32xf32>
    %169 = arith.mulf %158, %168 : vector<1x32xf32>
    %170 = arith.addf %167, %169 : vector<1x32xf32>
    %171 = math.tanh %170 : vector<1x32xf32>
    %cst_107 = arith.constant 1.000000e+00 : f32
    %172 = vector.broadcast %cst_107 : f32 to vector<1x32xf32>
    %173 = arith.subf %172, %166 : vector<1x32xf32>
    %174 = arith.mulf %173, %171 : vector<1x32xf32>
    %175 = arith.mulf %166, %144 : vector<1x32xf32>
    %176 = arith.addf %174, %175 : vector<1x32xf32>
    %cst_108 = arith.constant dense<0.000000e+00> : vector<1x32xf32>
    %177 = tpu.matmul %176, %23, %cst_108 {dimension_numbers = #tpu.dot_dimension_numbers<[1], [0], [0], [1], [0, 0, 1, 1], [], []>} : vector<1x32xf32>, vector<32x32xf32>, vector<1x32xf32> -> vector<1x32xf32>
    %178 = arith.addf %177, %24 : vector<1x32xf32>
    %179 = vector.extract_strided_slice %25 {offsets = [2, 0], sizes = [1, 32], strides = [1, 1]} : vector<6x32xf32> to vector<1x32xf32>
    %180 = arith.addf %178, %179 : vector<1x32xf32>
    %181 = arith.negf %180 : vector<1x32xf32>
    %182 = math.exp %181 : vector<1x32xf32>
    %cst_109 = arith.constant 1.000000e+00 : f32
    %183 = vector.broadcast %cst_109 : f32 to vector<1x32xf32>
    %184 = arith.addf %183, %182 : vector<1x32xf32>
    %185 = arith.divf %183, %184 : vector<1x32xf32>
    %cst_110 = arith.constant dense<0.000000e+00> : vector<1x32xf32>
    %186 = tpu.matmul %176, %26, %cst_110 {dimension_numbers = #tpu.dot_dimension_numbers<[1], [0], [0], [1], [0, 0, 1, 1], [], []>} : vector<1x32xf32>, vector<32x32xf32>, vector<1x32xf32> -> vector<1x32xf32>
    %187 = vector.extract_strided_slice %27 {offsets = [2, 0], sizes = [1, 32], strides = [1, 1]} : vector<6x32xf32> to vector<1x32xf32>
    %188 = arith.addf %186, %187 : vector<1x32xf32>
    %189 = arith.mulf %185, %188 : vector<1x32xf32>
    %c2_111 = arith.constant 2 : index
    %c0_112 = arith.constant 0 : index
    %c0_113 = arith.constant 0 : index
    %190 = vector.load %arg33[%c2_111, %c0_112, %c0_113] : memref<6x1x32xf32, #tpu.memory_space<vmem>>, vector<1x1x32xf32>
    %191 = vector.shape_cast %190 : vector<1x1x32xf32> to vector<1x32xf32>
    %192 = vector.shape_cast %189 : vector<1x32xf32> to vector<1x1x32xf32>
    tpu.vector_store %arg33[%c2_111, %c0_112, %c0_113], %192 {strides = array<i32>} : memref<6x1x32xf32, #tpu.memory_space<vmem>>, vector<1x1x32xf32>,
    %c3 = arith.constant 3 : index
    %c0_114 = arith.constant 0 : index
    %c0_115 = arith.constant 0 : index
    %c0_116 = arith.constant 0 : index
    %193 = vector.load %arg2[%c3, %c0_114, %c0_115, %c0_116] : memref<6x1x1x6xf32, #tpu.memory_space<vmem>>, vector<1x1x1x6xf32>
    %194 = vector.shape_cast %193 : vector<1x1x1x6xf32> to vector<1x6xf32>
    %195 = vector.extract_strided_slice %194 {offsets = [0, 0], sizes = [1, 1], strides = [1, 1]} : vector<1x6xf32> to vector<1x1xf32>
    %c0_117 = arith.constant 0 : index
    %c0_118 = arith.constant 0 : index
    %c0_119 = arith.constant 0 : index
    %196 = vector.load %arg33[%c0_117, %c0_118, %c0_119] : memref<6x1x32xf32, #tpu.memory_space<vmem>>, vector<1x1x32xf32>
    %197 = vector.shape_cast %196 : vector<1x1x32xf32> to vector<1x32xf32>
    %198 = vector.broadcast %195 : vector<1x1xf32> to vector<1x32xf32>
    %199 = arith.mulf %198, %197 : vector<1x32xf32>
    %200 = arith.addf %28, %199 : vector<1x32xf32>
    %201 = vector.extract_strided_slice %194 {offsets = [0, 1], sizes = [1, 1], strides = [1, 1]} : vector<1x6xf32> to vector<1x1xf32>
    %c1_120 = arith.constant 1 : index
    %c0_121 = arith.constant 0 : index
    %c0_122 = arith.constant 0 : index
    %202 = vector.load %arg33[%c1_120, %c0_121, %c0_122] : memref<6x1x32xf32, #tpu.memory_space<vmem>>, vector<1x1x32xf32>
    %203 = vector.shape_cast %202 : vector<1x1x32xf32> to vector<1x32xf32>
    %204 = vector.broadcast %201 : vector<1x1xf32> to vector<1x32xf32>
    %205 = arith.mulf %204, %203 : vector<1x32xf32>
    %206 = arith.addf %200, %205 : vector<1x32xf32>
    %207 = vector.extract_strided_slice %194 {offsets = [0, 2], sizes = [1, 1], strides = [1, 1]} : vector<1x6xf32> to vector<1x1xf32>
    %c2_123 = arith.constant 2 : index
    %c0_124 = arith.constant 0 : index
    %c0_125 = arith.constant 0 : index
    %208 = vector.load %arg33[%c2_123, %c0_124, %c0_125] : memref<6x1x32xf32, #tpu.memory_space<vmem>>, vector<1x1x32xf32>
    %209 = vector.shape_cast %208 : vector<1x1x32xf32> to vector<1x32xf32>
    %210 = vector.broadcast %207 : vector<1x1xf32> to vector<1x32xf32>
    %211 = arith.mulf %210, %209 : vector<1x32xf32>
    %212 = arith.addf %206, %211 : vector<1x32xf32>
    %c3_126 = arith.constant 3 : index
    %c0_127 = arith.constant 0 : index
    %c0_128 = arith.constant 0 : index
    %c0_129 = arith.constant 0 : index
    %213 = vector.load %arg1[%c3_126, %c0_127, %c0_128, %c0_129] : memref<6x1x1x5xf32, #tpu.memory_space<vmem>>, vector<1x1x1x5xf32>
    %214 = vector.shape_cast %213 : vector<1x1x1x5xf32> to vector<1x5xf32>
    %cst_130 = arith.constant dense<0.000000e+00> : vector<1x96xf32>
    %215 = tpu.matmul %214, %0, %cst_130 {dimension_numbers = #tpu.dot_dimension_numbers<[1], [0], [0], [1], [0, 0, 1, 1], [], []>} : vector<1x5xf32>, vector<5x96xf32>, vector<1x96xf32> -> vector<1x96xf32>
    %216 = arith.addf %215, %2 : vector<1x96xf32>
    %cst_131 = arith.constant dense<0.000000e+00> : vector<1x96xf32>
    %217 = tpu.matmul %212, %1, %cst_131 {dimension_numbers = #tpu.dot_dimension_numbers<[1], [0], [0], [1], [0, 0, 1, 1], [], []>} : vector<1x32xf32>, vector<32x96xf32>, vector<1x96xf32> -> vector<1x96xf32>
    %218 = arith.addf %217, %3 : vector<1x96xf32>
    %219 = vector.extract_strided_slice %216 {offsets = [0, 0], sizes = [1, 32], strides = [1, 1]} : vector<1x96xf32> to vector<1x32xf32>
    %220 = vector.extract_strided_slice %218 {offsets = [0, 0], sizes = [1, 32], strides = [1, 1]} : vector<1x96xf32> to vector<1x32xf32>
    %221 = arith.addf %219, %220 : vector<1x32xf32>
    %222 = arith.negf %221 : vector<1x32xf32>
    %223 = math.exp %222 : vector<1x32xf32>
    %cst_132 = arith.constant 1.000000e+00 : f32
    %224 = vector.broadcast %cst_132 : f32 to vector<1x32xf32>
    %225 = arith.addf %224, %223 : vector<1x32xf32>
    %226 = arith.divf %224, %225 : vector<1x32xf32>
    %227 = vector.extract_strided_slice %216 {offsets = [0, 32], sizes = [1, 32], strides = [1, 1]} : vector<1x96xf32> to vector<1x32xf32>
    %228 = vector.extract_strided_slice %218 {offsets = [0, 32], sizes = [1, 32], strides = [1, 1]} : vector<1x96xf32> to vector<1x32xf32>
    %229 = arith.addf %227, %228 : vector<1x32xf32>
    %230 = arith.negf %229 : vector<1x32xf32>
    %231 = math.exp %230 : vector<1x32xf32>
    %cst_133 = arith.constant 1.000000e+00 : f32
    %232 = vector.broadcast %cst_133 : f32 to vector<1x32xf32>
    %233 = arith.addf %232, %231 : vector<1x32xf32>
    %234 = arith.divf %232, %233 : vector<1x32xf32>
    %235 = vector.extract_strided_slice %216 {offsets = [0, 64], sizes = [1, 32], strides = [1, 1]} : vector<1x96xf32> to vector<1x32xf32>
    %236 = vector.extract_strided_slice %218 {offsets = [0, 64], sizes = [1, 32], strides = [1, 1]} : vector<1x96xf32> to vector<1x32xf32>
    %237 = arith.mulf %226, %236 : vector<1x32xf32>
    %238 = arith.addf %235, %237 : vector<1x32xf32>
    %239 = math.tanh %238 : vector<1x32xf32>
    %cst_134 = arith.constant 1.000000e+00 : f32
    %240 = vector.broadcast %cst_134 : f32 to vector<1x32xf32>
    %241 = arith.subf %240, %234 : vector<1x32xf32>
    %242 = arith.mulf %241, %239 : vector<1x32xf32>
    %243 = arith.mulf %234, %212 : vector<1x32xf32>
    %244 = arith.addf %242, %243 : vector<1x32xf32>
    %cst_135 = arith.constant dense<0.000000e+00> : vector<1x32xf32>
    %245 = tpu.matmul %244, %23, %cst_135 {dimension_numbers = #tpu.dot_dimension_numbers<[1], [0], [0], [1], [0, 0, 1, 1], [], []>} : vector<1x32xf32>, vector<32x32xf32>, vector<1x32xf32> -> vector<1x32xf32>
    %246 = arith.addf %245, %24 : vector<1x32xf32>
    %247 = vector.extract_strided_slice %25 {offsets = [3, 0], sizes = [1, 32], strides = [1, 1]} : vector<6x32xf32> to vector<1x32xf32>
    %248 = arith.addf %246, %247 : vector<1x32xf32>
    %249 = arith.negf %248 : vector<1x32xf32>
    %250 = math.exp %249 : vector<1x32xf32>
    %cst_136 = arith.constant 1.000000e+00 : f32
    %251 = vector.broadcast %cst_136 : f32 to vector<1x32xf32>
    %252 = arith.addf %251, %250 : vector<1x32xf32>
    %253 = arith.divf %251, %252 : vector<1x32xf32>
    %cst_137 = arith.constant dense<0.000000e+00> : vector<1x32xf32>
    %254 = tpu.matmul %244, %26, %cst_137 {dimension_numbers = #tpu.dot_dimension_numbers<[1], [0], [0], [1], [0, 0, 1, 1], [], []>} : vector<1x32xf32>, vector<32x32xf32>, vector<1x32xf32> -> vector<1x32xf32>
    %255 = vector.extract_strided_slice %27 {offsets = [3, 0], sizes = [1, 32], strides = [1, 1]} : vector<6x32xf32> to vector<1x32xf32>
    %256 = arith.addf %254, %255 : vector<1x32xf32>
    %257 = arith.mulf %253, %256 : vector<1x32xf32>
    %c3_138 = arith.constant 3 : index
    %c0_139 = arith.constant 0 : index
    %c0_140 = arith.constant 0 : index
    %258 = vector.load %arg33[%c3_138, %c0_139, %c0_140] : memref<6x1x32xf32, #tpu.memory_space<vmem>>, vector<1x1x32xf32>
    %259 = vector.shape_cast %258 : vector<1x1x32xf32> to vector<1x32xf32>
    %260 = vector.shape_cast %257 : vector<1x32xf32> to vector<1x1x32xf32>
    tpu.vector_store %arg33[%c3_138, %c0_139, %c0_140], %260 {strides = array<i32>} : memref<6x1x32xf32, #tpu.memory_space<vmem>>, vector<1x1x32xf32>,
    %c4 = arith.constant 4 : index
    %c0_141 = arith.constant 0 : index
    %c0_142 = arith.constant 0 : index
    %c0_143 = arith.constant 0 : index
    %261 = vector.load %arg2[%c4, %c0_141, %c0_142, %c0_143] : memref<6x1x1x6xf32, #tpu.memory_space<vmem>>, vector<1x1x1x6xf32>
    %262 = vector.shape_cast %261 : vector<1x1x1x6xf32> to vector<1x6xf32>
    %263 = vector.extract_strided_slice %262 {offsets = [0, 0], sizes = [1, 1], strides = [1, 1]} : vector<1x6xf32> to vector<1x1xf32>
    %c0_144 = arith.constant 0 : index
    %c0_145 = arith.constant 0 : index
    %c0_146 = arith.constant 0 : index
    %264 = vector.load %arg33[%c0_144, %c0_145, %c0_146] : memref<6x1x32xf32, #tpu.memory_space<vmem>>, vector<1x1x32xf32>
    %265 = vector.shape_cast %264 : vector<1x1x32xf32> to vector<1x32xf32>
    %266 = vector.broadcast %263 : vector<1x1xf32> to vector<1x32xf32>
    %267 = arith.mulf %266, %265 : vector<1x32xf32>
    %268 = arith.addf %28, %267 : vector<1x32xf32>
    %269 = vector.extract_strided_slice %262 {offsets = [0, 1], sizes = [1, 1], strides = [1, 1]} : vector<1x6xf32> to vector<1x1xf32>
    %c1_147 = arith.constant 1 : index
    %c0_148 = arith.constant 0 : index
    %c0_149 = arith.constant 0 : index
    %270 = vector.load %arg33[%c1_147, %c0_148, %c0_149] : memref<6x1x32xf32, #tpu.memory_space<vmem>>, vector<1x1x32xf32>
    %271 = vector.shape_cast %270 : vector<1x1x32xf32> to vector<1x32xf32>
    %272 = vector.broadcast %269 : vector<1x1xf32> to vector<1x32xf32>
    %273 = arith.mulf %272, %271 : vector<1x32xf32>
    %274 = arith.addf %268, %273 : vector<1x32xf32>
    %275 = vector.extract_strided_slice %262 {offsets = [0, 2], sizes = [1, 1], strides = [1, 1]} : vector<1x6xf32> to vector<1x1xf32>
    %c2_150 = arith.constant 2 : index
    %c0_151 = arith.constant 0 : index
    %c0_152 = arith.constant 0 : index
    %276 = vector.load %arg33[%c2_150, %c0_151, %c0_152] : memref<6x1x32xf32, #tpu.memory_space<vmem>>, vector<1x1x32xf32>
    %277 = vector.shape_cast %276 : vector<1x1x32xf32> to vector<1x32xf32>
    %278 = vector.broadcast %275 : vector<1x1xf32> to vector<1x32xf32>
    %279 = arith.mulf %278, %277 : vector<1x32xf32>
    %280 = arith.addf %274, %279 : vector<1x32xf32>
    %281 = vector.extract_strided_slice %262 {offsets = [0, 3], sizes = [1, 1], strides = [1, 1]} : vector<1x6xf32> to vector<1x1xf32>
    %c3_153 = arith.constant 3 : index
    %c0_154 = arith.constant 0 : index
    %c0_155 = arith.constant 0 : index
    %282 = vector.load %arg33[%c3_153, %c0_154, %c0_155] : memref<6x1x32xf32, #tpu.memory_space<vmem>>, vector<1x1x32xf32>
    %283 = vector.shape_cast %282 : vector<1x1x32xf32> to vector<1x32xf32>
    %284 = vector.broadcast %281 : vector<1x1xf32> to vector<1x32xf32>
    %285 = arith.mulf %284, %283 : vector<1x32xf32>
    %286 = arith.addf %280, %285 : vector<1x32xf32>
    %c4_156 = arith.constant 4 : index
    %c0_157 = arith.constant 0 : index
    %c0_158 = arith.constant 0 : index
    %c0_159 = arith.constant 0 : index
    %287 = vector.load %arg1[%c4_156, %c0_157, %c0_158, %c0_159] : memref<6x1x1x5xf32, #tpu.memory_space<vmem>>, vector<1x1x1x5xf32>
    %288 = vector.shape_cast %287 : vector<1x1x1x5xf32> to vector<1x5xf32>
    %cst_160 = arith.constant dense<0.000000e+00> : vector<1x96xf32>
    %289 = tpu.matmul %288, %0, %cst_160 {dimension_numbers = #tpu.dot_dimension_numbers<[1], [0], [0], [1], [0, 0, 1, 1], [], []>} : vector<1x5xf32>, vector<5x96xf32>, vector<1x96xf32> -> vector<1x96xf32>
    %290 = arith.addf %289, %2 : vector<1x96xf32>
    %cst_161 = arith.constant dense<0.000000e+00> : vector<1x96xf32>
    %291 = tpu.matmul %286, %1, %cst_161 {dimension_numbers = #tpu.dot_dimension_numbers<[1], [0], [0], [1], [0, 0, 1, 1], [], []>} : vector<1x32xf32>, vector<32x96xf32>, vector<1x96xf32> -> vector<1x96xf32>
    %292 = arith.addf %291, %3 : vector<1x96xf32>
    %293 = vector.extract_strided_slice %290 {offsets = [0, 0], sizes = [1, 32], strides = [1, 1]} : vector<1x96xf32> to vector<1x32xf32>
    %294 = vector.extract_strided_slice %292 {offsets = [0, 0], sizes = [1, 32], strides = [1, 1]} : vector<1x96xf32> to vector<1x32xf32>
    %295 = arith.addf %293, %294 : vector<1x32xf32>
    %296 = arith.negf %295 : vector<1x32xf32>
    %297 = math.exp %296 : vector<1x32xf32>
    %cst_162 = arith.constant 1.000000e+00 : f32
    %298 = vector.broadcast %cst_162 : f32 to vector<1x32xf32>
    %299 = arith.addf %298, %297 : vector<1x32xf32>
    %300 = arith.divf %298, %299 : vector<1x32xf32>
    %301 = vector.extract_strided_slice %290 {offsets = [0, 32], sizes = [1, 32], strides = [1, 1]} : vector<1x96xf32> to vector<1x32xf32>
    %302 = vector.extract_strided_slice %292 {offsets = [0, 32], sizes = [1, 32], strides = [1, 1]} : vector<1x96xf32> to vector<1x32xf32>
    %303 = arith.addf %301, %302 : vector<1x32xf32>
    %304 = arith.negf %303 : vector<1x32xf32>
    %305 = math.exp %304 : vector<1x32xf32>
    %cst_163 = arith.constant 1.000000e+00 : f32
    %306 = vector.broadcast %cst_163 : f32 to vector<1x32xf32>
    %307 = arith.addf %306, %305 : vector<1x32xf32>
    %308 = arith.divf %306, %307 : vector<1x32xf32>
    %309 = vector.extract_strided_slice %290 {offsets = [0, 64], sizes = [1, 32], strides = [1, 1]} : vector<1x96xf32> to vector<1x32xf32>
    %310 = vector.extract_strided_slice %292 {offsets = [0, 64], sizes = [1, 32], strides = [1, 1]} : vector<1x96xf32> to vector<1x32xf32>
    %311 = arith.mulf %300, %310 : vector<1x32xf32>
    %312 = arith.addf %309, %311 : vector<1x32xf32>
    %313 = math.tanh %312 : vector<1x32xf32>
    %cst_164 = arith.constant 1.000000e+00 : f32
    %314 = vector.broadcast %cst_164 : f32 to vector<1x32xf32>
    %315 = arith.subf %314, %308 : vector<1x32xf32>
    %316 = arith.mulf %315, %313 : vector<1x32xf32>
    %317 = arith.mulf %308, %286 : vector<1x32xf32>
    %318 = arith.addf %316, %317 : vector<1x32xf32>
    %cst_165 = arith.constant dense<0.000000e+00> : vector<1x32xf32>
    %319 = tpu.matmul %318, %23, %cst_165 {dimension_numbers = #tpu.dot_dimension_numbers<[1], [0], [0], [1], [0, 0, 1, 1], [], []>} : vector<1x32xf32>, vector<32x32xf32>, vector<1x32xf32> -> vector<1x32xf32>
    %320 = arith.addf %319, %24 : vector<1x32xf32>
    %321 = vector.extract_strided_slice %25 {offsets = [4, 0], sizes = [1, 32], strides = [1, 1]} : vector<6x32xf32> to vector<1x32xf32>
    %322 = arith.addf %320, %321 : vector<1x32xf32>
    %323 = arith.negf %322 : vector<1x32xf32>
    %324 = math.exp %323 : vector<1x32xf32>
    %cst_166 = arith.constant 1.000000e+00 : f32
    %325 = vector.broadcast %cst_166 : f32 to vector<1x32xf32>
    %326 = arith.addf %325, %324 : vector<1x32xf32>
    %327 = arith.divf %325, %326 : vector<1x32xf32>
    %cst_167 = arith.constant dense<0.000000e+00> : vector<1x32xf32>
    %328 = tpu.matmul %318, %26, %cst_167 {dimension_numbers = #tpu.dot_dimension_numbers<[1], [0], [0], [1], [0, 0, 1, 1], [], []>} : vector<1x32xf32>, vector<32x32xf32>, vector<1x32xf32> -> vector<1x32xf32>
    %329 = vector.extract_strided_slice %27 {offsets = [4, 0], sizes = [1, 32], strides = [1, 1]} : vector<6x32xf32> to vector<1x32xf32>
    %330 = arith.addf %328, %329 : vector<1x32xf32>
    %331 = arith.mulf %327, %330 : vector<1x32xf32>
    %c4_168 = arith.constant 4 : index
    %c0_169 = arith.constant 0 : index
    %c0_170 = arith.constant 0 : index
    %332 = vector.load %arg33[%c4_168, %c0_169, %c0_170] : memref<6x1x32xf32, #tpu.memory_space<vmem>>, vector<1x1x32xf32>
    %333 = vector.shape_cast %332 : vector<1x1x32xf32> to vector<1x32xf32>
    %334 = vector.shape_cast %331 : vector<1x32xf32> to vector<1x1x32xf32>
    tpu.vector_store %arg33[%c4_168, %c0_169, %c0_170], %334 {strides = array<i32>} : memref<6x1x32xf32, #tpu.memory_space<vmem>>, vector<1x1x32xf32>,
    %c5 = arith.constant 5 : index
    %c0_171 = arith.constant 0 : index
    %c0_172 = arith.constant 0 : index
    %c0_173 = arith.constant 0 : index
    %335 = vector.load %arg2[%c5, %c0_171, %c0_172, %c0_173] : memref<6x1x1x6xf32, #tpu.memory_space<vmem>>, vector<1x1x1x6xf32>
    %336 = vector.shape_cast %335 : vector<1x1x1x6xf32> to vector<1x6xf32>
    %337 = vector.extract_strided_slice %336 {offsets = [0, 0], sizes = [1, 1], strides = [1, 1]} : vector<1x6xf32> to vector<1x1xf32>
    %c0_174 = arith.constant 0 : index
    %c0_175 = arith.constant 0 : index
    %c0_176 = arith.constant 0 : index
    %338 = vector.load %arg33[%c0_174, %c0_175, %c0_176] : memref<6x1x32xf32, #tpu.memory_space<vmem>>, vector<1x1x32xf32>
    %339 = vector.shape_cast %338 : vector<1x1x32xf32> to vector<1x32xf32>
    %340 = vector.broadcast %337 : vector<1x1xf32> to vector<1x32xf32>
    %341 = arith.mulf %340, %339 : vector<1x32xf32>
    %342 = arith.addf %28, %341 : vector<1x32xf32>
    %343 = vector.extract_strided_slice %336 {offsets = [0, 1], sizes = [1, 1], strides = [1, 1]} : vector<1x6xf32> to vector<1x1xf32>
    %c1_177 = arith.constant 1 : index
    %c0_178 = arith.constant 0 : index
    %c0_179 = arith.constant 0 : index
    %344 = vector.load %arg33[%c1_177, %c0_178, %c0_179] : memref<6x1x32xf32, #tpu.memory_space<vmem>>, vector<1x1x32xf32>
    %345 = vector.shape_cast %344 : vector<1x1x32xf32> to vector<1x32xf32>
    %346 = vector.broadcast %343 : vector<1x1xf32> to vector<1x32xf32>
    %347 = arith.mulf %346, %345 : vector<1x32xf32>
    %348 = arith.addf %342, %347 : vector<1x32xf32>
    %349 = vector.extract_strided_slice %336 {offsets = [0, 2], sizes = [1, 1], strides = [1, 1]} : vector<1x6xf32> to vector<1x1xf32>
    %c2_180 = arith.constant 2 : index
    %c0_181 = arith.constant 0 : index
    %c0_182 = arith.constant 0 : index
    %350 = vector.load %arg33[%c2_180, %c0_181, %c0_182] : memref<6x1x32xf32, #tpu.memory_space<vmem>>, vector<1x1x32xf32>
    %351 = vector.shape_cast %350 : vector<1x1x32xf32> to vector<1x32xf32>
    %352 = vector.broadcast %349 : vector<1x1xf32> to vector<1x32xf32>
    %353 = arith.mulf %352, %351 : vector<1x32xf32>
    %354 = arith.addf %348, %353 : vector<1x32xf32>
    %355 = vector.extract_strided_slice %336 {offsets = [0, 3], sizes = [1, 1], strides = [1, 1]} : vector<1x6xf32> to vector<1x1xf32>
    %c3_183 = arith.constant 3 : index
    %c0_184 = arith.constant 0 : index
    %c0_185 = arith.constant 0 : index
    %356 = vector.load %arg33[%c3_183, %c0_184, %c0_185] : memref<6x1x32xf32, #tpu.memory_space<vmem>>, vector<1x1x32xf32>
    %357 = vector.shape_cast %356 : vector<1x1x32xf32> to vector<1x32xf32>
    %358 = vector.broadcast %355 : vector<1x1xf32> to vector<1x32xf32>
    %359 = arith.mulf %358, %357 : vector<1x32xf32>
    %360 = arith.addf %354, %359 : vector<1x32xf32>
    %361 = vector.extract_strided_slice %336 {offsets = [0, 4], sizes = [1, 1], strides = [1, 1]} : vector<1x6xf32> to vector<1x1xf32>
    %c4_186 = arith.constant 4 : index
    %c0_187 = arith.constant 0 : index
    %c0_188 = arith.constant 0 : index
    %362 = vector.load %arg33[%c4_186, %c0_187, %c0_188] : memref<6x1x32xf32, #tpu.memory_space<vmem>>, vector<1x1x32xf32>
    %363 = vector.shape_cast %362 : vector<1x1x32xf32> to vector<1x32xf32>
    %364 = vector.broadcast %361 : vector<1x1xf32> to vector<1x32xf32>
    %365 = arith.mulf %364, %363 : vector<1x32xf32>
    %366 = arith.addf %360, %365 : vector<1x32xf32>
    %c5_189 = arith.constant 5 : index
    %c0_190 = arith.constant 0 : index
    %c0_191 = arith.constant 0 : index
    %c0_192 = arith.constant 0 : index
    %367 = vector.load %arg1[%c5_189, %c0_190, %c0_191, %c0_192] : memref<6x1x1x5xf32, #tpu.memory_space<vmem>>, vector<1x1x1x5xf32>
    %368 = vector.shape_cast %367 : vector<1x1x1x5xf32> to vector<1x5xf32>
    %cst_193 = arith.constant dense<0.000000e+00> : vector<1x96xf32>
    %369 = tpu.matmul %368, %0, %cst_193 {dimension_numbers = #tpu.dot_dimension_numbers<[1], [0], [0], [1], [0, 0, 1, 1], [], []>} : vector<1x5xf32>, vector<5x96xf32>, vector<1x96xf32> -> vector<1x96xf32>
    %370 = arith.addf %369, %2 : vector<1x96xf32>
    %cst_194 = arith.constant dense<0.000000e+00> : vector<1x96xf32>
    %371 = tpu.matmul %366, %1, %cst_194 {dimension_numbers = #tpu.dot_dimension_numbers<[1], [0], [0], [1], [0, 0, 1, 1], [], []>} : vector<1x32xf32>, vector<32x96xf32>, vector<1x96xf32> -> vector<1x96xf32>
    %372 = arith.addf %371, %3 : vector<1x96xf32>
    %373 = vector.extract_strided_slice %370 {offsets = [0, 0], sizes = [1, 32], strides = [1, 1]} : vector<1x96xf32> to vector<1x32xf32>
    %374 = vector.extract_strided_slice %372 {offsets = [0, 0], sizes = [1, 32], strides = [1, 1]} : vector<1x96xf32> to vector<1x32xf32>
    %375 = arith.addf %373, %374 : vector<1x32xf32>
    %376 = arith.negf %375 : vector<1x32xf32>
    %377 = math.exp %376 : vector<1x32xf32>
    %cst_195 = arith.constant 1.000000e+00 : f32
    %378 = vector.broadcast %cst_195 : f32 to vector<1x32xf32>
    %379 = arith.addf %378, %377 : vector<1x32xf32>
    %380 = arith.divf %378, %379 : vector<1x32xf32>
    %381 = vector.extract_strided_slice %370 {offsets = [0, 32], sizes = [1, 32], strides = [1, 1]} : vector<1x96xf32> to vector<1x32xf32>
    %382 = vector.extract_strided_slice %372 {offsets = [0, 32], sizes = [1, 32], strides = [1, 1]} : vector<1x96xf32> to vector<1x32xf32>
    %383 = arith.addf %381, %382 : vector<1x32xf32>
    %384 = arith.negf %383 : vector<1x32xf32>
    %385 = math.exp %384 : vector<1x32xf32>
    %cst_196 = arith.constant 1.000000e+00 : f32
    %386 = vector.broadcast %cst_196 : f32 to vector<1x32xf32>
    %387 = arith.addf %386, %385 : vector<1x32xf32>
    %388 = arith.divf %386, %387 : vector<1x32xf32>
    %389 = vector.extract_strided_slice %370 {offsets = [0, 64], sizes = [1, 32], strides = [1, 1]} : vector<1x96xf32> to vector<1x32xf32>
    %390 = vector.extract_strided_slice %372 {offsets = [0, 64], sizes = [1, 32], strides = [1, 1]} : vector<1x96xf32> to vector<1x32xf32>
    %391 = arith.mulf %380, %390 : vector<1x32xf32>
    %392 = arith.addf %389, %391 : vector<1x32xf32>
    %393 = math.tanh %392 : vector<1x32xf32>
    %cst_197 = arith.constant 1.000000e+00 : f32
    %394 = vector.broadcast %cst_197 : f32 to vector<1x32xf32>
    %395 = arith.subf %394, %388 : vector<1x32xf32>
    %396 = arith.mulf %395, %393 : vector<1x32xf32>
    %397 = arith.mulf %388, %366 : vector<1x32xf32>
    %398 = arith.addf %396, %397 : vector<1x32xf32>
    %cst_198 = arith.constant dense<0.000000e+00> : vector<1x16xf32>
    %399 = tpu.matmul %398, %8, %cst_198 {dimension_numbers = #tpu.dot_dimension_numbers<[1], [0], [0], [1], [0, 0, 1, 1], [], []>} : vector<1x32xf32>, vector<32x16xf32>, vector<1x16xf32> -> vector<1x16xf32>
    %400 = arith.addf %399, %9 : vector<1x16xf32>
    %cst_199 = arith.constant dense<0.000000e+00> : vector<1x16xf32>
    %401 = tpu.matmul %398, %10, %cst_199 {dimension_numbers = #tpu.dot_dimension_numbers<[1], [0], [0], [1], [0, 0, 1, 1], [], []>} : vector<1x32xf32>, vector<32x16xf32>, vector<1x16xf32> -> vector<1x16xf32>
    %402 = arith.addf %401, %11 : vector<1x16xf32>
    %cst_200 = arith.constant 5.000000e-01 : f32
    %403 = vector.broadcast %cst_200 : f32 to vector<1x16xf32>
    %404 = arith.mulf %403, %402 : vector<1x16xf32>
    %405 = math.exp %404 : vector<1x16xf32>
    %c0_201 = arith.constant 0 : index
    %c0_202 = arith.constant 0 : index
    %c0_203 = arith.constant 0 : index
    %406 = vector.load %arg3[%c0_201, %c0_202, %c0_203] : memref<1x1x16xf32, #tpu.memory_space<vmem>>, vector<1x1x16xf32>
    %407 = vector.shape_cast %406 : vector<1x1x16xf32> to vector<1x16xf32>
    %cst_204 = arith.constant 0.00999999977 : f32
    %408 = vector.broadcast %cst_204 : f32 to vector<1x16xf32>
    %409 = arith.mulf %407, %408 : vector<1x16xf32>
    %410 = arith.mulf %409, %405 : vector<1x16xf32>
    %411 = arith.addf %410, %400 : vector<1x16xf32>
    %cst_205 = arith.constant dense<0.000000e+00> : vector<1x32xf32>
    %412 = tpu.matmul %411, %12, %cst_205 {dimension_numbers = #tpu.dot_dimension_numbers<[1], [0], [0], [1], [0, 0, 1, 1], [], []>} : vector<1x16xf32>, vector<16x32xf32>, vector<1x32xf32> -> vector<1x32xf32>
    %413 = arith.addf %412, %13 : vector<1x32xf32>
    %414 = math.tanh %413 : vector<1x32xf32>
    %c0_206 = arith.constant 0 : index
    %c0_207 = arith.constant 0 : index
    %c0_208 = arith.constant 0 : index
    %c0_209 = arith.constant 0 : index
    %415 = vector.load %arg1[%c0_206, %c0_207, %c0_208, %c0_209] : memref<6x1x1x5xf32, #tpu.memory_space<vmem>>, vector<1x1x1x5xf32>
    %416 = vector.shape_cast %415 : vector<1x1x1x5xf32> to vector<1x5xf32>
    %cst_210 = arith.constant dense<0.000000e+00> : vector<1x96xf32>
    %417 = tpu.matmul %416, %4, %cst_210 {dimension_numbers = #tpu.dot_dimension_numbers<[1], [0], [0], [1], [0, 0, 1, 1], [], []>} : vector<1x5xf32>, vector<5x96xf32>, vector<1x96xf32> -> vector<1x96xf32>
    %418 = arith.addf %417, %6 : vector<1x96xf32>
    %cst_211 = arith.constant dense<0.000000e+00> : vector<1x96xf32>
    %419 = tpu.matmul %414, %5, %cst_211 {dimension_numbers = #tpu.dot_dimension_numbers<[1], [0], [0], [1], [0, 0, 1, 1], [], []>} : vector<1x32xf32>, vector<32x96xf32>, vector<1x96xf32> -> vector<1x96xf32>
    %420 = arith.addf %419, %7 : vector<1x96xf32>
    %421 = vector.extract_strided_slice %418 {offsets = [0, 0], sizes = [1, 32], strides = [1, 1]} : vector<1x96xf32> to vector<1x32xf32>
    %422 = vector.extract_strided_slice %420 {offsets = [0, 0], sizes = [1, 32], strides = [1, 1]} : vector<1x96xf32> to vector<1x32xf32>
    %423 = arith.addf %421, %422 : vector<1x32xf32>
    %424 = arith.negf %423 : vector<1x32xf32>
    %425 = math.exp %424 : vector<1x32xf32>
    %cst_212 = arith.constant 1.000000e+00 : f32
    %426 = vector.broadcast %cst_212 : f32 to vector<1x32xf32>
    %427 = arith.addf %426, %425 : vector<1x32xf32>
    %428 = arith.divf %426, %427 : vector<1x32xf32>
    %429 = vector.extract_strided_slice %418 {offsets = [0, 32], sizes = [1, 32], strides = [1, 1]} : vector<1x96xf32> to vector<1x32xf32>
    %430 = vector.extract_strided_slice %420 {offsets = [0, 32], sizes = [1, 32], strides = [1, 1]} : vector<1x96xf32> to vector<1x32xf32>
    %431 = arith.addf %429, %430 : vector<1x32xf32>
    %432 = arith.negf %431 : vector<1x32xf32>
    %433 = math.exp %432 : vector<1x32xf32>
    %cst_213 = arith.constant 1.000000e+00 : f32
    %434 = vector.broadcast %cst_213 : f32 to vector<1x32xf32>
    %435 = arith.addf %434, %433 : vector<1x32xf32>
    %436 = arith.divf %434, %435 : vector<1x32xf32>
    %437 = vector.extract_strided_slice %418 {offsets = [0, 64], sizes = [1, 32], strides = [1, 1]} : vector<1x96xf32> to vector<1x32xf32>
    %438 = vector.extract_strided_slice %420 {offsets = [0, 64], sizes = [1, 32], strides = [1, 1]} : vector<1x96xf32> to vector<1x32xf32>
    %439 = arith.mulf %428, %438 : vector<1x32xf32>
    %440 = arith.addf %437, %439 : vector<1x32xf32>
    %441 = math.tanh %440 : vector<1x32xf32>
    %cst_214 = arith.constant 1.000000e+00 : f32
    %442 = vector.broadcast %cst_214 : f32 to vector<1x32xf32>
    %443 = arith.subf %442, %436 : vector<1x32xf32>
    %444 = arith.mulf %443, %441 : vector<1x32xf32>
    %445 = arith.mulf %436, %414 : vector<1x32xf32>
    %446 = arith.addf %444, %445 : vector<1x32xf32>
    %cst_215 = arith.constant dense<0.000000e+00> : vector<1x32xf32>
    %447 = tpu.matmul %446, %23, %cst_215 {dimension_numbers = #tpu.dot_dimension_numbers<[1], [0], [0], [1], [0, 0, 1, 1], [], []>} : vector<1x32xf32>, vector<32x32xf32>, vector<1x32xf32> -> vector<1x32xf32>
    %448 = arith.addf %447, %24 : vector<1x32xf32>
    %449 = vector.extract_strided_slice %25 {offsets = [0, 0], sizes = [1, 32], strides = [1, 1]} : vector<6x32xf32> to vector<1x32xf32>
    %450 = arith.addf %448, %449 : vector<1x32xf32>
    %451 = arith.negf %450 : vector<1x32xf32>
    %452 = math.exp %451 : vector<1x32xf32>
    %cst_216 = arith.constant 1.000000e+00 : f32
    %453 = vector.broadcast %cst_216 : f32 to vector<1x32xf32>
    %454 = arith.addf %453, %452 : vector<1x32xf32>
    %455 = arith.divf %453, %454 : vector<1x32xf32>
    %cst_217 = arith.constant dense<0.000000e+00> : vector<1x32xf32>
    %456 = tpu.matmul %446, %26, %cst_217 {dimension_numbers = #tpu.dot_dimension_numbers<[1], [0], [0], [1], [0, 0, 1, 1], [], []>} : vector<1x32xf32>, vector<32x32xf32>, vector<1x32xf32> -> vector<1x32xf32>
    %457 = vector.extract_strided_slice %27 {offsets = [0, 0], sizes = [1, 32], strides = [1, 1]} : vector<6x32xf32> to vector<1x32xf32>
    %458 = arith.addf %456, %457 : vector<1x32xf32>
    %459 = arith.mulf %455, %458 : vector<1x32xf32>
    %c0_218 = arith.constant 0 : index
    %c0_219 = arith.constant 0 : index
    %c0_220 = arith.constant 0 : index
    %460 = vector.load %arg33[%c0_218, %c0_219, %c0_220] : memref<6x1x32xf32, #tpu.memory_space<vmem>>, vector<1x1x32xf32>
    %461 = vector.shape_cast %460 : vector<1x1x32xf32> to vector<1x32xf32>
    %462 = vector.shape_cast %459 : vector<1x32xf32> to vector<1x1x32xf32>
    tpu.vector_store %arg33[%c0_218, %c0_219, %c0_220], %462 {strides = array<i32>} : memref<6x1x32xf32, #tpu.memory_space<vmem>>, vector<1x1x32xf32>,
    %cst_221 = arith.constant dense<0.000000e+00> : vector<1x128xf32>
    %463 = tpu.matmul %446, %18, %cst_221 {dimension_numbers = #tpu.dot_dimension_numbers<[1], [0], [0], [1], [0, 0, 1, 1], [], []>} : vector<1x32xf32>, vector<32x128xf32>, vector<1x128xf32> -> vector<1x128xf32>
    %c0_222 = arith.constant 0 : index
    %c0_223 = arith.constant 0 : index
    %c0_224 = arith.constant 0 : index
    %464 = vector.load %arg34[%c0_222, %c0_223, %c0_224] : memref<6x1x128xf32, #tpu.memory_space<vmem>>, vector<1x1x128xf32>
    %465 = vector.shape_cast %464 : vector<1x1x128xf32> to vector<1x128xf32>
    %466 = vector.shape_cast %463 : vector<1x128xf32> to vector<1x1x128xf32>
    tpu.vector_store %arg34[%c0_222, %c0_223, %c0_224], %466 {strides = array<i32>} : memref<6x1x128xf32, #tpu.memory_space<vmem>>, vector<1x1x128xf32>,
    %cst_225 = arith.constant 0.000000e+00 : f32
    %467 = vector.broadcast %cst_225 : f32 to vector<1x1xf32>
    %c1_226 = arith.constant 1 : index
    %c0_227 = arith.constant 0 : index
    %c0_228 = arith.constant 0 : index
    %c0_229 = arith.constant 0 : index
    %468 = vector.load %arg1[%c1_226, %c0_227, %c0_228, %c0_229] : memref<6x1x1x5xf32, #tpu.memory_space<vmem>>, vector<1x1x1x5xf32>
    %469 = vector.shape_cast %468 : vector<1x1x1x5xf32> to vector<1x5xf32>
    %c1_230 = arith.constant 1 : index
    %c0_231 = arith.constant 0 : index
    %c0_232 = arith.constant 0 : index
    %c0_233 = arith.constant 0 : index
    %470 = vector.load %arg2[%c1_230, %c0_231, %c0_232, %c0_233] : memref<6x1x1x6xf32, #tpu.memory_space<vmem>>, vector<1x1x1x6xf32>
    %471 = vector.shape_cast %470 : vector<1x1x1x6xf32> to vector<1x6xf32>
    %cst_234 = arith.constant dense<0.000000e+00> : vector<1x64xf32>
    %472 = tpu.matmul %446, %14, %cst_234 {dimension_numbers = #tpu.dot_dimension_numbers<[1], [0], [0], [1], [0, 0, 1, 1], [], []>} : vector<1x32xf32>, vector<32x64xf32>, vector<1x64xf32> -> vector<1x64xf32>
    %473 = arith.addf %472, %15 : vector<1x64xf32>
    %cst_235 = arith.constant 0.000000e+00 : f32
    %474 = vector.broadcast %cst_235 : f32 to vector<1x64xf32>
    %475 = arith.maximumf %473, %474 : vector<1x64xf32>
    %cst_236 = arith.constant dense<0.000000e+00> : vector<1x5xf32>
    %476 = tpu.matmul %475, %16, %cst_236 {dimension_numbers = #tpu.dot_dimension_numbers<[1], [0], [0], [1], [0, 0, 1, 1], [], []>} : vector<1x64xf32>, vector<64x5xf32>, vector<1x5xf32> -> vector<1x5xf32>
    %477 = arith.addf %476, %17 : vector<1x5xf32>
    %cst_237 = arith.constant dense<0xFF800000> : vector<1xf32>
    %478 = vector.multi_reduction <maximumf>, %477, %cst_237 [1] : vector<1x5xf32> to vector<1xf32>
    %479 = vector.shape_cast %478 : vector<1xf32> to vector<1x1xf32>
    %480 = vector.broadcast %479 : vector<1x1xf32> to vector<1x5xf32>
    %481 = arith.subf %477, %480 : vector<1x5xf32>
    %482 = math.exp %481 : vector<1x5xf32>
    %cst_238 = arith.constant dense<0.000000e+00> : vector<1xf32>
    %483 = vector.multi_reduction <add>, %482, %cst_238 [1] : vector<1x5xf32> to vector<1xf32>
    %484 = vector.shape_cast %483 : vector<1xf32> to vector<1x1xf32>
    %485 = math.log %484 : vector<1x1xf32>
    %486 = vector.broadcast %485 : vector<1x1xf32> to vector<1x5xf32>
    %487 = arith.subf %481, %486 : vector<1x5xf32>
    %488 = arith.mulf %487, %469 : vector<1x5xf32>
    %489 = vector.shape_cast %488 : vector<1x5xf32> to vector<1x1x5xf32>
    %cst_239 = arith.constant dense<0.000000e+00> : vector<1xf32>
    %490 = vector.multi_reduction <add>, %489, %cst_239 [1, 2] : vector<1x1x5xf32> to vector<1xf32>
    %491 = vector.shape_cast %490 : vector<1xf32> to vector<1x1x1xf32>
    %492 = vector.extract %491[0, 0, 0] : f32 from vector<1x1x1xf32>
    %493 = vector.broadcast %492 : f32 to vector<1x1xf32>
    %494 = arith.addf %467, %493 : vector<1x1xf32>
    %cst_240 = arith.constant dense<0.000000e+00> : vector<1x96xf32>
    %495 = tpu.matmul %469, %4, %cst_240 {dimension_numbers = #tpu.dot_dimension_numbers<[1], [0], [0], [1], [0, 0, 1, 1], [], []>} : vector<1x5xf32>, vector<5x96xf32>, vector<1x96xf32> -> vector<1x96xf32>
    %496 = arith.addf %495, %6 : vector<1x96xf32>
    %497 = vector.extract_strided_slice %496 {offsets = [0, 0], sizes = [1, 32], strides = [1, 1]} : vector<1x96xf32> to vector<1x32xf32>
    %498 = vector.extract_strided_slice %7 {offsets = [0, 0], sizes = [1, 32], strides = [1, 1]} : vector<1x96xf32> to vector<1x32xf32>
    %499 = arith.addf %497, %498 : vector<1x32xf32>
    %500 = arith.negf %499 : vector<1x32xf32>
    %501 = math.exp %500 : vector<1x32xf32>
    %cst_241 = arith.constant 1.000000e+00 : f32
    %502 = vector.broadcast %cst_241 : f32 to vector<1x32xf32>
    %503 = arith.addf %502, %501 : vector<1x32xf32>
    %504 = arith.divf %502, %503 : vector<1x32xf32>
    %505 = vector.extract_strided_slice %496 {offsets = [0, 32], sizes = [1, 32], strides = [1, 1]} : vector<1x96xf32> to vector<1x32xf32>
    %506 = vector.extract_strided_slice %7 {offsets = [0, 32], sizes = [1, 32], strides = [1, 1]} : vector<1x96xf32> to vector<1x32xf32>
    %507 = arith.addf %505, %506 : vector<1x32xf32>
    %508 = arith.negf %507 : vector<1x32xf32>
    %509 = math.exp %508 : vector<1x32xf32>
    %cst_242 = arith.constant 1.000000e+00 : f32
    %510 = vector.broadcast %cst_242 : f32 to vector<1x32xf32>
    %511 = arith.addf %510, %509 : vector<1x32xf32>
    %512 = arith.divf %510, %511 : vector<1x32xf32>
    %513 = vector.extract_strided_slice %496 {offsets = [0, 64], sizes = [1, 32], strides = [1, 1]} : vector<1x96xf32> to vector<1x32xf32>
    %514 = vector.extract_strided_slice %7 {offsets = [0, 64], sizes = [1, 32], strides = [1, 1]} : vector<1x96xf32> to vector<1x32xf32>
    %515 = arith.mulf %504, %514 : vector<1x32xf32>
    %516 = arith.addf %513, %515 : vector<1x32xf32>
    %517 = math.tanh %516 : vector<1x32xf32>
    %cst_243 = arith.constant 1.000000e+00 : f32
    %518 = vector.broadcast %cst_243 : f32 to vector<1x32xf32>
    %519 = arith.subf %518, %512 : vector<1x32xf32>
    %520 = arith.mulf %519, %517 : vector<1x32xf32>
    %521 = arith.mulf %512, %28 : vector<1x32xf32>
    %522 = arith.addf %520, %521 : vector<1x32xf32>
    %c0_244 = arith.constant 0 : index
    %c0_245 = arith.constant 0 : index
    %c0_246 = arith.constant 0 : index
    %523 = vector.load %arg34[%c0_244, %c0_245, %c0_246] : memref<6x1x128xf32, #tpu.memory_space<vmem>>, vector<1x1x128xf32>
    %524 = vector.shape_cast %523 : vector<1x1x128xf32> to vector<1x128xf32>
    %cst_247 = arith.constant dense<0.000000e+00> : vector<1x128xf32>
    %525 = tpu.matmul %522, %19, %cst_247 {dimension_numbers = #tpu.dot_dimension_numbers<[1], [0], [0], [1], [0, 0, 1, 1], [], []>} : vector<1x32xf32>, vector<32x128xf32>, vector<1x128xf32> -> vector<1x128xf32>
    %526 = arith.addf %524, %525 : vector<1x128xf32>
    %527 = arith.addf %526, %20 : vector<1x128xf32>
    %cst_248 = arith.constant 0.000000e+00 : f32
    %528 = vector.broadcast %cst_248 : f32 to vector<1x128xf32>
    %529 = arith.maximumf %527, %528 : vector<1x128xf32>
    %530 = arith.mulf %529, %21 : vector<1x128xf32>
    %cst_249 = arith.constant dense<0.000000e+00> : vector<1xf32>
    %531 = vector.multi_reduction <add>, %530, %cst_249 [1] : vector<1x128xf32> to vector<1xf32>
    %532 = vector.shape_cast %531 : vector<1xf32> to vector<1x1xf32>
    %533 = arith.addf %532, %22 : vector<1x1xf32>
    %534 = math.absf %533 : vector<1x1xf32>
    %cst_250 = arith.constant 0.000000e+00 : f32
    %535 = vector.broadcast %cst_250 : f32 to vector<1x1xf32>
    %536 = arith.subf %535, %534 : vector<1x1xf32>
    %537 = math.exp %536 : vector<1x1xf32>
    %cst_251 = arith.constant 0.000000e+00 : f32
    %538 = vector.broadcast %cst_251 : f32 to vector<1x1xf32>
    %539 = arith.minimumf %533, %538 : vector<1x1xf32>
    %cst_252 = arith.constant 1.000000e+00 : f32
    %540 = vector.broadcast %cst_252 : f32 to vector<1x1xf32>
    %541 = arith.addf %540, %537 : vector<1x1xf32>
    %542 = math.log %541 : vector<1x1xf32>
    %543 = arith.subf %539, %542 : vector<1x1xf32>
    %cst_253 = arith.constant -1.000000e+02 : f32
    %544 = vector.broadcast %cst_253 : f32 to vector<1x1xf32>
    %545 = arith.maximumf %543, %544 : vector<1x1xf32>
    %cst_254 = arith.constant 0.000000e+00 : f32
    %546 = vector.broadcast %cst_254 : f32 to vector<1x1xf32>
    %547 = arith.subf %546, %533 : vector<1x1xf32>
    %cst_255 = arith.constant 0.000000e+00 : f32
    %548 = vector.broadcast %cst_255 : f32 to vector<1x1xf32>
    %549 = arith.minimumf %547, %548 : vector<1x1xf32>
    %cst_256 = arith.constant 1.000000e+00 : f32
    %550 = vector.broadcast %cst_256 : f32 to vector<1x1xf32>
    %551 = arith.addf %550, %537 : vector<1x1xf32>
    %552 = math.log %551 : vector<1x1xf32>
    %553 = arith.subf %549, %552 : vector<1x1xf32>
    %cst_257 = arith.constant -1.000000e+02 : f32
    %554 = vector.broadcast %cst_257 : f32 to vector<1x1xf32>
    %555 = arith.maximumf %553, %554 : vector<1x1xf32>
    %556 = vector.extract_strided_slice %471 {offsets = [0, 0], sizes = [1, 1], strides = [1, 1]} : vector<1x6xf32> to vector<1x1xf32>
    %557 = arith.mulf %556, %545 : vector<1x1xf32>
    %cst_258 = arith.constant 1.000000e+00 : f32
    %558 = vector.broadcast %cst_258 : f32 to vector<1x1xf32>
    %559 = arith.subf %558, %556 : vector<1x1xf32>
    %560 = arith.mulf %559, %555 : vector<1x1xf32>
    %561 = arith.addf %557, %560 : vector<1x1xf32>
    %562 = vector.shape_cast %561 : vector<1x1xf32> to vector<1x1x1xf32>
    %cst_259 = arith.constant dense<0.000000e+00> : vector<1xf32>
    %563 = vector.multi_reduction <add>, %562, %cst_259 [1, 2] : vector<1x1x1xf32> to vector<1xf32>
    %564 = vector.shape_cast %563 : vector<1xf32> to vector<1x1x1xf32>
    %565 = vector.extract %564[0, 0, 0] : f32 from vector<1x1x1xf32>
    %566 = vector.broadcast %565 : f32 to vector<1x1xf32>
    %567 = arith.addf %494, %566 : vector<1x1xf32>
    %c0_260 = arith.constant 0 : index
    %c0_261 = arith.constant 0 : index
    %c0_262 = arith.constant 0 : index
    %568 = vector.load %arg33[%c0_260, %c0_261, %c0_262] : memref<6x1x32xf32, #tpu.memory_space<vmem>>, vector<1x1x32xf32>
    %569 = vector.shape_cast %568 : vector<1x1x32xf32> to vector<1x32xf32>
    %570 = vector.broadcast %556 : vector<1x1xf32> to vector<1x32xf32>
    %571 = arith.mulf %570, %569 : vector<1x32xf32>
    %572 = arith.addf %28, %571 : vector<1x32xf32>
    %cst_263 = arith.constant dense<0.000000e+00> : vector<1x96xf32>
    %573 = tpu.matmul %572, %5, %cst_263 {dimension_numbers = #tpu.dot_dimension_numbers<[1], [0], [0], [1], [0, 0, 1, 1], [], []>} : vector<1x32xf32>, vector<32x96xf32>, vector<1x96xf32> -> vector<1x96xf32>
    %574 = arith.addf %573, %7 : vector<1x96xf32>
    %575 = vector.extract_strided_slice %496 {offsets = [0, 0], sizes = [1, 32], strides = [1, 1]} : vector<1x96xf32> to vector<1x32xf32>
    %576 = vector.extract_strided_slice %574 {offsets = [0, 0], sizes = [1, 32], strides = [1, 1]} : vector<1x96xf32> to vector<1x32xf32>
    %577 = arith.addf %575, %576 : vector<1x32xf32>
    %578 = arith.negf %577 : vector<1x32xf32>
    %579 = math.exp %578 : vector<1x32xf32>
    %cst_264 = arith.constant 1.000000e+00 : f32
    %580 = vector.broadcast %cst_264 : f32 to vector<1x32xf32>
    %581 = arith.addf %580, %579 : vector<1x32xf32>
    %582 = arith.divf %580, %581 : vector<1x32xf32>
    %583 = vector.extract_strided_slice %496 {offsets = [0, 32], sizes = [1, 32], strides = [1, 1]} : vector<1x96xf32> to vector<1x32xf32>
    %584 = vector.extract_strided_slice %574 {offsets = [0, 32], sizes = [1, 32], strides = [1, 1]} : vector<1x96xf32> to vector<1x32xf32>
    %585 = arith.addf %583, %584 : vector<1x32xf32>
    %586 = arith.negf %585 : vector<1x32xf32>
    %587 = math.exp %586 : vector<1x32xf32>
    %cst_265 = arith.constant 1.000000e+00 : f32
    %588 = vector.broadcast %cst_265 : f32 to vector<1x32xf32>
    %589 = arith.addf %588, %587 : vector<1x32xf32>
    %590 = arith.divf %588, %589 : vector<1x32xf32>
    %591 = vector.extract_strided_slice %496 {offsets = [0, 64], sizes = [1, 32], strides = [1, 1]} : vector<1x96xf32> to vector<1x32xf32>
    %592 = vector.extract_strided_slice %574 {offsets = [0, 64], sizes = [1, 32], strides = [1, 1]} : vector<1x96xf32> to vector<1x32xf32>
    %593 = arith.mulf %582, %592 : vector<1x32xf32>
    %594 = arith.addf %591, %593 : vector<1x32xf32>
    %595 = math.tanh %594 : vector<1x32xf32>
    %cst_266 = arith.constant 1.000000e+00 : f32
    %596 = vector.broadcast %cst_266 : f32 to vector<1x32xf32>
    %597 = arith.subf %596, %590 : vector<1x32xf32>
    %598 = arith.mulf %597, %595 : vector<1x32xf32>
    %599 = arith.mulf %590, %572 : vector<1x32xf32>
    %600 = arith.addf %598, %599 : vector<1x32xf32>
    %cst_267 = arith.constant dense<0.000000e+00> : vector<1x32xf32>
    %601 = tpu.matmul %600, %23, %cst_267 {dimension_numbers = #tpu.dot_dimension_numbers<[1], [0], [0], [1], [0, 0, 1, 1], [], []>} : vector<1x32xf32>, vector<32x32xf32>, vector<1x32xf32> -> vector<1x32xf32>
    %602 = arith.addf %601, %24 : vector<1x32xf32>
    %603 = vector.extract_strided_slice %25 {offsets = [1, 0], sizes = [1, 32], strides = [1, 1]} : vector<6x32xf32> to vector<1x32xf32>
    %604 = arith.addf %602, %603 : vector<1x32xf32>
    %605 = arith.negf %604 : vector<1x32xf32>
    %606 = math.exp %605 : vector<1x32xf32>
    %cst_268 = arith.constant 1.000000e+00 : f32
    %607 = vector.broadcast %cst_268 : f32 to vector<1x32xf32>
    %608 = arith.addf %607, %606 : vector<1x32xf32>
    %609 = arith.divf %607, %608 : vector<1x32xf32>
    %cst_269 = arith.constant dense<0.000000e+00> : vector<1x32xf32>
    %610 = tpu.matmul %600, %26, %cst_269 {dimension_numbers = #tpu.dot_dimension_numbers<[1], [0], [0], [1], [0, 0, 1, 1], [], []>} : vector<1x32xf32>, vector<32x32xf32>, vector<1x32xf32> -> vector<1x32xf32>
    %611 = vector.extract_strided_slice %27 {offsets = [1, 0], sizes = [1, 32], strides = [1, 1]} : vector<6x32xf32> to vector<1x32xf32>
    %612 = arith.addf %610, %611 : vector<1x32xf32>
    %613 = arith.mulf %609, %612 : vector<1x32xf32>
    %c1_270 = arith.constant 1 : index
    %c0_271 = arith.constant 0 : index
    %c0_272 = arith.constant 0 : index
    %614 = vector.load %arg33[%c1_270, %c0_271, %c0_272] : memref<6x1x32xf32, #tpu.memory_space<vmem>>, vector<1x1x32xf32>
    %615 = vector.shape_cast %614 : vector<1x1x32xf32> to vector<1x32xf32>
    %616 = vector.shape_cast %613 : vector<1x32xf32> to vector<1x1x32xf32>
    tpu.vector_store %arg33[%c1_270, %c0_271, %c0_272], %616 {strides = array<i32>} : memref<6x1x32xf32, #tpu.memory_space<vmem>>, vector<1x1x32xf32>,
    %cst_273 = arith.constant dense<0.000000e+00> : vector<1x128xf32>
    %617 = tpu.matmul %600, %18, %cst_273 {dimension_numbers = #tpu.dot_dimension_numbers<[1], [0], [0], [1], [0, 0, 1, 1], [], []>} : vector<1x32xf32>, vector<32x128xf32>, vector<1x128xf32> -> vector<1x128xf32>
    %c1_274 = arith.constant 1 : index
    %c0_275 = arith.constant 0 : index
    %c0_276 = arith.constant 0 : index
    %618 = vector.load %arg34[%c1_274, %c0_275, %c0_276] : memref<6x1x128xf32, #tpu.memory_space<vmem>>, vector<1x1x128xf32>
    %619 = vector.shape_cast %618 : vector<1x1x128xf32> to vector<1x128xf32>
    %620 = vector.shape_cast %617 : vector<1x128xf32> to vector<1x1x128xf32>
    tpu.vector_store %arg34[%c1_274, %c0_275, %c0_276], %620 {strides = array<i32>} : memref<6x1x128xf32, #tpu.memory_space<vmem>>, vector<1x1x128xf32>,
    %c2_277 = arith.constant 2 : index
    %c0_278 = arith.constant 0 : index
    %c0_279 = arith.constant 0 : index
    %c0_280 = arith.constant 0 : index
    %621 = vector.load %arg1[%c2_277, %c0_278, %c0_279, %c0_280] : memref<6x1x1x5xf32, #tpu.memory_space<vmem>>, vector<1x1x1x5xf32>
    %622 = vector.shape_cast %621 : vector<1x1x1x5xf32> to vector<1x5xf32>
    %c2_281 = arith.constant 2 : index
    %c0_282 = arith.constant 0 : index
    %c0_283 = arith.constant 0 : index
    %c0_284 = arith.constant 0 : index
    %623 = vector.load %arg2[%c2_281, %c0_282, %c0_283, %c0_284] : memref<6x1x1x6xf32, #tpu.memory_space<vmem>>, vector<1x1x1x6xf32>
    %624 = vector.shape_cast %623 : vector<1x1x1x6xf32> to vector<1x6xf32>
    %cst_285 = arith.constant dense<0.000000e+00> : vector<1x64xf32>
    %625 = tpu.matmul %600, %14, %cst_285 {dimension_numbers = #tpu.dot_dimension_numbers<[1], [0], [0], [1], [0, 0, 1, 1], [], []>} : vector<1x32xf32>, vector<32x64xf32>, vector<1x64xf32> -> vector<1x64xf32>
    %626 = arith.addf %625, %15 : vector<1x64xf32>
    %cst_286 = arith.constant 0.000000e+00 : f32
    %627 = vector.broadcast %cst_286 : f32 to vector<1x64xf32>
    %628 = arith.maximumf %626, %627 : vector<1x64xf32>
    %cst_287 = arith.constant dense<0.000000e+00> : vector<1x5xf32>
    %629 = tpu.matmul %628, %16, %cst_287 {dimension_numbers = #tpu.dot_dimension_numbers<[1], [0], [0], [1], [0, 0, 1, 1], [], []>} : vector<1x64xf32>, vector<64x5xf32>, vector<1x5xf32> -> vector<1x5xf32>
    %630 = arith.addf %629, %17 : vector<1x5xf32>
    %cst_288 = arith.constant dense<0xFF800000> : vector<1xf32>
    %631 = vector.multi_reduction <maximumf>, %630, %cst_288 [1] : vector<1x5xf32> to vector<1xf32>
    %632 = vector.shape_cast %631 : vector<1xf32> to vector<1x1xf32>
    %633 = vector.broadcast %632 : vector<1x1xf32> to vector<1x5xf32>
    %634 = arith.subf %630, %633 : vector<1x5xf32>
    %635 = math.exp %634 : vector<1x5xf32>
    %cst_289 = arith.constant dense<0.000000e+00> : vector<1xf32>
    %636 = vector.multi_reduction <add>, %635, %cst_289 [1] : vector<1x5xf32> to vector<1xf32>
    %637 = vector.shape_cast %636 : vector<1xf32> to vector<1x1xf32>
    %638 = math.log %637 : vector<1x1xf32>
    %639 = vector.broadcast %638 : vector<1x1xf32> to vector<1x5xf32>
    %640 = arith.subf %634, %639 : vector<1x5xf32>
    %641 = arith.mulf %640, %622 : vector<1x5xf32>
    %642 = vector.shape_cast %641 : vector<1x5xf32> to vector<1x1x5xf32>
    %cst_290 = arith.constant dense<0.000000e+00> : vector<1xf32>
    %643 = vector.multi_reduction <add>, %642, %cst_290 [1, 2] : vector<1x1x5xf32> to vector<1xf32>
    %644 = vector.shape_cast %643 : vector<1xf32> to vector<1x1x1xf32>
    %645 = vector.extract %644[0, 0, 0] : f32 from vector<1x1x1xf32>
    %646 = vector.broadcast %645 : f32 to vector<1x1xf32>
    %647 = arith.addf %567, %646 : vector<1x1xf32>
    %cst_291 = arith.constant dense<0.000000e+00> : vector<1x96xf32>
    %648 = tpu.matmul %622, %4, %cst_291 {dimension_numbers = #tpu.dot_dimension_numbers<[1], [0], [0], [1], [0, 0, 1, 1], [], []>} : vector<1x5xf32>, vector<5x96xf32>, vector<1x96xf32> -> vector<1x96xf32>
    %649 = arith.addf %648, %6 : vector<1x96xf32>
    %650 = vector.extract_strided_slice %649 {offsets = [0, 0], sizes = [1, 32], strides = [1, 1]} : vector<1x96xf32> to vector<1x32xf32>
    %651 = vector.extract_strided_slice %7 {offsets = [0, 0], sizes = [1, 32], strides = [1, 1]} : vector<1x96xf32> to vector<1x32xf32>
    %652 = arith.addf %650, %651 : vector<1x32xf32>
    %653 = arith.negf %652 : vector<1x32xf32>
    %654 = math.exp %653 : vector<1x32xf32>
    %cst_292 = arith.constant 1.000000e+00 : f32
    %655 = vector.broadcast %cst_292 : f32 to vector<1x32xf32>
    %656 = arith.addf %655, %654 : vector<1x32xf32>
    %657 = arith.divf %655, %656 : vector<1x32xf32>
    %658 = vector.extract_strided_slice %649 {offsets = [0, 32], sizes = [1, 32], strides = [1, 1]} : vector<1x96xf32> to vector<1x32xf32>
    %659 = vector.extract_strided_slice %7 {offsets = [0, 32], sizes = [1, 32], strides = [1, 1]} : vector<1x96xf32> to vector<1x32xf32>
    %660 = arith.addf %658, %659 : vector<1x32xf32>
    %661 = arith.negf %660 : vector<1x32xf32>
    %662 = math.exp %661 : vector<1x32xf32>
    %cst_293 = arith.constant 1.000000e+00 : f32
    %663 = vector.broadcast %cst_293 : f32 to vector<1x32xf32>
    %664 = arith.addf %663, %662 : vector<1x32xf32>
    %665 = arith.divf %663, %664 : vector<1x32xf32>
    %666 = vector.extract_strided_slice %649 {offsets = [0, 64], sizes = [1, 32], strides = [1, 1]} : vector<1x96xf32> to vector<1x32xf32>
    %667 = vector.extract_strided_slice %7 {offsets = [0, 64], sizes = [1, 32], strides = [1, 1]} : vector<1x96xf32> to vector<1x32xf32>
    %668 = arith.mulf %657, %667 : vector<1x32xf32>
    %669 = arith.addf %666, %668 : vector<1x32xf32>
    %670 = math.tanh %669 : vector<1x32xf32>
    %cst_294 = arith.constant 1.000000e+00 : f32
    %671 = vector.broadcast %cst_294 : f32 to vector<1x32xf32>
    %672 = arith.subf %671, %665 : vector<1x32xf32>
    %673 = arith.mulf %672, %670 : vector<1x32xf32>
    %674 = arith.mulf %665, %28 : vector<1x32xf32>
    %675 = arith.addf %673, %674 : vector<1x32xf32>
    %c1_295 = arith.constant 1 : index
    %c0_296 = arith.constant 0 : index
    %c0_297 = arith.constant 0 : index
    %676 = vector.load %arg34[%c1_295, %c0_296, %c0_297] : memref<6x1x128xf32, #tpu.memory_space<vmem>>, vector<1x1x128xf32>
    %677 = vector.shape_cast %676 : vector<1x1x128xf32> to vector<1x128xf32>
    %cst_298 = arith.constant dense<0.000000e+00> : vector<1x128xf32>
    %678 = tpu.matmul %675, %19, %cst_298 {dimension_numbers = #tpu.dot_dimension_numbers<[1], [0], [0], [1], [0, 0, 1, 1], [], []>} : vector<1x32xf32>, vector<32x128xf32>, vector<1x128xf32> -> vector<1x128xf32>
    %679 = arith.addf %677, %678 : vector<1x128xf32>
    %680 = arith.addf %679, %20 : vector<1x128xf32>
    %cst_299 = arith.constant 0.000000e+00 : f32
    %681 = vector.broadcast %cst_299 : f32 to vector<1x128xf32>
    %682 = arith.maximumf %680, %681 : vector<1x128xf32>
    %683 = arith.mulf %682, %21 : vector<1x128xf32>
    %cst_300 = arith.constant dense<0.000000e+00> : vector<1xf32>
    %684 = vector.multi_reduction <add>, %683, %cst_300 [1] : vector<1x128xf32> to vector<1xf32>
    %685 = vector.shape_cast %684 : vector<1xf32> to vector<1x1xf32>
    %686 = arith.addf %685, %22 : vector<1x1xf32>
    %687 = math.absf %686 : vector<1x1xf32>
    %cst_301 = arith.constant 0.000000e+00 : f32
    %688 = vector.broadcast %cst_301 : f32 to vector<1x1xf32>
    %689 = arith.subf %688, %687 : vector<1x1xf32>
    %690 = math.exp %689 : vector<1x1xf32>
    %cst_302 = arith.constant 0.000000e+00 : f32
    %691 = vector.broadcast %cst_302 : f32 to vector<1x1xf32>
    %692 = arith.minimumf %686, %691 : vector<1x1xf32>
    %cst_303 = arith.constant 1.000000e+00 : f32
    %693 = vector.broadcast %cst_303 : f32 to vector<1x1xf32>
    %694 = arith.addf %693, %690 : vector<1x1xf32>
    %695 = math.log %694 : vector<1x1xf32>
    %696 = arith.subf %692, %695 : vector<1x1xf32>
    %cst_304 = arith.constant -1.000000e+02 : f32
    %697 = vector.broadcast %cst_304 : f32 to vector<1x1xf32>
    %698 = arith.maximumf %696, %697 : vector<1x1xf32>
    %cst_305 = arith.constant 0.000000e+00 : f32
    %699 = vector.broadcast %cst_305 : f32 to vector<1x1xf32>
    %700 = arith.subf %699, %686 : vector<1x1xf32>
    %cst_306 = arith.constant 0.000000e+00 : f32
    %701 = vector.broadcast %cst_306 : f32 to vector<1x1xf32>
    %702 = arith.minimumf %700, %701 : vector<1x1xf32>
    %cst_307 = arith.constant 1.000000e+00 : f32
    %703 = vector.broadcast %cst_307 : f32 to vector<1x1xf32>
    %704 = arith.addf %703, %690 : vector<1x1xf32>
    %705 = math.log %704 : vector<1x1xf32>
    %706 = arith.subf %702, %705 : vector<1x1xf32>
    %cst_308 = arith.constant -1.000000e+02 : f32
    %707 = vector.broadcast %cst_308 : f32 to vector<1x1xf32>
    %708 = arith.maximumf %706, %707 : vector<1x1xf32>
    %709 = vector.extract_strided_slice %624 {offsets = [0, 1], sizes = [1, 1], strides = [1, 1]} : vector<1x6xf32> to vector<1x1xf32>
    %710 = arith.mulf %709, %698 : vector<1x1xf32>
    %cst_309 = arith.constant 1.000000e+00 : f32
    %711 = vector.broadcast %cst_309 : f32 to vector<1x1xf32>
    %712 = arith.subf %711, %709 : vector<1x1xf32>
    %713 = arith.mulf %712, %708 : vector<1x1xf32>
    %714 = arith.addf %710, %713 : vector<1x1xf32>
    %715 = vector.shape_cast %714 : vector<1x1xf32> to vector<1x1x1xf32>
    %cst_310 = arith.constant dense<0.000000e+00> : vector<1xf32>
    %716 = vector.multi_reduction <add>, %715, %cst_310 [1, 2] : vector<1x1x1xf32> to vector<1xf32>
    %717 = vector.shape_cast %716 : vector<1xf32> to vector<1x1x1xf32>
    %718 = vector.extract %717[0, 0, 0] : f32 from vector<1x1x1xf32>
    %719 = vector.broadcast %718 : f32 to vector<1x1xf32>
    %720 = arith.addf %647, %719 : vector<1x1xf32>
    %c1_311 = arith.constant 1 : index
    %c0_312 = arith.constant 0 : index
    %c0_313 = arith.constant 0 : index
    %721 = vector.load %arg33[%c1_311, %c0_312, %c0_313] : memref<6x1x32xf32, #tpu.memory_space<vmem>>, vector<1x1x32xf32>
    %722 = vector.shape_cast %721 : vector<1x1x32xf32> to vector<1x32xf32>
    %723 = vector.broadcast %709 : vector<1x1xf32> to vector<1x32xf32>
    %724 = arith.mulf %723, %722 : vector<1x32xf32>
    %725 = arith.addf %28, %724 : vector<1x32xf32>
    %cst_314 = arith.constant dense<0.000000e+00> : vector<1x96xf32>
    %726 = tpu.matmul %725, %5, %cst_314 {dimension_numbers = #tpu.dot_dimension_numbers<[1], [0], [0], [1], [0, 0, 1, 1], [], []>} : vector<1x32xf32>, vector<32x96xf32>, vector<1x96xf32> -> vector<1x96xf32>
    %727 = arith.addf %726, %7 : vector<1x96xf32>
    %728 = vector.extract_strided_slice %649 {offsets = [0, 0], sizes = [1, 32], strides = [1, 1]} : vector<1x96xf32> to vector<1x32xf32>
    %729 = vector.extract_strided_slice %727 {offsets = [0, 0], sizes = [1, 32], strides = [1, 1]} : vector<1x96xf32> to vector<1x32xf32>
    %730 = arith.addf %728, %729 : vector<1x32xf32>
    %731 = arith.negf %730 : vector<1x32xf32>
    %732 = math.exp %731 : vector<1x32xf32>
    %cst_315 = arith.constant 1.000000e+00 : f32
    %733 = vector.broadcast %cst_315 : f32 to vector<1x32xf32>
    %734 = arith.addf %733, %732 : vector<1x32xf32>
    %735 = arith.divf %733, %734 : vector<1x32xf32>
    %736 = vector.extract_strided_slice %649 {offsets = [0, 32], sizes = [1, 32], strides = [1, 1]} : vector<1x96xf32> to vector<1x32xf32>
    %737 = vector.extract_strided_slice %727 {offsets = [0, 32], sizes = [1, 32], strides = [1, 1]} : vector<1x96xf32> to vector<1x32xf32>
    %738 = arith.addf %736, %737 : vector<1x32xf32>
    %739 = arith.negf %738 : vector<1x32xf32>
    %740 = math.exp %739 : vector<1x32xf32>
    %cst_316 = arith.constant 1.000000e+00 : f32
    %741 = vector.broadcast %cst_316 : f32 to vector<1x32xf32>
    %742 = arith.addf %741, %740 : vector<1x32xf32>
    %743 = arith.divf %741, %742 : vector<1x32xf32>
    %744 = vector.extract_strided_slice %649 {offsets = [0, 64], sizes = [1, 32], strides = [1, 1]} : vector<1x96xf32> to vector<1x32xf32>
    %745 = vector.extract_strided_slice %727 {offsets = [0, 64], sizes = [1, 32], strides = [1, 1]} : vector<1x96xf32> to vector<1x32xf32>
    %746 = arith.mulf %735, %745 : vector<1x32xf32>
    %747 = arith.addf %744, %746 : vector<1x32xf32>
    %748 = math.tanh %747 : vector<1x32xf32>
    %cst_317 = arith.constant 1.000000e+00 : f32
    %749 = vector.broadcast %cst_317 : f32 to vector<1x32xf32>
    %750 = arith.subf %749, %743 : vector<1x32xf32>
    %751 = arith.mulf %750, %748 : vector<1x32xf32>
    %752 = arith.mulf %743, %725 : vector<1x32xf32>
    %753 = arith.addf %751, %752 : vector<1x32xf32>
    %c0_318 = arith.constant 0 : index
    %c0_319 = arith.constant 0 : index
    %c0_320 = arith.constant 0 : index
    %754 = vector.load %arg34[%c0_318, %c0_319, %c0_320] : memref<6x1x128xf32, #tpu.memory_space<vmem>>, vector<1x1x128xf32>
    %755 = vector.shape_cast %754 : vector<1x1x128xf32> to vector<1x128xf32>
    %cst_321 = arith.constant dense<0.000000e+00> : vector<1x128xf32>
    %756 = tpu.matmul %753, %19, %cst_321 {dimension_numbers = #tpu.dot_dimension_numbers<[1], [0], [0], [1], [0, 0, 1, 1], [], []>} : vector<1x32xf32>, vector<32x128xf32>, vector<1x128xf32> -> vector<1x128xf32>
    %757 = arith.addf %755, %756 : vector<1x128xf32>
    %758 = arith.addf %757, %20 : vector<1x128xf32>
    %cst_322 = arith.constant 0.000000e+00 : f32
    %759 = vector.broadcast %cst_322 : f32 to vector<1x128xf32>
    %760 = arith.maximumf %758, %759 : vector<1x128xf32>
    %761 = arith.mulf %760, %21 : vector<1x128xf32>
    %cst_323 = arith.constant dense<0.000000e+00> : vector<1xf32>
    %762 = vector.multi_reduction <add>, %761, %cst_323 [1] : vector<1x128xf32> to vector<1xf32>
    %763 = vector.shape_cast %762 : vector<1xf32> to vector<1x1xf32>
    %764 = arith.addf %763, %22 : vector<1x1xf32>
    %765 = math.absf %764 : vector<1x1xf32>
    %cst_324 = arith.constant 0.000000e+00 : f32
    %766 = vector.broadcast %cst_324 : f32 to vector<1x1xf32>
    %767 = arith.subf %766, %765 : vector<1x1xf32>
    %768 = math.exp %767 : vector<1x1xf32>
    %cst_325 = arith.constant 0.000000e+00 : f32
    %769 = vector.broadcast %cst_325 : f32 to vector<1x1xf32>
    %770 = arith.minimumf %764, %769 : vector<1x1xf32>
    %cst_326 = arith.constant 1.000000e+00 : f32
    %771 = vector.broadcast %cst_326 : f32 to vector<1x1xf32>
    %772 = arith.addf %771, %768 : vector<1x1xf32>
    %773 = math.log %772 : vector<1x1xf32>
    %774 = arith.subf %770, %773 : vector<1x1xf32>
    %cst_327 = arith.constant -1.000000e+02 : f32
    %775 = vector.broadcast %cst_327 : f32 to vector<1x1xf32>
    %776 = arith.maximumf %774, %775 : vector<1x1xf32>
    %cst_328 = arith.constant 0.000000e+00 : f32
    %777 = vector.broadcast %cst_328 : f32 to vector<1x1xf32>
    %778 = arith.subf %777, %764 : vector<1x1xf32>
    %cst_329 = arith.constant 0.000000e+00 : f32
    %779 = vector.broadcast %cst_329 : f32 to vector<1x1xf32>
    %780 = arith.minimumf %778, %779 : vector<1x1xf32>
    %cst_330 = arith.constant 1.000000e+00 : f32
    %781 = vector.broadcast %cst_330 : f32 to vector<1x1xf32>
    %782 = arith.addf %781, %768 : vector<1x1xf32>
    %783 = math.log %782 : vector<1x1xf32>
    %784 = arith.subf %780, %783 : vector<1x1xf32>
    %cst_331 = arith.constant -1.000000e+02 : f32
    %785 = vector.broadcast %cst_331 : f32 to vector<1x1xf32>
    %786 = arith.maximumf %784, %785 : vector<1x1xf32>
    %787 = vector.extract_strided_slice %624 {offsets = [0, 0], sizes = [1, 1], strides = [1, 1]} : vector<1x6xf32> to vector<1x1xf32>
    %788 = arith.mulf %787, %776 : vector<1x1xf32>
    %cst_332 = arith.constant 1.000000e+00 : f32
    %789 = vector.broadcast %cst_332 : f32 to vector<1x1xf32>
    %790 = arith.subf %789, %787 : vector<1x1xf32>
    %791 = arith.mulf %790, %786 : vector<1x1xf32>
    %792 = arith.addf %788, %791 : vector<1x1xf32>
    %793 = vector.shape_cast %792 : vector<1x1xf32> to vector<1x1x1xf32>
    %cst_333 = arith.constant dense<0.000000e+00> : vector<1xf32>
    %794 = vector.multi_reduction <add>, %793, %cst_333 [1, 2] : vector<1x1x1xf32> to vector<1xf32>
    %795 = vector.shape_cast %794 : vector<1xf32> to vector<1x1x1xf32>
    %796 = vector.extract %795[0, 0, 0] : f32 from vector<1x1x1xf32>
    %797 = vector.broadcast %796 : f32 to vector<1x1xf32>
    %798 = arith.addf %720, %797 : vector<1x1xf32>
    %c0_334 = arith.constant 0 : index
    %c0_335 = arith.constant 0 : index
    %c0_336 = arith.constant 0 : index
    %799 = vector.load %arg33[%c0_334, %c0_335, %c0_336] : memref<6x1x32xf32, #tpu.memory_space<vmem>>, vector<1x1x32xf32>
    %800 = vector.shape_cast %799 : vector<1x1x32xf32> to vector<1x32xf32>
    %801 = vector.broadcast %787 : vector<1x1xf32> to vector<1x32xf32>
    %802 = arith.mulf %801, %800 : vector<1x32xf32>
    %803 = arith.addf %725, %802 : vector<1x32xf32>
    %cst_337 = arith.constant dense<0.000000e+00> : vector<1x96xf32>
    %804 = tpu.matmul %803, %5, %cst_337 {dimension_numbers = #tpu.dot_dimension_numbers<[1], [0], [0], [1], [0, 0, 1, 1], [], []>} : vector<1x32xf32>, vector<32x96xf32>, vector<1x96xf32> -> vector<1x96xf32>
    %805 = arith.addf %804, %7 : vector<1x96xf32>
    %806 = vector.extract_strided_slice %649 {offsets = [0, 0], sizes = [1, 32], strides = [1, 1]} : vector<1x96xf32> to vector<1x32xf32>
    %807 = vector.extract_strided_slice %805 {offsets = [0, 0], sizes = [1, 32], strides = [1, 1]} : vector<1x96xf32> to vector<1x32xf32>
    %808 = arith.addf %806, %807 : vector<1x32xf32>
    %809 = arith.negf %808 : vector<1x32xf32>
    %810 = math.exp %809 : vector<1x32xf32>
    %cst_338 = arith.constant 1.000000e+00 : f32
    %811 = vector.broadcast %cst_338 : f32 to vector<1x32xf32>
    %812 = arith.addf %811, %810 : vector<1x32xf32>
    %813 = arith.divf %811, %812 : vector<1x32xf32>
    %814 = vector.extract_strided_slice %649 {offsets = [0, 32], sizes = [1, 32], strides = [1, 1]} : vector<1x96xf32> to vector<1x32xf32>
    %815 = vector.extract_strided_slice %805 {offsets = [0, 32], sizes = [1, 32], strides = [1, 1]} : vector<1x96xf32> to vector<1x32xf32>
    %816 = arith.addf %814, %815 : vector<1x32xf32>
    %817 = arith.negf %816 : vector<1x32xf32>
    %818 = math.exp %817 : vector<1x32xf32>
    %cst_339 = arith.constant 1.000000e+00 : f32
    %819 = vector.broadcast %cst_339 : f32 to vector<1x32xf32>
    %820 = arith.addf %819, %818 : vector<1x32xf32>
    %821 = arith.divf %819, %820 : vector<1x32xf32>
    %822 = vector.extract_strided_slice %649 {offsets = [0, 64], sizes = [1, 32], strides = [1, 1]} : vector<1x96xf32> to vector<1x32xf32>
    %823 = vector.extract_strided_slice %805 {offsets = [0, 64], sizes = [1, 32], strides = [1, 1]} : vector<1x96xf32> to vector<1x32xf32>
    %824 = arith.mulf %813, %823 : vector<1x32xf32>
    %825 = arith.addf %822, %824 : vector<1x32xf32>
    %826 = math.tanh %825 : vector<1x32xf32>
    %cst_340 = arith.constant 1.000000e+00 : f32
    %827 = vector.broadcast %cst_340 : f32 to vector<1x32xf32>
    %828 = arith.subf %827, %821 : vector<1x32xf32>
    %829 = arith.mulf %828, %826 : vector<1x32xf32>
    %830 = arith.mulf %821, %803 : vector<1x32xf32>
    %831 = arith.addf %829, %830 : vector<1x32xf32>
    %cst_341 = arith.constant dense<0.000000e+00> : vector<1x32xf32>
    %832 = tpu.matmul %831, %23, %cst_341 {dimension_numbers = #tpu.dot_dimension_numbers<[1], [0], [0], [1], [0, 0, 1, 1], [], []>} : vector<1x32xf32>, vector<32x32xf32>, vector<1x32xf32> -> vector<1x32xf32>
    %833 = arith.addf %832, %24 : vector<1x32xf32>
    %834 = vector.extract_strided_slice %25 {offsets = [2, 0], sizes = [1, 32], strides = [1, 1]} : vector<6x32xf32> to vector<1x32xf32>
    %835 = arith.addf %833, %834 : vector<1x32xf32>
    %836 = arith.negf %835 : vector<1x32xf32>
    %837 = math.exp %836 : vector<1x32xf32>
    %cst_342 = arith.constant 1.000000e+00 : f32
    %838 = vector.broadcast %cst_342 : f32 to vector<1x32xf32>
    %839 = arith.addf %838, %837 : vector<1x32xf32>
    %840 = arith.divf %838, %839 : vector<1x32xf32>
    %cst_343 = arith.constant dense<0.000000e+00> : vector<1x32xf32>
    %841 = tpu.matmul %831, %26, %cst_343 {dimension_numbers = #tpu.dot_dimension_numbers<[1], [0], [0], [1], [0, 0, 1, 1], [], []>} : vector<1x32xf32>, vector<32x32xf32>, vector<1x32xf32> -> vector<1x32xf32>
    %842 = vector.extract_strided_slice %27 {offsets = [2, 0], sizes = [1, 32], strides = [1, 1]} : vector<6x32xf32> to vector<1x32xf32>
    %843 = arith.addf %841, %842 : vector<1x32xf32>
    %844 = arith.mulf %840, %843 : vector<1x32xf32>
    %c2_344 = arith.constant 2 : index
    %c0_345 = arith.constant 0 : index
    %c0_346 = arith.constant 0 : index
    %845 = vector.load %arg33[%c2_344, %c0_345, %c0_346] : memref<6x1x32xf32, #tpu.memory_space<vmem>>, vector<1x1x32xf32>
    %846 = vector.shape_cast %845 : vector<1x1x32xf32> to vector<1x32xf32>
    %847 = vector.shape_cast %844 : vector<1x32xf32> to vector<1x1x32xf32>
    tpu.vector_store %arg33[%c2_344, %c0_345, %c0_346], %847 {strides = array<i32>} : memref<6x1x32xf32, #tpu.memory_space<vmem>>, vector<1x1x32xf32>,
    %cst_347 = arith.constant dense<0.000000e+00> : vector<1x128xf32>
    %848 = tpu.matmul %831, %18, %cst_347 {dimension_numbers = #tpu.dot_dimension_numbers<[1], [0], [0], [1], [0, 0, 1, 1], [], []>} : vector<1x32xf32>, vector<32x128xf32>, vector<1x128xf32> -> vector<1x128xf32>
    %c2_348 = arith.constant 2 : index
    %c0_349 = arith.constant 0 : index
    %c0_350 = arith.constant 0 : index
    %849 = vector.load %arg34[%c2_348, %c0_349, %c0_350] : memref<6x1x128xf32, #tpu.memory_space<vmem>>, vector<1x1x128xf32>
    %850 = vector.shape_cast %849 : vector<1x1x128xf32> to vector<1x128xf32>
    %851 = vector.shape_cast %848 : vector<1x128xf32> to vector<1x1x128xf32>
    tpu.vector_store %arg34[%c2_348, %c0_349, %c0_350], %851 {strides = array<i32>} : memref<6x1x128xf32, #tpu.memory_space<vmem>>, vector<1x1x128xf32>,
    %c3_351 = arith.constant 3 : index
    %c0_352 = arith.constant 0 : index
    %c0_353 = arith.constant 0 : index
    %c0_354 = arith.constant 0 : index
    %852 = vector.load %arg1[%c3_351, %c0_352, %c0_353, %c0_354] : memref<6x1x1x5xf32, #tpu.memory_space<vmem>>, vector<1x1x1x5xf32>
    %853 = vector.shape_cast %852 : vector<1x1x1x5xf32> to vector<1x5xf32>
    %c3_355 = arith.constant 3 : index
    %c0_356 = arith.constant 0 : index
    %c0_357 = arith.constant 0 : index
    %c0_358 = arith.constant 0 : index
    %854 = vector.load %arg2[%c3_355, %c0_356, %c0_357, %c0_358] : memref<6x1x1x6xf32, #tpu.memory_space<vmem>>, vector<1x1x1x6xf32>
    %855 = vector.shape_cast %854 : vector<1x1x1x6xf32> to vector<1x6xf32>
    %cst_359 = arith.constant dense<0.000000e+00> : vector<1x64xf32>
    %856 = tpu.matmul %831, %14, %cst_359 {dimension_numbers = #tpu.dot_dimension_numbers<[1], [0], [0], [1], [0, 0, 1, 1], [], []>} : vector<1x32xf32>, vector<32x64xf32>, vector<1x64xf32> -> vector<1x64xf32>
    %857 = arith.addf %856, %15 : vector<1x64xf32>
    %cst_360 = arith.constant 0.000000e+00 : f32
    %858 = vector.broadcast %cst_360 : f32 to vector<1x64xf32>
    %859 = arith.maximumf %857, %858 : vector<1x64xf32>
    %cst_361 = arith.constant dense<0.000000e+00> : vector<1x5xf32>
    %860 = tpu.matmul %859, %16, %cst_361 {dimension_numbers = #tpu.dot_dimension_numbers<[1], [0], [0], [1], [0, 0, 1, 1], [], []>} : vector<1x64xf32>, vector<64x5xf32>, vector<1x5xf32> -> vector<1x5xf32>
    %861 = arith.addf %860, %17 : vector<1x5xf32>
    %cst_362 = arith.constant dense<0xFF800000> : vector<1xf32>
    %862 = vector.multi_reduction <maximumf>, %861, %cst_362 [1] : vector<1x5xf32> to vector<1xf32>
    %863 = vector.shape_cast %862 : vector<1xf32> to vector<1x1xf32>
    %864 = vector.broadcast %863 : vector<1x1xf32> to vector<1x5xf32>
    %865 = arith.subf %861, %864 : vector<1x5xf32>
    %866 = math.exp %865 : vector<1x5xf32>
    %cst_363 = arith.constant dense<0.000000e+00> : vector<1xf32>
    %867 = vector.multi_reduction <add>, %866, %cst_363 [1] : vector<1x5xf32> to vector<1xf32>
    %868 = vector.shape_cast %867 : vector<1xf32> to vector<1x1xf32>
    %869 = math.log %868 : vector<1x1xf32>
    %870 = vector.broadcast %869 : vector<1x1xf32> to vector<1x5xf32>
    %871 = arith.subf %865, %870 : vector<1x5xf32>
    %872 = arith.mulf %871, %853 : vector<1x5xf32>
    %873 = vector.shape_cast %872 : vector<1x5xf32> to vector<1x1x5xf32>
    %cst_364 = arith.constant dense<0.000000e+00> : vector<1xf32>
    %874 = vector.multi_reduction <add>, %873, %cst_364 [1, 2] : vector<1x1x5xf32> to vector<1xf32>
    %875 = vector.shape_cast %874 : vector<1xf32> to vector<1x1x1xf32>
    %876 = vector.extract %875[0, 0, 0] : f32 from vector<1x1x1xf32>
    %877 = vector.broadcast %876 : f32 to vector<1x1xf32>
    %878 = arith.addf %798, %877 : vector<1x1xf32>
    %cst_365 = arith.constant dense<0.000000e+00> : vector<1x96xf32>
    %879 = tpu.matmul %853, %4, %cst_365 {dimension_numbers = #tpu.dot_dimension_numbers<[1], [0], [0], [1], [0, 0, 1, 1], [], []>} : vector<1x5xf32>, vector<5x96xf32>, vector<1x96xf32> -> vector<1x96xf32>
    %880 = arith.addf %879, %6 : vector<1x96xf32>
    %881 = vector.extract_strided_slice %880 {offsets = [0, 0], sizes = [1, 32], strides = [1, 1]} : vector<1x96xf32> to vector<1x32xf32>
    %882 = vector.extract_strided_slice %7 {offsets = [0, 0], sizes = [1, 32], strides = [1, 1]} : vector<1x96xf32> to vector<1x32xf32>
    %883 = arith.addf %881, %882 : vector<1x32xf32>
    %884 = arith.negf %883 : vector<1x32xf32>
    %885 = math.exp %884 : vector<1x32xf32>
    %cst_366 = arith.constant 1.000000e+00 : f32
    %886 = vector.broadcast %cst_366 : f32 to vector<1x32xf32>
    %887 = arith.addf %886, %885 : vector<1x32xf32>
    %888 = arith.divf %886, %887 : vector<1x32xf32>
    %889 = vector.extract_strided_slice %880 {offsets = [0, 32], sizes = [1, 32], strides = [1, 1]} : vector<1x96xf32> to vector<1x32xf32>
    %890 = vector.extract_strided_slice %7 {offsets = [0, 32], sizes = [1, 32], strides = [1, 1]} : vector<1x96xf32> to vector<1x32xf32>
    %891 = arith.addf %889, %890 : vector<1x32xf32>
    %892 = arith.negf %891 : vector<1x32xf32>
    %893 = math.exp %892 : vector<1x32xf32>
    %cst_367 = arith.constant 1.000000e+00 : f32
    %894 = vector.broadcast %cst_367 : f32 to vector<1x32xf32>
    %895 = arith.addf %894, %893 : vector<1x32xf32>
    %896 = arith.divf %894, %895 : vector<1x32xf32>
    %897 = vector.extract_strided_slice %880 {offsets = [0, 64], sizes = [1, 32], strides = [1, 1]} : vector<1x96xf32> to vector<1x32xf32>
    %898 = vector.extract_strided_slice %7 {offsets = [0, 64], sizes = [1, 32], strides = [1, 1]} : vector<1x96xf32> to vector<1x32xf32>
    %899 = arith.mulf %888, %898 : vector<1x32xf32>
    %900 = arith.addf %897, %899 : vector<1x32xf32>
    %901 = math.tanh %900 : vector<1x32xf32>
    %cst_368 = arith.constant 1.000000e+00 : f32
    %902 = vector.broadcast %cst_368 : f32 to vector<1x32xf32>
    %903 = arith.subf %902, %896 : vector<1x32xf32>
    %904 = arith.mulf %903, %901 : vector<1x32xf32>
    %905 = arith.mulf %896, %28 : vector<1x32xf32>
    %906 = arith.addf %904, %905 : vector<1x32xf32>
    %c2_369 = arith.constant 2 : index
    %c0_370 = arith.constant 0 : index
    %c0_371 = arith.constant 0 : index
    %907 = vector.load %arg34[%c2_369, %c0_370, %c0_371] : memref<6x1x128xf32, #tpu.memory_space<vmem>>, vector<1x1x128xf32>
    %908 = vector.shape_cast %907 : vector<1x1x128xf32> to vector<1x128xf32>
    %cst_372 = arith.constant dense<0.000000e+00> : vector<1x128xf32>
    %909 = tpu.matmul %906, %19, %cst_372 {dimension_numbers = #tpu.dot_dimension_numbers<[1], [0], [0], [1], [0, 0, 1, 1], [], []>} : vector<1x32xf32>, vector<32x128xf32>, vector<1x128xf32> -> vector<1x128xf32>
    %910 = arith.addf %908, %909 : vector<1x128xf32>
    %911 = arith.addf %910, %20 : vector<1x128xf32>
    %cst_373 = arith.constant 0.000000e+00 : f32
    %912 = vector.broadcast %cst_373 : f32 to vector<1x128xf32>
    %913 = arith.maximumf %911, %912 : vector<1x128xf32>
    %914 = arith.mulf %913, %21 : vector<1x128xf32>
    %cst_374 = arith.constant dense<0.000000e+00> : vector<1xf32>
    %915 = vector.multi_reduction <add>, %914, %cst_374 [1] : vector<1x128xf32> to vector<1xf32>
    %916 = vector.shape_cast %915 : vector<1xf32> to vector<1x1xf32>
    %917 = arith.addf %916, %22 : vector<1x1xf32>
    %918 = math.absf %917 : vector<1x1xf32>
    %cst_375 = arith.constant 0.000000e+00 : f32
    %919 = vector.broadcast %cst_375 : f32 to vector<1x1xf32>
    %920 = arith.subf %919, %918 : vector<1x1xf32>
    %921 = math.exp %920 : vector<1x1xf32>
    %cst_376 = arith.constant 0.000000e+00 : f32
    %922 = vector.broadcast %cst_376 : f32 to vector<1x1xf32>
    %923 = arith.minimumf %917, %922 : vector<1x1xf32>
    %cst_377 = arith.constant 1.000000e+00 : f32
    %924 = vector.broadcast %cst_377 : f32 to vector<1x1xf32>
    %925 = arith.addf %924, %921 : vector<1x1xf32>
    %926 = math.log %925 : vector<1x1xf32>
    %927 = arith.subf %923, %926 : vector<1x1xf32>
    %cst_378 = arith.constant -1.000000e+02 : f32
    %928 = vector.broadcast %cst_378 : f32 to vector<1x1xf32>
    %929 = arith.maximumf %927, %928 : vector<1x1xf32>
    %cst_379 = arith.constant 0.000000e+00 : f32
    %930 = vector.broadcast %cst_379 : f32 to vector<1x1xf32>
    %931 = arith.subf %930, %917 : vector<1x1xf32>
    %cst_380 = arith.constant 0.000000e+00 : f32
    %932 = vector.broadcast %cst_380 : f32 to vector<1x1xf32>
    %933 = arith.minimumf %931, %932 : vector<1x1xf32>
    %cst_381 = arith.constant 1.000000e+00 : f32
    %934 = vector.broadcast %cst_381 : f32 to vector<1x1xf32>
    %935 = arith.addf %934, %921 : vector<1x1xf32>
    %936 = math.log %935 : vector<1x1xf32>
    %937 = arith.subf %933, %936 : vector<1x1xf32>
    %cst_382 = arith.constant -1.000000e+02 : f32
    %938 = vector.broadcast %cst_382 : f32 to vector<1x1xf32>
    %939 = arith.maximumf %937, %938 : vector<1x1xf32>
    %940 = vector.extract_strided_slice %855 {offsets = [0, 2], sizes = [1, 1], strides = [1, 1]} : vector<1x6xf32> to vector<1x1xf32>
    %941 = arith.mulf %940, %929 : vector<1x1xf32>
    %cst_383 = arith.constant 1.000000e+00 : f32
    %942 = vector.broadcast %cst_383 : f32 to vector<1x1xf32>
    %943 = arith.subf %942, %940 : vector<1x1xf32>
    %944 = arith.mulf %943, %939 : vector<1x1xf32>
    %945 = arith.addf %941, %944 : vector<1x1xf32>
    %946 = vector.shape_cast %945 : vector<1x1xf32> to vector<1x1x1xf32>
    %cst_384 = arith.constant dense<0.000000e+00> : vector<1xf32>
    %947 = vector.multi_reduction <add>, %946, %cst_384 [1, 2] : vector<1x1x1xf32> to vector<1xf32>
    %948 = vector.shape_cast %947 : vector<1xf32> to vector<1x1x1xf32>
    %949 = vector.extract %948[0, 0, 0] : f32 from vector<1x1x1xf32>
    %950 = vector.broadcast %949 : f32 to vector<1x1xf32>
    %951 = arith.addf %878, %950 : vector<1x1xf32>
    %c2_385 = arith.constant 2 : index
    %c0_386 = arith.constant 0 : index
    %c0_387 = arith.constant 0 : index
    %952 = vector.load %arg33[%c2_385, %c0_386, %c0_387] : memref<6x1x32xf32, #tpu.memory_space<vmem>>, vector<1x1x32xf32>
    %953 = vector.shape_cast %952 : vector<1x1x32xf32> to vector<1x32xf32>
    %954 = vector.broadcast %940 : vector<1x1xf32> to vector<1x32xf32>
    %955 = arith.mulf %954, %953 : vector<1x32xf32>
    %956 = arith.addf %28, %955 : vector<1x32xf32>
    %cst_388 = arith.constant dense<0.000000e+00> : vector<1x96xf32>
    %957 = tpu.matmul %956, %5, %cst_388 {dimension_numbers = #tpu.dot_dimension_numbers<[1], [0], [0], [1], [0, 0, 1, 1], [], []>} : vector<1x32xf32>, vector<32x96xf32>, vector<1x96xf32> -> vector<1x96xf32>
    %958 = arith.addf %957, %7 : vector<1x96xf32>
    %959 = vector.extract_strided_slice %880 {offsets = [0, 0], sizes = [1, 32], strides = [1, 1]} : vector<1x96xf32> to vector<1x32xf32>
    %960 = vector.extract_strided_slice %958 {offsets = [0, 0], sizes = [1, 32], strides = [1, 1]} : vector<1x96xf32> to vector<1x32xf32>
    %961 = arith.addf %959, %960 : vector<1x32xf32>
    %962 = arith.negf %961 : vector<1x32xf32>
    %963 = math.exp %962 : vector<1x32xf32>
    %cst_389 = arith.constant 1.000000e+00 : f32
    %964 = vector.broadcast %cst_389 : f32 to vector<1x32xf32>
    %965 = arith.addf %964, %963 : vector<1x32xf32>
    %966 = arith.divf %964, %965 : vector<1x32xf32>
    %967 = vector.extract_strided_slice %880 {offsets = [0, 32], sizes = [1, 32], strides = [1, 1]} : vector<1x96xf32> to vector<1x32xf32>
    %968 = vector.extract_strided_slice %958 {offsets = [0, 32], sizes = [1, 32], strides = [1, 1]} : vector<1x96xf32> to vector<1x32xf32>
    %969 = arith.addf %967, %968 : vector<1x32xf32>
    %970 = arith.negf %969 : vector<1x32xf32>
    %971 = math.exp %970 : vector<1x32xf32>
    %cst_390 = arith.constant 1.000000e+00 : f32
    %972 = vector.broadcast %cst_390 : f32 to vector<1x32xf32>
    %973 = arith.addf %972, %971 : vector<1x32xf32>
    %974 = arith.divf %972, %973 : vector<1x32xf32>
    %975 = vector.extract_strided_slice %880 {offsets = [0, 64], sizes = [1, 32], strides = [1, 1]} : vector<1x96xf32> to vector<1x32xf32>
    %976 = vector.extract_strided_slice %958 {offsets = [0, 64], sizes = [1, 32], strides = [1, 1]} : vector<1x96xf32> to vector<1x32xf32>
    %977 = arith.mulf %966, %976 : vector<1x32xf32>
    %978 = arith.addf %975, %977 : vector<1x32xf32>
    %979 = math.tanh %978 : vector<1x32xf32>
    %cst_391 = arith.constant 1.000000e+00 : f32
    %980 = vector.broadcast %cst_391 : f32 to vector<1x32xf32>
    %981 = arith.subf %980, %974 : vector<1x32xf32>
    %982 = arith.mulf %981, %979 : vector<1x32xf32>
    %983 = arith.mulf %974, %956 : vector<1x32xf32>
    %984 = arith.addf %982, %983 : vector<1x32xf32>
    %c1_392 = arith.constant 1 : index
    %c0_393 = arith.constant 0 : index
    %c0_394 = arith.constant 0 : index
    %985 = vector.load %arg34[%c1_392, %c0_393, %c0_394] : memref<6x1x128xf32, #tpu.memory_space<vmem>>, vector<1x1x128xf32>
    %986 = vector.shape_cast %985 : vector<1x1x128xf32> to vector<1x128xf32>
    %cst_395 = arith.constant dense<0.000000e+00> : vector<1x128xf32>
    %987 = tpu.matmul %984, %19, %cst_395 {dimension_numbers = #tpu.dot_dimension_numbers<[1], [0], [0], [1], [0, 0, 1, 1], [], []>} : vector<1x32xf32>, vector<32x128xf32>, vector<1x128xf32> -> vector<1x128xf32>
    %988 = arith.addf %986, %987 : vector<1x128xf32>
    %989 = arith.addf %988, %20 : vector<1x128xf32>
    %cst_396 = arith.constant 0.000000e+00 : f32
    %990 = vector.broadcast %cst_396 : f32 to vector<1x128xf32>
    %991 = arith.maximumf %989, %990 : vector<1x128xf32>
    %992 = arith.mulf %991, %21 : vector<1x128xf32>
    %cst_397 = arith.constant dense<0.000000e+00> : vector<1xf32>
    %993 = vector.multi_reduction <add>, %992, %cst_397 [1] : vector<1x128xf32> to vector<1xf32>
    %994 = vector.shape_cast %993 : vector<1xf32> to vector<1x1xf32>
    %995 = arith.addf %994, %22 : vector<1x1xf32>
    %996 = math.absf %995 : vector<1x1xf32>
    %cst_398 = arith.constant 0.000000e+00 : f32
    %997 = vector.broadcast %cst_398 : f32 to vector<1x1xf32>
    %998 = arith.subf %997, %996 : vector<1x1xf32>
    %999 = math.exp %998 : vector<1x1xf32>
    %cst_399 = arith.constant 0.000000e+00 : f32
    %1000 = vector.broadcast %cst_399 : f32 to vector<1x1xf32>
    %1001 = arith.minimumf %995, %1000 : vector<1x1xf32>
    %cst_400 = arith.constant 1.000000e+00 : f32
    %1002 = vector.broadcast %cst_400 : f32 to vector<1x1xf32>
    %1003 = arith.addf %1002, %999 : vector<1x1xf32>
    %1004 = math.log %1003 : vector<1x1xf32>
    %1005 = arith.subf %1001, %1004 : vector<1x1xf32>
    %cst_401 = arith.constant -1.000000e+02 : f32
    %1006 = vector.broadcast %cst_401 : f32 to vector<1x1xf32>
    %1007 = arith.maximumf %1005, %1006 : vector<1x1xf32>
    %cst_402 = arith.constant 0.000000e+00 : f32
    %1008 = vector.broadcast %cst_402 : f32 to vector<1x1xf32>
    %1009 = arith.subf %1008, %995 : vector<1x1xf32>
    %cst_403 = arith.constant 0.000000e+00 : f32
    %1010 = vector.broadcast %cst_403 : f32 to vector<1x1xf32>
    %1011 = arith.minimumf %1009, %1010 : vector<1x1xf32>
    %cst_404 = arith.constant 1.000000e+00 : f32
    %1012 = vector.broadcast %cst_404 : f32 to vector<1x1xf32>
    %1013 = arith.addf %1012, %999 : vector<1x1xf32>
    %1014 = math.log %1013 : vector<1x1xf32>
    %1015 = arith.subf %1011, %1014 : vector<1x1xf32>
    %cst_405 = arith.constant -1.000000e+02 : f32
    %1016 = vector.broadcast %cst_405 : f32 to vector<1x1xf32>
    %1017 = arith.maximumf %1015, %1016 : vector<1x1xf32>
    %1018 = vector.extract_strided_slice %855 {offsets = [0, 1], sizes = [1, 1], strides = [1, 1]} : vector<1x6xf32> to vector<1x1xf32>
    %1019 = arith.mulf %1018, %1007 : vector<1x1xf32>
    %cst_406 = arith.constant 1.000000e+00 : f32
    %1020 = vector.broadcast %cst_406 : f32 to vector<1x1xf32>
    %1021 = arith.subf %1020, %1018 : vector<1x1xf32>
    %1022 = arith.mulf %1021, %1017 : vector<1x1xf32>
    %1023 = arith.addf %1019, %1022 : vector<1x1xf32>
    %1024 = vector.shape_cast %1023 : vector<1x1xf32> to vector<1x1x1xf32>
    %cst_407 = arith.constant dense<0.000000e+00> : vector<1xf32>
    %1025 = vector.multi_reduction <add>, %1024, %cst_407 [1, 2] : vector<1x1x1xf32> to vector<1xf32>
    %1026 = vector.shape_cast %1025 : vector<1xf32> to vector<1x1x1xf32>
    %1027 = vector.extract %1026[0, 0, 0] : f32 from vector<1x1x1xf32>
    %1028 = vector.broadcast %1027 : f32 to vector<1x1xf32>
    %1029 = arith.addf %951, %1028 : vector<1x1xf32>
    %c1_408 = arith.constant 1 : index
    %c0_409 = arith.constant 0 : index
    %c0_410 = arith.constant 0 : index
    %1030 = vector.load %arg33[%c1_408, %c0_409, %c0_410] : memref<6x1x32xf32, #tpu.memory_space<vmem>>, vector<1x1x32xf32>
    %1031 = vector.shape_cast %1030 : vector<1x1x32xf32> to vector<1x32xf32>
    %1032 = vector.broadcast %1018 : vector<1x1xf32> to vector<1x32xf32>
    %1033 = arith.mulf %1032, %1031 : vector<1x32xf32>
    %1034 = arith.addf %956, %1033 : vector<1x32xf32>
    %cst_411 = arith.constant dense<0.000000e+00> : vector<1x96xf32>
    %1035 = tpu.matmul %1034, %5, %cst_411 {dimension_numbers = #tpu.dot_dimension_numbers<[1], [0], [0], [1], [0, 0, 1, 1], [], []>} : vector<1x32xf32>, vector<32x96xf32>, vector<1x96xf32> -> vector<1x96xf32>
    %1036 = arith.addf %1035, %7 : vector<1x96xf32>
    %1037 = vector.extract_strided_slice %880 {offsets = [0, 0], sizes = [1, 32], strides = [1, 1]} : vector<1x96xf32> to vector<1x32xf32>
    %1038 = vector.extract_strided_slice %1036 {offsets = [0, 0], sizes = [1, 32], strides = [1, 1]} : vector<1x96xf32> to vector<1x32xf32>
    %1039 = arith.addf %1037, %1038 : vector<1x32xf32>
    %1040 = arith.negf %1039 : vector<1x32xf32>
    %1041 = math.exp %1040 : vector<1x32xf32>
    %cst_412 = arith.constant 1.000000e+00 : f32
    %1042 = vector.broadcast %cst_412 : f32 to vector<1x32xf32>
    %1043 = arith.addf %1042, %1041 : vector<1x32xf32>
    %1044 = arith.divf %1042, %1043 : vector<1x32xf32>
    %1045 = vector.extract_strided_slice %880 {offsets = [0, 32], sizes = [1, 32], strides = [1, 1]} : vector<1x96xf32> to vector<1x32xf32>
    %1046 = vector.extract_strided_slice %1036 {offsets = [0, 32], sizes = [1, 32], strides = [1, 1]} : vector<1x96xf32> to vector<1x32xf32>
    %1047 = arith.addf %1045, %1046 : vector<1x32xf32>
    %1048 = arith.negf %1047 : vector<1x32xf32>
    %1049 = math.exp %1048 : vector<1x32xf32>
    %cst_413 = arith.constant 1.000000e+00 : f32
    %1050 = vector.broadcast %cst_413 : f32 to vector<1x32xf32>
    %1051 = arith.addf %1050, %1049 : vector<1x32xf32>
    %1052 = arith.divf %1050, %1051 : vector<1x32xf32>
    %1053 = vector.extract_strided_slice %880 {offsets = [0, 64], sizes = [1, 32], strides = [1, 1]} : vector<1x96xf32> to vector<1x32xf32>
    %1054 = vector.extract_strided_slice %1036 {offsets = [0, 64], sizes = [1, 32], strides = [1, 1]} : vector<1x96xf32> to vector<1x32xf32>
    %1055 = arith.mulf %1044, %1054 : vector<1x32xf32>
    %1056 = arith.addf %1053, %1055 : vector<1x32xf32>
    %1057 = math.tanh %1056 : vector<1x32xf32>
    %cst_414 = arith.constant 1.000000e+00 : f32
    %1058 = vector.broadcast %cst_414 : f32 to vector<1x32xf32>
    %1059 = arith.subf %1058, %1052 : vector<1x32xf32>
    %1060 = arith.mulf %1059, %1057 : vector<1x32xf32>
    %1061 = arith.mulf %1052, %1034 : vector<1x32xf32>
    %1062 = arith.addf %1060, %1061 : vector<1x32xf32>
    %c0_415 = arith.constant 0 : index
    %c0_416 = arith.constant 0 : index
    %c0_417 = arith.constant 0 : index
    %1063 = vector.load %arg34[%c0_415, %c0_416, %c0_417] : memref<6x1x128xf32, #tpu.memory_space<vmem>>, vector<1x1x128xf32>
    %1064 = vector.shape_cast %1063 : vector<1x1x128xf32> to vector<1x128xf32>
    %cst_418 = arith.constant dense<0.000000e+00> : vector<1x128xf32>
    %1065 = tpu.matmul %1062, %19, %cst_418 {dimension_numbers = #tpu.dot_dimension_numbers<[1], [0], [0], [1], [0, 0, 1, 1], [], []>} : vector<1x32xf32>, vector<32x128xf32>, vector<1x128xf32> -> vector<1x128xf32>
    %1066 = arith.addf %1064, %1065 : vector<1x128xf32>
    %1067 = arith.addf %1066, %20 : vector<1x128xf32>
    %cst_419 = arith.constant 0.000000e+00 : f32
    %1068 = vector.broadcast %cst_419 : f32 to vector<1x128xf32>
    %1069 = arith.maximumf %1067, %1068 : vector<1x128xf32>
    %1070 = arith.mulf %1069, %21 : vector<1x128xf32>
    %cst_420 = arith.constant dense<0.000000e+00> : vector<1xf32>
    %1071 = vector.multi_reduction <add>, %1070, %cst_420 [1] : vector<1x128xf32> to vector<1xf32>
    %1072 = vector.shape_cast %1071 : vector<1xf32> to vector<1x1xf32>
    %1073 = arith.addf %1072, %22 : vector<1x1xf32>
    %1074 = math.absf %1073 : vector<1x1xf32>
    %cst_421 = arith.constant 0.000000e+00 : f32
    %1075 = vector.broadcast %cst_421 : f32 to vector<1x1xf32>
    %1076 = arith.subf %1075, %1074 : vector<1x1xf32>
    %1077 = math.exp %1076 : vector<1x1xf32>
    %cst_422 = arith.constant 0.000000e+00 : f32
    %1078 = vector.broadcast %cst_422 : f32 to vector<1x1xf32>
    %1079 = arith.minimumf %1073, %1078 : vector<1x1xf32>
    %cst_423 = arith.constant 1.000000e+00 : f32
    %1080 = vector.broadcast %cst_423 : f32 to vector<1x1xf32>
    %1081 = arith.addf %1080, %1077 : vector<1x1xf32>
    %1082 = math.log %1081 : vector<1x1xf32>
    %1083 = arith.subf %1079, %1082 : vector<1x1xf32>
    %cst_424 = arith.constant -1.000000e+02 : f32
    %1084 = vector.broadcast %cst_424 : f32 to vector<1x1xf32>
    %1085 = arith.maximumf %1083, %1084 : vector<1x1xf32>
    %cst_425 = arith.constant 0.000000e+00 : f32
    %1086 = vector.broadcast %cst_425 : f32 to vector<1x1xf32>
    %1087 = arith.subf %1086, %1073 : vector<1x1xf32>
    %cst_426 = arith.constant 0.000000e+00 : f32
    %1088 = vector.broadcast %cst_426 : f32 to vector<1x1xf32>
    %1089 = arith.minimumf %1087, %1088 : vector<1x1xf32>
    %cst_427 = arith.constant 1.000000e+00 : f32
    %1090 = vector.broadcast %cst_427 : f32 to vector<1x1xf32>
    %1091 = arith.addf %1090, %1077 : vector<1x1xf32>
    %1092 = math.log %1091 : vector<1x1xf32>
    %1093 = arith.subf %1089, %1092 : vector<1x1xf32>
    %cst_428 = arith.constant -1.000000e+02 : f32
    %1094 = vector.broadcast %cst_428 : f32 to vector<1x1xf32>
    %1095 = arith.maximumf %1093, %1094 : vector<1x1xf32>
    %1096 = vector.extract_strided_slice %855 {offsets = [0, 0], sizes = [1, 1], strides = [1, 1]} : vector<1x6xf32> to vector<1x1xf32>
    %1097 = arith.mulf %1096, %1085 : vector<1x1xf32>
    %cst_429 = arith.constant 1.000000e+00 : f32
    %1098 = vector.broadcast %cst_429 : f32 to vector<1x1xf32>
    %1099 = arith.subf %1098, %1096 : vector<1x1xf32>
    %1100 = arith.mulf %1099, %1095 : vector<1x1xf32>
    %1101 = arith.addf %1097, %1100 : vector<1x1xf32>
    %1102 = vector.shape_cast %1101 : vector<1x1xf32> to vector<1x1x1xf32>
    %cst_430 = arith.constant dense<0.000000e+00> : vector<1xf32>
    %1103 = vector.multi_reduction <add>, %1102, %cst_430 [1, 2] : vector<1x1x1xf32> to vector<1xf32>
    %1104 = vector.shape_cast %1103 : vector<1xf32> to vector<1x1x1xf32>
    %1105 = vector.extract %1104[0, 0, 0] : f32 from vector<1x1x1xf32>
    %1106 = vector.broadcast %1105 : f32 to vector<1x1xf32>
    %1107 = arith.addf %1029, %1106 : vector<1x1xf32>
    %c0_431 = arith.constant 0 : index
    %c0_432 = arith.constant 0 : index
    %c0_433 = arith.constant 0 : index
    %1108 = vector.load %arg33[%c0_431, %c0_432, %c0_433] : memref<6x1x32xf32, #tpu.memory_space<vmem>>, vector<1x1x32xf32>
    %1109 = vector.shape_cast %1108 : vector<1x1x32xf32> to vector<1x32xf32>
    %1110 = vector.broadcast %1096 : vector<1x1xf32> to vector<1x32xf32>
    %1111 = arith.mulf %1110, %1109 : vector<1x32xf32>
    %1112 = arith.addf %1034, %1111 : vector<1x32xf32>
    %cst_434 = arith.constant dense<0.000000e+00> : vector<1x96xf32>
    %1113 = tpu.matmul %1112, %5, %cst_434 {dimension_numbers = #tpu.dot_dimension_numbers<[1], [0], [0], [1], [0, 0, 1, 1], [], []>} : vector<1x32xf32>, vector<32x96xf32>, vector<1x96xf32> -> vector<1x96xf32>
    %1114 = arith.addf %1113, %7 : vector<1x96xf32>
    %1115 = vector.extract_strided_slice %880 {offsets = [0, 0], sizes = [1, 32], strides = [1, 1]} : vector<1x96xf32> to vector<1x32xf32>
    %1116 = vector.extract_strided_slice %1114 {offsets = [0, 0], sizes = [1, 32], strides = [1, 1]} : vector<1x96xf32> to vector<1x32xf32>
    %1117 = arith.addf %1115, %1116 : vector<1x32xf32>
    %1118 = arith.negf %1117 : vector<1x32xf32>
    %1119 = math.exp %1118 : vector<1x32xf32>
    %cst_435 = arith.constant 1.000000e+00 : f32
    %1120 = vector.broadcast %cst_435 : f32 to vector<1x32xf32>
    %1121 = arith.addf %1120, %1119 : vector<1x32xf32>
    %1122 = arith.divf %1120, %1121 : vector<1x32xf32>
    %1123 = vector.extract_strided_slice %880 {offsets = [0, 32], sizes = [1, 32], strides = [1, 1]} : vector<1x96xf32> to vector<1x32xf32>
    %1124 = vector.extract_strided_slice %1114 {offsets = [0, 32], sizes = [1, 32], strides = [1, 1]} : vector<1x96xf32> to vector<1x32xf32>
    %1125 = arith.addf %1123, %1124 : vector<1x32xf32>
    %1126 = arith.negf %1125 : vector<1x32xf32>
    %1127 = math.exp %1126 : vector<1x32xf32>
    %cst_436 = arith.constant 1.000000e+00 : f32
    %1128 = vector.broadcast %cst_436 : f32 to vector<1x32xf32>
    %1129 = arith.addf %1128, %1127 : vector<1x32xf32>
    %1130 = arith.divf %1128, %1129 : vector<1x32xf32>
    %1131 = vector.extract_strided_slice %880 {offsets = [0, 64], sizes = [1, 32], strides = [1, 1]} : vector<1x96xf32> to vector<1x32xf32>
    %1132 = vector.extract_strided_slice %1114 {offsets = [0, 64], sizes = [1, 32], strides = [1, 1]} : vector<1x96xf32> to vector<1x32xf32>
    %1133 = arith.mulf %1122, %1132 : vector<1x32xf32>
    %1134 = arith.addf %1131, %1133 : vector<1x32xf32>
    %1135 = math.tanh %1134 : vector<1x32xf32>
    %cst_437 = arith.constant 1.000000e+00 : f32
    %1136 = vector.broadcast %cst_437 : f32 to vector<1x32xf32>
    %1137 = arith.subf %1136, %1130 : vector<1x32xf32>
    %1138 = arith.mulf %1137, %1135 : vector<1x32xf32>
    %1139 = arith.mulf %1130, %1112 : vector<1x32xf32>
    %1140 = arith.addf %1138, %1139 : vector<1x32xf32>
    %cst_438 = arith.constant dense<0.000000e+00> : vector<1x32xf32>
    %1141 = tpu.matmul %1140, %23, %cst_438 {dimension_numbers = #tpu.dot_dimension_numbers<[1], [0], [0], [1], [0, 0, 1, 1], [], []>} : vector<1x32xf32>, vector<32x32xf32>, vector<1x32xf32> -> vector<1x32xf32>
    %1142 = arith.addf %1141, %24 : vector<1x32xf32>
    %1143 = vector.extract_strided_slice %25 {offsets = [3, 0], sizes = [1, 32], strides = [1, 1]} : vector<6x32xf32> to vector<1x32xf32>
    %1144 = arith.addf %1142, %1143 : vector<1x32xf32>
    %1145 = arith.negf %1144 : vector<1x32xf32>
    %1146 = math.exp %1145 : vector<1x32xf32>
    %cst_439 = arith.constant 1.000000e+00 : f32
    %1147 = vector.broadcast %cst_439 : f32 to vector<1x32xf32>
    %1148 = arith.addf %1147, %1146 : vector<1x32xf32>
    %1149 = arith.divf %1147, %1148 : vector<1x32xf32>
    %cst_440 = arith.constant dense<0.000000e+00> : vector<1x32xf32>
    %1150 = tpu.matmul %1140, %26, %cst_440 {dimension_numbers = #tpu.dot_dimension_numbers<[1], [0], [0], [1], [0, 0, 1, 1], [], []>} : vector<1x32xf32>, vector<32x32xf32>, vector<1x32xf32> -> vector<1x32xf32>
    %1151 = vector.extract_strided_slice %27 {offsets = [3, 0], sizes = [1, 32], strides = [1, 1]} : vector<6x32xf32> to vector<1x32xf32>
    %1152 = arith.addf %1150, %1151 : vector<1x32xf32>
    %1153 = arith.mulf %1149, %1152 : vector<1x32xf32>
    %c3_441 = arith.constant 3 : index
    %c0_442 = arith.constant 0 : index
    %c0_443 = arith.constant 0 : index
    %1154 = vector.load %arg33[%c3_441, %c0_442, %c0_443] : memref<6x1x32xf32, #tpu.memory_space<vmem>>, vector<1x1x32xf32>
    %1155 = vector.shape_cast %1154 : vector<1x1x32xf32> to vector<1x32xf32>
    %1156 = vector.shape_cast %1153 : vector<1x32xf32> to vector<1x1x32xf32>
    tpu.vector_store %arg33[%c3_441, %c0_442, %c0_443], %1156 {strides = array<i32>} : memref<6x1x32xf32, #tpu.memory_space<vmem>>, vector<1x1x32xf32>,
    %cst_444 = arith.constant dense<0.000000e+00> : vector<1x128xf32>
    %1157 = tpu.matmul %1140, %18, %cst_444 {dimension_numbers = #tpu.dot_dimension_numbers<[1], [0], [0], [1], [0, 0, 1, 1], [], []>} : vector<1x32xf32>, vector<32x128xf32>, vector<1x128xf32> -> vector<1x128xf32>
    %c3_445 = arith.constant 3 : index
    %c0_446 = arith.constant 0 : index
    %c0_447 = arith.constant 0 : index
    %1158 = vector.load %arg34[%c3_445, %c0_446, %c0_447] : memref<6x1x128xf32, #tpu.memory_space<vmem>>, vector<1x1x128xf32>
    %1159 = vector.shape_cast %1158 : vector<1x1x128xf32> to vector<1x128xf32>
    %1160 = vector.shape_cast %1157 : vector<1x128xf32> to vector<1x1x128xf32>
    tpu.vector_store %arg34[%c3_445, %c0_446, %c0_447], %1160 {strides = array<i32>} : memref<6x1x128xf32, #tpu.memory_space<vmem>>, vector<1x1x128xf32>,
    %c4_448 = arith.constant 4 : index
    %c0_449 = arith.constant 0 : index
    %c0_450 = arith.constant 0 : index
    %c0_451 = arith.constant 0 : index
    %1161 = vector.load %arg1[%c4_448, %c0_449, %c0_450, %c0_451] : memref<6x1x1x5xf32, #tpu.memory_space<vmem>>, vector<1x1x1x5xf32>
    %1162 = vector.shape_cast %1161 : vector<1x1x1x5xf32> to vector<1x5xf32>
    %c4_452 = arith.constant 4 : index
    %c0_453 = arith.constant 0 : index
    %c0_454 = arith.constant 0 : index
    %c0_455 = arith.constant 0 : index
    %1163 = vector.load %arg2[%c4_452, %c0_453, %c0_454, %c0_455] : memref<6x1x1x6xf32, #tpu.memory_space<vmem>>, vector<1x1x1x6xf32>
    %1164 = vector.shape_cast %1163 : vector<1x1x1x6xf32> to vector<1x6xf32>
    %cst_456 = arith.constant dense<0.000000e+00> : vector<1x64xf32>
    %1165 = tpu.matmul %1140, %14, %cst_456 {dimension_numbers = #tpu.dot_dimension_numbers<[1], [0], [0], [1], [0, 0, 1, 1], [], []>} : vector<1x32xf32>, vector<32x64xf32>, vector<1x64xf32> -> vector<1x64xf32>
    %1166 = arith.addf %1165, %15 : vector<1x64xf32>
    %cst_457 = arith.constant 0.000000e+00 : f32
    %1167 = vector.broadcast %cst_457 : f32 to vector<1x64xf32>
    %1168 = arith.maximumf %1166, %1167 : vector<1x64xf32>
    %cst_458 = arith.constant dense<0.000000e+00> : vector<1x5xf32>
    %1169 = tpu.matmul %1168, %16, %cst_458 {dimension_numbers = #tpu.dot_dimension_numbers<[1], [0], [0], [1], [0, 0, 1, 1], [], []>} : vector<1x64xf32>, vector<64x5xf32>, vector<1x5xf32> -> vector<1x5xf32>
    %1170 = arith.addf %1169, %17 : vector<1x5xf32>
    %cst_459 = arith.constant dense<0xFF800000> : vector<1xf32>
    %1171 = vector.multi_reduction <maximumf>, %1170, %cst_459 [1] : vector<1x5xf32> to vector<1xf32>
    %1172 = vector.shape_cast %1171 : vector<1xf32> to vector<1x1xf32>
    %1173 = vector.broadcast %1172 : vector<1x1xf32> to vector<1x5xf32>
    %1174 = arith.subf %1170, %1173 : vector<1x5xf32>
    %1175 = math.exp %1174 : vector<1x5xf32>
    %cst_460 = arith.constant dense<0.000000e+00> : vector<1xf32>
    %1176 = vector.multi_reduction <add>, %1175, %cst_460 [1] : vector<1x5xf32> to vector<1xf32>
    %1177 = vector.shape_cast %1176 : vector<1xf32> to vector<1x1xf32>
    %1178 = math.log %1177 : vector<1x1xf32>
    %1179 = vector.broadcast %1178 : vector<1x1xf32> to vector<1x5xf32>
    %1180 = arith.subf %1174, %1179 : vector<1x5xf32>
    %1181 = arith.mulf %1180, %1162 : vector<1x5xf32>
    %1182 = vector.shape_cast %1181 : vector<1x5xf32> to vector<1x1x5xf32>
    %cst_461 = arith.constant dense<0.000000e+00> : vector<1xf32>
    %1183 = vector.multi_reduction <add>, %1182, %cst_461 [1, 2] : vector<1x1x5xf32> to vector<1xf32>
    %1184 = vector.shape_cast %1183 : vector<1xf32> to vector<1x1x1xf32>
    %1185 = vector.extract %1184[0, 0, 0] : f32 from vector<1x1x1xf32>
    %1186 = vector.broadcast %1185 : f32 to vector<1x1xf32>
    %1187 = arith.addf %1107, %1186 : vector<1x1xf32>
    %cst_462 = arith.constant dense<0.000000e+00> : vector<1x96xf32>
    %1188 = tpu.matmul %1162, %4, %cst_462 {dimension_numbers = #tpu.dot_dimension_numbers<[1], [0], [0], [1], [0, 0, 1, 1], [], []>} : vector<1x5xf32>, vector<5x96xf32>, vector<1x96xf32> -> vector<1x96xf32>
    %1189 = arith.addf %1188, %6 : vector<1x96xf32>
    %1190 = vector.extract_strided_slice %1189 {offsets = [0, 0], sizes = [1, 32], strides = [1, 1]} : vector<1x96xf32> to vector<1x32xf32>
    %1191 = vector.extract_strided_slice %7 {offsets = [0, 0], sizes = [1, 32], strides = [1, 1]} : vector<1x96xf32> to vector<1x32xf32>
    %1192 = arith.addf %1190, %1191 : vector<1x32xf32>
    %1193 = arith.negf %1192 : vector<1x32xf32>
    %1194 = math.exp %1193 : vector<1x32xf32>
    %cst_463 = arith.constant 1.000000e+00 : f32
    %1195 = vector.broadcast %cst_463 : f32 to vector<1x32xf32>
    %1196 = arith.addf %1195, %1194 : vector<1x32xf32>
    %1197 = arith.divf %1195, %1196 : vector<1x32xf32>
    %1198 = vector.extract_strided_slice %1189 {offsets = [0, 32], sizes = [1, 32], strides = [1, 1]} : vector<1x96xf32> to vector<1x32xf32>
    %1199 = vector.extract_strided_slice %7 {offsets = [0, 32], sizes = [1, 32], strides = [1, 1]} : vector<1x96xf32> to vector<1x32xf32>
    %1200 = arith.addf %1198, %1199 : vector<1x32xf32>
    %1201 = arith.negf %1200 : vector<1x32xf32>
    %1202 = math.exp %1201 : vector<1x32xf32>
    %cst_464 = arith.constant 1.000000e+00 : f32
    %1203 = vector.broadcast %cst_464 : f32 to vector<1x32xf32>
    %1204 = arith.addf %1203, %1202 : vector<1x32xf32>
    %1205 = arith.divf %1203, %1204 : vector<1x32xf32>
    %1206 = vector.extract_strided_slice %1189 {offsets = [0, 64], sizes = [1, 32], strides = [1, 1]} : vector<1x96xf32> to vector<1x32xf32>
    %1207 = vector.extract_strided_slice %7 {offsets = [0, 64], sizes = [1, 32], strides = [1, 1]} : vector<1x96xf32> to vector<1x32xf32>
    %1208 = arith.mulf %1197, %1207 : vector<1x32xf32>
    %1209 = arith.addf %1206, %1208 : vector<1x32xf32>
    %1210 = math.tanh %1209 : vector<1x32xf32>
    %cst_465 = arith.constant 1.000000e+00 : f32
    %1211 = vector.broadcast %cst_465 : f32 to vector<1x32xf32>
    %1212 = arith.subf %1211, %1205 : vector<1x32xf32>
    %1213 = arith.mulf %1212, %1210 : vector<1x32xf32>
    %1214 = arith.mulf %1205, %28 : vector<1x32xf32>
    %1215 = arith.addf %1213, %1214 : vector<1x32xf32>
    %c3_466 = arith.constant 3 : index
    %c0_467 = arith.constant 0 : index
    %c0_468 = arith.constant 0 : index
    %1216 = vector.load %arg34[%c3_466, %c0_467, %c0_468] : memref<6x1x128xf32, #tpu.memory_space<vmem>>, vector<1x1x128xf32>
    %1217 = vector.shape_cast %1216 : vector<1x1x128xf32> to vector<1x128xf32>
    %cst_469 = arith.constant dense<0.000000e+00> : vector<1x128xf32>
    %1218 = tpu.matmul %1215, %19, %cst_469 {dimension_numbers = #tpu.dot_dimension_numbers<[1], [0], [0], [1], [0, 0, 1, 1], [], []>} : vector<1x32xf32>, vector<32x128xf32>, vector<1x128xf32> -> vector<1x128xf32>
    %1219 = arith.addf %1217, %1218 : vector<1x128xf32>
    %1220 = arith.addf %1219, %20 : vector<1x128xf32>
    %cst_470 = arith.constant 0.000000e+00 : f32
    %1221 = vector.broadcast %cst_470 : f32 to vector<1x128xf32>
    %1222 = arith.maximumf %1220, %1221 : vector<1x128xf32>
    %1223 = arith.mulf %1222, %21 : vector<1x128xf32>
    %cst_471 = arith.constant dense<0.000000e+00> : vector<1xf32>
    %1224 = vector.multi_reduction <add>, %1223, %cst_471 [1] : vector<1x128xf32> to vector<1xf32>
    %1225 = vector.shape_cast %1224 : vector<1xf32> to vector<1x1xf32>
    %1226 = arith.addf %1225, %22 : vector<1x1xf32>
    %1227 = math.absf %1226 : vector<1x1xf32>
    %cst_472 = arith.constant 0.000000e+00 : f32
    %1228 = vector.broadcast %cst_472 : f32 to vector<1x1xf32>
    %1229 = arith.subf %1228, %1227 : vector<1x1xf32>
    %1230 = math.exp %1229 : vector<1x1xf32>
    %cst_473 = arith.constant 0.000000e+00 : f32
    %1231 = vector.broadcast %cst_473 : f32 to vector<1x1xf32>
    %1232 = arith.minimumf %1226, %1231 : vector<1x1xf32>
    %cst_474 = arith.constant 1.000000e+00 : f32
    %1233 = vector.broadcast %cst_474 : f32 to vector<1x1xf32>
    %1234 = arith.addf %1233, %1230 : vector<1x1xf32>
    %1235 = math.log %1234 : vector<1x1xf32>
    %1236 = arith.subf %1232, %1235 : vector<1x1xf32>
    %cst_475 = arith.constant -1.000000e+02 : f32
    %1237 = vector.broadcast %cst_475 : f32 to vector<1x1xf32>
    %1238 = arith.maximumf %1236, %1237 : vector<1x1xf32>
    %cst_476 = arith.constant 0.000000e+00 : f32
    %1239 = vector.broadcast %cst_476 : f32 to vector<1x1xf32>
    %1240 = arith.subf %1239, %1226 : vector<1x1xf32>
    %cst_477 = arith.constant 0.000000e+00 : f32
    %1241 = vector.broadcast %cst_477 : f32 to vector<1x1xf32>
    %1242 = arith.minimumf %1240, %1241 : vector<1x1xf32>
    %cst_478 = arith.constant 1.000000e+00 : f32
    %1243 = vector.broadcast %cst_478 : f32 to vector<1x1xf32>
    %1244 = arith.addf %1243, %1230 : vector<1x1xf32>
    %1245 = math.log %1244 : vector<1x1xf32>
    %1246 = arith.subf %1242, %1245 : vector<1x1xf32>
    %cst_479 = arith.constant -1.000000e+02 : f32
    %1247 = vector.broadcast %cst_479 : f32 to vector<1x1xf32>
    %1248 = arith.maximumf %1246, %1247 : vector<1x1xf32>
    %1249 = vector.extract_strided_slice %1164 {offsets = [0, 3], sizes = [1, 1], strides = [1, 1]} : vector<1x6xf32> to vector<1x1xf32>
    %1250 = arith.mulf %1249, %1238 : vector<1x1xf32>
    %cst_480 = arith.constant 1.000000e+00 : f32
    %1251 = vector.broadcast %cst_480 : f32 to vector<1x1xf32>
    %1252 = arith.subf %1251, %1249 : vector<1x1xf32>
    %1253 = arith.mulf %1252, %1248 : vector<1x1xf32>
    %1254 = arith.addf %1250, %1253 : vector<1x1xf32>
    %1255 = vector.shape_cast %1254 : vector<1x1xf32> to vector<1x1x1xf32>
    %cst_481 = arith.constant dense<0.000000e+00> : vector<1xf32>
    %1256 = vector.multi_reduction <add>, %1255, %cst_481 [1, 2] : vector<1x1x1xf32> to vector<1xf32>
    %1257 = vector.shape_cast %1256 : vector<1xf32> to vector<1x1x1xf32>
    %1258 = vector.extract %1257[0, 0, 0] : f32 from vector<1x1x1xf32>
    %1259 = vector.broadcast %1258 : f32 to vector<1x1xf32>
    %1260 = arith.addf %1187, %1259 : vector<1x1xf32>
    %c3_482 = arith.constant 3 : index
    %c0_483 = arith.constant 0 : index
    %c0_484 = arith.constant 0 : index
    %1261 = vector.load %arg33[%c3_482, %c0_483, %c0_484] : memref<6x1x32xf32, #tpu.memory_space<vmem>>, vector<1x1x32xf32>
    %1262 = vector.shape_cast %1261 : vector<1x1x32xf32> to vector<1x32xf32>
    %1263 = vector.broadcast %1249 : vector<1x1xf32> to vector<1x32xf32>
    %1264 = arith.mulf %1263, %1262 : vector<1x32xf32>
    %1265 = arith.addf %28, %1264 : vector<1x32xf32>
    %cst_485 = arith.constant dense<0.000000e+00> : vector<1x96xf32>
    %1266 = tpu.matmul %1265, %5, %cst_485 {dimension_numbers = #tpu.dot_dimension_numbers<[1], [0], [0], [1], [0, 0, 1, 1], [], []>} : vector<1x32xf32>, vector<32x96xf32>, vector<1x96xf32> -> vector<1x96xf32>
    %1267 = arith.addf %1266, %7 : vector<1x96xf32>
    %1268 = vector.extract_strided_slice %1189 {offsets = [0, 0], sizes = [1, 32], strides = [1, 1]} : vector<1x96xf32> to vector<1x32xf32>
    %1269 = vector.extract_strided_slice %1267 {offsets = [0, 0], sizes = [1, 32], strides = [1, 1]} : vector<1x96xf32> to vector<1x32xf32>
    %1270 = arith.addf %1268, %1269 : vector<1x32xf32>
    %1271 = arith.negf %1270 : vector<1x32xf32>
    %1272 = math.exp %1271 : vector<1x32xf32>
    %cst_486 = arith.constant 1.000000e+00 : f32
    %1273 = vector.broadcast %cst_486 : f32 to vector<1x32xf32>
    %1274 = arith.addf %1273, %1272 : vector<1x32xf32>
    %1275 = arith.divf %1273, %1274 : vector<1x32xf32>
    %1276 = vector.extract_strided_slice %1189 {offsets = [0, 32], sizes = [1, 32], strides = [1, 1]} : vector<1x96xf32> to vector<1x32xf32>
    %1277 = vector.extract_strided_slice %1267 {offsets = [0, 32], sizes = [1, 32], strides = [1, 1]} : vector<1x96xf32> to vector<1x32xf32>
    %1278 = arith.addf %1276, %1277 : vector<1x32xf32>
    %1279 = arith.negf %1278 : vector<1x32xf32>
    %1280 = math.exp %1279 : vector<1x32xf32>
    %cst_487 = arith.constant 1.000000e+00 : f32
    %1281 = vector.broadcast %cst_487 : f32 to vector<1x32xf32>
    %1282 = arith.addf %1281, %1280 : vector<1x32xf32>
    %1283 = arith.divf %1281, %1282 : vector<1x32xf32>
    %1284 = vector.extract_strided_slice %1189 {offsets = [0, 64], sizes = [1, 32], strides = [1, 1]} : vector<1x96xf32> to vector<1x32xf32>
    %1285 = vector.extract_strided_slice %1267 {offsets = [0, 64], sizes = [1, 32], strides = [1, 1]} : vector<1x96xf32> to vector<1x32xf32>
    %1286 = arith.mulf %1275, %1285 : vector<1x32xf32>
    %1287 = arith.addf %1284, %1286 : vector<1x32xf32>
    %1288 = math.tanh %1287 : vector<1x32xf32>
    %cst_488 = arith.constant 1.000000e+00 : f32
    %1289 = vector.broadcast %cst_488 : f32 to vector<1x32xf32>
    %1290 = arith.subf %1289, %1283 : vector<1x32xf32>
    %1291 = arith.mulf %1290, %1288 : vector<1x32xf32>
    %1292 = arith.mulf %1283, %1265 : vector<1x32xf32>
    %1293 = arith.addf %1291, %1292 : vector<1x32xf32>
    %c2_489 = arith.constant 2 : index
    %c0_490 = arith.constant 0 : index
    %c0_491 = arith.constant 0 : index
    %1294 = vector.load %arg34[%c2_489, %c0_490, %c0_491] : memref<6x1x128xf32, #tpu.memory_space<vmem>>, vector<1x1x128xf32>
    %1295 = vector.shape_cast %1294 : vector<1x1x128xf32> to vector<1x128xf32>
    %cst_492 = arith.constant dense<0.000000e+00> : vector<1x128xf32>
    %1296 = tpu.matmul %1293, %19, %cst_492 {dimension_numbers = #tpu.dot_dimension_numbers<[1], [0], [0], [1], [0, 0, 1, 1], [], []>} : vector<1x32xf32>, vector<32x128xf32>, vector<1x128xf32> -> vector<1x128xf32>
    %1297 = arith.addf %1295, %1296 : vector<1x128xf32>
    %1298 = arith.addf %1297, %20 : vector<1x128xf32>
    %cst_493 = arith.constant 0.000000e+00 : f32
    %1299 = vector.broadcast %cst_493 : f32 to vector<1x128xf32>
    %1300 = arith.maximumf %1298, %1299 : vector<1x128xf32>
    %1301 = arith.mulf %1300, %21 : vector<1x128xf32>
    %cst_494 = arith.constant dense<0.000000e+00> : vector<1xf32>
    %1302 = vector.multi_reduction <add>, %1301, %cst_494 [1] : vector<1x128xf32> to vector<1xf32>
    %1303 = vector.shape_cast %1302 : vector<1xf32> to vector<1x1xf32>
    %1304 = arith.addf %1303, %22 : vector<1x1xf32>
    %1305 = math.absf %1304 : vector<1x1xf32>
    %cst_495 = arith.constant 0.000000e+00 : f32
    %1306 = vector.broadcast %cst_495 : f32 to vector<1x1xf32>
    %1307 = arith.subf %1306, %1305 : vector<1x1xf32>
    %1308 = math.exp %1307 : vector<1x1xf32>
    %cst_496 = arith.constant 0.000000e+00 : f32
    %1309 = vector.broadcast %cst_496 : f32 to vector<1x1xf32>
    %1310 = arith.minimumf %1304, %1309 : vector<1x1xf32>
    %cst_497 = arith.constant 1.000000e+00 : f32
    %1311 = vector.broadcast %cst_497 : f32 to vector<1x1xf32>
    %1312 = arith.addf %1311, %1308 : vector<1x1xf32>
    %1313 = math.log %1312 : vector<1x1xf32>
    %1314 = arith.subf %1310, %1313 : vector<1x1xf32>
    %cst_498 = arith.constant -1.000000e+02 : f32
    %1315 = vector.broadcast %cst_498 : f32 to vector<1x1xf32>
    %1316 = arith.maximumf %1314, %1315 : vector<1x1xf32>
    %cst_499 = arith.constant 0.000000e+00 : f32
    %1317 = vector.broadcast %cst_499 : f32 to vector<1x1xf32>
    %1318 = arith.subf %1317, %1304 : vector<1x1xf32>
    %cst_500 = arith.constant 0.000000e+00 : f32
    %1319 = vector.broadcast %cst_500 : f32 to vector<1x1xf32>
    %1320 = arith.minimumf %1318, %1319 : vector<1x1xf32>
    %cst_501 = arith.constant 1.000000e+00 : f32
    %1321 = vector.broadcast %cst_501 : f32 to vector<1x1xf32>
    %1322 = arith.addf %1321, %1308 : vector<1x1xf32>
    %1323 = math.log %1322 : vector<1x1xf32>
    %1324 = arith.subf %1320, %1323 : vector<1x1xf32>
    %cst_502 = arith.constant -1.000000e+02 : f32
    %1325 = vector.broadcast %cst_502 : f32 to vector<1x1xf32>
    %1326 = arith.maximumf %1324, %1325 : vector<1x1xf32>
    %1327 = vector.extract_strided_slice %1164 {offsets = [0, 2], sizes = [1, 1], strides = [1, 1]} : vector<1x6xf32> to vector<1x1xf32>
    %1328 = arith.mulf %1327, %1316 : vector<1x1xf32>
    %cst_503 = arith.constant 1.000000e+00 : f32
    %1329 = vector.broadcast %cst_503 : f32 to vector<1x1xf32>
    %1330 = arith.subf %1329, %1327 : vector<1x1xf32>
    %1331 = arith.mulf %1330, %1326 : vector<1x1xf32>
    %1332 = arith.addf %1328, %1331 : vector<1x1xf32>
    %1333 = vector.shape_cast %1332 : vector<1x1xf32> to vector<1x1x1xf32>
    %cst_504 = arith.constant dense<0.000000e+00> : vector<1xf32>
    %1334 = vector.multi_reduction <add>, %1333, %cst_504 [1, 2] : vector<1x1x1xf32> to vector<1xf32>
    %1335 = vector.shape_cast %1334 : vector<1xf32> to vector<1x1x1xf32>
    %1336 = vector.extract %1335[0, 0, 0] : f32 from vector<1x1x1xf32>
    %1337 = vector.broadcast %1336 : f32 to vector<1x1xf32>
    %1338 = arith.addf %1260, %1337 : vector<1x1xf32>
    %c2_505 = arith.constant 2 : index
    %c0_506 = arith.constant 0 : index
    %c0_507 = arith.constant 0 : index
    %1339 = vector.load %arg33[%c2_505, %c0_506, %c0_507] : memref<6x1x32xf32, #tpu.memory_space<vmem>>, vector<1x1x32xf32>
    %1340 = vector.shape_cast %1339 : vector<1x1x32xf32> to vector<1x32xf32>
    %1341 = vector.broadcast %1327 : vector<1x1xf32> to vector<1x32xf32>
    %1342 = arith.mulf %1341, %1340 : vector<1x32xf32>
    %1343 = arith.addf %1265, %1342 : vector<1x32xf32>
    %cst_508 = arith.constant dense<0.000000e+00> : vector<1x96xf32>
    %1344 = tpu.matmul %1343, %5, %cst_508 {dimension_numbers = #tpu.dot_dimension_numbers<[1], [0], [0], [1], [0, 0, 1, 1], [], []>} : vector<1x32xf32>, vector<32x96xf32>, vector<1x96xf32> -> vector<1x96xf32>
    %1345 = arith.addf %1344, %7 : vector<1x96xf32>
    %1346 = vector.extract_strided_slice %1189 {offsets = [0, 0], sizes = [1, 32], strides = [1, 1]} : vector<1x96xf32> to vector<1x32xf32>
    %1347 = vector.extract_strided_slice %1345 {offsets = [0, 0], sizes = [1, 32], strides = [1, 1]} : vector<1x96xf32> to vector<1x32xf32>
    %1348 = arith.addf %1346, %1347 : vector<1x32xf32>
    %1349 = arith.negf %1348 : vector<1x32xf32>
    %1350 = math.exp %1349 : vector<1x32xf32>
    %cst_509 = arith.constant 1.000000e+00 : f32
    %1351 = vector.broadcast %cst_509 : f32 to vector<1x32xf32>
    %1352 = arith.addf %1351, %1350 : vector<1x32xf32>
    %1353 = arith.divf %1351, %1352 : vector<1x32xf32>
    %1354 = vector.extract_strided_slice %1189 {offsets = [0, 32], sizes = [1, 32], strides = [1, 1]} : vector<1x96xf32> to vector<1x32xf32>
    %1355 = vector.extract_strided_slice %1345 {offsets = [0, 32], sizes = [1, 32], strides = [1, 1]} : vector<1x96xf32> to vector<1x32xf32>
    %1356 = arith.addf %1354, %1355 : vector<1x32xf32>
    %1357 = arith.negf %1356 : vector<1x32xf32>
    %1358 = math.exp %1357 : vector<1x32xf32>
    %cst_510 = arith.constant 1.000000e+00 : f32
    %1359 = vector.broadcast %cst_510 : f32 to vector<1x32xf32>
    %1360 = arith.addf %1359, %1358 : vector<1x32xf32>
    %1361 = arith.divf %1359, %1360 : vector<1x32xf32>
    %1362 = vector.extract_strided_slice %1189 {offsets = [0, 64], sizes = [1, 32], strides = [1, 1]} : vector<1x96xf32> to vector<1x32xf32>
    %1363 = vector.extract_strided_slice %1345 {offsets = [0, 64], sizes = [1, 32], strides = [1, 1]} : vector<1x96xf32> to vector<1x32xf32>
    %1364 = arith.mulf %1353, %1363 : vector<1x32xf32>
    %1365 = arith.addf %1362, %1364 : vector<1x32xf32>
    %1366 = math.tanh %1365 : vector<1x32xf32>
    %cst_511 = arith.constant 1.000000e+00 : f32
    %1367 = vector.broadcast %cst_511 : f32 to vector<1x32xf32>
    %1368 = arith.subf %1367, %1361 : vector<1x32xf32>
    %1369 = arith.mulf %1368, %1366 : vector<1x32xf32>
    %1370 = arith.mulf %1361, %1343 : vector<1x32xf32>
    %1371 = arith.addf %1369, %1370 : vector<1x32xf32>
    %c1_512 = arith.constant 1 : index
    %c0_513 = arith.constant 0 : index
    %c0_514 = arith.constant 0 : index
    %1372 = vector.load %arg34[%c1_512, %c0_513, %c0_514] : memref<6x1x128xf32, #tpu.memory_space<vmem>>, vector<1x1x128xf32>
    %1373 = vector.shape_cast %1372 : vector<1x1x128xf32> to vector<1x128xf32>
    %cst_515 = arith.constant dense<0.000000e+00> : vector<1x128xf32>
    %1374 = tpu.matmul %1371, %19, %cst_515 {dimension_numbers = #tpu.dot_dimension_numbers<[1], [0], [0], [1], [0, 0, 1, 1], [], []>} : vector<1x32xf32>, vector<32x128xf32>, vector<1x128xf32> -> vector<1x128xf32>
    %1375 = arith.addf %1373, %1374 : vector<1x128xf32>
    %1376 = arith.addf %1375, %20 : vector<1x128xf32>
    %cst_516 = arith.constant 0.000000e+00 : f32
    %1377 = vector.broadcast %cst_516 : f32 to vector<1x128xf32>
    %1378 = arith.maximumf %1376, %1377 : vector<1x128xf32>
    %1379 = arith.mulf %1378, %21 : vector<1x128xf32>
    %cst_517 = arith.constant dense<0.000000e+00> : vector<1xf32>
    %1380 = vector.multi_reduction <add>, %1379, %cst_517 [1] : vector<1x128xf32> to vector<1xf32>
    %1381 = vector.shape_cast %1380 : vector<1xf32> to vector<1x1xf32>
    %1382 = arith.addf %1381, %22 : vector<1x1xf32>
    %1383 = math.absf %1382 : vector<1x1xf32>
    %cst_518 = arith.constant 0.000000e+00 : f32
    %1384 = vector.broadcast %cst_518 : f32 to vector<1x1xf32>
    %1385 = arith.subf %1384, %1383 : vector<1x1xf32>
    %1386 = math.exp %1385 : vector<1x1xf32>
    %cst_519 = arith.constant 0.000000e+00 : f32
    %1387 = vector.broadcast %cst_519 : f32 to vector<1x1xf32>
    %1388 = arith.minimumf %1382, %1387 : vector<1x1xf32>
    %cst_520 = arith.constant 1.000000e+00 : f32
    %1389 = vector.broadcast %cst_520 : f32 to vector<1x1xf32>
    %1390 = arith.addf %1389, %1386 : vector<1x1xf32>
    %1391 = math.log %1390 : vector<1x1xf32>
    %1392 = arith.subf %1388, %1391 : vector<1x1xf32>
    %cst_521 = arith.constant -1.000000e+02 : f32
    %1393 = vector.broadcast %cst_521 : f32 to vector<1x1xf32>
    %1394 = arith.maximumf %1392, %1393 : vector<1x1xf32>
    %cst_522 = arith.constant 0.000000e+00 : f32
    %1395 = vector.broadcast %cst_522 : f32 to vector<1x1xf32>
    %1396 = arith.subf %1395, %1382 : vector<1x1xf32>
    %cst_523 = arith.constant 0.000000e+00 : f32
    %1397 = vector.broadcast %cst_523 : f32 to vector<1x1xf32>
    %1398 = arith.minimumf %1396, %1397 : vector<1x1xf32>
    %cst_524 = arith.constant 1.000000e+00 : f32
    %1399 = vector.broadcast %cst_524 : f32 to vector<1x1xf32>
    %1400 = arith.addf %1399, %1386 : vector<1x1xf32>
    %1401 = math.log %1400 : vector<1x1xf32>
    %1402 = arith.subf %1398, %1401 : vector<1x1xf32>
    %cst_525 = arith.constant -1.000000e+02 : f32
    %1403 = vector.broadcast %cst_525 : f32 to vector<1x1xf32>
    %1404 = arith.maximumf %1402, %1403 : vector<1x1xf32>
    %1405 = vector.extract_strided_slice %1164 {offsets = [0, 1], sizes = [1, 1], strides = [1, 1]} : vector<1x6xf32> to vector<1x1xf32>
    %1406 = arith.mulf %1405, %1394 : vector<1x1xf32>
    %cst_526 = arith.constant 1.000000e+00 : f32
    %1407 = vector.broadcast %cst_526 : f32 to vector<1x1xf32>
    %1408 = arith.subf %1407, %1405 : vector<1x1xf32>
    %1409 = arith.mulf %1408, %1404 : vector<1x1xf32>
    %1410 = arith.addf %1406, %1409 : vector<1x1xf32>
    %1411 = vector.shape_cast %1410 : vector<1x1xf32> to vector<1x1x1xf32>
    %cst_527 = arith.constant dense<0.000000e+00> : vector<1xf32>
    %1412 = vector.multi_reduction <add>, %1411, %cst_527 [1, 2] : vector<1x1x1xf32> to vector<1xf32>
    %1413 = vector.shape_cast %1412 : vector<1xf32> to vector<1x1x1xf32>
    %1414 = vector.extract %1413[0, 0, 0] : f32 from vector<1x1x1xf32>
    %1415 = vector.broadcast %1414 : f32 to vector<1x1xf32>
    %1416 = arith.addf %1338, %1415 : vector<1x1xf32>
    %c1_528 = arith.constant 1 : index
    %c0_529 = arith.constant 0 : index
    %c0_530 = arith.constant 0 : index
    %1417 = vector.load %arg33[%c1_528, %c0_529, %c0_530] : memref<6x1x32xf32, #tpu.memory_space<vmem>>, vector<1x1x32xf32>
    %1418 = vector.shape_cast %1417 : vector<1x1x32xf32> to vector<1x32xf32>
    %1419 = vector.broadcast %1405 : vector<1x1xf32> to vector<1x32xf32>
    %1420 = arith.mulf %1419, %1418 : vector<1x32xf32>
    %1421 = arith.addf %1343, %1420 : vector<1x32xf32>
    %cst_531 = arith.constant dense<0.000000e+00> : vector<1x96xf32>
    %1422 = tpu.matmul %1421, %5, %cst_531 {dimension_numbers = #tpu.dot_dimension_numbers<[1], [0], [0], [1], [0, 0, 1, 1], [], []>} : vector<1x32xf32>, vector<32x96xf32>, vector<1x96xf32> -> vector<1x96xf32>
    %1423 = arith.addf %1422, %7 : vector<1x96xf32>
    %1424 = vector.extract_strided_slice %1189 {offsets = [0, 0], sizes = [1, 32], strides = [1, 1]} : vector<1x96xf32> to vector<1x32xf32>
    %1425 = vector.extract_strided_slice %1423 {offsets = [0, 0], sizes = [1, 32], strides = [1, 1]} : vector<1x96xf32> to vector<1x32xf32>
    %1426 = arith.addf %1424, %1425 : vector<1x32xf32>
    %1427 = arith.negf %1426 : vector<1x32xf32>
    %1428 = math.exp %1427 : vector<1x32xf32>
    %cst_532 = arith.constant 1.000000e+00 : f32
    %1429 = vector.broadcast %cst_532 : f32 to vector<1x32xf32>
    %1430 = arith.addf %1429, %1428 : vector<1x32xf32>
    %1431 = arith.divf %1429, %1430 : vector<1x32xf32>
    %1432 = vector.extract_strided_slice %1189 {offsets = [0, 32], sizes = [1, 32], strides = [1, 1]} : vector<1x96xf32> to vector<1x32xf32>
    %1433 = vector.extract_strided_slice %1423 {offsets = [0, 32], sizes = [1, 32], strides = [1, 1]} : vector<1x96xf32> to vector<1x32xf32>
    %1434 = arith.addf %1432, %1433 : vector<1x32xf32>
    %1435 = arith.negf %1434 : vector<1x32xf32>
    %1436 = math.exp %1435 : vector<1x32xf32>
    %cst_533 = arith.constant 1.000000e+00 : f32
    %1437 = vector.broadcast %cst_533 : f32 to vector<1x32xf32>
    %1438 = arith.addf %1437, %1436 : vector<1x32xf32>
    %1439 = arith.divf %1437, %1438 : vector<1x32xf32>
    %1440 = vector.extract_strided_slice %1189 {offsets = [0, 64], sizes = [1, 32], strides = [1, 1]} : vector<1x96xf32> to vector<1x32xf32>
    %1441 = vector.extract_strided_slice %1423 {offsets = [0, 64], sizes = [1, 32], strides = [1, 1]} : vector<1x96xf32> to vector<1x32xf32>
    %1442 = arith.mulf %1431, %1441 : vector<1x32xf32>
    %1443 = arith.addf %1440, %1442 : vector<1x32xf32>
    %1444 = math.tanh %1443 : vector<1x32xf32>
    %cst_534 = arith.constant 1.000000e+00 : f32
    %1445 = vector.broadcast %cst_534 : f32 to vector<1x32xf32>
    %1446 = arith.subf %1445, %1439 : vector<1x32xf32>
    %1447 = arith.mulf %1446, %1444 : vector<1x32xf32>
    %1448 = arith.mulf %1439, %1421 : vector<1x32xf32>
    %1449 = arith.addf %1447, %1448 : vector<1x32xf32>
    %c0_535 = arith.constant 0 : index
    %c0_536 = arith.constant 0 : index
    %c0_537 = arith.constant 0 : index
    %1450 = vector.load %arg34[%c0_535, %c0_536, %c0_537] : memref<6x1x128xf32, #tpu.memory_space<vmem>>, vector<1x1x128xf32>
    %1451 = vector.shape_cast %1450 : vector<1x1x128xf32> to vector<1x128xf32>
    %cst_538 = arith.constant dense<0.000000e+00> : vector<1x128xf32>
    %1452 = tpu.matmul %1449, %19, %cst_538 {dimension_numbers = #tpu.dot_dimension_numbers<[1], [0], [0], [1], [0, 0, 1, 1], [], []>} : vector<1x32xf32>, vector<32x128xf32>, vector<1x128xf32> -> vector<1x128xf32>
    %1453 = arith.addf %1451, %1452 : vector<1x128xf32>
    %1454 = arith.addf %1453, %20 : vector<1x128xf32>
    %cst_539 = arith.constant 0.000000e+00 : f32
    %1455 = vector.broadcast %cst_539 : f32 to vector<1x128xf32>
    %1456 = arith.maximumf %1454, %1455 : vector<1x128xf32>
    %1457 = arith.mulf %1456, %21 : vector<1x128xf32>
    %cst_540 = arith.constant dense<0.000000e+00> : vector<1xf32>
    %1458 = vector.multi_reduction <add>, %1457, %cst_540 [1] : vector<1x128xf32> to vector<1xf32>
    %1459 = vector.shape_cast %1458 : vector<1xf32> to vector<1x1xf32>
    %1460 = arith.addf %1459, %22 : vector<1x1xf32>
    %1461 = math.absf %1460 : vector<1x1xf32>
    %cst_541 = arith.constant 0.000000e+00 : f32
    %1462 = vector.broadcast %cst_541 : f32 to vector<1x1xf32>
    %1463 = arith.subf %1462, %1461 : vector<1x1xf32>
    %1464 = math.exp %1463 : vector<1x1xf32>
    %cst_542 = arith.constant 0.000000e+00 : f32
    %1465 = vector.broadcast %cst_542 : f32 to vector<1x1xf32>
    %1466 = arith.minimumf %1460, %1465 : vector<1x1xf32>
    %cst_543 = arith.constant 1.000000e+00 : f32
    %1467 = vector.broadcast %cst_543 : f32 to vector<1x1xf32>
    %1468 = arith.addf %1467, %1464 : vector<1x1xf32>
    %1469 = math.log %1468 : vector<1x1xf32>
    %1470 = arith.subf %1466, %1469 : vector<1x1xf32>
    %cst_544 = arith.constant -1.000000e+02 : f32
    %1471 = vector.broadcast %cst_544 : f32 to vector<1x1xf32>
    %1472 = arith.maximumf %1470, %1471 : vector<1x1xf32>
    %cst_545 = arith.constant 0.000000e+00 : f32
    %1473 = vector.broadcast %cst_545 : f32 to vector<1x1xf32>
    %1474 = arith.subf %1473, %1460 : vector<1x1xf32>
    %cst_546 = arith.constant 0.000000e+00 : f32
    %1475 = vector.broadcast %cst_546 : f32 to vector<1x1xf32>
    %1476 = arith.minimumf %1474, %1475 : vector<1x1xf32>
    %cst_547 = arith.constant 1.000000e+00 : f32
    %1477 = vector.broadcast %cst_547 : f32 to vector<1x1xf32>
    %1478 = arith.addf %1477, %1464 : vector<1x1xf32>
    %1479 = math.log %1478 : vector<1x1xf32>
    %1480 = arith.subf %1476, %1479 : vector<1x1xf32>
    %cst_548 = arith.constant -1.000000e+02 : f32
    %1481 = vector.broadcast %cst_548 : f32 to vector<1x1xf32>
    %1482 = arith.maximumf %1480, %1481 : vector<1x1xf32>
    %1483 = vector.extract_strided_slice %1164 {offsets = [0, 0], sizes = [1, 1], strides = [1, 1]} : vector<1x6xf32> to vector<1x1xf32>
    %1484 = arith.mulf %1483, %1472 : vector<1x1xf32>
    %cst_549 = arith.constant 1.000000e+00 : f32
    %1485 = vector.broadcast %cst_549 : f32 to vector<1x1xf32>
    %1486 = arith.subf %1485, %1483 : vector<1x1xf32>
    %1487 = arith.mulf %1486, %1482 : vector<1x1xf32>
    %1488 = arith.addf %1484, %1487 : vector<1x1xf32>
    %1489 = vector.shape_cast %1488 : vector<1x1xf32> to vector<1x1x1xf32>
    %cst_550 = arith.constant dense<0.000000e+00> : vector<1xf32>
    %1490 = vector.multi_reduction <add>, %1489, %cst_550 [1, 2] : vector<1x1x1xf32> to vector<1xf32>
    %1491 = vector.shape_cast %1490 : vector<1xf32> to vector<1x1x1xf32>
    %1492 = vector.extract %1491[0, 0, 0] : f32 from vector<1x1x1xf32>
    %1493 = vector.broadcast %1492 : f32 to vector<1x1xf32>
    %1494 = arith.addf %1416, %1493 : vector<1x1xf32>
    %c0_551 = arith.constant 0 : index
    %c0_552 = arith.constant 0 : index
    %c0_553 = arith.constant 0 : index
    %1495 = vector.load %arg33[%c0_551, %c0_552, %c0_553] : memref<6x1x32xf32, #tpu.memory_space<vmem>>, vector<1x1x32xf32>
    %1496 = vector.shape_cast %1495 : vector<1x1x32xf32> to vector<1x32xf32>
    %1497 = vector.broadcast %1483 : vector<1x1xf32> to vector<1x32xf32>
    %1498 = arith.mulf %1497, %1496 : vector<1x32xf32>
    %1499 = arith.addf %1421, %1498 : vector<1x32xf32>
    %cst_554 = arith.constant dense<0.000000e+00> : vector<1x96xf32>
    %1500 = tpu.matmul %1499, %5, %cst_554 {dimension_numbers = #tpu.dot_dimension_numbers<[1], [0], [0], [1], [0, 0, 1, 1], [], []>} : vector<1x32xf32>, vector<32x96xf32>, vector<1x96xf32> -> vector<1x96xf32>
    %1501 = arith.addf %1500, %7 : vector<1x96xf32>
    %1502 = vector.extract_strided_slice %1189 {offsets = [0, 0], sizes = [1, 32], strides = [1, 1]} : vector<1x96xf32> to vector<1x32xf32>
    %1503 = vector.extract_strided_slice %1501 {offsets = [0, 0], sizes = [1, 32], strides = [1, 1]} : vector<1x96xf32> to vector<1x32xf32>
    %1504 = arith.addf %1502, %1503 : vector<1x32xf32>
    %1505 = arith.negf %1504 : vector<1x32xf32>
    %1506 = math.exp %1505 : vector<1x32xf32>
    %cst_555 = arith.constant 1.000000e+00 : f32
    %1507 = vector.broadcast %cst_555 : f32 to vector<1x32xf32>
    %1508 = arith.addf %1507, %1506 : vector<1x32xf32>
    %1509 = arith.divf %1507, %1508 : vector<1x32xf32>
    %1510 = vector.extract_strided_slice %1189 {offsets = [0, 32], sizes = [1, 32], strides = [1, 1]} : vector<1x96xf32> to vector<1x32xf32>
    %1511 = vector.extract_strided_slice %1501 {offsets = [0, 32], sizes = [1, 32], strides = [1, 1]} : vector<1x96xf32> to vector<1x32xf32>
    %1512 = arith.addf %1510, %1511 : vector<1x32xf32>
    %1513 = arith.negf %1512 : vector<1x32xf32>
    %1514 = math.exp %1513 : vector<1x32xf32>
    %cst_556 = arith.constant 1.000000e+00 : f32
    %1515 = vector.broadcast %cst_556 : f32 to vector<1x32xf32>
    %1516 = arith.addf %1515, %1514 : vector<1x32xf32>
    %1517 = arith.divf %1515, %1516 : vector<1x32xf32>
    %1518 = vector.extract_strided_slice %1189 {offsets = [0, 64], sizes = [1, 32], strides = [1, 1]} : vector<1x96xf32> to vector<1x32xf32>
    %1519 = vector.extract_strided_slice %1501 {offsets = [0, 64], sizes = [1, 32], strides = [1, 1]} : vector<1x96xf32> to vector<1x32xf32>
    %1520 = arith.mulf %1509, %1519 : vector<1x32xf32>
    %1521 = arith.addf %1518, %1520 : vector<1x32xf32>
    %1522 = math.tanh %1521 : vector<1x32xf32>
    %cst_557 = arith.constant 1.000000e+00 : f32
    %1523 = vector.broadcast %cst_557 : f32 to vector<1x32xf32>
    %1524 = arith.subf %1523, %1517 : vector<1x32xf32>
    %1525 = arith.mulf %1524, %1522 : vector<1x32xf32>
    %1526 = arith.mulf %1517, %1499 : vector<1x32xf32>
    %1527 = arith.addf %1525, %1526 : vector<1x32xf32>
    %cst_558 = arith.constant dense<0.000000e+00> : vector<1x32xf32>
    %1528 = tpu.matmul %1527, %23, %cst_558 {dimension_numbers = #tpu.dot_dimension_numbers<[1], [0], [0], [1], [0, 0, 1, 1], [], []>} : vector<1x32xf32>, vector<32x32xf32>, vector<1x32xf32> -> vector<1x32xf32>
    %1529 = arith.addf %1528, %24 : vector<1x32xf32>
    %1530 = vector.extract_strided_slice %25 {offsets = [4, 0], sizes = [1, 32], strides = [1, 1]} : vector<6x32xf32> to vector<1x32xf32>
    %1531 = arith.addf %1529, %1530 : vector<1x32xf32>
    %1532 = arith.negf %1531 : vector<1x32xf32>
    %1533 = math.exp %1532 : vector<1x32xf32>
    %cst_559 = arith.constant 1.000000e+00 : f32
    %1534 = vector.broadcast %cst_559 : f32 to vector<1x32xf32>
    %1535 = arith.addf %1534, %1533 : vector<1x32xf32>
    %1536 = arith.divf %1534, %1535 : vector<1x32xf32>
    %cst_560 = arith.constant dense<0.000000e+00> : vector<1x32xf32>
    %1537 = tpu.matmul %1527, %26, %cst_560 {dimension_numbers = #tpu.dot_dimension_numbers<[1], [0], [0], [1], [0, 0, 1, 1], [], []>} : vector<1x32xf32>, vector<32x32xf32>, vector<1x32xf32> -> vector<1x32xf32>
    %1538 = vector.extract_strided_slice %27 {offsets = [4, 0], sizes = [1, 32], strides = [1, 1]} : vector<6x32xf32> to vector<1x32xf32>
    %1539 = arith.addf %1537, %1538 : vector<1x32xf32>
    %1540 = arith.mulf %1536, %1539 : vector<1x32xf32>
    %c4_561 = arith.constant 4 : index
    %c0_562 = arith.constant 0 : index
    %c0_563 = arith.constant 0 : index
    %1541 = vector.load %arg33[%c4_561, %c0_562, %c0_563] : memref<6x1x32xf32, #tpu.memory_space<vmem>>, vector<1x1x32xf32>
    %1542 = vector.shape_cast %1541 : vector<1x1x32xf32> to vector<1x32xf32>
    %1543 = vector.shape_cast %1540 : vector<1x32xf32> to vector<1x1x32xf32>
    tpu.vector_store %arg33[%c4_561, %c0_562, %c0_563], %1543 {strides = array<i32>} : memref<6x1x32xf32, #tpu.memory_space<vmem>>, vector<1x1x32xf32>,
    %cst_564 = arith.constant dense<0.000000e+00> : vector<1x128xf32>
    %1544 = tpu.matmul %1527, %18, %cst_564 {dimension_numbers = #tpu.dot_dimension_numbers<[1], [0], [0], [1], [0, 0, 1, 1], [], []>} : vector<1x32xf32>, vector<32x128xf32>, vector<1x128xf32> -> vector<1x128xf32>
    %c4_565 = arith.constant 4 : index
    %c0_566 = arith.constant 0 : index
    %c0_567 = arith.constant 0 : index
    %1545 = vector.load %arg34[%c4_565, %c0_566, %c0_567] : memref<6x1x128xf32, #tpu.memory_space<vmem>>, vector<1x1x128xf32>
    %1546 = vector.shape_cast %1545 : vector<1x1x128xf32> to vector<1x128xf32>
    %1547 = vector.shape_cast %1544 : vector<1x128xf32> to vector<1x1x128xf32>
    tpu.vector_store %arg34[%c4_565, %c0_566, %c0_567], %1547 {strides = array<i32>} : memref<6x1x128xf32, #tpu.memory_space<vmem>>, vector<1x1x128xf32>,
    %c5_568 = arith.constant 5 : index
    %c0_569 = arith.constant 0 : index
    %c0_570 = arith.constant 0 : index
    %c0_571 = arith.constant 0 : index
    %1548 = vector.load %arg1[%c5_568, %c0_569, %c0_570, %c0_571] : memref<6x1x1x5xf32, #tpu.memory_space<vmem>>, vector<1x1x1x5xf32>
    %1549 = vector.shape_cast %1548 : vector<1x1x1x5xf32> to vector<1x5xf32>
    %c5_572 = arith.constant 5 : index
    %c0_573 = arith.constant 0 : index
    %c0_574 = arith.constant 0 : index
    %c0_575 = arith.constant 0 : index
    %1550 = vector.load %arg2[%c5_572, %c0_573, %c0_574, %c0_575] : memref<6x1x1x6xf32, #tpu.memory_space<vmem>>, vector<1x1x1x6xf32>
    %1551 = vector.shape_cast %1550 : vector<1x1x1x6xf32> to vector<1x6xf32>
    %cst_576 = arith.constant dense<0.000000e+00> : vector<1x64xf32>
    %1552 = tpu.matmul %1527, %14, %cst_576 {dimension_numbers = #tpu.dot_dimension_numbers<[1], [0], [0], [1], [0, 0, 1, 1], [], []>} : vector<1x32xf32>, vector<32x64xf32>, vector<1x64xf32> -> vector<1x64xf32>
    %1553 = arith.addf %1552, %15 : vector<1x64xf32>
    %cst_577 = arith.constant 0.000000e+00 : f32
    %1554 = vector.broadcast %cst_577 : f32 to vector<1x64xf32>
    %1555 = arith.maximumf %1553, %1554 : vector<1x64xf32>
    %cst_578 = arith.constant dense<0.000000e+00> : vector<1x5xf32>
    %1556 = tpu.matmul %1555, %16, %cst_578 {dimension_numbers = #tpu.dot_dimension_numbers<[1], [0], [0], [1], [0, 0, 1, 1], [], []>} : vector<1x64xf32>, vector<64x5xf32>, vector<1x5xf32> -> vector<1x5xf32>
    %1557 = arith.addf %1556, %17 : vector<1x5xf32>
    %cst_579 = arith.constant dense<0xFF800000> : vector<1xf32>
    %1558 = vector.multi_reduction <maximumf>, %1557, %cst_579 [1] : vector<1x5xf32> to vector<1xf32>
    %1559 = vector.shape_cast %1558 : vector<1xf32> to vector<1x1xf32>
    %1560 = vector.broadcast %1559 : vector<1x1xf32> to vector<1x5xf32>
    %1561 = arith.subf %1557, %1560 : vector<1x5xf32>
    %1562 = math.exp %1561 : vector<1x5xf32>
    %cst_580 = arith.constant dense<0.000000e+00> : vector<1xf32>
    %1563 = vector.multi_reduction <add>, %1562, %cst_580 [1] : vector<1x5xf32> to vector<1xf32>
    %1564 = vector.shape_cast %1563 : vector<1xf32> to vector<1x1xf32>
    %1565 = math.log %1564 : vector<1x1xf32>
    %1566 = vector.broadcast %1565 : vector<1x1xf32> to vector<1x5xf32>
    %1567 = arith.subf %1561, %1566 : vector<1x5xf32>
    %1568 = arith.mulf %1567, %1549 : vector<1x5xf32>
    %1569 = vector.shape_cast %1568 : vector<1x5xf32> to vector<1x1x5xf32>
    %cst_581 = arith.constant dense<0.000000e+00> : vector<1xf32>
    %1570 = vector.multi_reduction <add>, %1569, %cst_581 [1, 2] : vector<1x1x5xf32> to vector<1xf32>
    %1571 = vector.shape_cast %1570 : vector<1xf32> to vector<1x1x1xf32>
    %1572 = vector.extract %1571[0, 0, 0] : f32 from vector<1x1x1xf32>
    %1573 = vector.broadcast %1572 : f32 to vector<1x1xf32>
    %1574 = arith.addf %1494, %1573 : vector<1x1xf32>
    %cst_582 = arith.constant dense<0.000000e+00> : vector<1x96xf32>
    %1575 = tpu.matmul %1549, %4, %cst_582 {dimension_numbers = #tpu.dot_dimension_numbers<[1], [0], [0], [1], [0, 0, 1, 1], [], []>} : vector<1x5xf32>, vector<5x96xf32>, vector<1x96xf32> -> vector<1x96xf32>
    %1576 = arith.addf %1575, %6 : vector<1x96xf32>
    %1577 = vector.extract_strided_slice %1576 {offsets = [0, 0], sizes = [1, 32], strides = [1, 1]} : vector<1x96xf32> to vector<1x32xf32>
    %1578 = vector.extract_strided_slice %7 {offsets = [0, 0], sizes = [1, 32], strides = [1, 1]} : vector<1x96xf32> to vector<1x32xf32>
    %1579 = arith.addf %1577, %1578 : vector<1x32xf32>
    %1580 = arith.negf %1579 : vector<1x32xf32>
    %1581 = math.exp %1580 : vector<1x32xf32>
    %cst_583 = arith.constant 1.000000e+00 : f32
    %1582 = vector.broadcast %cst_583 : f32 to vector<1x32xf32>
    %1583 = arith.addf %1582, %1581 : vector<1x32xf32>
    %1584 = arith.divf %1582, %1583 : vector<1x32xf32>
    %1585 = vector.extract_strided_slice %1576 {offsets = [0, 32], sizes = [1, 32], strides = [1, 1]} : vector<1x96xf32> to vector<1x32xf32>
    %1586 = vector.extract_strided_slice %7 {offsets = [0, 32], sizes = [1, 32], strides = [1, 1]} : vector<1x96xf32> to vector<1x32xf32>
    %1587 = arith.addf %1585, %1586 : vector<1x32xf32>
    %1588 = arith.negf %1587 : vector<1x32xf32>
    %1589 = math.exp %1588 : vector<1x32xf32>
    %cst_584 = arith.constant 1.000000e+00 : f32
    %1590 = vector.broadcast %cst_584 : f32 to vector<1x32xf32>
    %1591 = arith.addf %1590, %1589 : vector<1x32xf32>
    %1592 = arith.divf %1590, %1591 : vector<1x32xf32>
    %1593 = vector.extract_strided_slice %1576 {offsets = [0, 64], sizes = [1, 32], strides = [1, 1]} : vector<1x96xf32> to vector<1x32xf32>
    %1594 = vector.extract_strided_slice %7 {offsets = [0, 64], sizes = [1, 32], strides = [1, 1]} : vector<1x96xf32> to vector<1x32xf32>
    %1595 = arith.mulf %1584, %1594 : vector<1x32xf32>
    %1596 = arith.addf %1593, %1595 : vector<1x32xf32>
    %1597 = math.tanh %1596 : vector<1x32xf32>
    %cst_585 = arith.constant 1.000000e+00 : f32
    %1598 = vector.broadcast %cst_585 : f32 to vector<1x32xf32>
    %1599 = arith.subf %1598, %1592 : vector<1x32xf32>
    %1600 = arith.mulf %1599, %1597 : vector<1x32xf32>
    %1601 = arith.mulf %1592, %28 : vector<1x32xf32>
    %1602 = arith.addf %1600, %1601 : vector<1x32xf32>
    %c4_586 = arith.constant 4 : index
    %c0_587 = arith.constant 0 : index
    %c0_588 = arith.constant 0 : index
    %1603 = vector.load %arg34[%c4_586, %c0_587, %c0_588] : memref<6x1x128xf32, #tpu.memory_space<vmem>>, vector<1x1x128xf32>
    %1604 = vector.shape_cast %1603 : vector<1x1x128xf32> to vector<1x128xf32>
    %cst_589 = arith.constant dense<0.000000e+00> : vector<1x128xf32>
    %1605 = tpu.matmul %1602, %19, %cst_589 {dimension_numbers = #tpu.dot_dimension_numbers<[1], [0], [0], [1], [0, 0, 1, 1], [], []>} : vector<1x32xf32>, vector<32x128xf32>, vector<1x128xf32> -> vector<1x128xf32>
    %1606 = arith.addf %1604, %1605 : vector<1x128xf32>
    %1607 = arith.addf %1606, %20 : vector<1x128xf32>
    %cst_590 = arith.constant 0.000000e+00 : f32
    %1608 = vector.broadcast %cst_590 : f32 to vector<1x128xf32>
    %1609 = arith.maximumf %1607, %1608 : vector<1x128xf32>
    %1610 = arith.mulf %1609, %21 : vector<1x128xf32>
    %cst_591 = arith.constant dense<0.000000e+00> : vector<1xf32>
    %1611 = vector.multi_reduction <add>, %1610, %cst_591 [1] : vector<1x128xf32> to vector<1xf32>
    %1612 = vector.shape_cast %1611 : vector<1xf32> to vector<1x1xf32>
    %1613 = arith.addf %1612, %22 : vector<1x1xf32>
    %1614 = math.absf %1613 : vector<1x1xf32>
    %cst_592 = arith.constant 0.000000e+00 : f32
    %1615 = vector.broadcast %cst_592 : f32 to vector<1x1xf32>
    %1616 = arith.subf %1615, %1614 : vector<1x1xf32>
    %1617 = math.exp %1616 : vector<1x1xf32>
    %cst_593 = arith.constant 0.000000e+00 : f32
    %1618 = vector.broadcast %cst_593 : f32 to vector<1x1xf32>
    %1619 = arith.minimumf %1613, %1618 : vector<1x1xf32>
    %cst_594 = arith.constant 1.000000e+00 : f32
    %1620 = vector.broadcast %cst_594 : f32 to vector<1x1xf32>
    %1621 = arith.addf %1620, %1617 : vector<1x1xf32>
    %1622 = math.log %1621 : vector<1x1xf32>
    %1623 = arith.subf %1619, %1622 : vector<1x1xf32>
    %cst_595 = arith.constant -1.000000e+02 : f32
    %1624 = vector.broadcast %cst_595 : f32 to vector<1x1xf32>
    %1625 = arith.maximumf %1623, %1624 : vector<1x1xf32>
    %cst_596 = arith.constant 0.000000e+00 : f32
    %1626 = vector.broadcast %cst_596 : f32 to vector<1x1xf32>
    %1627 = arith.subf %1626, %1613 : vector<1x1xf32>
    %cst_597 = arith.constant 0.000000e+00 : f32
    %1628 = vector.broadcast %cst_597 : f32 to vector<1x1xf32>
    %1629 = arith.minimumf %1627, %1628 : vector<1x1xf32>
    %cst_598 = arith.constant 1.000000e+00 : f32
    %1630 = vector.broadcast %cst_598 : f32 to vector<1x1xf32>
    %1631 = arith.addf %1630, %1617 : vector<1x1xf32>
    %1632 = math.log %1631 : vector<1x1xf32>
    %1633 = arith.subf %1629, %1632 : vector<1x1xf32>
    %cst_599 = arith.constant -1.000000e+02 : f32
    %1634 = vector.broadcast %cst_599 : f32 to vector<1x1xf32>
    %1635 = arith.maximumf %1633, %1634 : vector<1x1xf32>
    %1636 = vector.extract_strided_slice %1551 {offsets = [0, 4], sizes = [1, 1], strides = [1, 1]} : vector<1x6xf32> to vector<1x1xf32>
    %1637 = arith.mulf %1636, %1625 : vector<1x1xf32>
    %cst_600 = arith.constant 1.000000e+00 : f32
    %1638 = vector.broadcast %cst_600 : f32 to vector<1x1xf32>
    %1639 = arith.subf %1638, %1636 : vector<1x1xf32>
    %1640 = arith.mulf %1639, %1635 : vector<1x1xf32>
    %1641 = arith.addf %1637, %1640 : vector<1x1xf32>
    %1642 = vector.shape_cast %1641 : vector<1x1xf32> to vector<1x1x1xf32>
    %cst_601 = arith.constant dense<0.000000e+00> : vector<1xf32>
    %1643 = vector.multi_reduction <add>, %1642, %cst_601 [1, 2] : vector<1x1x1xf32> to vector<1xf32>
    %1644 = vector.shape_cast %1643 : vector<1xf32> to vector<1x1x1xf32>
    %1645 = vector.extract %1644[0, 0, 0] : f32 from vector<1x1x1xf32>
    %1646 = vector.broadcast %1645 : f32 to vector<1x1xf32>
    %1647 = arith.addf %1574, %1646 : vector<1x1xf32>
    %c4_602 = arith.constant 4 : index
    %c0_603 = arith.constant 0 : index
    %c0_604 = arith.constant 0 : index
    %1648 = vector.load %arg33[%c4_602, %c0_603, %c0_604] : memref<6x1x32xf32, #tpu.memory_space<vmem>>, vector<1x1x32xf32>
    %1649 = vector.shape_cast %1648 : vector<1x1x32xf32> to vector<1x32xf32>
    %1650 = vector.broadcast %1636 : vector<1x1xf32> to vector<1x32xf32>
    %1651 = arith.mulf %1650, %1649 : vector<1x32xf32>
    %1652 = arith.addf %28, %1651 : vector<1x32xf32>
    %cst_605 = arith.constant dense<0.000000e+00> : vector<1x96xf32>
    %1653 = tpu.matmul %1652, %5, %cst_605 {dimension_numbers = #tpu.dot_dimension_numbers<[1], [0], [0], [1], [0, 0, 1, 1], [], []>} : vector<1x32xf32>, vector<32x96xf32>, vector<1x96xf32> -> vector<1x96xf32>
    %1654 = arith.addf %1653, %7 : vector<1x96xf32>
    %1655 = vector.extract_strided_slice %1576 {offsets = [0, 0], sizes = [1, 32], strides = [1, 1]} : vector<1x96xf32> to vector<1x32xf32>
    %1656 = vector.extract_strided_slice %1654 {offsets = [0, 0], sizes = [1, 32], strides = [1, 1]} : vector<1x96xf32> to vector<1x32xf32>
    %1657 = arith.addf %1655, %1656 : vector<1x32xf32>
    %1658 = arith.negf %1657 : vector<1x32xf32>
    %1659 = math.exp %1658 : vector<1x32xf32>
    %cst_606 = arith.constant 1.000000e+00 : f32
    %1660 = vector.broadcast %cst_606 : f32 to vector<1x32xf32>
    %1661 = arith.addf %1660, %1659 : vector<1x32xf32>
    %1662 = arith.divf %1660, %1661 : vector<1x32xf32>
    %1663 = vector.extract_strided_slice %1576 {offsets = [0, 32], sizes = [1, 32], strides = [1, 1]} : vector<1x96xf32> to vector<1x32xf32>
    %1664 = vector.extract_strided_slice %1654 {offsets = [0, 32], sizes = [1, 32], strides = [1, 1]} : vector<1x96xf32> to vector<1x32xf32>
    %1665 = arith.addf %1663, %1664 : vector<1x32xf32>
    %1666 = arith.negf %1665 : vector<1x32xf32>
    %1667 = math.exp %1666 : vector<1x32xf32>
    %cst_607 = arith.constant 1.000000e+00 : f32
    %1668 = vector.broadcast %cst_607 : f32 to vector<1x32xf32>
    %1669 = arith.addf %1668, %1667 : vector<1x32xf32>
    %1670 = arith.divf %1668, %1669 : vector<1x32xf32>
    %1671 = vector.extract_strided_slice %1576 {offsets = [0, 64], sizes = [1, 32], strides = [1, 1]} : vector<1x96xf32> to vector<1x32xf32>
    %1672 = vector.extract_strided_slice %1654 {offsets = [0, 64], sizes = [1, 32], strides = [1, 1]} : vector<1x96xf32> to vector<1x32xf32>
    %1673 = arith.mulf %1662, %1672 : vector<1x32xf32>
    %1674 = arith.addf %1671, %1673 : vector<1x32xf32>
    %1675 = math.tanh %1674 : vector<1x32xf32>
    %cst_608 = arith.constant 1.000000e+00 : f32
    %1676 = vector.broadcast %cst_608 : f32 to vector<1x32xf32>
    %1677 = arith.subf %1676, %1670 : vector<1x32xf32>
    %1678 = arith.mulf %1677, %1675 : vector<1x32xf32>
    %1679 = arith.mulf %1670, %1652 : vector<1x32xf32>
    %1680 = arith.addf %1678, %1679 : vector<1x32xf32>
    %c3_609 = arith.constant 3 : index
    %c0_610 = arith.constant 0 : index
    %c0_611 = arith.constant 0 : index
    %1681 = vector.load %arg34[%c3_609, %c0_610, %c0_611] : memref<6x1x128xf32, #tpu.memory_space<vmem>>, vector<1x1x128xf32>
    %1682 = vector.shape_cast %1681 : vector<1x1x128xf32> to vector<1x128xf32>
    %cst_612 = arith.constant dense<0.000000e+00> : vector<1x128xf32>
    %1683 = tpu.matmul %1680, %19, %cst_612 {dimension_numbers = #tpu.dot_dimension_numbers<[1], [0], [0], [1], [0, 0, 1, 1], [], []>} : vector<1x32xf32>, vector<32x128xf32>, vector<1x128xf32> -> vector<1x128xf32>
    %1684 = arith.addf %1682, %1683 : vector<1x128xf32>
    %1685 = arith.addf %1684, %20 : vector<1x128xf32>
    %cst_613 = arith.constant 0.000000e+00 : f32
    %1686 = vector.broadcast %cst_613 : f32 to vector<1x128xf32>
    %1687 = arith.maximumf %1685, %1686 : vector<1x128xf32>
    %1688 = arith.mulf %1687, %21 : vector<1x128xf32>
    %cst_614 = arith.constant dense<0.000000e+00> : vector<1xf32>
    %1689 = vector.multi_reduction <add>, %1688, %cst_614 [1] : vector<1x128xf32> to vector<1xf32>
    %1690 = vector.shape_cast %1689 : vector<1xf32> to vector<1x1xf32>
    %1691 = arith.addf %1690, %22 : vector<1x1xf32>
    %1692 = math.absf %1691 : vector<1x1xf32>
    %cst_615 = arith.constant 0.000000e+00 : f32
    %1693 = vector.broadcast %cst_615 : f32 to vector<1x1xf32>
    %1694 = arith.subf %1693, %1692 : vector<1x1xf32>
    %1695 = math.exp %1694 : vector<1x1xf32>
    %cst_616 = arith.constant 0.000000e+00 : f32
    %1696 = vector.broadcast %cst_616 : f32 to vector<1x1xf32>
    %1697 = arith.minimumf %1691, %1696 : vector<1x1xf32>
    %cst_617 = arith.constant 1.000000e+00 : f32
    %1698 = vector.broadcast %cst_617 : f32 to vector<1x1xf32>
    %1699 = arith.addf %1698, %1695 : vector<1x1xf32>
    %1700 = math.log %1699 : vector<1x1xf32>
    %1701 = arith.subf %1697, %1700 : vector<1x1xf32>
    %cst_618 = arith.constant -1.000000e+02 : f32
    %1702 = vector.broadcast %cst_618 : f32 to vector<1x1xf32>
    %1703 = arith.maximumf %1701, %1702 : vector<1x1xf32>
    %cst_619 = arith.constant 0.000000e+00 : f32
    %1704 = vector.broadcast %cst_619 : f32 to vector<1x1xf32>
    %1705 = arith.subf %1704, %1691 : vector<1x1xf32>
    %cst_620 = arith.constant 0.000000e+00 : f32
    %1706 = vector.broadcast %cst_620 : f32 to vector<1x1xf32>
    %1707 = arith.minimumf %1705, %1706 : vector<1x1xf32>
    %cst_621 = arith.constant 1.000000e+00 : f32
    %1708 = vector.broadcast %cst_621 : f32 to vector<1x1xf32>
    %1709 = arith.addf %1708, %1695 : vector<1x1xf32>
    %1710 = math.log %1709 : vector<1x1xf32>
    %1711 = arith.subf %1707, %1710 : vector<1x1xf32>
    %cst_622 = arith.constant -1.000000e+02 : f32
    %1712 = vector.broadcast %cst_622 : f32 to vector<1x1xf32>
    %1713 = arith.maximumf %1711, %1712 : vector<1x1xf32>
    %1714 = vector.extract_strided_slice %1551 {offsets = [0, 3], sizes = [1, 1], strides = [1, 1]} : vector<1x6xf32> to vector<1x1xf32>
    %1715 = arith.mulf %1714, %1703 : vector<1x1xf32>
    %cst_623 = arith.constant 1.000000e+00 : f32
    %1716 = vector.broadcast %cst_623 : f32 to vector<1x1xf32>
    %1717 = arith.subf %1716, %1714 : vector<1x1xf32>
    %1718 = arith.mulf %1717, %1713 : vector<1x1xf32>
    %1719 = arith.addf %1715, %1718 : vector<1x1xf32>
    %1720 = vector.shape_cast %1719 : vector<1x1xf32> to vector<1x1x1xf32>
    %cst_624 = arith.constant dense<0.000000e+00> : vector<1xf32>
    %1721 = vector.multi_reduction <add>, %1720, %cst_624 [1, 2] : vector<1x1x1xf32> to vector<1xf32>
    %1722 = vector.shape_cast %1721 : vector<1xf32> to vector<1x1x1xf32>
    %1723 = vector.extract %1722[0, 0, 0] : f32 from vector<1x1x1xf32>
    %1724 = vector.broadcast %1723 : f32 to vector<1x1xf32>
    %1725 = arith.addf %1647, %1724 : vector<1x1xf32>
    %c3_625 = arith.constant 3 : index
    %c0_626 = arith.constant 0 : index
    %c0_627 = arith.constant 0 : index
    %1726 = vector.load %arg33[%c3_625, %c0_626, %c0_627] : memref<6x1x32xf32, #tpu.memory_space<vmem>>, vector<1x1x32xf32>
    %1727 = vector.shape_cast %1726 : vector<1x1x32xf32> to vector<1x32xf32>
    %1728 = vector.broadcast %1714 : vector<1x1xf32> to vector<1x32xf32>
    %1729 = arith.mulf %1728, %1727 : vector<1x32xf32>
    %1730 = arith.addf %1652, %1729 : vector<1x32xf32>
    %cst_628 = arith.constant dense<0.000000e+00> : vector<1x96xf32>
    %1731 = tpu.matmul %1730, %5, %cst_628 {dimension_numbers = #tpu.dot_dimension_numbers<[1], [0], [0], [1], [0, 0, 1, 1], [], []>} : vector<1x32xf32>, vector<32x96xf32>, vector<1x96xf32> -> vector<1x96xf32>
    %1732 = arith.addf %1731, %7 : vector<1x96xf32>
    %1733 = vector.extract_strided_slice %1576 {offsets = [0, 0], sizes = [1, 32], strides = [1, 1]} : vector<1x96xf32> to vector<1x32xf32>
    %1734 = vector.extract_strided_slice %1732 {offsets = [0, 0], sizes = [1, 32], strides = [1, 1]} : vector<1x96xf32> to vector<1x32xf32>
    %1735 = arith.addf %1733, %1734 : vector<1x32xf32>
    %1736 = arith.negf %1735 : vector<1x32xf32>
    %1737 = math.exp %1736 : vector<1x32xf32>
    %cst_629 = arith.constant 1.000000e+00 : f32
    %1738 = vector.broadcast %cst_629 : f32 to vector<1x32xf32>
    %1739 = arith.addf %1738, %1737 : vector<1x32xf32>
    %1740 = arith.divf %1738, %1739 : vector<1x32xf32>
    %1741 = vector.extract_strided_slice %1576 {offsets = [0, 32], sizes = [1, 32], strides = [1, 1]} : vector<1x96xf32> to vector<1x32xf32>
    %1742 = vector.extract_strided_slice %1732 {offsets = [0, 32], sizes = [1, 32], strides = [1, 1]} : vector<1x96xf32> to vector<1x32xf32>
    %1743 = arith.addf %1741, %1742 : vector<1x32xf32>
    %1744 = arith.negf %1743 : vector<1x32xf32>
    %1745 = math.exp %1744 : vector<1x32xf32>
    %cst_630 = arith.constant 1.000000e+00 : f32
    %1746 = vector.broadcast %cst_630 : f32 to vector<1x32xf32>
    %1747 = arith.addf %1746, %1745 : vector<1x32xf32>
    %1748 = arith.divf %1746, %1747 : vector<1x32xf32>
    %1749 = vector.extract_strided_slice %1576 {offsets = [0, 64], sizes = [1, 32], strides = [1, 1]} : vector<1x96xf32> to vector<1x32xf32>
    %1750 = vector.extract_strided_slice %1732 {offsets = [0, 64], sizes = [1, 32], strides = [1, 1]} : vector<1x96xf32> to vector<1x32xf32>
    %1751 = arith.mulf %1740, %1750 : vector<1x32xf32>
    %1752 = arith.addf %1749, %1751 : vector<1x32xf32>
    %1753 = math.tanh %1752 : vector<1x32xf32>
    %cst_631 = arith.constant 1.000000e+00 : f32
    %1754 = vector.broadcast %cst_631 : f32 to vector<1x32xf32>
    %1755 = arith.subf %1754, %1748 : vector<1x32xf32>
    %1756 = arith.mulf %1755, %1753 : vector<1x32xf32>
    %1757 = arith.mulf %1748, %1730 : vector<1x32xf32>
    %1758 = arith.addf %1756, %1757 : vector<1x32xf32>
    %c2_632 = arith.constant 2 : index
    %c0_633 = arith.constant 0 : index
    %c0_634 = arith.constant 0 : index
    %1759 = vector.load %arg34[%c2_632, %c0_633, %c0_634] : memref<6x1x128xf32, #tpu.memory_space<vmem>>, vector<1x1x128xf32>
    %1760 = vector.shape_cast %1759 : vector<1x1x128xf32> to vector<1x128xf32>
    %cst_635 = arith.constant dense<0.000000e+00> : vector<1x128xf32>
    %1761 = tpu.matmul %1758, %19, %cst_635 {dimension_numbers = #tpu.dot_dimension_numbers<[1], [0], [0], [1], [0, 0, 1, 1], [], []>} : vector<1x32xf32>, vector<32x128xf32>, vector<1x128xf32> -> vector<1x128xf32>
    %1762 = arith.addf %1760, %1761 : vector<1x128xf32>
    %1763 = arith.addf %1762, %20 : vector<1x128xf32>
    %cst_636 = arith.constant 0.000000e+00 : f32
    %1764 = vector.broadcast %cst_636 : f32 to vector<1x128xf32>
    %1765 = arith.maximumf %1763, %1764 : vector<1x128xf32>
    %1766 = arith.mulf %1765, %21 : vector<1x128xf32>
    %cst_637 = arith.constant dense<0.000000e+00> : vector<1xf32>
    %1767 = vector.multi_reduction <add>, %1766, %cst_637 [1] : vector<1x128xf32> to vector<1xf32>
    %1768 = vector.shape_cast %1767 : vector<1xf32> to vector<1x1xf32>
    %1769 = arith.addf %1768, %22 : vector<1x1xf32>
    %1770 = math.absf %1769 : vector<1x1xf32>
    %cst_638 = arith.constant 0.000000e+00 : f32
    %1771 = vector.broadcast %cst_638 : f32 to vector<1x1xf32>
    %1772 = arith.subf %1771, %1770 : vector<1x1xf32>
    %1773 = math.exp %1772 : vector<1x1xf32>
    %cst_639 = arith.constant 0.000000e+00 : f32
    %1774 = vector.broadcast %cst_639 : f32 to vector<1x1xf32>
    %1775 = arith.minimumf %1769, %1774 : vector<1x1xf32>
    %cst_640 = arith.constant 1.000000e+00 : f32
    %1776 = vector.broadcast %cst_640 : f32 to vector<1x1xf32>
    %1777 = arith.addf %1776, %1773 : vector<1x1xf32>
    %1778 = math.log %1777 : vector<1x1xf32>
    %1779 = arith.subf %1775, %1778 : vector<1x1xf32>
    %cst_641 = arith.constant -1.000000e+02 : f32
    %1780 = vector.broadcast %cst_641 : f32 to vector<1x1xf32>
    %1781 = arith.maximumf %1779, %1780 : vector<1x1xf32>
    %cst_642 = arith.constant 0.000000e+00 : f32
    %1782 = vector.broadcast %cst_642 : f32 to vector<1x1xf32>
    %1783 = arith.subf %1782, %1769 : vector<1x1xf32>
    %cst_643 = arith.constant 0.000000e+00 : f32
    %1784 = vector.broadcast %cst_643 : f32 to vector<1x1xf32>
    %1785 = arith.minimumf %1783, %1784 : vector<1x1xf32>
    %cst_644 = arith.constant 1.000000e+00 : f32
    %1786 = vector.broadcast %cst_644 : f32 to vector<1x1xf32>
    %1787 = arith.addf %1786, %1773 : vector<1x1xf32>
    %1788 = math.log %1787 : vector<1x1xf32>
    %1789 = arith.subf %1785, %1788 : vector<1x1xf32>
    %cst_645 = arith.constant -1.000000e+02 : f32
    %1790 = vector.broadcast %cst_645 : f32 to vector<1x1xf32>
    %1791 = arith.maximumf %1789, %1790 : vector<1x1xf32>
    %1792 = vector.extract_strided_slice %1551 {offsets = [0, 2], sizes = [1, 1], strides = [1, 1]} : vector<1x6xf32> to vector<1x1xf32>
    %1793 = arith.mulf %1792, %1781 : vector<1x1xf32>
    %cst_646 = arith.constant 1.000000e+00 : f32
    %1794 = vector.broadcast %cst_646 : f32 to vector<1x1xf32>
    %1795 = arith.subf %1794, %1792 : vector<1x1xf32>
    %1796 = arith.mulf %1795, %1791 : vector<1x1xf32>
    %1797 = arith.addf %1793, %1796 : vector<1x1xf32>
    %1798 = vector.shape_cast %1797 : vector<1x1xf32> to vector<1x1x1xf32>
    %cst_647 = arith.constant dense<0.000000e+00> : vector<1xf32>
    %1799 = vector.multi_reduction <add>, %1798, %cst_647 [1, 2] : vector<1x1x1xf32> to vector<1xf32>
    %1800 = vector.shape_cast %1799 : vector<1xf32> to vector<1x1x1xf32>
    %1801 = vector.extract %1800[0, 0, 0] : f32 from vector<1x1x1xf32>
    %1802 = vector.broadcast %1801 : f32 to vector<1x1xf32>
    %1803 = arith.addf %1725, %1802 : vector<1x1xf32>
    %c2_648 = arith.constant 2 : index
    %c0_649 = arith.constant 0 : index
    %c0_650 = arith.constant 0 : index
    %1804 = vector.load %arg33[%c2_648, %c0_649, %c0_650] : memref<6x1x32xf32, #tpu.memory_space<vmem>>, vector<1x1x32xf32>
    %1805 = vector.shape_cast %1804 : vector<1x1x32xf32> to vector<1x32xf32>
    %1806 = vector.broadcast %1792 : vector<1x1xf32> to vector<1x32xf32>
    %1807 = arith.mulf %1806, %1805 : vector<1x32xf32>
    %1808 = arith.addf %1730, %1807 : vector<1x32xf32>
    %cst_651 = arith.constant dense<0.000000e+00> : vector<1x96xf32>
    %1809 = tpu.matmul %1808, %5, %cst_651 {dimension_numbers = #tpu.dot_dimension_numbers<[1], [0], [0], [1], [0, 0, 1, 1], [], []>} : vector<1x32xf32>, vector<32x96xf32>, vector<1x96xf32> -> vector<1x96xf32>
    %1810 = arith.addf %1809, %7 : vector<1x96xf32>
    %1811 = vector.extract_strided_slice %1576 {offsets = [0, 0], sizes = [1, 32], strides = [1, 1]} : vector<1x96xf32> to vector<1x32xf32>
    %1812 = vector.extract_strided_slice %1810 {offsets = [0, 0], sizes = [1, 32], strides = [1, 1]} : vector<1x96xf32> to vector<1x32xf32>
    %1813 = arith.addf %1811, %1812 : vector<1x32xf32>
    %1814 = arith.negf %1813 : vector<1x32xf32>
    %1815 = math.exp %1814 : vector<1x32xf32>
    %cst_652 = arith.constant 1.000000e+00 : f32
    %1816 = vector.broadcast %cst_652 : f32 to vector<1x32xf32>
    %1817 = arith.addf %1816, %1815 : vector<1x32xf32>
    %1818 = arith.divf %1816, %1817 : vector<1x32xf32>
    %1819 = vector.extract_strided_slice %1576 {offsets = [0, 32], sizes = [1, 32], strides = [1, 1]} : vector<1x96xf32> to vector<1x32xf32>
    %1820 = vector.extract_strided_slice %1810 {offsets = [0, 32], sizes = [1, 32], strides = [1, 1]} : vector<1x96xf32> to vector<1x32xf32>
    %1821 = arith.addf %1819, %1820 : vector<1x32xf32>
    %1822 = arith.negf %1821 : vector<1x32xf32>
    %1823 = math.exp %1822 : vector<1x32xf32>
    %cst_653 = arith.constant 1.000000e+00 : f32
    %1824 = vector.broadcast %cst_653 : f32 to vector<1x32xf32>
    %1825 = arith.addf %1824, %1823 : vector<1x32xf32>
    %1826 = arith.divf %1824, %1825 : vector<1x32xf32>
    %1827 = vector.extract_strided_slice %1576 {offsets = [0, 64], sizes = [1, 32], strides = [1, 1]} : vector<1x96xf32> to vector<1x32xf32>
    %1828 = vector.extract_strided_slice %1810 {offsets = [0, 64], sizes = [1, 32], strides = [1, 1]} : vector<1x96xf32> to vector<1x32xf32>
    %1829 = arith.mulf %1818, %1828 : vector<1x32xf32>
    %1830 = arith.addf %1827, %1829 : vector<1x32xf32>
    %1831 = math.tanh %1830 : vector<1x32xf32>
    %cst_654 = arith.constant 1.000000e+00 : f32
    %1832 = vector.broadcast %cst_654 : f32 to vector<1x32xf32>
    %1833 = arith.subf %1832, %1826 : vector<1x32xf32>
    %1834 = arith.mulf %1833, %1831 : vector<1x32xf32>
    %1835 = arith.mulf %1826, %1808 : vector<1x32xf32>
    %1836 = arith.addf %1834, %1835 : vector<1x32xf32>
    %c1_655 = arith.constant 1 : index
    %c0_656 = arith.constant 0 : index
    %c0_657 = arith.constant 0 : index
    %1837 = vector.load %arg34[%c1_655, %c0_656, %c0_657] : memref<6x1x128xf32, #tpu.memory_space<vmem>>, vector<1x1x128xf32>
    %1838 = vector.shape_cast %1837 : vector<1x1x128xf32> to vector<1x128xf32>
    %cst_658 = arith.constant dense<0.000000e+00> : vector<1x128xf32>
    %1839 = tpu.matmul %1836, %19, %cst_658 {dimension_numbers = #tpu.dot_dimension_numbers<[1], [0], [0], [1], [0, 0, 1, 1], [], []>} : vector<1x32xf32>, vector<32x128xf32>, vector<1x128xf32> -> vector<1x128xf32>
    %1840 = arith.addf %1838, %1839 : vector<1x128xf32>
    %1841 = arith.addf %1840, %20 : vector<1x128xf32>
    %cst_659 = arith.constant 0.000000e+00 : f32
    %1842 = vector.broadcast %cst_659 : f32 to vector<1x128xf32>
    %1843 = arith.maximumf %1841, %1842 : vector<1x128xf32>
    %1844 = arith.mulf %1843, %21 : vector<1x128xf32>
    %cst_660 = arith.constant dense<0.000000e+00> : vector<1xf32>
    %1845 = vector.multi_reduction <add>, %1844, %cst_660 [1] : vector<1x128xf32> to vector<1xf32>
    %1846 = vector.shape_cast %1845 : vector<1xf32> to vector<1x1xf32>
    %1847 = arith.addf %1846, %22 : vector<1x1xf32>
    %1848 = math.absf %1847 : vector<1x1xf32>
    %cst_661 = arith.constant 0.000000e+00 : f32
    %1849 = vector.broadcast %cst_661 : f32 to vector<1x1xf32>
    %1850 = arith.subf %1849, %1848 : vector<1x1xf32>
    %1851 = math.exp %1850 : vector<1x1xf32>
    %cst_662 = arith.constant 0.000000e+00 : f32
    %1852 = vector.broadcast %cst_662 : f32 to vector<1x1xf32>
    %1853 = arith.minimumf %1847, %1852 : vector<1x1xf32>
    %cst_663 = arith.constant 1.000000e+00 : f32
    %1854 = vector.broadcast %cst_663 : f32 to vector<1x1xf32>
    %1855 = arith.addf %1854, %1851 : vector<1x1xf32>
    %1856 = math.log %1855 : vector<1x1xf32>
    %1857 = arith.subf %1853, %1856 : vector<1x1xf32>
    %cst_664 = arith.constant -1.000000e+02 : f32
    %1858 = vector.broadcast %cst_664 : f32 to vector<1x1xf32>
    %1859 = arith.maximumf %1857, %1858 : vector<1x1xf32>
    %cst_665 = arith.constant 0.000000e+00 : f32
    %1860 = vector.broadcast %cst_665 : f32 to vector<1x1xf32>
    %1861 = arith.subf %1860, %1847 : vector<1x1xf32>
    %cst_666 = arith.constant 0.000000e+00 : f32
    %1862 = vector.broadcast %cst_666 : f32 to vector<1x1xf32>
    %1863 = arith.minimumf %1861, %1862 : vector<1x1xf32>
    %cst_667 = arith.constant 1.000000e+00 : f32
    %1864 = vector.broadcast %cst_667 : f32 to vector<1x1xf32>
    %1865 = arith.addf %1864, %1851 : vector<1x1xf32>
    %1866 = math.log %1865 : vector<1x1xf32>
    %1867 = arith.subf %1863, %1866 : vector<1x1xf32>
    %cst_668 = arith.constant -1.000000e+02 : f32
    %1868 = vector.broadcast %cst_668 : f32 to vector<1x1xf32>
    %1869 = arith.maximumf %1867, %1868 : vector<1x1xf32>
    %1870 = vector.extract_strided_slice %1551 {offsets = [0, 1], sizes = [1, 1], strides = [1, 1]} : vector<1x6xf32> to vector<1x1xf32>
    %1871 = arith.mulf %1870, %1859 : vector<1x1xf32>
    %cst_669 = arith.constant 1.000000e+00 : f32
    %1872 = vector.broadcast %cst_669 : f32 to vector<1x1xf32>
    %1873 = arith.subf %1872, %1870 : vector<1x1xf32>
    %1874 = arith.mulf %1873, %1869 : vector<1x1xf32>
    %1875 = arith.addf %1871, %1874 : vector<1x1xf32>
    %1876 = vector.shape_cast %1875 : vector<1x1xf32> to vector<1x1x1xf32>
    %cst_670 = arith.constant dense<0.000000e+00> : vector<1xf32>
    %1877 = vector.multi_reduction <add>, %1876, %cst_670 [1, 2] : vector<1x1x1xf32> to vector<1xf32>
    %1878 = vector.shape_cast %1877 : vector<1xf32> to vector<1x1x1xf32>
    %1879 = vector.extract %1878[0, 0, 0] : f32 from vector<1x1x1xf32>
    %1880 = vector.broadcast %1879 : f32 to vector<1x1xf32>
    %1881 = arith.addf %1803, %1880 : vector<1x1xf32>
    %c1_671 = arith.constant 1 : index
    %c0_672 = arith.constant 0 : index
    %c0_673 = arith.constant 0 : index
    %1882 = vector.load %arg33[%c1_671, %c0_672, %c0_673] : memref<6x1x32xf32, #tpu.memory_space<vmem>>, vector<1x1x32xf32>
    %1883 = vector.shape_cast %1882 : vector<1x1x32xf32> to vector<1x32xf32>
    %1884 = vector.broadcast %1870 : vector<1x1xf32> to vector<1x32xf32>
    %1885 = arith.mulf %1884, %1883 : vector<1x32xf32>
    %1886 = arith.addf %1808, %1885 : vector<1x32xf32>
    %cst_674 = arith.constant dense<0.000000e+00> : vector<1x96xf32>
    %1887 = tpu.matmul %1886, %5, %cst_674 {dimension_numbers = #tpu.dot_dimension_numbers<[1], [0], [0], [1], [0, 0, 1, 1], [], []>} : vector<1x32xf32>, vector<32x96xf32>, vector<1x96xf32> -> vector<1x96xf32>
    %1888 = arith.addf %1887, %7 : vector<1x96xf32>
    %1889 = vector.extract_strided_slice %1576 {offsets = [0, 0], sizes = [1, 32], strides = [1, 1]} : vector<1x96xf32> to vector<1x32xf32>
    %1890 = vector.extract_strided_slice %1888 {offsets = [0, 0], sizes = [1, 32], strides = [1, 1]} : vector<1x96xf32> to vector<1x32xf32>
    %1891 = arith.addf %1889, %1890 : vector<1x32xf32>
    %1892 = arith.negf %1891 : vector<1x32xf32>
    %1893 = math.exp %1892 : vector<1x32xf32>
    %cst_675 = arith.constant 1.000000e+00 : f32
    %1894 = vector.broadcast %cst_675 : f32 to vector<1x32xf32>
    %1895 = arith.addf %1894, %1893 : vector<1x32xf32>
    %1896 = arith.divf %1894, %1895 : vector<1x32xf32>
    %1897 = vector.extract_strided_slice %1576 {offsets = [0, 32], sizes = [1, 32], strides = [1, 1]} : vector<1x96xf32> to vector<1x32xf32>
    %1898 = vector.extract_strided_slice %1888 {offsets = [0, 32], sizes = [1, 32], strides = [1, 1]} : vector<1x96xf32> to vector<1x32xf32>
    %1899 = arith.addf %1897, %1898 : vector<1x32xf32>
    %1900 = arith.negf %1899 : vector<1x32xf32>
    %1901 = math.exp %1900 : vector<1x32xf32>
    %cst_676 = arith.constant 1.000000e+00 : f32
    %1902 = vector.broadcast %cst_676 : f32 to vector<1x32xf32>
    %1903 = arith.addf %1902, %1901 : vector<1x32xf32>
    %1904 = arith.divf %1902, %1903 : vector<1x32xf32>
    %1905 = vector.extract_strided_slice %1576 {offsets = [0, 64], sizes = [1, 32], strides = [1, 1]} : vector<1x96xf32> to vector<1x32xf32>
    %1906 = vector.extract_strided_slice %1888 {offsets = [0, 64], sizes = [1, 32], strides = [1, 1]} : vector<1x96xf32> to vector<1x32xf32>
    %1907 = arith.mulf %1896, %1906 : vector<1x32xf32>
    %1908 = arith.addf %1905, %1907 : vector<1x32xf32>
    %1909 = math.tanh %1908 : vector<1x32xf32>
    %cst_677 = arith.constant 1.000000e+00 : f32
    %1910 = vector.broadcast %cst_677 : f32 to vector<1x32xf32>
    %1911 = arith.subf %1910, %1904 : vector<1x32xf32>
    %1912 = arith.mulf %1911, %1909 : vector<1x32xf32>
    %1913 = arith.mulf %1904, %1886 : vector<1x32xf32>
    %1914 = arith.addf %1912, %1913 : vector<1x32xf32>
    %c0_678 = arith.constant 0 : index
    %c0_679 = arith.constant 0 : index
    %c0_680 = arith.constant 0 : index
    %1915 = vector.load %arg34[%c0_678, %c0_679, %c0_680] : memref<6x1x128xf32, #tpu.memory_space<vmem>>, vector<1x1x128xf32>
    %1916 = vector.shape_cast %1915 : vector<1x1x128xf32> to vector<1x128xf32>
    %cst_681 = arith.constant dense<0.000000e+00> : vector<1x128xf32>
    %1917 = tpu.matmul %1914, %19, %cst_681 {dimension_numbers = #tpu.dot_dimension_numbers<[1], [0], [0], [1], [0, 0, 1, 1], [], []>} : vector<1x32xf32>, vector<32x128xf32>, vector<1x128xf32> -> vector<1x128xf32>
    %1918 = arith.addf %1916, %1917 : vector<1x128xf32>
    %1919 = arith.addf %1918, %20 : vector<1x128xf32>
    %cst_682 = arith.constant 0.000000e+00 : f32
    %1920 = vector.broadcast %cst_682 : f32 to vector<1x128xf32>
    %1921 = arith.maximumf %1919, %1920 : vector<1x128xf32>
    %1922 = arith.mulf %1921, %21 : vector<1x128xf32>
    %cst_683 = arith.constant dense<0.000000e+00> : vector<1xf32>
    %1923 = vector.multi_reduction <add>, %1922, %cst_683 [1] : vector<1x128xf32> to vector<1xf32>
    %1924 = vector.shape_cast %1923 : vector<1xf32> to vector<1x1xf32>
    %1925 = arith.addf %1924, %22 : vector<1x1xf32>
    %1926 = math.absf %1925 : vector<1x1xf32>
    %cst_684 = arith.constant 0.000000e+00 : f32
    %1927 = vector.broadcast %cst_684 : f32 to vector<1x1xf32>
    %1928 = arith.subf %1927, %1926 : vector<1x1xf32>
    %1929 = math.exp %1928 : vector<1x1xf32>
    %cst_685 = arith.constant 0.000000e+00 : f32
    %1930 = vector.broadcast %cst_685 : f32 to vector<1x1xf32>
    %1931 = arith.minimumf %1925, %1930 : vector<1x1xf32>
    %cst_686 = arith.constant 1.000000e+00 : f32
    %1932 = vector.broadcast %cst_686 : f32 to vector<1x1xf32>
    %1933 = arith.addf %1932, %1929 : vector<1x1xf32>
    %1934 = math.log %1933 : vector<1x1xf32>
    %1935 = arith.subf %1931, %1934 : vector<1x1xf32>
    %cst_687 = arith.constant -1.000000e+02 : f32
    %1936 = vector.broadcast %cst_687 : f32 to vector<1x1xf32>
    %1937 = arith.maximumf %1935, %1936 : vector<1x1xf32>
    %cst_688 = arith.constant 0.000000e+00 : f32
    %1938 = vector.broadcast %cst_688 : f32 to vector<1x1xf32>
    %1939 = arith.subf %1938, %1925 : vector<1x1xf32>
    %cst_689 = arith.constant 0.000000e+00 : f32
    %1940 = vector.broadcast %cst_689 : f32 to vector<1x1xf32>
    %1941 = arith.minimumf %1939, %1940 : vector<1x1xf32>
    %cst_690 = arith.constant 1.000000e+00 : f32
    %1942 = vector.broadcast %cst_690 : f32 to vector<1x1xf32>
    %1943 = arith.addf %1942, %1929 : vector<1x1xf32>
    %1944 = math.log %1943 : vector<1x1xf32>
    %1945 = arith.subf %1941, %1944 : vector<1x1xf32>
    %cst_691 = arith.constant -1.000000e+02 : f32
    %1946 = vector.broadcast %cst_691 : f32 to vector<1x1xf32>
    %1947 = arith.maximumf %1945, %1946 : vector<1x1xf32>
    %1948 = vector.extract_strided_slice %1551 {offsets = [0, 0], sizes = [1, 1], strides = [1, 1]} : vector<1x6xf32> to vector<1x1xf32>
    %1949 = arith.mulf %1948, %1937 : vector<1x1xf32>
    %cst_692 = arith.constant 1.000000e+00 : f32
    %1950 = vector.broadcast %cst_692 : f32 to vector<1x1xf32>
    %1951 = arith.subf %1950, %1948 : vector<1x1xf32>
    %1952 = arith.mulf %1951, %1947 : vector<1x1xf32>
    %1953 = arith.addf %1949, %1952 : vector<1x1xf32>
    %1954 = vector.shape_cast %1953 : vector<1x1xf32> to vector<1x1x1xf32>
    %cst_693 = arith.constant dense<0.000000e+00> : vector<1xf32>
    %1955 = vector.multi_reduction <add>, %1954, %cst_693 [1, 2] : vector<1x1x1xf32> to vector<1xf32>
    %1956 = vector.shape_cast %1955 : vector<1xf32> to vector<1x1x1xf32>
    %1957 = vector.extract %1956[0, 0, 0] : f32 from vector<1x1x1xf32>
    %1958 = vector.broadcast %1957 : f32 to vector<1x1xf32>
    %1959 = arith.addf %1881, %1958 : vector<1x1xf32>
    %cst_694 = arith.constant 1.000000e+00 : f32
    %1960 = vector.broadcast %cst_694 : f32 to vector<1x16xf32>
    %1961 = arith.addf %1960, %402 : vector<1x16xf32>
    %1962 = arith.mulf %400, %400 : vector<1x16xf32>
    %1963 = arith.subf %1961, %1962 : vector<1x16xf32>
    %1964 = math.exp %402 : vector<1x16xf32>
    %1965 = arith.subf %1963, %1964 : vector<1x16xf32>
    %1966 = vector.shape_cast %1965 : vector<1x16xf32> to vector<1x1x16xf32>
    %cst_695 = arith.constant dense<0.000000e+00> : vector<1xf32>
    %1967 = vector.multi_reduction <add>, %1966, %cst_695 [1, 2] : vector<1x1x16xf32> to vector<1xf32>
    %1968 = vector.shape_cast %1967 : vector<1xf32> to vector<1x1x1xf32>
    %1969 = vector.extract %1968[0, 0, 0] : f32 from vector<1x1x1xf32>
    %1970 = vector.broadcast %1969 : f32 to vector<1x1xf32>
    %cst_696 = arith.constant -5.000000e-01 : f32
    %1971 = vector.broadcast %cst_696 : f32 to vector<1x1xf32>
    %1972 = arith.mulf %1971, %1970 : vector<1x1xf32>
    %cst_697 = arith.constant 0.000000e+00 : f32
    %1973 = vector.broadcast %cst_697 : f32 to vector<1x1xf32>
    %1974 = arith.subf %1973, %1959 : vector<1x1xf32>
    %cst_698 = arith.constant 5.000000e-03 : f32
    %1975 = vector.broadcast %cst_698 : f32 to vector<1x1xf32>
    %1976 = arith.mulf %1975, %1972 : vector<1x1xf32>
    %1977 = arith.addf %1974, %1976 : vector<1x1xf32>
    %cst_699 = arith.constant 0.000000e+00 : f32
    %1978 = vector.broadcast %cst_699 : f32 to vector<8x128xf32>
    %1979 = vector.broadcast %1977 : vector<1x1xf32> to vector<8x128xf32>
    %1980 = arith.addf %1978, %1979 : vector<8x128xf32>
    %c0_700 = arith.constant 0 : index
    %c0_701 = arith.constant 0 : index
    %c0_702 = arith.constant 0 : index
    %1981 = vector.load %arg32[%c0_700, %c0_701, %c0_702] : memref<1x8x128xf32, #tpu.memory_space<vmem>>, vector<1x8x128xf32>
    %1982 = vector.shape_cast %1981 : vector<1x8x128xf32> to vector<8x128xf32>
    %1983 = vector.shape_cast %1980 : vector<8x128xf32> to vector<1x8x128xf32>
    tpu.vector_store %arg32[%c0_700, %c0_701, %c0_702], %1983 {strides = array<i32>} : memref<1x8x128xf32, #tpu.memory_space<vmem>>, vector<1x8x128xf32>,
    return
  }
  func.func @transform_0(%arg0: i32) -> (i32, i32, i32, i32) {
    %c0_i32 = arith.constant 0 : i32
    %c0_i32_0 = arith.constant 0 : i32
    %c0_i32_1 = arith.constant 0 : i32
    %c0_i32_2 = arith.constant 0 : i32
    return %c0_i32, %arg0, %c0_i32_0, %c0_i32_1 : i32, i32, i32, i32
  }
  func.func @transform_1(%arg0: i32) -> (i32, i32, i32, i32) {
    %c0_i32 = arith.constant 0 : i32
    %c0_i32_0 = arith.constant 0 : i32
    %c0_i32_1 = arith.constant 0 : i32
    %c0_i32_2 = arith.constant 0 : i32
    return %c0_i32, %arg0, %c0_i32_0, %c0_i32_1 : i32, i32, i32, i32
  }
  func.func @transform_2(%arg0: i32) -> (i32, i32, i32) {
    %c0_i32 = arith.constant 0 : i32
    %c0_i32_0 = arith.constant 0 : i32
    %c0_i32_1 = arith.constant 0 : i32
    return %arg0, %c0_i32, %c0_i32_0 : i32, i32, i32
  }
  func.func @transform_3(%arg0: i32) -> (i32, i32) {
    %c0_i32 = arith.constant 0 : i32
    %c0_i32_0 = arith.constant 0 : i32
    %c0_i32_1 = arith.constant 0 : i32
    return %c0_i32, %c0_i32_0 : i32, i32
  }
  func.func @transform_4(%arg0: i32) -> (i32, i32) {
    %c0_i32 = arith.constant 0 : i32
    %c0_i32_0 = arith.constant 0 : i32
    %c0_i32_1 = arith.constant 0 : i32
    return %c0_i32, %c0_i32_0 : i32, i32
  }
  func.func @transform_5(%arg0: i32) -> (i32, i32) {
    %c0_i32 = arith.constant 0 : i32
    %c0_i32_0 = arith.constant 0 : i32
    %c0_i32_1 = arith.constant 0 : i32
    return %c0_i32, %c0_i32_0 : i32, i32
  }
  func.func @transform_6(%arg0: i32) -> (i32, i32) {
    %c0_i32 = arith.constant 0 : i32
    %c0_i32_0 = arith.constant 0 : i32
    %c0_i32_1 = arith.constant 0 : i32
    return %c0_i32, %c0_i32_0 : i32, i32
  }
  func.func @transform_7(%arg0: i32) -> (i32, i32) {
    %c0_i32 = arith.constant 0 : i32
    %c0_i32_0 = arith.constant 0 : i32
    %c0_i32_1 = arith.constant 0 : i32
    return %c0_i32, %c0_i32_0 : i32, i32
  }
  func.func @transform_8(%arg0: i32) -> (i32, i32) {
    %c0_i32 = arith.constant 0 : i32
    %c0_i32_0 = arith.constant 0 : i32
    %c0_i32_1 = arith.constant 0 : i32
    return %c0_i32, %c0_i32_0 : i32, i32
  }
  func.func @transform_9(%arg0: i32) -> (i32, i32) {
    %c0_i32 = arith.constant 0 : i32
    %c0_i32_0 = arith.constant 0 : i32
    %c0_i32_1 = arith.constant 0 : i32
    return %c0_i32, %c0_i32_0 : i32, i32
  }
  func.func @transform_10(%arg0: i32) -> (i32, i32) {
    %c0_i32 = arith.constant 0 : i32
    %c0_i32_0 = arith.constant 0 : i32
    %c0_i32_1 = arith.constant 0 : i32
    return %c0_i32, %c0_i32_0 : i32, i32
  }
  func.func @transform_11(%arg0: i32) -> (i32, i32) {
    %c0_i32 = arith.constant 0 : i32
    %c0_i32_0 = arith.constant 0 : i32
    %c0_i32_1 = arith.constant 0 : i32
    return %c0_i32, %c0_i32_0 : i32, i32
  }
  func.func @transform_12(%arg0: i32) -> (i32, i32) {
    %c0_i32 = arith.constant 0 : i32
    %c0_i32_0 = arith.constant 0 : i32
    %c0_i32_1 = arith.constant 0 : i32
    return %c0_i32, %c0_i32_0 : i32, i32
  }
  func.func @transform_13(%arg0: i32) -> (i32, i32) {
    %c0_i32 = arith.constant 0 : i32
    %c0_i32_0 = arith.constant 0 : i32
    %c0_i32_1 = arith.constant 0 : i32
    return %c0_i32, %c0_i32_0 : i32, i32
  }
  func.func @transform_14(%arg0: i32) -> (i32, i32) {
    %c0_i32 = arith.constant 0 : i32
    %c0_i32_0 = arith.constant 0 : i32
    %c0_i32_1 = arith.constant 0 : i32
    return %c0_i32, %c0_i32_0 : i32, i32
  }
  func.func @transform_15(%arg0: i32) -> (i32, i32) {
    %c0_i32 = arith.constant 0 : i32
    %c0_i32_0 = arith.constant 0 : i32
    %c0_i32_1 = arith.constant 0 : i32
    return %c0_i32, %c0_i32_0 : i32, i32
  }
  func.func @transform_16(%arg0: i32) -> (i32, i32) {
    %c0_i32 = arith.constant 0 : i32
    %c0_i32_0 = arith.constant 0 : i32
    %c0_i32_1 = arith.constant 0 : i32
    return %c0_i32, %c0_i32_0 : i32, i32
  }
  func.func @transform_17(%arg0: i32) -> (i32, i32) {
    %c0_i32 = arith.constant 0 : i32
    %c0_i32_0 = arith.constant 0 : i32
    %c0_i32_1 = arith.constant 0 : i32
    return %c0_i32, %c0_i32_0 : i32, i32
  }
  func.func @transform_18(%arg0: i32) -> (i32, i32) {
    %c0_i32 = arith.constant 0 : i32
    %c0_i32_0 = arith.constant 0 : i32
    %c0_i32_1 = arith.constant 0 : i32
    return %c0_i32, %c0_i32_0 : i32, i32
  }
  func.func @transform_19(%arg0: i32) -> (i32, i32) {
    %c0_i32 = arith.constant 0 : i32
    %c0_i32_0 = arith.constant 0 : i32
    %c0_i32_1 = arith.constant 0 : i32
    return %c0_i32, %c0_i32_0 : i32, i32
  }
  func.func @transform_20(%arg0: i32) -> (i32, i32) {
    %c0_i32 = arith.constant 0 : i32
    %c0_i32_0 = arith.constant 0 : i32
    %c0_i32_1 = arith.constant 0 : i32
    return %c0_i32, %c0_i32_0 : i32, i32
  }
  func.func @transform_21(%arg0: i32) -> (i32, i32) {
    %c0_i32 = arith.constant 0 : i32
    %c0_i32_0 = arith.constant 0 : i32
    %c0_i32_1 = arith.constant 0 : i32
    return %c0_i32, %c0_i32_0 : i32, i32
  }
  func.func @transform_22(%arg0: i32) -> (i32, i32) {
    %c0_i32 = arith.constant 0 : i32
    %c0_i32_0 = arith.constant 0 : i32
    %c0_i32_1 = arith.constant 0 : i32
    return %c0_i32, %c0_i32_0 : i32, i32
  }
  func.func @transform_23(%arg0: i32) -> (i32, i32) {
    %c0_i32 = arith.constant 0 : i32
    %c0_i32_0 = arith.constant 0 : i32
    %c0_i32_1 = arith.constant 0 : i32
    return %c0_i32, %c0_i32_0 : i32, i32
  }
  func.func @transform_24(%arg0: i32) -> (i32, i32) {
    %c0_i32 = arith.constant 0 : i32
    %c0_i32_0 = arith.constant 0 : i32
    %c0_i32_1 = arith.constant 0 : i32
    return %c0_i32, %c0_i32_0 : i32, i32
  }
  func.func @transform_25(%arg0: i32) -> (i32, i32) {
    %c0_i32 = arith.constant 0 : i32
    %c0_i32_0 = arith.constant 0 : i32
    %c0_i32_1 = arith.constant 0 : i32
    return %c0_i32, %c0_i32_0 : i32, i32
  }
  func.func @transform_26(%arg0: i32) -> (i32, i32) {
    %c0_i32 = arith.constant 0 : i32
    %c0_i32_0 = arith.constant 0 : i32
    %c0_i32_1 = arith.constant 0 : i32
    return %c0_i32, %c0_i32_0 : i32, i32
  }
  func.func @transform_27(%arg0: i32) -> (i32, i32) {
    %c0_i32 = arith.constant 0 : i32
    %c0_i32_0 = arith.constant 0 : i32
    %c0_i32_1 = arith.constant 0 : i32
    return %c0_i32, %c0_i32_0 : i32, i32
  }
  func.func @transform_28(%arg0: i32) -> (i32, i32) {
    %c0_i32 = arith.constant 0 : i32
    %c0_i32_0 = arith.constant 0 : i32
    %c0_i32_1 = arith.constant 0 : i32
    return %c0_i32, %c0_i32_0 : i32, i32
  }
  func.func @transform_29(%arg0: i32) -> (i32, i32) {
    %c0_i32 = arith.constant 0 : i32
    %c0_i32_0 = arith.constant 0 : i32
    %c0_i32_1 = arith.constant 0 : i32
    return %c0_i32, %c0_i32_0 : i32, i32
  }
  func.func @transform_30(%arg0: i32) -> (i32, i32) {
    %c0_i32 = arith.constant 0 : i32
    %c0_i32_0 = arith.constant 0 : i32
    %c0_i32_1 = arith.constant 0 : i32
    return %c0_i32, %c0_i32_0 : i32, i32
  }
  func.func @transform_31(%arg0: i32) -> (i32, i32, i32) {
    %c0_i32 = arith.constant 0 : i32
    %c0_i32_0 = arith.constant 0 : i32
    %c0_i32_1 = arith.constant 0 : i32
    return %arg0, %c0_i32, %c0_i32_0 : i32, i32, i32
  }
}

</mosaic_0001>

<bundles_post_ra>
// kernel: _lambda_.1
= control target key start
LH: loop header
LB: loop body
LE: loop exit
PB: predicated region body
PF: predicated region fallthrough
CT: control target
= control target key end

     0   :  { %s12191_s6 = smov 1   ;;  %s12192_s10 = smov 2   ;;  %s14032_s0 = inlined_call_operand.smem [shape: u32[32], index: -1, kind: input, shape index: {}] }
   0x1   :  { %s12250_s5 = sld [smem:[%s14032_s0]]   ;;  %s12193_s14 = smov 3  }
   0x2   :  { %s12255_s9 = sld [smem:[%s14032_s0 + %s12191_s6]]   ;;  %s12194_s18 = smov 4  }
   0x3   :  { %s12260_s13 = sld [smem:[%s14032_s0 + %s12192_s10]]   ;;  %s12195_s22 = smov 5  }
   0x4   :  { %s12265_s17 = sld [smem:[%s14032_s0 + %s12193_s14]]   ;;  %s12196_s26 = smov 6  }
   0x5   :  { %s12270_s21 = sld [smem:[%s14032_s0 + %s12194_s18]]   ;;  %s12197_s30 = smov 7  }
   0x6   :  { %s12275_s25 = sld [smem:[%s14032_s0 + %s12195_s22]]   ;;  %s12198_s4 = smov 8  }
   0x7   :  { %14070 = sst [smem:[#allocation7_spill]] %s12250_s5  ;;  %s12199_s10 = smov 9  }
   0x8   :  { %s12280_s29 = sld [smem:[%s14032_s0 + %s12196_s26]]   ;;  %s12200_s15 = smov 10  }
   0x9   :  { %14071 = sst [smem:[#allocation8_spill]] %s12260_s13  ;;  %s12201_s20 = smov 11  }
   0xa   :  { %s12285_s3 = sld [smem:[%s14032_s0 + %s12197_s30]]   ;;  %s12202_s26 = smov 12  }
   0xb   :  { %s12290_s8 = sld [smem:[%s14032_s0 + %s12198_s4]]   ;;  %s12203_s1 = smov 13  }
   0xc   :  { %s12295_s14 = sld [smem:[%s14032_s0 + %s12199_s10]]   ;;  %s12204_s7 = smov 14  }
   0xd   :  { %s12300_s19 = sld [smem:[%s14032_s0 + %s12200_s15]]   ;;  %s12205_s15 = smov 15  }
   0xe   :  { %s12305_s24 = sld [smem:[%s14032_s0 + %s12201_s20]]   ;;  %s12206_s22 = smov 16  }
   0xf   :  { %s12310_s30 = sld [smem:[%s14032_s0 + %s12202_s26]]   ;;  %s12207_s28 = smov 17  }
  0x10   :  { %14072 = sst [smem:[#allocation9_spill]] %s12285_s3  ;;  %s12216_s10 = smov 26  }
  0x11   :  { %14073 = sst [smem:[#allocation10_spill]] %s12290_s8  ;;  %s12217_s16 = smov 27  }
  0x12   :  { %14074 = sst [smem:[#allocation11_spill]] %s12295_s14  ;;  %s12218_s23 = smov 28  }
  0x13   :  { %14075 = sst [smem:[#allocation12_spill]] %s12300_s19 }
  0x14   :  { %s12315_s6 = sld [smem:[%s14032_s0 + %s12203_s1]]   ;;  %s12219_s1 = smov 29  }
  0x15   :  { %s12320_s12 = sld [smem:[%s14032_s0 + %s12204_s7]]   ;;  %s12208_s7 = smov 18  }
  0x16   :  { %s12325_s20 = sld [smem:[%s14032_s0 + %s12205_s15]]   ;;  %s12209_s15 = smov 19  }
  0x17   :  { %s12330_s27 = sld [smem:[%s14032_s0 + %s12206_s22]]   ;;  %s12210_s22 = smov 20  }
  0x18   :  { %s12335_s4 = sld [smem:[%s14032_s0 + %s12207_s28]]   ;;  %s12211_s28 = smov 21  }
  0x19   :  { %s12340_s14 = sld [smem:[%s14032_s0 + %s12208_s7]]   ;;  %s12212_s7 = smov 22  }
  0x1a   :  { %14076 = sst [smem:[#allocation13_spill]] %s12315_s6 }
  0x1b   :  { %s12345_s19 = sld [smem:[%s14032_s0 + %s12209_s15]]   ;;  %s12213_s15 = smov 23  }
  0x1c   :  { %s12393_s3 = sld [smem:[%s14032_s0 + %s12219_s1]]  }
  0x1d   :  { %14077 = sst [smem:[#allocation14_spill]] %s12330_s27 }
  0x1e   :  { %14078 = sst [smem:[#allocation15_spill]] %s12335_s4 }
  0x1f   :  { %14079 = sst [smem:[#allocation16_spill]] %s12340_s14 }
  0x20   :  { %s12350_s27 = sld [smem:[%s14032_s0 + %s12210_s22]]   ;;  %s12214_s22 = smov 24  }
  0x21   :  { %14080 = sst [smem:[#allocation17_spill]] %s12345_s19 }
  0x22   :  { %s12355_s4 = sld [smem:[%s14032_s0 + %s12211_s28]]   ;;  %s12215_s28 = smov 25  }
  0x23   :  { %s12360_s14 = sld [smem:[%s14032_s0 + %s12212_s7]]  }
  0x24   :  { %s12365_s19 = sld [smem:[%s14032_s0 + %s12213_s15]]  }
  0x25   :  { %14086 = sst [smem:[#allocation23_spill]] %s12393_s3 }
  0x26   :  { %14081 = sst [smem:[#allocation18_spill]] %s12350_s27 }
  0x27   :  { %s12370_s27 = sld [smem:[%s14032_s0 + %s12214_s22]]  }
  0x28   :  { %14082 = sst [smem:[#allocation19_spill]] %s12355_s4 }
  0x29   :  { %14083 = sst [smem:[#allocation20_spill]] %s12360_s14 }
  0x2a   :  { %14084 = sst [smem:[#allocation21_spill]] %s12365_s19 }
  0x2b   :  { %s9779_s4 = sld [smem:[%s14032_s0 + %s12215_s28]]  }
  0x2c   :  { %s12378_s14 = sld [smem:[%s14032_s0 + %s12216_s10]]   ;;  %s12220_s10 = smov 30  }
  0x2d   :  { %14085 = sst [smem:[#allocation22_spill]] %s12370_s27 }
  0x2e   :  { %s12383_s19 = sld [smem:[%s14032_s0 + %s12217_s16]]   ;;  %s12221_s16 = smov 31  }
  0x2f   :  { %s12388_s27 = sld [smem:[%s14032_s0 + %s12218_s23]]  }
  0x30   :  { %s12398_s8 = sld [smem:[%s14032_s0 + %s12220_s10]]  }
  0x31   :  { %s12403_s13 = sld [smem:[%s14032_s0 + %s12221_s16]]   ;;  %v68_v0 = vstv %s9779_s4 }
  0x32   :  { %69 = vst [vmem:[#allocation4] sm:$0x1] %v68_v0 }
  0x36   :  { %14087 = sst [smem:[#allocation24_spill]] %s12398_s8 }
  0x37   :  { %s12405_s23 = smov 0   ;;  %s12407_s22 = smov 0  }
  0x38   :  { %s12409_s26 = smov 0  }
  0x39 LB: > { %s14088_s8 = sld [smem:[#allocation24_spill]]  ;;  %s14089_s6 = sld [smem:[#allocation13_spill]]  ;;  %s12189_s26 = sphi %s12409_s26, %s14119_s26   ;;  %s12185_s22 = sphi %s12407_s22, %s14118_s22   ;;  %s12181_s23 = sphi %s12405_s23, %s14117_s23  }
  0x3a   : > { %s14090_s3 = sld [smem:[#allocation23_spill]]  ;;  %s9786_s0 = sadd.s32 4294967295, %s12189_s26  }
  0x3b   : > { %s12422_s4 = sadd.s32 1, %s12189_s26   ;;  %s82_s28 = sadd.s32 1, %s12185_s22 }
  0x3c   : > { %s79_s1 = ssub.s32 %s12189_s26, %s12422_s4  ;;  %p89_p1 = scmp.ne.s32.totalorder %s12185_s22, %s12181_s23 }
  0x3d   : > { %p80_p0 = scmp.eq.s32.totalorder %s79_s1, 0  ;;  %p90_p2 = scmp.eq.s32.totalorder %s12189_s26, 0 }
  0x3e   : > { %p9789_p4 = scmp.ge.s32.totalorder %s12189_s26, 2 }
  0x3f   : > { %s12431_s2 = scalar_select %p80_p0, %s12185_s22, %s82_s28  }
  0x40   : > { %p12433_p3 = por %p90_p2, %p89_p1  ;;  %865 = sbr.rel (%p9789_p4) target bundleno = 91 (0x5b), region = 128 }
  0x47   : > { %868 = sbr.rel (!%p12433_p3) target bundleno = 83 (0x53), region = 132  ;;  %s14092_s5 = sld [smem:[#allocation7_spill]] (%p12433_p3) }
  0x48   : > { %s870_s7 = sand.u32 (%p12433_p3), 1, %s12185_s22  }
  0x49   : > { %s11718_s16 = smul.u32 (%p12433_p3), 6, %s870_s7 }
  0x4b   : > { %s872_s15 = scalar_lea.vmem (%p12433_p3), [#allocation5], %s11718_s16 }
  0x4d   : > { %s873_s11 = scalar_lea.vmem (%p12433_p3), %s14092_s5, %s12189_s26 }
  0x4e   : > { %v889_v1 = vld [vmem:[%s873_s11] sm:$0x1]  ;;  %v891_v2 = vld [vmem:[%s873_s11 + $0x2] sm:$0x1]  ;;  %v893_v3 = vld [vmem:[%s873_s11 + $0x4] sm:$0x1] }
  0x4f   : > { %v895_v4 = vld [vmem:[%s873_s11 + $0x6] sm:$0x1]  ;;  %v897_v5 = vld [vmem:[%s873_s11 + $0x8] sm:$0x1]  ;;  %v899_v6 = vld [vmem:[%s873_s11 + $0xa] sm:$0x1] }
  0x50   : > { %890 = vst [vmem:[%s872_s15] sm:$0x1] %v889_v1  ;;  %892 = vst [vmem:[%s872_s15 + $0x1] sm:$0x1] %v891_v2 }
  0x51   : > { %894 = vst [vmem:[%s872_s15 + $0x2] sm:$0x1] %v893_v3  ;;  %896 = vst [vmem:[%s872_s15 + $0x3] sm:$0x1] %v895_v4 }
  0x52   : > { %898 = vst [vmem:[%s872_s15 + $0x4] sm:$0x1] %v897_v5  ;;  %900 = vst [vmem:[%s872_s15 + $0x5] sm:$0x1] %v899_v6 }
  0x53 PF: > { %927 = sbr.rel (!%p12433_p3) target bundleno = 91 (0x5b), region = 166  ;;  %s929_s18 = sand.u32 (%p12433_p3), 1, %s12185_s22  }
  0x54   : > { %s932_s1 = scalar_lea.vmem (%p12433_p3), %s12255_s9, %s12189_s26  ;;  %s11719_s28 = smul.u32 (%p12433_p3), 6, %s929_s18 }
  0x55   : > { %v948_v7 = vld [vmem:[%s932_s1] sm:$0x1] (%p12433_p3)  ;;  %v950_v8 = vld [vmem:[%s932_s1 + $0x2] sm:$0x1] (%p12433_p3)  ;;  %v952_v9 = vld [vmem:[%s932_s1 + $0x4] sm:$0x1] (%p12433_p3) }
  0x56   : > { %v954_v10 = vld [vmem:[%s932_s1 + $0x6] sm:$0x1] (%p12433_p3)  ;;  %v956_v11 = vld [vmem:[%s932_s1 + $0x8] sm:$0x1] (%p12433_p3)  ;;  %v958_v12 = vld [vmem:[%s932_s1 + $0xa] sm:$0x1] (%p12433_p3) }
  0x57   : > { %s931_s7 = scalar_lea.vmem (%p12433_p3), [#allocation6], %s11719_s28 }
  0x58   : > { %949 = vst [vmem:[%s931_s7] sm:$0x1] (%p12433_p3), %v948_v7  ;;  %951 = vst [vmem:[%s931_s7 + $0x1] sm:$0x1] (%p12433_p3), %v950_v8 }
  0x59   : > { %953 = vst [vmem:[%s931_s7 + $0x2] sm:$0x1] (%p12433_p3), %v952_v9  ;;  %955 = vst [vmem:[%s931_s7 + $0x3] sm:$0x1] (%p12433_p3), %v954_v10 }
  0x5a   : > { %957 = vst [vmem:[%s931_s7 + $0x4] sm:$0x1] %v956_v11  ;;  %959 = vst [vmem:[%s931_s7 + $0x5] sm:$0x1] %v958_v12 }
  0x5b PF: > { %p9790_p5 = scmp.ge.s32.totalorder %s12189_s26, 1  ;;  %p991_p6 = scmp.lt.s32.totalorder %s12189_s26, 3 }
  0x5d   : > { %p992_p7 = pnand %p9790_p5, %p991_p6 }
  0x5e   : > { %v12451_v13 = vld [vmem:[%s12265_s17] sm:$0x1f] (!%p992_p7)  ;;  %vm1165_vm0 = vcmask (!%p992_p7), 1044480   ;;  %s998_s10 = sand.u32 (!%p992_p7), 1, %s12181_s23   ;;  %v1247_v14 = vlaneseq (!%p992_p7)  ;;  %v12222_v15 = vmov (!%p992_p7), 0.0   ;;  %vm12223_vm1 = vmmov (!%p992_p7), 0  }
  0x5f   : > { %995 = sbr.rel (%p992_p7) target bundleno = 15076 (0x3ae4), region = 204  ;;  %10354 = vmatprep.subr.mxu0 (!%p992_p7), %v12222_v15  ;;  %10356 = vmatprep.mubr.msk.f32.mxu0 (!%p992_p7), %vm12223_vm1, %v12222_v15  ;;  %vm1161_vm2 = vcmask (!%p992_p7), 39936   ;;  %v12466_v17 = vld [vmem:[%s12280_s29] sm:$0x1] (!%p992_p7)  ;;  %s14050_s16 = smov (!%p992_p7), 64   ;;  %v1150_v35 = vld [vmem:[%s12378_s14 + $0x8] sm:$0xff] (!%p992_p7) }
  0x60   : > { %s12457_s11 = smul.u32 (!%p992_p7), 6, %s998_s10  ;;  %10355 = vmatpush3.msk.msra.mxu0 (!%p992_p7), %vm1165_vm0, %v12451_v13  ;;  %v12461_v16 = vshrl.u32 (!%p992_p7), %v1247_v14, 7  ;;  %10367 = vmatprep.mubr.msk.f32.mxu1 (!%p992_p7), %vm12223_vm1, %v12222_v15  ;;  %v12482_v21 = vld [vmem:[%s12275_s25] sm:$0x1] (!%p992_p7)  ;;  %v12225_v37 = vmov (!%p992_p7), 0.0|0.0   ;;  %v1156_v39 = vld [vmem:[%s14090_s3 + $0x8] sm:$0xff] (!%p992_p7) }
  0x61   : > { %v1149_v34 = vld [vmem:[%s12378_s14] sm:$0xff] (!%p992_p7)  ;;  %11253 = vmatprep.subr.bf16.mxu1 (!%p992_p7), %v12225_v37  ;;  %11259 = vmatprep.subr.bf16.mxu0 (!%p992_p7), %v12225_v37  ;;  %v1151_v40 = vld [vmem:[%s12378_s14 + $0x10] sm:$0xff] (!%p992_p7)  ;;  %v1152_v41 = vld [vmem:[%s12378_s14 + $0x18] sm:$0xff] (!%p992_p7)  ;;  %s14045_s15 = smov (!%p992_p7), 96   ;;  %v12227_v48 = vmov (!%p992_p7), 0   ;;  %vm1272_vm3 = vcmask (!%p992_p7), 261120  }
  0x62   : > { %s12469_s23 = scalar_lea.vmem (!%p992_p7), [#allocation5], %s12457_s11  ;;  %v12473_v19 = vsub.s32 (!%p992_p7), 0, %v12461_v16  ;;  %v1155_v36 = vld [vmem:[%s14090_s3] sm:$0xff] (!%p992_p7)  ;;  %v12492_v38 = vpack.c.bf16 (!%p992_p7), %v1150_v35, %v1149_v34  ;;  %v1157_v43 = vld [vmem:[%s14090_s3 + $0x10] sm:$0xff] (!%p992_p7)  ;;  %v1158_v44 = vld [vmem:[%s14090_s3 + $0x18] sm:$0xff] (!%p992_p7)  ;;  %v12502_v45 = vpack.c.bf16 (!%p992_p7), %v1152_v41, %v1151_v40  ;;  %11838 = vset.pattern.permute.xlu0 (!%p992_p7), %v12227_v48  ;;  %s12516_s18 = scalar_lea.vmem (!%p992_p7), [#allocation6], %s12457_s11  ;;  %11839 = vset.pattern.permute.xlu1 (!%p992_p7), %v12227_v48 }
  0x63   : > { %v1160_v18 = vld [vmem:[%s12469_s23] sm:$0x1] (!%p992_p7)  ;;  %v12497_v42 = vpack.c.bf16 (!%p992_p7), %v1156_v39, %v1155_v36  ;;  %v12506_v46 = vpack.c.bf16 (!%p992_p7), %v1158_v44, %v1157_v43  ;;  %v9798_v49 = vld [vmem:[%s12516_s18 + $0x1] sm:$0x1] (!%p992_p7)  ;;  %v9799_v62 = vld [vmem:[%s12469_s23 + $0x1] sm:$0x1] (!%p992_p7) }
  0x64   : > { %10357 = vmatmul.mubr.msk.f32.vlgmr.msra.gmra.mrb[0].mxu0 (!%p992_p7), %vm1161_vm2, %v1160_v18  ;;  %v1250_v20 = vrot.slane (!%p992_p7), %v12466_v17, %v12473_v19  ;;  %11255 = vmatpush3.bf16.msra.mxu1 (!%p992_p7), %v12492_v38  ;;  %v1098_v56 = vld [vmem:[%s12270_s21] sm:$0xff] (!%p992_p7)  ;;  %v1099_v57 = vld [vmem:[%s12270_s21 + $0x8] sm:$0xff] (!%p992_p7)  ;;  %v1100_v59 = vld [vmem:[%s12270_s21 + $0x10] sm:$0xff] (!%p992_p7)  ;;  %vm1423_vm4 = vcmask (!%p992_p7), 253952   ;;  %s14048_s1 = smov (!%p992_p7), 32   ;;  %s14093_s28 = sld [smem:[#allocation8_spill]] (!%p992_p7) }
  0x65   : > { %10378 = vmatprep.mubr.msk.f32.mxu0 (!%p992_p7), %vm12223_vm1, %v12222_v15  ;;  %11261 = vmatpush3.bf16.msra.mxu0 (!%p992_p7), %v12497_v42  ;;  %v12532_v58 = vpack.c.bf16 (!%p992_p7), %v1099_v57, %v1098_v56  ;;  %v1101_v60 = vld [vmem:[%s12270_s21 + $0x18] sm:$0xff] (!%p992_p7)  ;;  %v12551_v63 = vld [vmem:[%s12383_s19] sm:$0x1] (!%p992_p7)  ;;  %v9808_v56 = vld [vmem:[%s12469_s23 + $0x2] sm:$0x1] (!%p992_p7)  ;;  %p1090_p8 = scmp.lt.s32.totalorder (!%p992_p7), %s9786_s0, 1 }
  0x66   : > { %1251 = vrot.lane.b32.xlu0 %v1250_v20, %s14050_s16  ;;  %11256 = vmatprep.subr.bf16.mxu1 %v12225_v37  ;;  %v12538_v61 = vpack.c.bf16 %v1101_v60, %v1100_v59  ;;  %v12554_v0 = vld [vmem:[%s12388_s27] sm:$0x3f]  ;;  %s14094_s7 = sld [smem:[#allocation10_spill]]  ;;  %s14095_s11 = sld [smem:[#allocation9_spill]]  ;;  %vm3300_vm5 = vcmask 130048   ;;  %vm3852_vm6 = vcmask 523264  }
  0x67   : > { %11262 = vmatprep.subr.bf16.mxu0 %v12225_v37  ;;  %v12559_v10 = vld [vmem:[%s14088_s8] sm:$0x3f]  ;;  %v1696_v57 = vrot.slane %v12554_v0, 1  ;;  %s14121_s0 = smov (!%p1090_p8, %s9786_s0), 1  ;;  %s14096_s26 = sld [smem:[#allocation14_spill]]  ;;  %vm3926_vm7 = vcmask 32768  }
  0x68   : > { %11258 = vmatpush3.bf16.msra.mxu1 %v12502_v45  ;;  %v9807_v40 = vld [vmem:[%s12516_s18 + $0x2] sm:$0x1]  ;;  %s14101_s3 = sld [smem:[#allocation15_spill]]  ;;  %s14102_s5 = smov 96   ;;  %vm4135_vm8 = vcmask 1040384   ;;  %vm9653_vm9 = vcmask 122880  }
  0x69   : > { %11264 = vmatpush3.bf16.msra.mxu0 %v12506_v46  ;;  %10381 = vmatprep.subr.mxu1 %v12222_v15 }
  0x6a   : > { %11265 = vmatprep.subr.bf16.mxu0 %v12225_v37  ;;  %s1092_s10 = scalar_lea.vmem %s14093_s28, %s14121_s0  ;;  %s14097_s28 = sld [smem:[#allocation12_spill]] }
  0xd8   : > { %v1252_v29 = vpop.permute.xlu0 %1251 }
 0x137   : > { %v1235_v22 = vpop.f32.mrb[0].mxu0 }
 0x138   : > { %v1236_v23 = vadd.f32 %v1235_v22, %v12482_v21  ;;  %v10358_v24 = vpop.f32.mrb[1].mxu0 }
 0x13a   : > { %v1239_v25 = vadd.f32 %v1236_v23, %v12466_v17 }
 0x13c   : > { %v9794_v26 = vmul.f32 -1.442695, %v1239_v25 }
 0x13e   : > { %11863 = vpow2.f32 %v9794_v26 }
 0x148   : > { %v11864_v27 = vpop.eup %11863 }
 0x149   : > { %v1243_v28 = vadd.f32 1.0, %v11864_v27 }
 0x14b   : > { %11865 = vrcp.f32 %v1243_v28 }
 0x155   : > { %v11866_v30 = vpop.eup %11865 }
 0x156   : > { %v1254_v31 = vmul.f32 %v11866_v30, %v1252_v29  ;;  %v1261_v50 = vsub.f32 1.0, %v11866_v30  ;;  %v1267_v52 = vmul.f32 0.0, %v11866_v30 }
 0x158   : > { %1256 = vrot.lane.b32.xlu0 %v1254_v31, %s14050_s16 }
 0x15c   : > { %1430 = vperm.xlu0 %11838, %v9798_v49  }
 0x1ca   : > { %v1257_v32 = vpop.permute.xlu0 %1256 }
 0x1cb   : > { %v1259_v33 = vadd.f32 %v1257_v32, %v1236_v23 }
 0x1cd   : > { %11867 = vtanh.f32 %v1259_v33 }
 0x1d7   : > { %v11868_v47 = vpop.eup %11867 }
 0x1d8   : > { %1263 = vrot.lane.b32.xlu1 %v11868_v47, %s14045_s15  ;;  %v12229_v47 = vmov 1  }
 0x1d9   : > { %11840 = vset.pattern.permute.xlu0 %v12229_v47 }
 0x1db   : > { %v1431_v18 = vpop.permute.xlu0 %1430 }
 0x1dc   : > { %v1436_v20 = vrot.slane %v1431_v18, %v12473_v19 }
 0x24a   : > { %v1264_v51 = vpop.permute.xlu1 %1263 }
 0x24b   : > { %v1266_v53 = vmul.f32 %v1264_v51, %v1261_v50 }
 0x24d   : > { %v1268_v54 = vadd.f32 %v1267_v52, %v1266_v53 }
 0x24f   : > { %1270 = vrot.lane.b32.xlu1 %v1268_v54, %s14045_s15 }
 0x2c1   : > { %v1271_v55 = vpop.permute.xlu1 %1270 }
 0x2c2   : > { %10368 = vmatmul.mubr.msk.f32.vlgmr.msra.gmra.mrb[0].mxu1 %vm1272_vm3, %v1271_v55  ;;  %10379 = vmatmul.mubr.msk.f32.vlgmr.msra.gmra.mrb[2].mxu0 %vm1272_vm3, %v1271_v55 }
 0x2c3   : > { %10382 = vmatpush3.msk.msra.mxu1 %vm1165_vm0, %v12451_v13  ;;  %10383 = vmatprep.mubr.msk.f32.mxu1 %vm12223_vm1, %v12222_v15 }
 0x2c4   : > { %10394 = vmatprep.mubr.msk.f32.mxu0 %vm12223_vm1, %v12222_v15  ;;  %11271 = vmatprep.subr.bf16.mxu1 %v12225_v37 }
 0x2c5   : > { %11267 = vmatpush3.bf16.msra.mxu0 %v12532_v58 }
 0x2c6   : > { %11268 = vmatprep.subr.bf16.mxu0 %v12225_v37  ;;  %10384 = vmatmul.mubr.msk.f32.vlgmr.msra.gmra.mrb[2].mxu1 %vm1161_vm2, %v9799_v62 }
 0x2c7   : > { %11273 = vmatpush3.bf16.msra.mxu1 %v12492_v38  ;;  %10405 = vmatprep.mubr.msk.f32.mxu1 %vm12223_vm1, %v12222_v15 }
 0x2c8   : > { %11274 = vmatprep.subr.bf16.mxu1 %v12225_v37 }
 0x2c9   : > { %11270 = vmatpush3.bf16.msra.mxu0 %v12538_v61 }
 0x2ca   : > { %11277 = vmatprep.subr.bf16.mxu0 %v12225_v37 }
 0x2cb   : > { %11276 = vmatpush3.bf16.msra.mxu1 %v12502_v45 }
 0x2cc   : > { %10419 = vmatprep.subr.mxu1 %v12222_v15 }
 0x395   : > { %v1341_v1 = vpop.f32.mrb[0].mxu1  ;;  %v1418_v2 = vpop.f32.mrb[2].mxu0 }
 0x396   : > { %v1342_v3 = vadd.f32 %v1341_v1, %v12551_v63  ;;  %v10369_v4 = vpop.f32.mrb[1].mxu1  ;;  %v10380_v5 = vpop.f32.mrb[3].mxu0  ;;  %v1419_v11 = vadd.f32 %v1418_v2, %v12559_v10 }
 0x398   : > { %v1345_v6 = vadd.f32 %v1342_v3, %v12554_v0 }
 0x399   : > { %v1510_v24 = vpop.f32.mrb[2].mxu1 }
 0x39a   : > { %v9796_v7 = vmul.f32 -1.442695, %v1345_v6  ;;  %v10385_v25 = vpop.f32.mrb[3].mxu1  ;;  %v1511_v29 = vadd.f32 %v1510_v24, %v12482_v21 }
 0x39c   : > { %11869 = vpow2.f32 %v9796_v7  ;;  %v1706_v7 = vrot.slane %v12559_v10, 1 }
 0x3a6   : > { %v11870_v8 = vpop.eup %11869 }
 0x3a7   : > { %v1349_v9 = vadd.f32 1.0, %v11870_v8 }
 0x3a9   : > { %11871 = vrcp.f32 %v1349_v9 }
 0x3b3   : > { %v11872_v12 = vpop.eup %11871 }
 0x3b4   : > { %v1422_v14 = vmul.f32 %v11872_v12, %v1419_v11 }
 0x3b6   : > { %1424 = vst.msk [vmem:[#allocation2] sm:$0x1] %vm1423_vm4, %v1422_v14 }
 0x3bd   : > { %v1427_v22 = vld [vmem:[#allocation2] sm:$0x1] }
 0x3be   : > { %v1437_v23 = vmul.f32 %v1436_v20, %v1427_v22  ;;  %v1783_v22 = vld [vmem:[#allocation2] sm:$0x1] }
 0x3c0   : > { %10395 = vmatmul.mubr.msk.f32.vlgmr.msra.gmra.mrb[4].mxu0 %vm1272_vm3, %v1437_v23  ;;  %v1614_v39 = vrot.slane %v1437_v23, %v12473_v19 }
 0x3c1   : > { %11279 = vmatpush3.bf16.msra.mxu0 %v12497_v42  ;;  %10416 = vmatprep.mubr.msk.f32.mxu0 %vm12223_vm1, %v12222_v15 }
 0x3c2   : > { %11280 = vmatprep.subr.bf16.mxu0 %v12225_v37 }
 0x3c5   : > { %11282 = vmatpush3.bf16.msra.mxu0 %v12506_v46 }
 0x3c6   : > { %11289 = vmatprep.subr.bf16.mxu0 %v12225_v37 }
 0x493   : > { %v1583_v26 = vpop.f32.mrb[4].mxu0 }
 0x494   : > { %v1584_v27 = vadd.f32 %v1583_v26, %v12466_v17  ;;  %v10396_v28 = vpop.f32.mrb[5].mxu0 }
 0x496   : > { %1595 = vrot.lane.b32.xlu1 %v1584_v27, %s14050_s16  ;;  %v1587_v30 = vadd.f32 %v1584_v27, %v1511_v29 }
 0x498   : > { %v9803_v31 = vmul.f32 -1.442695, %v1587_v30 }
 0x49a   : > { %11873 = vpow2.f32 %v9803_v31 }
 0x4a4   : > { %v11874_v32 = vpop.eup %11873 }
 0x4a5   : > { %v1591_v33 = vadd.f32 1.0, %v11874_v32 }
 0x4a7   : > { %11875 = vrcp.f32 %v1591_v33 }
 0x4b1   : > { %v11876_v34 = vpop.eup %11875 }
 0x4b2   : > { %v1605_v50 = vsub.f32 1.0, %v11876_v34 }
 0x508   : > { %v1596_v35 = vpop.permute.xlu1 %1595 }
 0x509   : > { %v1598_v36 = vmul.f32 %v11876_v34, %v1596_v35 }
 0x50b   : > { %1600 = vrot.lane.b32.xlu1 %v1598_v36, %s14050_s16 }
 0x50f   : > { %1615 = vrot.lane.b32.xlu1 %v1614_v39, %s14048_s1 }
 0x513   : > { %1786 = vperm.xlu1 %11839, %v9807_v40  }
 0x57d   : > { %v1601_v41 = vpop.permute.xlu1 %1600 }
 0x57e   : > { %v1603_v43 = vadd.f32 %v1601_v41, %v1511_v29 }
 0x580   : > { %11877 = vtanh.f32 %v1603_v43 }
 0x581   : > { %v1616_v49 = vpop.permute.xlu1 %1615 }
 0x582   : > { %v1618_v52 = vmul.f32 %v11876_v34, %v1616_v49 }
 0x58a   : > { %v11878_v44 = vpop.eup %11877 }
 0x58b   : > { %1607 = vrot.lane.b32.xlu0 %v11878_v44, %s14045_s15  ;;  %v9816_v44 = vld [vmem:[%s12516_s18 + $0x3] sm:$0x1] }
 0x592   : > { %v1787_v12 = vpop.permute.xlu1 %1786 }
 0x593   : > { %v1792_v18 = vrot.slane %v1787_v12, %v12473_v19 }
 0x595   : > { %v1793_v24 = vmul.f32 %v1792_v18, %v1783_v22  ;;  %v2071_v18 = vrot.slane %v12559_v10, 2 }
 0x5fd   : > { %v1608_v51 = vpop.permute.xlu0 %1607 }
 0x5fe   : > { %v1610_v53 = vmul.f32 %v1608_v51, %v1605_v50 }
 0x600   : > { %v1619_v54 = vadd.f32 %v1618_v52, %v1610_v53 }
 0x602   : > { %1621 = vrot.lane.b32.xlu0 %v1619_v54, %s14045_s15 }
 0x606   : > { %1797 = vperm.xlu0 %11840, %v9807_v40  }
 0x674   : > { %v1622_v55 = vpop.permute.xlu0 %1621 }
 0x675   : > { %10406 = vmatmul.mubr.msk.f32.vlgmr.msra.gmra.mrb[4].mxu1 %vm1272_vm3, %v1622_v55  ;;  %10417 = vmatmul.mubr.msk.f32.vlgmr.msra.gmra.mrb[6].mxu0 %vm1272_vm3, %v1622_v55 }
 0x676   : > { %10420 = vmatpush3.msk.msra.mxu1 %vm1165_vm0, %v12451_v13  ;;  %10421 = vmatprep.mubr.msk.f32.mxu1 %vm12223_vm1, %v12222_v15 }
 0x677   : > { %11283 = vmatprep.subr.bf16.mxu1 %v12225_v37  ;;  %11291 = vmatpush3.bf16.msra.mxu0 %v12492_v38 }
 0x678   : > { %11292 = vmatprep.subr.bf16.mxu0 %v12225_v37  ;;  %10443 = vmatprep.mubr.msk.f32.mxu0 %vm12223_vm1, %v12222_v15 }
 0x679   : > { %10422 = vmatmul.mubr.msk.f32.vlgmr.msra.gmra.mrb[6].mxu1 %vm1161_vm2, %v9808_v56 }
 0x67a   : > { %11285 = vmatpush3.bf16.msra.mxu1 %v12532_v58  ;;  %10432 = vmatprep.mubr.msk.f32.mxu1 %vm12223_vm1, %v12222_v15 }
 0x67b   : > { %11294 = vmatpush3.bf16.msra.mxu0 %v12502_v45  ;;  %11286 = vmatprep.subr.bf16.mxu1 %v12225_v37 }
 0x67c   : > { %10457 = vmatprep.subr.mxu0 %v12222_v15 }
 0x67e   : > { %11288 = vmatpush3.bf16.msra.mxu1 %v12538_v61 }
 0x67f   : > { %11295 = vmatprep.subr.bf16.mxu1 %v12225_v37 }
 0x685   : > { %v1798_v14 = vpop.permute.xlu0 %1797 }
 0x686   : > { %v1803_v20 = vrot.slane %v1798_v14, %v12473_v19 }
 0x748   : > { %v1691_v59 = vpop.f32.mrb[4].mxu1  ;;  %v1774_v60 = vpop.f32.mrb[6].mxu0 }
 0x749   : > { %v1692_v62 = vadd.f32 %v1691_v59, %v12551_v63  ;;  %v10407_v1 = vpop.f32.mrb[5].mxu1  ;;  %v10418_v2 = vpop.f32.mrb[7].mxu0  ;;  %v1775_v8 = vadd.f32 %v1774_v60, %v1706_v7  ;;  %v12230_v60 = vmov 2  }
 0x74a   : > { %v9817_v1 = vld [vmem:[%s12469_s23 + $0x3] sm:$0x1]  ;;  %v2062_v2 = vrot.slane %v12554_v0, 2 }
 0x74b   : > { %v1698_v3 = vadd.f32 %v1696_v57, %v1692_v62 }
 0x74c   : > { %v1877_v27 = vpop.f32.mrb[6].mxu1 }
 0x74d   : > { %v9805_v4 = vmul.f32 -1.442695, %v1698_v3  ;;  %v10423_v28 = vpop.f32.mrb[7].mxu1  ;;  %v1878_v32 = vadd.f32 %v1877_v27, %v12482_v21 }
 0x74f   : > { %11879 = vpow2.f32 %v9805_v4 }
 0x759   : > { %v11880_v5 = vpop.eup %11879 }
 0x75a   : > { %v1702_v6 = vadd.f32 1.0, %v11880_v5 }
 0x75c   : > { %11881 = vrcp.f32 %v1702_v6 }
 0x766   : > { %v11882_v9 = vpop.eup %11881 }
 0x767   : > { %v1778_v11 = vmul.f32 %v11882_v9, %v1775_v8 }
 0x769   : > { %1780 = vst.msk [vmem:[#allocation2 + $0x1] sm:$0x1] %vm1423_vm4, %v1778_v11 }
 0x770   : > { %v1795_v23 = vld [vmem:[#allocation2 + $0x1] sm:$0x1] }
 0x771   : > { %v1804_v25 = vmul.f32 %v1803_v20, %v1795_v23 }
 0x773   : > { %v1805_v26 = vadd.f32 %v1804_v25, %v1793_v24 }
 0x775   : > { %10433 = vmatmul.mubr.msk.f32.vlgmr.msra.gmra.mrb[8].mxu1 %vm1272_vm3, %v1805_v26  ;;  %v1981_v43 = vrot.slane %v1805_v26, %v12473_v19 }
 0x776   : > { %11297 = vmatpush3.bf16.msra.mxu1 %v12497_v42  ;;  %10454 = vmatprep.mubr.msk.f32.mxu1 %vm12223_vm1, %v12222_v15 }
 0x777   : > { %11298 = vmatprep.subr.bf16.mxu1 %v12225_v37 }
 0x77a   : > { %11300 = vmatpush3.bf16.msra.mxu1 %v12506_v46 }
 0x77b   : > { %11307 = vmatprep.subr.bf16.mxu1 %v12225_v37 }
 0x848   : > { %v1950_v29 = vpop.f32.mrb[8].mxu1 }
 0x849   : > { %v1951_v30 = vadd.f32 %v1950_v29, %v12466_v17  ;;  %v10434_v31 = vpop.f32.mrb[9].mxu1  ;;  %v2160_v29 = vld [vmem:[#allocation2 + $0x1] sm:$0x1] }
 0x84b   : > { %1962 = vrot.lane.b32.xlu1 %v1951_v30, %s14050_s16  ;;  %v1954_v33 = vadd.f32 %v1951_v30, %v1878_v32 }
 0x84d   : > { %v9812_v34 = vmul.f32 -1.442695, %v1954_v33 }
 0x84f   : > { %11883 = vpow2.f32 %v9812_v34 }
 0x859   : > { %v11884_v35 = vpop.eup %11883 }
 0x85a   : > { %v1958_v36 = vadd.f32 1.0, %v11884_v35 }
 0x85c   : > { %11885 = vrcp.f32 %v1958_v36 }
 0x866   : > { %v11886_v39 = vpop.eup %11885 }
 0x867   : > { %v1972_v53 = vsub.f32 1.0, %v11886_v39 }
 0x8bd   : > { %v1963_v40 = vpop.permute.xlu1 %1962 }
 0x8be   : > { %v1965_v41 = vmul.f32 %v11886_v39, %v1963_v40 }
 0x8c0   : > { %1967 = vrot.lane.b32.xlu1 %v1965_v41, %s14050_s16 }
 0x8c4   : > { %1982 = vrot.lane.b32.xlu1 %v1981_v43, %s14048_s1 }
 0x8c8   : > { %2151 = vperm.xlu1 %11839, %v9816_v44  }
 0x8cc   : > { %11841 = vset.pattern.permute.xlu1 %v12230_v60 }
 0x8cd   : > { %2173 = vperm.xlu1 %11841, %v9816_v44  }
 0x8d1   : > { %11842 = vset.pattern.permute.xlu1 %v12227_v48 }
 0x932   : > { %v1968_v49 = vpop.permute.xlu1 %1967 }
 0x933   : > { %v1970_v50 = vadd.f32 %v1968_v49, %v1878_v32  ;;  %v2148_v32 = vld [vmem:[#allocation2] sm:$0x1] }
 0x935   : > { %11887 = vtanh.f32 %v1970_v50 }
 0x936   : > { %v1983_v52 = vpop.permute.xlu1 %1982 }
 0x937   : > { %v1985_v55 = vmul.f32 %v11886_v39, %v1983_v52 }
 0x93f   : > { %v11888_v51 = vpop.eup %11887 }
 0x940   : > { %1974 = vrot.lane.b32.xlu0 %v11888_v51, %s14045_s15 }
 0x947   : > { %v2152_v23 = vpop.permute.xlu1 %2151 }
 0x948   : > { %v2157_v28 = vrot.slane %v2152_v23, %v12473_v19  ;;  %v9826_v23 = vld [vmem:[%s12469_s23 + $0x4] sm:$0x1] }
 0x94a   : > { %v2158_v33 = vmul.f32 %v2157_v28, %v2148_v32 }
 0x94c   : > { %v2174_v27 = vpop.permute.xlu1 %2173 }
 0x94d   : > { %v2179_v31 = vrot.slane %v2174_v27, %v12473_v19 }
 0x9b2   : > { %v1975_v54 = vpop.permute.xlu0 %1974 }
 0x9b3   : > { %v1977_v56 = vmul.f32 %v1975_v54, %v1972_v53 }
 0x9b5   : > { %v1986_v59 = vadd.f32 %v1985_v55, %v1977_v56 }
 0x9b7   : > { %1988 = vrot.lane.b32.xlu0 %v1986_v59, %s14045_s15 }
 0x9bb   : > { %2162 = vperm.xlu0 %11840, %v9816_v44  }
 0xa29   : > { %v1989_v62 = vpop.permute.xlu0 %1988 }
 0xa2a   : > { %10444 = vmatmul.mubr.msk.f32.vlgmr.msra.gmra.mrb[8].mxu0 %vm1272_vm3, %v1989_v62  ;;  %10455 = vmatmul.mubr.msk.f32.vlgmr.msra.gmra.mrb[10].mxu1 %vm1272_vm3, %v1989_v62 }
 0xa2b   : > { %10458 = vmatpush3.msk.msra.mxu0 %vm1165_vm0, %v12451_v13  ;;  %10459 = vmatprep.mubr.msk.f32.mxu0 %vm12223_vm1, %v12222_v15 }
 0xa2c   : > { %11301 = vmatprep.subr.bf16.mxu0 %v12225_v37  ;;  %11309 = vmatpush3.bf16.msra.mxu1 %v12492_v38 }
 0xa2d   : > { %11310 = vmatprep.subr.bf16.mxu1 %v12225_v37  ;;  %10481 = vmatprep.mubr.msk.f32.mxu1 %vm12223_vm1, %v12222_v15 }
 0xa2e   : > { %10460 = vmatmul.mubr.msk.f32.vlgmr.msra.gmra.mrb[10].mxu0 %vm1161_vm2, %v9817_v1  ;;  %v9825_v1 = vld [vmem:[%s12516_s18 + $0x4] sm:$0x1] }
 0xa2f   : > { %11303 = vmatpush3.bf16.msra.mxu0 %v12532_v58  ;;  %10470 = vmatprep.mubr.msk.f32.mxu0 %vm12223_vm1, %v12222_v15 }
 0xa30   : > { %11312 = vmatpush3.bf16.msra.mxu1 %v12502_v45  ;;  %11304 = vmatprep.subr.bf16.mxu0 %v12225_v37 }
 0xa31   : > { %10495 = vmatprep.subr.mxu1 %v12222_v15 }
 0xa33   : > { %11306 = vmatpush3.bf16.msra.mxu0 %v12538_v61 }
 0xa34   : > { %11313 = vmatprep.subr.bf16.mxu0 %v12225_v37 }
 0xa3a   : > { %v2163_v24 = vpop.permute.xlu0 %2162 }
 0xa3b   : > { %v2168_v26 = vrot.slane %v2163_v24, %v12473_v19  ;;  %v2438_v24 = vrot.slane %v12554_v0, 3 }
 0xa3d   : > { %v2169_v30 = vmul.f32 %v2168_v26, %v2160_v29 }
 0xa3f   : > { %v2170_v35 = vadd.f32 %v2169_v30, %v2158_v33 }
 0xafd   : > { %v2058_v3 = vpop.f32.mrb[8].mxu0  ;;  %v2139_v4 = vpop.f32.mrb[10].mxu1 }
 0xafe   : > { %v2059_v5 = vadd.f32 %v2058_v3, %v12551_v63  ;;  %v10445_v6 = vpop.f32.mrb[9].mxu0  ;;  %v10456_v8 = vpop.f32.mrb[11].mxu1  ;;  %v2140_v20 = vadd.f32 %v2139_v4, %v2071_v18 }
 0xb00   : > { %v2064_v9 = vadd.f32 %v2062_v2, %v2059_v5 }
 0xb01   : > { %v2253_v40 = vpop.f32.mrb[10].mxu0 }
 0xb02   : > { %v9814_v11 = vmul.f32 -1.442695, %v2064_v9  ;;  %v10461_v41 = vpop.f32.mrb[11].mxu0  ;;  %v2254_v50 = vadd.f32 %v2253_v40, %v12482_v21 }
 0xb04   : > { %11889 = vpow2.f32 %v9814_v11 }
 0xb0e   : > { %v11890_v12 = vpop.eup %11889 }
 0xb0f   : > { %v2068_v14 = vadd.f32 1.0, %v11890_v12 }
 0xb11   : > { %11891 = vrcp.f32 %v2068_v14 }
 0xb1b   : > { %v11892_v22 = vpop.eup %11891 }
 0xb1c   : > { %v2143_v25 = vmul.f32 %v11892_v22, %v2140_v20  ;;  %v12231_v20 = vmov 3  }
 0xb1e   : > { %2145 = vst.msk [vmem:[#allocation2 + $0x2] sm:$0x1] %vm1423_vm4, %v2143_v25 }
 0xb25   : > { %v2171_v34 = vld [vmem:[#allocation2 + $0x2] sm:$0x1] }
 0xb26   : > { %v2180_v36 = vmul.f32 %v2179_v31, %v2171_v34  ;;  %v2447_v34 = vrot.slane %v12559_v10, 3 }
 0xb28   : > { %v2181_v39 = vadd.f32 %v2180_v36, %v2170_v35 }
 0xb2a   : > { %10471 = vmatmul.mubr.msk.f32.vlgmr.msra.gmra.mrb[12].mxu0 %vm1272_vm3, %v2181_v39  ;;  %v2357_v62 = vrot.slane %v2181_v39, %v12473_v19 }
 0xb2b   : > { %11315 = vmatpush3.bf16.msra.mxu0 %v12497_v42  ;;  %10492 = vmatprep.mubr.msk.f32.mxu0 %vm12223_vm1, %v12222_v15 }
 0xb2c   : > { %11316 = vmatprep.subr.bf16.mxu0 %v12225_v37 }
 0xb2f   : > { %11318 = vmatpush3.bf16.msra.mxu0 %v12506_v46 }
 0xb30   : > { %11325 = vmatprep.subr.bf16.mxu0 %v12225_v37 }
 0xbfd   : > { %v2326_v43 = vpop.f32.mrb[12].mxu0 }
 0xbfe   : > { %v2327_v44 = vadd.f32 %v2326_v43, %v12466_v17  ;;  %v10472_v49 = vpop.f32.mrb[13].mxu0 }
 0xc00   : > { %2338 = vrot.lane.b32.xlu0 %v2327_v44, %s14050_s16  ;;  %v2330_v51 = vadd.f32 %v2327_v44, %v2254_v50 }
 0xc02   : > { %v9821_v52 = vmul.f32 -1.442695, %v2330_v51 }
 0xc04   : > { %11893 = vpow2.f32 %v9821_v52  ;;  %v2524_v52 = vld [vmem:[#allocation2] sm:$0x1] }
 0xc0e   : > { %v11894_v53 = vpop.eup %11893 }
 0xc0f   : > { %v2334_v54 = vadd.f32 1.0, %v11894_v53 }
 0xc11   : > { %11895 = vrcp.f32 %v2334_v54 }
 0xc1b   : > { %v11896_v55 = vpop.eup %11895 }
 0xc1c   : > { %v2348_v8 = vsub.f32 1.0, %v11896_v55 }
 0xc72   : > { %v2339_v56 = vpop.permute.xlu0 %2338 }
 0xc73   : > { %v2341_v59 = vmul.f32 %v11896_v55, %v2339_v56 }
 0xc75   : > { %2343 = vrot.lane.b32.xlu1 %v2341_v59, %s14050_s16 }
 0xc79   : > { %2358 = vrot.lane.b32.xlu1 %v2357_v62, %s14048_s1  ;;  %v2547_v62 = vld [vmem:[#allocation2 + $0x2] sm:$0x1] }
 0xc7d   : > { %2527 = vperm.xlu1 %11842, %v9825_v1  }
 0xc81   : > { %11843 = vset.pattern.permute.xlu1 %v12230_v60 }
 0xc82   : > { %2549 = vperm.xlu1 %11843, %v9825_v1  }
 0xc86   : > { %11845 = vset.pattern.permute.xlu1 %v12227_v48 }
 0xce7   : > { %v2344_v3 = vpop.permute.xlu1 %2343 }
 0xce8   : > { %v2346_v4 = vadd.f32 %v2344_v3, %v2254_v50  ;;  %v2536_v50 = vld [vmem:[#allocation2 + $0x1] sm:$0x1] }
 0xcea   : > { %11897 = vtanh.f32 %v2346_v4 }
 0xceb   : > { %v2359_v6 = vpop.permute.xlu1 %2358 }
 0xcec   : > { %v2361_v11 = vmul.f32 %v11896_v55, %v2359_v6 }
 0xcf4   : > { %v11898_v5 = vpop.eup %11897 }
 0xcf5   : > { %2350 = vrot.lane.b32.xlu0 %v11898_v5, %s14045_s15 }
 0xcfc   : > { %v2528_v35 = vpop.permute.xlu1 %2527 }
 0xcfd   : > { %v2533_v43 = vrot.slane %v2528_v35, %v12473_v19 }
 0xcff   : > { %v2534_v54 = vmul.f32 %v2533_v43, %v2524_v52  ;;  %v9835_v52 = vld [vmem:[%s12469_s23 + $0x5] sm:$0x1] }
 0xd01   : > { %v2550_v49 = vpop.permute.xlu1 %2549 }
 0xd02   : > { %v2555_v55 = vrot.slane %v2550_v49, %v12473_v19 }
 0xd67   : > { %v2351_v9 = vpop.permute.xlu0 %2350 }
 0xd68   : > { %v2353_v12 = vmul.f32 %v2351_v9, %v2348_v8 }
 0xd6a   : > { %v2362_v14 = vadd.f32 %v2361_v11, %v2353_v12 }
 0xd6c   : > { %2364 = vrot.lane.b32.xlu0 %v2362_v14, %s14045_s15 }
 0xd70   : > { %2538 = vperm.xlu0 %11840, %v9825_v1  }
 0xd74   : > { %11844 = vset.pattern.permute.xlu0 %v12231_v20 }
 0xd75   : > { %2560 = vperm.xlu0 %11844, %v9825_v1   ;;  %v2556_v1 = vmul.f32 %v2555_v55, %v2547_v62 }
 0xd79   : > { %11846 = vset.pattern.permute.xlu0 %v12229_v47 }
 0xdde   : > { %v2365_v22 = vpop.permute.xlu0 %2364 }
 0xddf   : > { %10482 = vmatmul.mubr.msk.f32.vlgmr.msra.gmra.mrb[12].mxu1 %vm1272_vm3, %v2365_v22  ;;  %10493 = vmatmul.mubr.msk.f32.vlgmr.msra.gmra.mrb[14].mxu0 %vm1272_vm3, %v2365_v22 }
 0xde0   : > { %10496 = vmatpush3.msk.msra.mxu1 %vm1165_vm0, %v12451_v13  ;;  %10497 = vmatprep.mubr.msk.f32.mxu1 %vm12223_vm1, %v12222_v15 }
 0xde1   : > { %11319 = vmatprep.subr.bf16.mxu1 %v12225_v37  ;;  %11327 = vmatpush3.bf16.msra.mxu0 %v12492_v38 }
 0xde2   : > { %11328 = vmatprep.subr.bf16.mxu0 %v12225_v37  ;;  %10519 = vmatprep.mubr.msk.f32.mxu0 %vm12223_vm1, %v12222_v15 }
 0xde3   : > { %10498 = vmatmul.mubr.msk.f32.vlgmr.msra.gmra.mrb[14].mxu1 %vm1161_vm2, %v9826_v23 }
 0xde4   : > { %11321 = vmatpush3.bf16.msra.mxu1 %v12532_v58  ;;  %10508 = vmatprep.mubr.msk.f32.mxu1 %vm12223_vm1, %v12222_v15 }
 0xde5   : > { %11330 = vmatpush3.bf16.msra.mxu0 %v12502_v45  ;;  %11322 = vmatprep.subr.bf16.mxu1 %v12225_v37 }
 0xde6   : > { %10533 = vmatprep.subr.mxu0 %v12222_v15 }
 0xde8   : > { %11324 = vmatpush3.bf16.msra.mxu1 %v12538_v61 }
 0xde9   : > { %11331 = vmatprep.subr.bf16.mxu1 %v12225_v37 }
 0xdef   : > { %v2539_v36 = vpop.permute.xlu0 %2538 }
 0xdf0   : > { %v2544_v39 = vrot.slane %v2539_v36, %v12473_v19 }
 0xdf2   : > { %v2545_v51 = vmul.f32 %v2544_v39, %v2536_v50  ;;  %v12232_v50 = vmov 4  }
 0xdf4   : > { %v2561_v53 = vpop.permute.xlu0 %2560  ;;  %v2546_v56 = vadd.f32 %v2545_v51, %v2534_v54 }
 0xdf5   : > { %v2566_v59 = vrot.slane %v2561_v53, %v12473_v19 }
 0xdf6   : > { %v2557_v4 = vadd.f32 %v2556_v1, %v2546_v56 }
 0xeb2   : > { %v2434_v25 = vpop.f32.mrb[12].mxu1  ;;  %v2515_v26 = vpop.f32.mrb[14].mxu0 }
 0xeb3   : > { %v2435_v27 = vadd.f32 %v2434_v25, %v12551_v63  ;;  %v10483_v28 = vpop.f32.mrb[13].mxu1  ;;  %v10494_v29 = vpop.f32.mrb[15].mxu0  ;;  %v2516_v40 = vadd.f32 %v2515_v26, %v2447_v34 }
 0xeb5   : > { %v2440_v30 = vadd.f32 %v2438_v24, %v2435_v27 }
 0xeb6   : > { %v2640_v8 = vpop.f32.mrb[14].mxu1 }
 0xeb7   : > { %v9823_v31 = vmul.f32 -1.442695, %v2440_v30  ;;  %v10499_v9 = vpop.f32.mrb[15].mxu1  ;;  %v2641_v22 = vadd.f32 %v2640_v8, %v12482_v21 }
 0xeb9   : > { %11899 = vpow2.f32 %v9823_v31 }
 0xec3   : > { %v11900_v32 = vpop.eup %11899 }
 0xec4   : > { %v2444_v33 = vadd.f32 1.0, %v11900_v32  ;;  %v9834_v32 = vld [vmem:[%s12516_s18 + $0x5] sm:$0x1] }
 0xec6   : > { %11901 = vrcp.f32 %v2444_v33 }
 0xed0   : > { %v11902_v41 = vpop.eup %11901 }
 0xed1   : > { %v2519_v44 = vmul.f32 %v11902_v41, %v2516_v40 }
 0xed3   : > { %2521 = vst.msk [vmem:[#allocation2 + $0x3] sm:$0x1] %vm1423_vm4, %v2519_v44 }
 0xeda   : > { %v2558_v3 = vld [vmem:[#allocation2 + $0x3] sm:$0x1] }
 0xedb   : > { %v2567_v5 = vmul.f32 %v2566_v59, %v2558_v3 }
 0xedd   : > { %v2568_v6 = vadd.f32 %v2567_v5, %v2557_v4 }
 0xedf   : > { %10509 = vmatmul.mubr.msk.f32.vlgmr.msra.gmra.mrb[16].mxu1 %vm1272_vm3, %v2568_v6  ;;  %v2744_v31 = vrot.slane %v2568_v6, %v12473_v19  ;;  %v2834_v6 = vrot.slane %v12559_v10, 4 }
 0xee0   : > { %11333 = vmatpush3.bf16.msra.mxu1 %v12497_v42  ;;  %10530 = vmatprep.mubr.msk.f32.mxu1 %vm12223_vm1, %v12222_v15 }
 0xee1   : > { %11334 = vmatprep.subr.bf16.mxu1 %v12225_v37 }
 0xee4   : > { %11336 = vmatpush3.bf16.msra.mxu1 %v12506_v46 }
 0xee5   : > { %11343 = vmatprep.subr.bf16.mxu1 %v12225_v37 }
 0xfb2   : > { %v2713_v11 = vpop.f32.mrb[16].mxu1 }
 0xfb3   : > { %v2714_v12 = vadd.f32 %v2713_v11, %v12466_v17  ;;  %v10510_v14 = vpop.f32.mrb[17].mxu1 }
 0xfb5   : > { %2725 = vrot.lane.b32.xlu1 %v2714_v12, %s14050_s16  ;;  %v2717_v23 = vadd.f32 %v2714_v12, %v2641_v22 }
 0xfb7   : > { %v9830_v25 = vmul.f32 -1.442695, %v2717_v23 }
 0xfb9   : > { %11903 = vpow2.f32 %v9830_v25 }
 0xfc3   : > { %v11904_v26 = vpop.eup %11903 }
 0xfc4   : > { %v2721_v27 = vadd.f32 1.0, %v11904_v26 }
 0xfc6   : > { %11905 = vrcp.f32 %v2721_v27 }
 0xfd0   : > { %v11906_v28 = vpop.eup %11905 }
 0xfd1   : > { %v2735_v40 = vsub.f32 1.0, %v11906_v28 }
0x1027   : > { %v2726_v29 = vpop.permute.xlu1 %2725 }
0x1028   : > { %v2728_v30 = vmul.f32 %v11906_v28, %v2726_v29  ;;  %v2934_v29 = vld [vmem:[#allocation2 + $0x2] sm:$0x1] }
0x102a   : > { %2730 = vrot.lane.b32.xlu1 %v2728_v30, %s14050_s16 }
0x102e   : > { %2745 = vrot.lane.b32.xlu1 %v2744_v31, %s14048_s1 }
0x1032   : > { %2914 = vperm.xlu1 %11845, %v9834_v32  }
0x1036   : > { %11847 = vset.pattern.permute.xlu1 %v12230_v60 }
0x1037   : > { %2936 = vperm.xlu1 %11847, %v9834_v32  }
0x103b   : > { %11848 = vset.pattern.permute.xlu1 %v12231_v20 }
0x103c   : > { %2947 = vperm.xlu1 %11848, %v9834_v32  }
0x1040   : > { %11851 = vset.pattern.permute.xlu1 %v12229_v47 }
0x109c   : > { %v2731_v33 = vpop.permute.xlu1 %2730 }
0x109d   : > { %v2733_v35 = vadd.f32 %v2731_v33, %v2641_v22  ;;  %v2911_v22 = vld [vmem:[#allocation2] sm:$0x1] }
0x109f   : > { %11907 = vtanh.f32 %v2733_v35 }
0x10a0   : > { %v2746_v39 = vpop.permute.xlu1 %2745 }
0x10a1   : > { %v2748_v43 = vmul.f32 %v11906_v28, %v2746_v39 }
0x10a9   : > { %v11908_v36 = vpop.eup %11907 }
0x10aa   : > { %2737 = vrot.lane.b32.xlu0 %v11908_v36, %s14045_s15  ;;  %v2945_v36 = vld [vmem:[#allocation2 + $0x3] sm:$0x1] }
0x10b1   : > { %v2915_v4 = vpop.permute.xlu1 %2914 }
0x10b2   : > { %v2920_v9 = vrot.slane %v2915_v4, %v12473_v19 }
0x10b4   : > { %v2921_v23 = vmul.f32 %v2920_v9, %v2911_v22  ;;  %v1116_v9 = vld [vmem:[%s14089_s6] sm:$0xff] }
0x10b6   : > { %v2937_v8 = vpop.permute.xlu1 %2936 }
0x10b7   : > { %v2942_v25 = vrot.slane %v2937_v8, %v12473_v19  ;;  %v1112_v8 = vld [vmem:[%s12305_s24 + $0x8] sm:$0xff] }
0x10b9   : > { %v2943_v31 = vmul.f32 %v2942_v25, %v2934_v29  ;;  %v1119_v25 = vld [vmem:[%s14089_s6 + $0x18] sm:$0xff] }
0x10bb   : > { %v2948_v27 = vpop.permute.xlu1 %2947 }
0x111c   : > { %v2738_v41 = vpop.permute.xlu0 %2737 }
0x111d   : > { %v2740_v44 = vmul.f32 %v2738_v41, %v2735_v40 }
0x111f   : > { %v2749_v49 = vadd.f32 %v2748_v43, %v2740_v44 }
0x1121   : > { %2751 = vrot.lane.b32.xlu0 %v2749_v49, %s14045_s15 }
0x1125   : > { %2925 = vperm.xlu0 %11846, %v9834_v32  }
0x1129   : > { %11849 = vset.pattern.permute.xlu0 %v12232_v50 }
0x112a   : > { %2958 = vperm.xlu0 %11849, %v9834_v32   ;;  %v2953_v32 = vrot.slane %v2948_v27, %v12473_v19 }
0x112c   : > { %v2954_v39 = vmul.f32 %v2953_v32, %v2945_v36 }
0x112e   : > { %11850 = vset.pattern.permute.xlu0 %v12227_v48 }
0x1193   : > { %v2752_v51 = vpop.permute.xlu0 %2751 }
0x1194   : > { %10520 = vmatmul.mubr.msk.f32.vlgmr.msra.gmra.mrb[16].mxu0 %vm1272_vm3, %v2752_v51  ;;  %10531 = vmatmul.mubr.msk.f32.vlgmr.msra.gmra.mrb[18].mxu1 %vm1272_vm3, %v2752_v51 }
0x1195   : > { %10534 = vmatpush3.msk.msra.mxu0 %vm1165_vm0, %v12451_v13  ;;  %10535 = vmatprep.mubr.msk.f32.mxu0 %vm12223_vm1, %v12222_v15  ;;  %v2825_v13 = vrot.slane %v12554_v0, 4 }
0x1196   : > { %11337 = vmatprep.subr.bf16.mxu0 %v12225_v37  ;;  %10557 = vmatprep.mubr.msk.f32.mxu1 %vm12223_vm1, %v12222_v15 }
0x1198   : > { %10536 = vmatmul.mubr.msk.f32.vlgmr.msra.gmra.mrb[18].mxu0 %vm1161_vm2, %v9835_v52 }
0x1199   : > { %11339 = vmatpush3.bf16.msra.mxu0 %v12532_v58  ;;  %10546 = vmatprep.mubr.msk.f32.mxu0 %vm12223_vm1, %v12222_v15 }
0x119a   : > { %11340 = vmatprep.subr.bf16.mxu0 %v12225_v37 }
0x119d   : > { %11342 = vmatpush3.bf16.msra.mxu0 %v12538_v61 }
0x119e   : > { %11349 = vmatprep.subr.bf16.mxu0 %v12225_v37 }
0x11a4   : > { %v2926_v61 = vpop.permute.xlu0 %2925 }
0x11a5   : > { %v2931_v5 = vrot.slane %v2926_v61, %v12473_v19 }
0x11a9   : > { %v2959_v30 = vpop.permute.xlu0 %2958 }
0x11aa   : > { %v2964_v35 = vrot.slane %v2959_v30, %v12473_v19 }
0x1267   : > { %v2821_v53 = vpop.f32.mrb[16].mxu0  ;;  %v2902_v54 = vpop.f32.mrb[18].mxu1 }
0x1268   : > { %v2822_v55 = vadd.f32 %v2821_v53, %v12551_v63  ;;  %v10521_v56 = vpop.f32.mrb[17].mxu0  ;;  %v10532_v59 = vpop.f32.mrb[19].mxu1  ;;  %v2923_v63 = vld [vmem:[#allocation2 + $0x1] sm:$0x1]  ;;  %v2903_v12 = vadd.f32 %v2902_v54, %v2834_v6 }
0x1269   : > { %v2932_v11 = vmul.f32 %v2931_v5, %v2923_v63  ;;  %v1111_v5 = vld [vmem:[%s12305_s24] sm:$0xff] }
0x126a   : > { %v2827_v58 = vadd.f32 %v2825_v13, %v2822_v55  ;;  %v11344_v63 = vpack.c.bf16 %v1112_v8, %v1111_v5 }
0x126b   : > { %v2933_v28 = vadd.f32 %v2932_v11, %v2921_v23  ;;  %v3038_v49 = vpop.f32.mrb[18].mxu0  ;;  %v1117_v11 = vld [vmem:[%s14089_s6 + $0x8] sm:$0xff]  ;;  %v1118_v23 = vld [vmem:[%s14089_s6 + $0x10] sm:$0xff]  ;;  %s14110_s6 = sld [smem:[#allocation18_spill]] }
0x126c   : > { %v9832_v62 = vmul.f32 -1.442695, %v2827_v58  ;;  %v10537_v51 = vpop.f32.mrb[19].mxu0  ;;  %v3039_v55 = vadd.f32 %v3038_v49, %v12482_v21  ;;  %v11350_v22 = vpack.c.bf16 %v1117_v11, %v1116_v9  ;;  %11345 = vmatpush3.bf16.msra.mxu1 %v11344_v63  ;;  %v11353_v27 = vpack.c.bf16 %v1119_v25, %v1118_v23  ;;  %v1105_v63 = vld [vmem:[%s14094_s7] sm:$0xff]  ;;  %v1106_v11 = vld [vmem:[%s14094_s7 + $0x8] sm:$0xff] }
0x126d   : > { %v2944_v33 = vadd.f32 %v2943_v31, %v2933_v28  ;;  %11346 = vmatprep.subr.bf16.mxu1 %v12225_v37  ;;  %v12819_v23 = vld [vmem:[%s14095_s11] sm:$0x1f]  ;;  %v3375_v25 = vld [vmem:[%s12469_s23] sm:$0x1] }
0x126e   : > { %11909 = vpow2.f32 %v9832_v62 }
0x126f   : > { %v2955_v41 = vadd.f32 %v2954_v39, %v2944_v33  ;;  %v1121_v39 = vld [vmem:[%s12325_s20] sm:$0xff] }
0x1278   : > { %v11910_v1 = vpop.eup %11909 }
0x1279   : > { %v2831_v3 = vadd.f32 1.0, %v11910_v1 }
0x127b   : > { %11911 = vrcp.f32 %v2831_v3 }
0x1285   : > { %v11912_v14 = vpop.eup %11911 }
0x1286   : > { %v2906_v26 = vmul.f32 %v11912_v14, %v2903_v12  ;;  %v1113_v12 = vld [vmem:[%s12305_s24 + $0x10] sm:$0xff]  ;;  %v1114_v14 = vld [vmem:[%s12305_s24 + $0x18] sm:$0xff] }
0x1288   : > { %2908 = vst.msk [vmem:[#allocation2 + $0x4] sm:$0x1] %vm1423_vm4, %v2906_v26  ;;  %v11347_v26 = vpack.c.bf16 %v1114_v14, %v1113_v12  ;;  %v1107_v12 = vld [vmem:[%s14094_s7 + $0x10] sm:$0xff]  ;;  %v12815_v14 = vpack.c.bf16 %v1106_v11, %v1105_v63  ;;  %v1124_v11 = vld [vmem:[%s14101_s3] sm:$0xff] }
0x128a   : > { %11348 = vmatpush3.bf16.msra.mxu1 %v11347_v26 }
0x128b   : > { %11355 = vmatprep.subr.bf16.mxu1 %v12225_v37 }
0x128f   : > { %v2956_v40 = vld [vmem:[#allocation2 + $0x4] sm:$0x1] }
0x1290   : > { %v2965_v43 = vmul.f32 %v2964_v35, %v2956_v40  ;;  %v1122_v40 = vld [vmem:[%s12325_s20 + $0x8] sm:$0xff] }
0x1292   : > { %v2966_v44 = vadd.f32 %v2965_v43, %v2955_v41  ;;  %v11356_v41 = vpack.c.bf16 %v1122_v40, %v1121_v39  ;;  %v1115_v43 = vld [vmem:[%s12310_s30] sm:$0x1] }
0x1294   : > { %10547 = vmatmul.mubr.msk.f32.vlgmr.msra.gmra.mrb[20].mxu0 %vm1272_vm3, %v2966_v44  ;;  %v3142_v21 = vrot.slane %v2966_v44, %v12473_v19  ;;  %v1120_v44 = vld [vmem:[%s12320_s12] sm:$0x1] }
0x1295   : > { %10568 = vmatprep.mubr.msk.f32.mxu0 %vm12223_vm1, %v12222_v15  ;;  %11351 = vmatpush3.bf16.msra.mxu0 %v11350_v22  ;;  %v1108_v22 = vld [vmem:[%s14094_s7 + $0x18] sm:$0xff]  ;;  %s14111_s7 = sld [smem:[#allocation22_spill]] }
0x1296   : > { %11352 = vmatprep.subr.bf16.mxu0 %v12225_v37  ;;  %v12825_v26 = vpack.c.bf16 %v1108_v22, %v1107_v12  ;;  %v1125_v12 = vld [vmem:[%s14101_s3 + $0x8] sm:$0xff] }
0x1299   : > { %11354 = vmatpush3.bf16.msra.mxu0 %v11353_v27  ;;  %v1123_v27 = vld [vmem:[%s14096_s26] sm:$0x1]  ;;  %s14099_s26 = sld [smem:[#allocation19_spill]] }
0x129a   : > { %11358 = vmatprep.subr.bf16.mxu0 %v12225_v37 }
0x1367   : > { %v3111_v52 = vpop.f32.mrb[20].mxu0 }
0x1368   : > { %v3112_v53 = vadd.f32 %v3111_v52, %v12466_v17  ;;  %v10548_v54 = vpop.f32.mrb[21].mxu0 }
0x136a   : > { %3123 = vrot.lane.b32.xlu1 %v3112_v53, %s14050_s16  ;;  %v3115_v56 = vadd.f32 %v3112_v53, %v3039_v55 }
0x136c   : > { %v9839_v59 = vmul.f32 -1.442695, %v3115_v56 }
0x136e   : > { %11913 = vpow2.f32 %v9839_v59 }
0x1378   : > { %v11914_v58 = vpop.eup %11913 }
0x1379   : > { %v3119_v62 = vadd.f32 1.0, %v11914_v58 }
0x137b   : > { %11915 = vrcp.f32 %v3119_v62 }
0x1385   : > { %v11916_v1 = vpop.eup %11915 }
0x1386   : > { %v3133_v30 = vsub.f32 1.0, %v11916_v1 }
0x13dc   : > { %v3124_v3 = vpop.permute.xlu1 %3123 }
0x13dd   : > { %v3126_v17 = vmul.f32 %v11916_v1, %v3124_v3 }
0x13df   : > { %3128 = vrot.lane.b32.xlu1 %v3126_v17, %s14050_s16  ;;  %v3296_v17 = vld [vmem:[%s1092_s10] sm:$0x1]  ;;  %s14098_s10 = sld [smem:[#allocation11_spill]] }
0x13e3   : > { %3143 = vrot.lane.b32.xlu1 %v3142_v21, %s14048_s1  ;;  %v3297_v21 = vmul.f32 0.01, %v3296_v17 }
0x1451   : > { %v3129_v4 = vpop.permute.xlu1 %3128 }
0x1452   : > { %v3131_v61 = vadd.f32 %v3129_v4, %v3039_v55 }
0x1454   : > { %11917 = vtanh.f32 %v3131_v61 }
0x1455   : > { %v3144_v29 = vpop.permute.xlu1 %3143 }
0x1456   : > { %v3146_v32 = vmul.f32 %v11916_v1, %v3144_v29 }
0x145e   : > { %v11918_v28 = vpop.eup %11917 }
0x145f   : > { %3135 = vrot.lane.b32.xlu0 %v11918_v28, %s14045_s15 }
0x14d1   : > { %v3136_v31 = vpop.permute.xlu0 %3135 }
0x14d2   : > { %v3138_v33 = vmul.f32 %v3136_v31, %v3133_v30 }
0x14d4   : > { %v3147_v35 = vadd.f32 %v3146_v32, %v3138_v33 }
0x14d6   : > { %3149 = vrot.lane.b32.xlu0 %v3147_v35, %s14045_s15  ;;  %v12847_v35 = vld [vmem:[%s14097_s28] sm:$0x1]  ;;  %s14100_s15 = smov %s14099_s26 }
0x14d7   : > { %v1139_v63 = vld [vmem:[%s14100_s15 + $0x8] sm:$0xff] }
0x1548   : > { %v3150_v36 = vpop.permute.xlu0 %3149 }
0x1549   : > { %10558 = vmatmul.mubr.msk.f32.vlgmr.msra.gmra.mrb[20].mxu1 %vm1272_vm3, %v3150_v36  ;;  %10569 = vmatmul.mubr.msk.f32.vlgmr.msra.gmra.mrb[22].mxu0 %vm1272_vm3, %v3150_v36 }
0x154a   : > { %10575 = vmatprep.mubr.msk.f32.mxu1 %vm12223_vm1, %v12222_v15  ;;  %10591 = vmatprep.mubr.msk.f32.mxu0 %vm12223_vm1, %v12222_v15 }
0x154b   : > { %11357 = vmatpush3.bf16.msra.mxu1 %v11356_v41  ;;  %11360 = vmatpush3.bf16.msra.mxu0 %v12815_v14  ;;  %v12852_v41 = vld [vmem:[%s14098_s10] sm:$0x1] }
0x154c   : > { %10578 = vmatprep.subr.mxu1 %v12222_v15  ;;  %11361 = vmatprep.subr.bf16.mxu0 %v12225_v37 }
0x154f   : > { %11363 = vmatpush3.bf16.msra.mxu0 %v12825_v26 }
0x1550   : > { %11370 = vmatprep.subr.bf16.mxu0 %v12225_v37 }
0x161c   : > { %v3219_v49 = vpop.f32.mrb[20].mxu1  ;;  %v3289_v51 = vpop.f32.mrb[22].mxu0 }
0x161d   : > { %v3220_v52 = vadd.f32 %v3219_v49, %v1115_v43  ;;  %v3290_v53 = vadd.f32 %v3289_v51, %v1120_v44  ;;  %v10559_v54 = vpop.f32.mrb[21].mxu1  ;;  %v10570_v55 = vpop.f32.mrb[23].mxu0 }
0x161f   : > { %v9648_v56 = vmul.f32 %v3220_v52, %v3220_v52  ;;  %v3293_v59 = vmul.f32 0.5, %v3290_v53  ;;  %v9647_v58 = vadd.f32 1.0, %v3290_v53  ;;  %v9650_v62 = vmul.f32 1.442695, %v3290_v53 }
0x1621   : > { %v3294_v1 = vmul.f32 1.442695, %v3293_v59  ;;  %11919 = vpow2.f32 %v9650_v62  ;;  %v9649_v3 = vsub.f32 %v9647_v58, %v9648_v56 }
0x1623   : > { %11921 = vpow2.f32 %v3294_v1 }
0x162b   : > { %v11920_v4 = vpop.eup %11919 }
0x162c   : > { %v12808_v61 = vsub.f32 %v9649_v3, %v11920_v4 }
0x162d   : > { %v11922_v5 = vpop.eup %11921 }
0x162e   : > { %v3298_v8 = vmul.f32 %v11922_v5, %v3297_v21  ;;  %v9852_v5 = vld [vmem:[%s12516_s18 + $0x1] sm:$0x1] }
0x1630   : > { %v3299_v9 = vadd.f32 %v3298_v8, %v3220_v52  ;;  %v4036_v8 = vrot.slane %v12847_v35, %v12473_v19 }
0x1632   : > { %10576 = vmatmul.mubr.msk.f32.vlgmr.msra.gmra.mrb[22].mxu1 %vm3300_vm5, %v3299_v9  ;;  %v1138_v9 = vld [vmem:[%s14099_s26] sm:$0xff]  ;;  %s14104_s26 = sld [smem:[#allocation16_spill]] }
0x1633   : > { %10580 = vmatprep.mubr.msk.f32.mxu1 %vm12223_vm1, %v12222_v15  ;;  %10579 = vmatpush3.msk.msra.mxu1 %vm1165_vm0, %v12819_v23  ;;  %v12867_v22 = vpack.c.bf16 %v1139_v63, %v1138_v9 }
0x1634   : > { %11364 = vmatprep.subr.bf16.mxu1 %v12225_v37 }
0x1636   : > { %10581 = vmatmul.mubr.msk.f32.vlgmr.msra.gmra.mrb[24].mxu1 %vm1161_vm2, %v3375_v25  ;;  %v12869_v25 = vpack.c.bf16 %v1125_v12, %v1124_v11 }
0x1637   : > { %11366 = vmatpush3.bf16.msra.mxu1 %v12492_v38  ;;  %10602 = vmatprep.mubr.msk.f32.mxu1 %vm12223_vm1, %v12222_v15 }
0x1638   : > { %11367 = vmatprep.subr.bf16.mxu1 %v12225_v37  ;;  %v12936_v9 = vld [vmem:[%s14104_s26] sm:$0x1] }
0x163b   : > { %11369 = vmatpush3.bf16.msra.mxu1 %v12502_v45 }
0x163c   : > { %11376 = vmatprep.subr.bf16.mxu1 %v12225_v37 }
0x1705   : > { %v3370_v28 = vpop.f32.mrb[22].mxu1 }
0x1706   : > { %v3371_v29 = vadd.f32 %v3370_v28, %v1123_v27  ;;  %v10577_v30 = vpop.f32.mrb[23].mxu1  ;;  %v1140_v27 = vld [vmem:[%s14100_s15 + $0x10] sm:$0xff]  ;;  %v1141_v28 = vld [vmem:[%s14100_s15 + $0x18] sm:$0xff] }
0x1707   : > { %v1127_v30 = vld [vmem:[%s14101_s3 + $0x18] sm:$0xff] }
0x1708   : > { %11923 = vtanh.f32 %v3371_v29  ;;  %v1126_v29 = vld [vmem:[%s14101_s3 + $0x10] sm:$0xff]  ;;  %s14108_s3 = sld [smem:[#allocation20_spill]] }
0x1709   : > { %v3448_v32 = vpop.f32.mrb[24].mxu1 }
0x170a   : > { %v10582_v33 = vpop.f32.mrb[25].mxu1  ;;  %v3449_v43 = vadd.f32 %v3448_v32, %v12852_v41  ;;  %v12879_v32 = vpack.c.bf16 %v1141_v28, %v1140_v27 }
0x170b   : > { %v12881_v33 = vpack.c.bf16 %v1127_v30, %v1126_v29 }
0x1712   : > { %v11924_v31 = vpop.eup %11923 }
0x1713   : > { %10592 = vmatmul.mubr.msk.f32.vlgmr.msra.gmra.mrb[24].mxu0 %vm1272_vm3, %v11924_v31 }
0x1714   : > { %11372 = vmatpush3.bf16.msra.mxu0 %v12497_v42  ;;  %10613 = vmatprep.mubr.msk.f32.mxu0 %vm12223_vm1, %v12222_v15 }
0x1715   : > { %11373 = vmatprep.subr.bf16.mxu0 %v12225_v37 }
0x1718   : > { %11375 = vmatpush3.bf16.msra.mxu0 %v12506_v46 }
0x1719   : > { %11382 = vmatprep.subr.bf16.mxu0 %v12225_v37 }
0x17e6   : > { %v3521_v36 = vpop.f32.mrb[24].mxu0 }
0x17e7   : > { %v3522_v39 = vadd.f32 %v3521_v36, %v12847_v35  ;;  %v10593_v40 = vpop.f32.mrb[25].mxu0 }
0x17e9   : > { %3533 = vrot.lane.b32.xlu1 %v3522_v39, %s14050_s16  ;;  %v3525_v44 = vadd.f32 %v3522_v39, %v3449_v43 }
0x17eb   : > { %v9846_v49 = vmul.f32 -1.442695, %v3525_v44 }
0x17ed   : > { %11925 = vpow2.f32 %v9846_v49 }
0x17f7   : > { %v11926_v51 = vpop.eup %11925 }
0x17f8   : > { %v3529_v52 = vadd.f32 1.0, %v11926_v51 }
0x17fa   : > { %11927 = vrcp.f32 %v3529_v52 }
0x1804   : > { %v11928_v53 = vpop.eup %11927 }
0x1805   : > { %v3543_v1 = vsub.f32 1.0, %v11928_v53 }
0x185b   : > { %v3534_v54 = vpop.permute.xlu1 %3533 }
0x185c   : > { %v3536_v55 = vmul.f32 %v11928_v53, %v3534_v54 }
0x185e   : > { %3538 = vrot.lane.b32.xlu0 %v3536_v55, %s14050_s16 }
0x1862   : > { %3549 = vrot.lane.b32.xlu0 %v11924_v31, %s14048_s1  ;;  %s14103_s1 = sld [smem:[#allocation17_spill]] }
0x1866   : > { %4165 = vperm.xlu0 %11850, %v9852_v5  }
0x1868   : > { %v1129_v36 = vld [vmem:[%s14103_s1] sm:$0xff]  ;;  %v1130_v39 = vld [vmem:[%s14103_s1 + $0x8] sm:$0xff]  ;;  %v1131_v44 = vld [vmem:[%s14103_s1 + $0x10] sm:$0xff] }
0x1869   : > { %v12895_v40 = vpack.c.bf16 %v1130_v39, %v1129_v36  ;;  %v1132_v49 = vld [vmem:[%s14103_s1 + $0x18] sm:$0xff]  ;;  %v1133_v52 = vld [vmem:[%s14103_s1 + $0x20] sm:$0xff]  ;;  %v1135_v55 = vld [vmem:[%s14103_s1 + $0x30] sm:$0xff] }
0x186a   : > { %v12914_v51 = vpack.c.bf16 %v1132_v49, %v1131_v44 }
0x18d0   : > { %v3539_v56 = vpop.permute.xlu0 %3538 }
0x18d1   : > { %v3541_v59 = vadd.f32 %v3539_v56, %v3449_v43  ;;  %v9851_v43 = vld [vmem:[%s12469_s23 + $0x1] sm:$0x1]  ;;  %v1136_v56 = vld [vmem:[%s14103_s1 + $0x38] sm:$0xff] }
0x18d3   : > { %11929 = vtanh.f32 %v3541_v59  ;;  %v12926_v59 = vpack.c.bf16 %v1136_v56, %v1135_v55 }
0x18d4   : > { %v3550_v62 = vpop.permute.xlu0 %3549 }
0x18d5   : > { %v3552_v17 = vmul.f32 %v11928_v53, %v3550_v62  ;;  %v1134_v53 = vld [vmem:[%s14103_s1 + $0x28] sm:$0xff]  ;;  %s14107_s1 = smov 32  }
0x18d6   : > { %v12920_v54 = vpack.c.bf16 %v1134_v53, %v1133_v52  ;;  %v12147_v53 = vld [vmem:[%s14088_s8] sm:$0x3f]  ;;  %s14062_s8 = smov 1  }
0x18dd   : > { %v11930_v58 = vpop.eup %11929 }
0x18de   : > { %3545 = vrot.lane.b32.xlu1 %v11930_v58, %s14102_s5 }
0x1950   : > { %v3546_v3 = vpop.permute.xlu1 %3545 }
0x1951   : > { %v3548_v21 = vmul.f32 %v3546_v3, %v3543_v1  ;;  %v12931_v1 = vld [vmem:[%s12383_s19] sm:$0x1] }
0x1953   : > { %v3553_v4 = vadd.f32 %v3552_v17, %v3548_v21 }
0x1955   : > { %3555 = vrot.lane.b32.xlu1 %v3553_v4, %s14102_s5  ;;  %v12146_v4 = vld [vmem:[%s12388_s27] sm:$0x3f] }
0x1959   : > { %4037 = vrot.lane.b32.xlu1 %v4036_v8, %s14050_s16  ;;  %s14105_s16 = smov %s14104_s26  ;;  %s14106_s26 = smov 64  }
0x19c7   : > { %v3556_v31 = vpop.permute.xlu1 %3555 }
0x19c8   : > { %10603 = vmatmul.mubr.msk.f32.vlgmr.msra.gmra.mrb[26].mxu1 %vm1272_vm3, %v3556_v31  ;;  %10614 = vmatmul.mubr.msk.f32.vlgmr.msra.gmra.mrb[26].mxu0 %vm1272_vm3, %v3556_v31 }
0x19c9   : > { %11378 = vmatpush3.bf16.msra.mxu1 %v12867_v22  ;;  %11384 = vmatpush3.bf16.msra.mxu0 %v12869_v25 }
0x19ca   : > { %11379 = vmatprep.subr.bf16.mxu1 %v12225_v37  ;;  %11385 = vmatprep.subr.bf16.mxu0 %v12225_v37 }
0x19cb   : > { %10624 = vmatprep.mubr.msk.f32.mxu1 %vm12223_vm1, %v12222_v15  ;;  %10635 = vmatprep.mubr.msk.f32.mxu0 %vm12223_vm1, %v12222_v15 }
0x19cd   : > { %11381 = vmatpush3.bf16.msra.mxu1 %v12879_v32  ;;  %11387 = vmatpush3.bf16.msra.mxu0 %v12881_v33 }
0x19ce   : > { %10657 = vmatprep.subr.mxu0 %v12222_v15  ;;  %11388 = vmatprep.subr.bf16.mxu1 %v12225_v37 }
0x19d0   : > { %10625 = vmatmul.mubr.msk.f32.vlgmr.msra.gmra.mrb[28].mxu1 %vm1272_vm3, %v3556_v31  ;;  %10636 = vmatmul.mubr.msk.f32.vlgmr.msra.gmra.mrb[28].mxu0 %vm1272_vm3, %v3556_v31 }
0x19d1   : > { %10658 = vmatpush3.msk.msra.mxu0 %vm1165_vm0, %v12819_v23  ;;  %10659 = vmatprep.mubr.msk.f32.mxu0 %vm12223_vm1, %v12222_v15 }
0x19d2   : > { %11390 = vmatpush3.bf16.msra.mxu1 %v12895_v40  ;;  %10654 = vmatprep.mubr.msk.f32.mxu1 %vm12223_vm1, %v12222_v15 }
0x19d3   : > { %11391 = vmatprep.subr.bf16.mxu1 %v12225_v37  ;;  %11400 = vmatprep.subr.bf16.mxu0 %v12225_v37 }
0x19d4   : > { %10660 = vmatmul.mubr.msk.f32.vlgmr.msra.gmra.mrb[30].mxu0 %vm1161_vm2, %v9851_v43 }
0x19d5   : > { %10670 = vmatprep.mubr.msk.f32.mxu0 %vm12223_vm1, %v12222_v15 }
0x19d6   : > { %11393 = vmatpush3.bf16.msra.mxu1 %v12914_v51 }
0x19d7   : > { %11394 = vmatprep.subr.bf16.mxu1 %v12225_v37 }
0x19da   : > { %11396 = vmatpush3.bf16.msra.mxu1 %v12920_v54 }
0x19db   : > { %11397 = vmatprep.subr.bf16.mxu1 %v12225_v37 }
0x19de   : > { %11399 = vmatpush3.bf16.msra.mxu1 %v12926_v59 }
0x19df   : > { %11406 = vmatprep.subr.bf16.mxu1 %v12225_v37 }
0x1a9b   : > { %v3625_v58 = vpop.f32.mrb[26].mxu1  ;;  %v3702_v62 = vpop.f32.mrb[26].mxu0 }
0x1a9c   : > { %v3626_v3 = vadd.f32 %v12931_v1, %v3625_v58  ;;  %v10604_v17 = vpop.f32.mrb[27].mxu1  ;;  %v10615_v21 = vpop.f32.mrb[27].mxu0  ;;  %v3703_v55 = vadd.f32 %v12147_v53, %v3702_v62 }
0x1a9d   : > { %v4166_v17 = vpop.permute.xlu0 %4165 }
0x1a9e   : > { %v3629_v5 = vadd.f32 %v12146_v4, %v3626_v3  ;;  %v4171_v21 = vrot.slane %v4166_v17, %v12473_v19  ;;  %v1143_v17 = vld [vmem:[%s14108_s3 + $0x8] sm:$0xff] }
0x1aa0   : > { %v9848_v8 = vmul.f32 -1.442695, %v3629_v5  ;;  %v12954_v5 = vpop.permute.xlu1 %4037 }
0x1aa2   : > { %11931 = vpow2.f32 %v9848_v8 }
0x1aa3   : > { %v3774_v63 = vpop.f32.mrb[28].mxu1  ;;  %v3847_v11 = vpop.f32.mrb[28].mxu0 }
0x1aa4   : > { %3778 = vst [vmem:[#allocation3] sm:$0x1] %v3774_v63  ;;  %v3848_v12 = vadd.f32 %v3847_v11, %v12936_v9  ;;  %v10626_v27 = vpop.f32.mrb[29].mxu1  ;;  %v10637_v28 = vpop.f32.mrb[29].mxu0 }
0x1aa6   : > { %v3851_v29 = vmax.f32 %v3848_v12, 0.0 }
0x1aa7   : > { %v4021_v30 = vpop.f32.mrb[30].mxu0 }
0x1aa8   : > { %v12940_v31 = vadd.f32 %v4021_v30, %v12852_v41  ;;  %10655 = vmatmul.mubr.msk.f32.vlgmr.msra.gmra.mrb[30].mxu1 %vm3852_vm6, %v3851_v29  ;;  %v10661_v36 = vpop.f32.mrb[31].mxu0 }
0x1aa9   : > { %11408 = vmatpush3.bf16.msra.mxu1 %v12815_v14  ;;  %10681 = vmatprep.mubr.msk.f32.mxu1 %vm12223_vm1, %v12222_v15 }
0x1aaa   : > { %v4025_v39 = vadd.f32 %v12940_v31, %v12847_v35  ;;  %11409 = vmatprep.subr.bf16.mxu1 %v12225_v37 }
0x1aac   : > { %v11932_v43 = vpop.eup %11931  ;;  %v9857_v44 = vmul.f32 -1.442695, %v4025_v39 }
0x1aad   : > { %v3633_v49 = vadd.f32 1.0, %v11932_v43  ;;  %11411 = vmatpush3.bf16.msra.mxu1 %v12825_v26 }
0x1aae   : > { %11933 = vpow2.f32 %v9857_v44  ;;  %11418 = vmatprep.subr.bf16.mxu1 %v12225_v37 }
0x1aaf   : > { %11935 = vrcp.f32 %v3633_v49 }
0x1ab8   : > { %v11934_v52 = vpop.eup %11933 }
0x1ab9   : > { %v11936_v56 = vpop.eup %11935  ;;  %v4029_v58 = vadd.f32 1.0, %v11934_v52 }
0x1aba   : > { %v3706_v3 = vmul.f32 %v11936_v56, %v3703_v55 }
0x1abb   : > { %11937 = vrcp.f32 %v4029_v58 }
0x1abc   : > { %3707 = vst.msk [vmem:[#allocation2] sm:$0x1] %vm1423_vm4, %v3706_v3  ;;  %v1142_v3 = vld [vmem:[%s14108_s3] sm:$0xff] }
0x1ac3   : > { %v4162_v4 = vld [vmem:[#allocation2] sm:$0x1] }
0x1ac4   : > { %v4172_v8 = vmul.f32 %v4171_v21, %v4162_v4  ;;  %v12977_v21 = vpack.c.bf16 %v1143_v17, %v1142_v3 }
0x1ac5   : > { %v11938_v63 = vpop.eup %11937 }
0x1ac6   : > { %10682 = vmatmul.mubr.msk.f32.vlgmr.msra.gmra.mrb[32].mxu1 %vm1272_vm3, %v4172_v8  ;;  %v4040_v11 = vmul.f32 %v11938_v63, %v12954_v5  ;;  %v4274_v28 = vrot.slane %v4172_v8, %v12473_v19  ;;  %11402 = vmatpush3.bf16.msra.mxu0 %v12977_v21  ;;  %v1144_v8 = vld [vmem:[%s14108_s3 + $0x10] sm:$0xff] }
0x1ac7   : > { %11420 = vmatpush3.bf16.msra.mxu1 %v12497_v42  ;;  %10703 = vmatprep.mubr.msk.f32.mxu1 %vm12223_vm1, %v12222_v15 }
0x1ac8   : > { %4042 = vrot.lane.b32.xlu0 %v4040_v11, %s14106_s26  ;;  %11421 = vmatprep.subr.bf16.mxu1 %v12225_v37  ;;  %v1145_v11 = vld [vmem:[%s14108_s3 + $0x18] sm:$0xff]  ;;  %s14109_s3 = sld [smem:[#allocation21_spill]] }
0x1ac9   : > { %11403 = vmatprep.subr.bf16.mxu0 %v12225_v37 }
0x1acb   : > { %11423 = vmatpush3.bf16.msra.mxu1 %v12506_v46 }
0x1acc   : > { %11430 = vmatprep.subr.bf16.mxu1 %v12225_v37 }
0x1b3a   : > { %v4043_v62 = vpop.permute.xlu0 %4042 }
0x1b3b   : > { %v4045_v12 = vadd.f32 %v4043_v62, %v12940_v31 }
0x1b3d   : > { %11939 = vtanh.f32 %v4045_v12  ;;  %v12984_v12 = vpack.c.bf16 %v1145_v11, %v1144_v8 }
0x1b3f   : > { %11405 = vmatpush3.bf16.msra.mxu0 %v12984_v12 }
0x1b40   : > { %11412 = vmatprep.subr.bf16.mxu0 %v12225_v37 }
0x1b47   : > { %v11940_v27 = vpop.eup %11939 }
0x1b48   : > { %4049 = vrot.lane.b32.xlu0 %v11940_v27, %s14102_s5  ;;  %v4047_v27 = vsub.f32 1.0, %v11938_v63 }
0x1b4c   : > { %4275 = vrot.lane.b32.xlu0 %v4274_v28, %s14107_s1 }
0x1b7b   : > { %v12969_v29 = vpop.f32.mrb[30].mxu1 }
0x1b7c   : > { %v10656_v30 = vpop.f32.mrb[31].mxu1 }
0x1b7d   : > { %v4053_v30 = vmul.f32 0.0, %v11938_v63 }
0x1b99   : > { %v4243_v36 = vpop.f32.mrb[32].mxu1 }
0x1b9a   : > { %v4244_v39 = vadd.f32 %v4243_v36, %v12847_v35  ;;  %v10683_v43 = vpop.f32.mrb[33].mxu1 }
0x1b9c   : > { %4255 = vrot.lane.b32.xlu1 %v4244_v39, %s14106_s26  ;;  %v4247_v44 = vadd.f32 %v4244_v39, %v12940_v31 }
0x1b9e   : > { %v9860_v49 = vmul.f32 -1.442695, %v4247_v44  ;;  %v9866_v44 = vld [vmem:[%s12516_s18 + $0x2] sm:$0x1] }
0x1ba0   : > { %11941 = vpow2.f32 %v9860_v49 }
0x1baa   : > { %v11942_v52 = vpop.eup %11941 }
0x1bab   : > { %v4251_v53 = vadd.f32 1.0, %v11942_v52 }
0x1bad   : > { %11943 = vrcp.f32 %v4251_v53 }
0x1bb7   : > { %v11944_v55 = vpop.eup %11943 }
0x1bb8   : > { %v4265_v49 = vsub.f32 1.0, %v11944_v55 }
0x1bba   : > { %v4050_v28 = vpop.permute.xlu0 %4049 }
0x1bbb   : > { %v4052_v36 = vmul.f32 %v4050_v28, %v4047_v27 }
0x1bbd   : > { %v4054_v43 = vadd.f32 %v4053_v30, %v4052_v36 }
0x1c0e   : > { %v4256_v56 = vpop.permute.xlu1 %4255 }
0x1c0f   : > { %v4258_v58 = vmul.f32 %v11944_v55, %v4256_v56 }
0x1c11   : > { %4260 = vrot.lane.b32.xlu1 %v4258_v58, %s14106_s26 }
0x1c83   : > { %v4261_v4 = vpop.permute.xlu1 %4260 }
0x1c84   : > { %v4263_v62 = vadd.f32 %v4261_v4, %v12940_v31  ;;  %v4276_v31 = vpop.permute.xlu0 %4275 }
0x1c85   : > { %v4278_v53 = vmul.f32 %v11944_v55, %v4276_v31  ;;  %v9865_v55 = vld [vmem:[%s12469_s23 + $0x2] sm:$0x1] }
0x1c86   : > { %11945 = vtanh.f32 %v4263_v62 }
0x1c90   : > { %v11946_v39 = vpop.eup %11945 }
0x1c91   : > { %4267 = vrot.lane.b32.xlu1 %v11946_v39, %s14102_s5 }
0x1c95   : > { %4057 = vrot.lane.b32.xlu1 %v4054_v43, %s14102_s5 }
0x1c99   : > { %4921 = vperm.xlu1 %11851, %v9866_v44  }
0x1d03   : > { %v4268_v52 = vpop.permute.xlu1 %4267 }
0x1d04   : > { %v4270_v56 = vmul.f32 %v4268_v52, %v4265_v49 }
0x1d06   : > { %v4279_v58 = vadd.f32 %v4278_v53, %v4270_v56 }
0x1d07   : > { %v4058_v3 = vpop.permute.xlu1 %4057 }
0x1d08   : > { %10671 = vmatmul.mubr.msk.f32.vlgmr.msra.gmra.mrb[32].mxu0 %vm1272_vm3, %v4058_v3  ;;  %4281 = vrot.lane.b32.xlu0 %v4279_v58, %s14102_s5 }
0x1d09   : > { %11414 = vmatpush3.bf16.msra.mxu0 %v12492_v38  ;;  %10692 = vmatprep.mubr.msk.f32.mxu0 %vm12223_vm1, %v12222_v15 }
0x1d0a   : > { %11415 = vmatprep.subr.bf16.mxu0 %v12225_v37 }
0x1d0c   : > { %5143 = vperm.xlu0 %11850, %v9866_v44  }
0x1d0d   : > { %11417 = vmatpush3.bf16.msra.mxu0 %v12502_v45 }
0x1d0e   : > { %11424 = vmatprep.subr.bf16.mxu0 %v12225_v37 }
0x1d10   : > { %11852 = vset.pattern.permute.xlu0 %v12230_v60 }
0x1d7a   : > { %v4282_v63 = vpop.permute.xlu0 %4281 }
0x1d7b   : > { %10693 = vmatmul.mubr.msk.f32.vlgmr.msra.gmra.mrb[34].mxu0 %vm1272_vm3, %v4282_v63  ;;  %10704 = vmatmul.mubr.msk.f32.vlgmr.msra.gmra.mrb[34].mxu1 %vm1272_vm3, %v4282_v63 }
0x1d7c   : > { %11426 = vmatpush3.bf16.msra.mxu0 %v12867_v22  ;;  %11432 = vmatpush3.bf16.msra.mxu1 %v12869_v25 }
0x1d7d   : > { %11427 = vmatprep.subr.bf16.mxu0 %v12225_v37  ;;  %11433 = vmatprep.subr.bf16.mxu1 %v12225_v37 }
0x1d7e   : > { %10714 = vmatprep.mubr.msk.f32.mxu0 %vm12223_vm1, %v12222_v15  ;;  %10725 = vmatprep.mubr.msk.f32.mxu1 %vm12223_vm1, %v12222_v15 }
0x1d80   : > { %11429 = vmatpush3.bf16.msra.mxu0 %v12879_v32  ;;  %11435 = vmatpush3.bf16.msra.mxu1 %v12881_v33 }
0x1d81   : > { %10747 = vmatprep.subr.mxu1 %v12222_v15  ;;  %11436 = vmatprep.subr.bf16.mxu0 %v12225_v37 }
0x1d83   : > { %10715 = vmatmul.mubr.msk.f32.vlgmr.msra.gmra.mrb[36].mxu0 %vm1272_vm3, %v4282_v63  ;;  %10726 = vmatmul.mubr.msk.f32.vlgmr.msra.gmra.mrb[36].mxu1 %vm1272_vm3, %v4282_v63 }
0x1d84   : > { %10748 = vmatpush3.msk.msra.mxu1 %vm1165_vm0, %v12819_v23  ;;  %10749 = vmatprep.mubr.msk.f32.mxu1 %vm12223_vm1, %v12222_v15 }
0x1d85   : > { %11438 = vmatpush3.bf16.msra.mxu0 %v12895_v40  ;;  %10744 = vmatprep.mubr.msk.f32.mxu0 %vm12223_vm1, %v12222_v15 }
0x1d86   : > { %11439 = vmatprep.subr.bf16.mxu0 %v12225_v37  ;;  %11448 = vmatprep.subr.bf16.mxu1 %v12225_v37 }
0x1d87   : > { %10750 = vmatmul.mubr.msk.f32.vlgmr.msra.gmra.mrb[38].mxu1 %vm1161_vm2, %v9865_v55 }
0x1d88   : > { %11450 = vmatpush3.bf16.msra.mxu1 %v12977_v21  ;;  %10760 = vmatprep.mubr.msk.f32.mxu1 %vm12223_vm1, %v12222_v15 }
0x1d89   : > { %11441 = vmatpush3.bf16.msra.mxu0 %v12914_v51  ;;  %11451 = vmatprep.subr.bf16.mxu1 %v12225_v37 }
0x1d8a   : > { %11442 = vmatprep.subr.bf16.mxu0 %v12225_v37 }
0x1d8c   : > { %11453 = vmatpush3.bf16.msra.mxu1 %v12984_v12 }
0x1d8d   : > { %11444 = vmatpush3.bf16.msra.mxu0 %v12920_v54  ;;  %11460 = vmatprep.subr.bf16.mxu1 %v12225_v37 }
0x1d8e   : > { %11445 = vmatprep.subr.bf16.mxu0 %v12225_v37 }
0x1d91   : > { %11447 = vmatpush3.bf16.msra.mxu0 %v12926_v59 }
0x1d92   : > { %11454 = vmatprep.subr.bf16.mxu0 %v12225_v37 }
0x1ddb   : > { %v13039_v17 = vpop.f32.mrb[32].mxu0 }
0x1ddc   : > { %v10672_v4 = vpop.f32.mrb[33].mxu0 }
0x1ddd   : > { %v4922_v4 = vpop.permute.xlu1 %4921 }
0x1e4e   : > { %v4351_v8 = vpop.f32.mrb[34].mxu0  ;;  %v4428_v11 = vpop.f32.mrb[34].mxu1 }
0x1e4f   : > { %v4352_v62 = vadd.f32 %v12931_v1, %v4351_v8  ;;  %v10694_v27 = vpop.f32.mrb[35].mxu0  ;;  %v10705_v28 = vpop.f32.mrb[35].mxu1  ;;  %v4429_v3 = vadd.f32 %v4428_v11, %v1706_v7  ;;  %v4927_v8 = vrot.slane %v4922_v4, %v12473_v19  ;;  %v5141_v7 = vld [vmem:[#allocation2] sm:$0x1] }
0x1e51   : > { %v4355_v30 = vadd.f32 %v4352_v62, %v1696_v57  ;;  %v5144_v62 = vpop.permute.xlu0 %5143 }
0x1e53   : > { %v9862_v36 = vmul.f32 -1.442695, %v4355_v30  ;;  %v5149_v30 = vrot.slane %v5144_v62, %v12473_v19 }
0x1e55   : > { %11947 = vpow2.f32 %v9862_v36  ;;  %v5150_v11 = vmul.f32 %v5149_v30, %v5141_v7 }
0x1e56   : > { %v4500_v39 = vpop.f32.mrb[36].mxu0  ;;  %v4574_v43 = vpop.f32.mrb[36].mxu1 }
0x1e57   : > { %4505 = vst [vmem:[#allocation3 + $0x1] sm:$0x1] %v4500_v39  ;;  %v4575_v44 = vadd.f32 %v4574_v43, %v12936_v9  ;;  %v10716_v31 = vpop.f32.mrb[37].mxu0  ;;  %v10727_v49 = vpop.f32.mrb[37].mxu1 }
0x1e59   : > { %v4578_v52 = vmax.f32 %v4575_v44, 0.0 }
0x1e5a   : > { %v4746_v53 = vpop.f32.mrb[38].mxu1 }
0x1e5b   : > { %10745 = vmatmul.mubr.msk.f32.vlgmr.msra.gmra.mrb[38].mxu0 %vm3852_vm6, %v4578_v52  ;;  %v10751_v56 = vpop.f32.mrb[39].mxu1  ;;  %v4747_v39 = vadd.f32 %v4746_v53, %v12852_v41 }
0x1e5c   : > { %11456 = vmatpush3.bf16.msra.mxu0 %v12815_v14  ;;  %10771 = vmatprep.mubr.msk.f32.mxu0 %vm12223_vm1, %v12222_v15 }
0x1e5d   : > { %11457 = vmatprep.subr.bf16.mxu0 %v12225_v37  ;;  %v4750_v43 = vadd.f32 %v4747_v39, %v12847_v35 }
0x1e5f   : > { %v11948_v57 = vpop.eup %11947  ;;  %v9871_v31 = vmul.f32 -1.442695, %v4750_v43 }
0x1e60   : > { %v4359_v58 = vadd.f32 1.0, %v11948_v57  ;;  %11459 = vmatpush3.bf16.msra.mxu0 %v12825_v26 }
0x1e61   : > { %11466 = vmatprep.subr.bf16.mxu0 %v12225_v37 }
0x1e62   : > { %11949 = vrcp.f32 %v4359_v58 }
0x1e63   : > { %11951 = vpow2.f32 %v9871_v31 }
0x1e6c   : > { %v11950_v63 = vpop.eup %11949 }
0x1e6d   : > { %v4432_v55 = vmul.f32 %v11950_v63, %v4429_v3  ;;  %v11952_v52 = vpop.eup %11951 }
0x1e6e   : > { %v4754_v56 = vadd.f32 1.0, %v11952_v52 }
0x1e6f   : > { %4433 = vst.msk [vmem:[#allocation2 + $0x1] sm:$0x1] %vm1423_vm4, %v4432_v55 }
0x1e70   : > { %11953 = vrcp.f32 %v4754_v56 }
0x1e76   : > { %v4918_v27 = vld [vmem:[#allocation2 + $0x1] sm:$0x1] }
0x1e77   : > { %v13056_v28 = vmul.f32 %v4927_v8, %v4918_v27 }
0x1e79   : > { %10772 = vmatmul.mubr.msk.f32.vlgmr.msra.gmra.mrb[40].mxu0 %vm1272_vm3, %v13056_v28  ;;  %v5151_v36 = vadd.f32 %v5150_v11, %v13056_v28 }
0x1e7a   : > { %11468 = vmatpush3.bf16.msra.mxu0 %v12815_v14  ;;  %10793 = vmatprep.mubr.msk.f32.mxu0 %vm12223_vm1, %v12222_v15  ;;  %v11954_v63 = vpop.eup %11953 }
0x1e7b   : > { %11469 = vmatprep.subr.bf16.mxu0 %v12225_v37  ;;  %v4757_v55 = vmul.f32 %v11954_v63, %v12954_v5 }
0x1e7e   : > { %11471 = vmatpush3.bf16.msra.mxu0 %v12825_v26 }
0x1e7f   : > { %11478 = vmatprep.subr.bf16.mxu0 %v12225_v37 }
0x1e81   : > { %10794 = vmatmul.mubr.msk.f32.vlgmr.msra.gmra.mrb[42].mxu0 %vm1272_vm3, %v5151_v36 }
0x1e82   : > { %11480 = vmatpush3.bf16.msra.mxu0 %v12497_v42  ;;  %10815 = vmatprep.mubr.msk.f32.mxu0 %vm12223_vm1, %v12222_v15 }
0x1e83   : > { %11481 = vmatprep.subr.bf16.mxu0 %v12225_v37 }
0x1e86   : > { %11483 = vmatpush3.bf16.msra.mxu0 %v12506_v46 }
0x1e87   : > { %11490 = vmatprep.subr.bf16.mxu0 %v12225_v37 }
0x1f2e   : > { %v13077_v44 = vpop.f32.mrb[38].mxu0 }
0x1f2f   : > { %v10746_v49 = vpop.f32.mrb[39].mxu0 }
0x1f4c   : > { %v4999_v57 = vpop.f32.mrb[40].mxu0 }
0x1f4d   : > { %v5000_v58 = vadd.f32 %v4999_v57, %v12847_v35  ;;  %v10773_v3 = vpop.f32.mrb[41].mxu0 }
0x1f4f   : > { %5011 = vrot.lane.b32.xlu1 %v5000_v58, %s14106_s26  ;;  %v5003_v62 = vadd.f32 %v5000_v58, %v4747_v39 }
0x1f51   : > { %v9874_v27 = vmul.f32 -1.442695, %v5003_v62  ;;  %v5030_v62 = vrot.slane %v13056_v28, %v12473_v19 }
0x1f53   : > { %4759 = vrot.lane.b32.xlu1 %v4757_v55, %s14106_s26  ;;  %11955 = vpow2.f32 %v9874_v27  ;;  %v5252_v27 = vrot.slane %v5151_v36, %v12473_v19 }
0x1f54   : > { %v5221_v53 = vpop.f32.mrb[42].mxu0 }
0x1f55   : > { %v5222_v4 = vadd.f32 %v5221_v53, %v12847_v35  ;;  %v10795_v8 = vpop.f32.mrb[43].mxu0 }
0x1f57   : > { %5233 = vrot.lane.b32.xlu0 %v5222_v4, %s14106_s26  ;;  %v5225_v30 = vadd.f32 %v5222_v4, %v4747_v39 }
0x1f59   : > { %v9877_v7 = vmul.f32 -1.442695, %v5225_v30 }
0x1f5b   : > { %11957 = vpow2.f32 %v9877_v7 }
0x1f5d   : > { %v11956_v11 = vpop.eup %11955 }
0x1f5e   : > { %v5007_v43 = vadd.f32 1.0, %v11956_v11 }
0x1f60   : > { %11959 = vrcp.f32 %v5007_v43 }
0x1f65   : > { %v11958_v31 = vpop.eup %11957 }
0x1f66   : > { %v5229_v49 = vadd.f32 1.0, %v11958_v31 }
0x1f68   : > { %11961 = vrcp.f32 %v5229_v49 }
0x1f6a   : > { %v11960_v52 = vpop.eup %11959 }
0x1f72   : > { %v11962_v58 = vpop.eup %11961 }
0x1fc1   : > { %v5012_v56 = vpop.permute.xlu1 %5011 }
0x1fc2   : > { %v5014_v57 = vmul.f32 %v11960_v52, %v5012_v56  ;;  %v4764_v56 = vsub.f32 1.0, %v11954_v63 }
0x1fc4   : > { %5016 = vrot.lane.b32.xlu0 %v5014_v57, %s14106_s26 }
0x1fc5   : > { %v4760_v3 = vpop.permute.xlu1 %4759 }
0x1fc6   : > { %v4762_v55 = vadd.f32 %v4760_v3, %v4747_v39  ;;  %v4770_v3 = vmul.f32 0.0, %v11954_v63 }
0x1fc8   : > { %11963 = vtanh.f32 %v4762_v55 }
0x1fc9   : > { %v5234_v53 = vpop.permute.xlu0 %5233 }
0x1fca   : > { %v5236_v8 = vmul.f32 %v11962_v58, %v5234_v53  ;;  %v5021_v53 = vsub.f32 1.0, %v11960_v52 }
0x1fcc   : > { %5238 = vrot.lane.b32.xlu1 %v5236_v8, %s14106_s26 }
0x1fd2   : > { %v11964_v4 = vpop.eup %11963 }
0x1fd3   : > { %4766 = vrot.lane.b32.xlu0 %v11964_v4, %s14102_s5 }
0x1fd7   : > { %5031 = vrot.lane.b32.xlu0 %v5030_v62, %s14107_s1 }
0x1fdb   : > { %5253 = vrot.lane.b32.xlu0 %v5252_v27, %s14107_s1 }
0x2036   : > { %v5017_v30 = vpop.permute.xlu0 %5016 }
0x2037   : > { %v5019_v7 = vadd.f32 %v5017_v30, %v4747_v39  ;;  %v5243_v30 = vsub.f32 1.0, %v11962_v58 }
0x2039   : > { %11965 = vtanh.f32 %v5019_v7 }
0x203e   : > { %v5239_v11 = vpop.permute.xlu1 %5238 }
0x203f   : > { %v5241_v43 = vadd.f32 %v5239_v11, %v4747_v39  ;;  %v9883_v11 = vld [vmem:[%s12516_s18 + $0x3] sm:$0x1] }
0x2041   : > { %11967 = vtanh.f32 %v5241_v43 }
0x2043   : > { %v11966_v31 = vpop.eup %11965 }
0x2044   : > { %5023 = vrot.lane.b32.xlu1 %v11966_v31, %s14102_s5 }
0x2045   : > { %v4767_v49 = vpop.permute.xlu0 %4766 }
0x2046   : > { %v4769_v57 = vmul.f32 %v4767_v49, %v4764_v56  ;;  %v9882_v56 = vld [vmem:[%s12469_s23 + $0x3] sm:$0x1] }
0x2048   : > { %v4771_v36 = vadd.f32 %v4770_v3, %v4769_v57 }
0x2049   : > { %v5032_v55 = vpop.permute.xlu0 %5031 }
0x204a   : > { %v5034_v4 = vmul.f32 %v11960_v52, %v5032_v55 }
0x204b   : > { %v11968_v28 = vpop.eup %11967 }
0x204c   : > { %5245 = vrot.lane.b32.xlu1 %v11968_v28, %s14102_s5 }
0x204d   : > { %v5254_v27 = vpop.permute.xlu0 %5253 }
0x204e   : > { %v5256_v43 = vmul.f32 %v11962_v58, %v5254_v27 }
0x2050   : > { %4774 = vrot.lane.b32.xlu1 %v4771_v36, %s14102_s5 }
0x20b6   : > { %v5024_v8 = vpop.permute.xlu1 %5023 }
0x20b7   : > { %v5026_v39 = vmul.f32 %v5024_v8, %v5021_v53 }
0x20b9   : > { %v5035_v62 = vadd.f32 %v5034_v4, %v5026_v39 }
0x20bb   : > { %5038 = vrot.lane.b32.xlu0 %v5035_v62, %s14102_s5 }
0x20be   : > { %v5246_v7 = vpop.permute.xlu1 %5245 }
0x20bf   : > { %v5248_v31 = vmul.f32 %v5246_v7, %v5243_v30  ;;  %5899 = vperm.xlu0 %11852, %v9883_v11  }
0x20c1   : > { %v5257_v63 = vadd.f32 %v5256_v43, %v5248_v31 }
0x20c2   : > { %v4775_v49 = vpop.permute.xlu1 %4774 }
0x20c3   : > { %5259 = vrot.lane.b32.xlu1 %v5257_v63, %s14102_s5  ;;  %10761 = vmatmul.mubr.msk.f32.vlgmr.msra.gmra.mrb[40].mxu1 %vm1272_vm3, %v4775_v49 }
0x20c4   : > { %11462 = vmatpush3.bf16.msra.mxu1 %v12977_v21  ;;  %10782 = vmatprep.mubr.msk.f32.mxu1 %vm12223_vm1, %v12222_v15 }
0x20c5   : > { %11463 = vmatprep.subr.bf16.mxu1 %v12225_v37  ;;  %11854 = vset.pattern.permute.xlu0 %v12231_v20 }
0x20c7   : > { %6161 = vperm.xlu1 %11851, %v9883_v11  }
0x20c8   : > { %11465 = vmatpush3.bf16.msra.mxu1 %v12984_v12 }
0x20c9   : > { %11472 = vmatprep.subr.bf16.mxu1 %v12225_v37 }
0x20cb   : > { %11853 = vset.pattern.permute.xlu1 %v12227_v48 }
0x20cc   : > { %6383 = vperm.xlu1 %11853, %v9883_v11  }
0x20d0   : > { %11855 = vset.pattern.permute.xlu1 %v12230_v60 }
0x212d   : > { %v5039_v52 = vpop.permute.xlu0 %5038 }
0x212e   : > { %10783 = vmatmul.mubr.msk.f32.vlgmr.msra.gmra.mrb[42].mxu1 %vm1272_vm3, %v5039_v52 }
0x212f   : > { %11474 = vmatpush3.bf16.msra.mxu1 %v12492_v38  ;;  %10804 = vmatprep.mubr.msk.f32.mxu1 %vm12223_vm1, %v12222_v15 }
0x2130   : > { %11475 = vmatprep.subr.bf16.mxu1 %v12225_v37 }
0x2133   : > { %11477 = vmatpush3.bf16.msra.mxu1 %v12502_v45 }
0x2134   : > { %11484 = vmatprep.subr.bf16.mxu1 %v12225_v37 }
0x2135   : > { %v5260_v58 = vpop.permute.xlu1 %5259 }
0x2136   : > { %10805 = vmatmul.mubr.msk.f32.vlgmr.msra.gmra.mrb[44].mxu1 %vm1272_vm3, %v5260_v58  ;;  %10816 = vmatmul.mubr.msk.f32.vlgmr.msra.gmra.mrb[44].mxu0 %vm1272_vm3, %v5260_v58 }
0x2137   : > { %11492 = vmatpush3.bf16.msra.mxu0 %v12869_v25  ;;  %11486 = vmatpush3.bf16.msra.mxu1 %v12867_v22 }
0x2138   : > { %11493 = vmatprep.subr.bf16.mxu0 %v12225_v37  ;;  %11487 = vmatprep.subr.bf16.mxu1 %v12225_v37 }
0x2139   : > { %10837 = vmatprep.mubr.msk.f32.mxu0 %vm12223_vm1, %v12222_v15  ;;  %10826 = vmatprep.mubr.msk.f32.mxu1 %vm12223_vm1, %v12222_v15 }
0x213b   : > { %11495 = vmatpush3.bf16.msra.mxu0 %v12881_v33  ;;  %11489 = vmatpush3.bf16.msra.mxu1 %v12879_v32 }
0x213c   : > { %10859 = vmatprep.subr.mxu0 %v12222_v15  ;;  %11496 = vmatprep.subr.bf16.mxu1 %v12225_v37 }
0x213e   : > { %10838 = vmatmul.mubr.msk.f32.vlgmr.msra.gmra.mrb[46].mxu0 %vm1272_vm3, %v5260_v58  ;;  %10827 = vmatmul.mubr.msk.f32.vlgmr.msra.gmra.mrb[46].mxu1 %vm1272_vm3, %v5260_v58 }
0x213f   : > { %10860 = vmatpush3.msk.msra.mxu0 %vm1165_vm0, %v12819_v23  ;;  %10861 = vmatprep.mubr.msk.f32.mxu0 %vm12223_vm1, %v12222_v15 }
0x2140   : > { %11498 = vmatpush3.bf16.msra.mxu1 %v12895_v40  ;;  %10856 = vmatprep.mubr.msk.f32.mxu1 %vm12223_vm1, %v12222_v15 }
0x2141   : > { %11499 = vmatprep.subr.bf16.mxu1 %v12225_v37  ;;  %11508 = vmatprep.subr.bf16.mxu0 %v12225_v37 }
0x2142   : > { %10862 = vmatmul.mubr.msk.f32.vlgmr.msra.gmra.mrb[48].mxu0 %vm1161_vm2, %v9882_v56  ;;  %v5900_v56 = vpop.permute.xlu0 %5899 }
0x2143   : > { %11510 = vmatpush3.bf16.msra.mxu0 %v12977_v21  ;;  %10872 = vmatprep.mubr.msk.f32.mxu0 %vm12223_vm1, %v12222_v15 }
0x2144   : > { %11501 = vmatpush3.bf16.msra.mxu1 %v12914_v51  ;;  %11511 = vmatprep.subr.bf16.mxu0 %v12225_v37 }
0x2145   : > { %11502 = vmatprep.subr.bf16.mxu1 %v12225_v37 }
0x2147   : > { %11513 = vmatpush3.bf16.msra.mxu0 %v12984_v12 }
0x2148   : > { %11504 = vmatpush3.bf16.msra.mxu1 %v12920_v54  ;;  %11520 = vmatprep.subr.bf16.mxu0 %v12225_v37 }
0x2149   : > { %11505 = vmatprep.subr.bf16.mxu1 %v12225_v37 }
0x214c   : > { %11507 = vmatpush3.bf16.msra.mxu1 %v12926_v59 }
0x214d   : > { %11514 = vmatprep.subr.bf16.mxu1 %v12225_v37 }
0x2196   : > { %v13155_v23 = vpop.f32.mrb[40].mxu1 }
0x2197   : > { %v10762_v57 = vpop.f32.mrb[41].mxu1 }
0x2198   : > { %v5905_v57 = vrot.slane %v5900_v56, %v12473_v19 }
0x2201   : > { %v13157_v28 = vpop.f32.mrb[42].mxu1 }
0x2202   : > { %v10784_v3 = vpop.f32.mrb[43].mxu1 }
0x2203   : > { %v6162_v3 = vpop.permute.xlu1 %6161 }
0x2209   : > { %v5329_v36 = vpop.f32.mrb[44].mxu1  ;;  %v5406_v55 = vpop.f32.mrb[44].mxu0 }
0x220a   : > { %v5330_v53 = vadd.f32 %v12931_v1, %v5329_v36  ;;  %v10806_v8 = vpop.f32.mrb[45].mxu1  ;;  %v10817_v4 = vpop.f32.mrb[45].mxu0 }
0x220b   : > { %v6167_v8 = vrot.slane %v6162_v3, %v12473_v19  ;;  %v6384_v4 = vpop.permute.xlu1 %6383 }
0x220c   : > { %v5333_v39 = vadd.f32 %v5330_v53, %v2062_v2 }
0x220e   : > { %v9879_v62 = vmul.f32 -1.442695, %v5333_v39 }
0x2210   : > { %11969 = vpow2.f32 %v9879_v62  ;;  %v6389_v62 = vrot.slane %v6384_v4, %v12473_v19 }
0x2211   : > { %v5552_v27 = vpop.f32.mrb[46].mxu0  ;;  %v5478_v30 = vpop.f32.mrb[46].mxu1 }
0x2212   : > { %v5553_v7 = vadd.f32 %v5552_v27, %v12936_v9  ;;  %5483 = vst [vmem:[#allocation3 + $0x2] sm:$0x1] %v5478_v30  ;;  %v10839_v11 = vpop.f32.mrb[47].mxu0  ;;  %v10828_v43 = vpop.f32.mrb[47].mxu1  ;;  %v5407_v9 = vadd.f32 %v5406_v55, %v2071_v18  ;;  %v6159_v18 = vld [vmem:[#allocation2 + $0x1] sm:$0x1] }
0x2213   : > { %v6168_v55 = vmul.f32 %v6167_v8, %v6159_v18  ;;  %v6381_v27 = vld [vmem:[#allocation2] sm:$0x1] }
0x2214   : > { %v5556_v31 = vmax.f32 %v5553_v7, 0.0  ;;  %v6390_v30 = vmul.f32 %v6389_v62, %v6381_v27 }
0x2215   : > { %v5724_v63 = vpop.f32.mrb[48].mxu0 }
0x2216   : > { %10857 = vmatmul.mubr.msk.f32.vlgmr.msra.gmra.mrb[48].mxu1 %vm3852_vm6, %v5556_v31  ;;  %v10863_v49 = vpop.f32.mrb[49].mxu0  ;;  %v13211_v43 = vadd.f32 %v5724_v63, %v12852_v41 }
0x2217   : > { %11516 = vmatpush3.bf16.msra.mxu1 %v12815_v14  ;;  %10883 = vmatprep.mubr.msk.f32.mxu1 %vm12223_vm1, %v12222_v15 }
0x2218   : > { %11517 = vmatprep.subr.bf16.mxu1 %v12225_v37  ;;  %v5728_v49 = vadd.f32 %v13211_v43, %v12847_v35 }
0x221a   : > { %v11970_v2 = vpop.eup %11969 }
0x221b   : > { %v5337_v1 = vadd.f32 1.0, %v11970_v2  ;;  %11519 = vmatpush3.bf16.msra.mxu1 %v12825_v26  ;;  %v9888_v2 = vmul.f32 -1.442695, %v5728_v49 }
0x221c   : > { %11526 = vmatprep.subr.bf16.mxu1 %v12225_v37 }
0x221d   : > { %11971 = vrcp.f32 %v5337_v1 }
0x221e   : > { %11973 = vpow2.f32 %v9888_v2 }
0x2227   : > { %v11972_v52 = vpop.eup %11971 }
0x2228   : > { %v5410_v58 = vmul.f32 %v11972_v52, %v5407_v9  ;;  %v11974_v1 = vpop.eup %11973 }
0x2229   : > { %v5732_v9 = vadd.f32 1.0, %v11974_v1 }
0x222a   : > { %5411 = vst.msk [vmem:[#allocation2 + $0x2] sm:$0x1] %vm1423_vm4, %v5410_v58 }
0x222b   : > { %11975 = vrcp.f32 %v5732_v9 }
0x2231   : > { %v5896_v36 = vld [vmem:[#allocation2 + $0x2] sm:$0x1] }
0x2232   : > { %v13174_v53 = vmul.f32 %v5905_v57, %v5896_v36 }
0x2234   : > { %10884 = vmatmul.mubr.msk.f32.vlgmr.msra.gmra.mrb[50].mxu1 %vm1272_vm3, %v13174_v53  ;;  %v13185_v39 = vadd.f32 %v6168_v55, %v13174_v53 }
0x2235   : > { %11528 = vmatpush3.bf16.msra.mxu1 %v12815_v14  ;;  %10905 = vmatprep.mubr.msk.f32.mxu1 %vm12223_vm1, %v12222_v15  ;;  %v13218_v63 = vpop.eup %11975 }
0x2236   : > { %11529 = vmatprep.subr.bf16.mxu1 %v12225_v37  ;;  %v13197_v7 = vadd.f32 %v6390_v30, %v13185_v39  ;;  %v5735_v36 = vmul.f32 %v13218_v63, %v12954_v5 }
0x2239   : > { %11531 = vmatpush3.bf16.msra.mxu1 %v12825_v26 }
0x223a   : > { %11538 = vmatprep.subr.bf16.mxu1 %v12225_v37 }
0x223c   : > { %10906 = vmatmul.mubr.msk.f32.vlgmr.msra.gmra.mrb[52].mxu1 %vm1272_vm3, %v13185_v39 }
0x223d   : > { %11540 = vmatpush3.bf16.msra.mxu1 %v12815_v14  ;;  %10927 = vmatprep.mubr.msk.f32.mxu1 %vm12223_vm1, %v12222_v15 }
0x223e   : > { %11541 = vmatprep.subr.bf16.mxu1 %v12225_v37 }
0x2241   : > { %11543 = vmatpush3.bf16.msra.mxu1 %v12825_v26 }
0x2242   : > { %11550 = vmatprep.subr.bf16.mxu1 %v12225_v37 }
0x2244   : > { %10928 = vmatmul.mubr.msk.f32.vlgmr.msra.gmra.mrb[54].mxu1 %vm1272_vm3, %v13197_v7 }
0x2245   : > { %11552 = vmatpush3.bf16.msra.mxu1 %v12497_v42  ;;  %10949 = vmatprep.mubr.msk.f32.mxu1 %vm12223_vm1, %v12222_v15 }
0x2246   : > { %11553 = vmatprep.subr.bf16.mxu1 %v12225_v37 }
0x2249   : > { %11555 = vmatpush3.bf16.msra.mxu1 %v12506_v46 }
0x224a   : > { %11562 = vmatprep.subr.bf16.mxu1 %v12225_v37 }
0x22e9   : > { %v13208_v11 = vpop.f32.mrb[48].mxu1 }
0x22ea   : > { %v10858_v31 = vpop.f32.mrb[49].mxu1 }
0x2307   : > { %v5977_v52 = vpop.f32.mrb[50].mxu1 }
0x2308   : > { %v5978_v58 = vadd.f32 %v5977_v52, %v12847_v35  ;;  %v10885_v56 = vpop.f32.mrb[51].mxu1 }
0x230a   : > { %5989 = vrot.lane.b32.xlu0 %v5978_v58, %s14106_s26  ;;  %v5981_v4 = vadd.f32 %v5978_v58, %v13211_v43 }
0x230c   : > { %v9891_v62 = vmul.f32 -1.442695, %v5981_v4 }
0x230e   : > { %11977 = vpow2.f32 %v9891_v62 }
0x230f   : > { %v6239_v57 = vpop.f32.mrb[52].mxu1 }
0x2310   : > { %v6240_v3 = vadd.f32 %v6239_v57, %v12847_v35  ;;  %v10907_v41 = vpop.f32.mrb[53].mxu1 }
0x2312   : > { %6251 = vrot.lane.b32.xlu1 %v6240_v3, %s14106_s26  ;;  %v6243_v27 = vadd.f32 %v6240_v3, %v13211_v43 }
0x2314   : > { %v9894_v30 = vmul.f32 -1.442695, %v6243_v27 }
0x2316   : > { %5737 = vrot.lane.b32.xlu1 %v5735_v36, %s14106_s26  ;;  %11979 = vpow2.f32 %v9894_v30 }
0x2317   : > { %v6461_v8 = vpop.f32.mrb[54].mxu1 }
0x2318   : > { %v6462_v18 = vadd.f32 %v6461_v8, %v12847_v35  ;;  %v10929_v55 = vpop.f32.mrb[55].mxu1  ;;  %v11978_v49 = vpop.eup %11977 }
0x2319   : > { %v5985_v1 = vadd.f32 1.0, %v11978_v49  ;;  %v6270_v49 = vrot.slane %v13185_v39, %v12473_v19 }
0x231a   : > { %6473 = vrot.lane.b32.xlu0 %v6462_v18, %s14106_s26  ;;  %v6465_v31 = vadd.f32 %v6462_v18, %v13211_v43 }
0x231c   : > { %v9897_v2 = vmul.f32 -1.442695, %v6465_v31  ;;  %v6008_v31 = vrot.slane %v13174_v53, %v12473_v19 }
0x231e   : > { %11981 = vpow2.f32 %v9897_v2  ;;  %v6492_v2 = vrot.slane %v13197_v7, %v12473_v19 }
0x231f   : > { %11983 = vrcp.f32 %v5985_v1 }
0x2320   : > { %v11980_v9 = vpop.eup %11979 }
0x2321   : > { %v6247_v35 = vadd.f32 1.0, %v11980_v9 }
0x2323   : > { %11985 = vrcp.f32 %v6247_v35 }
0x2328   : > { %v11982_v52 = vpop.eup %11981 }
0x2329   : > { %v11984_v56 = vpop.eup %11983  ;;  %v6469_v41 = vadd.f32 1.0, %v11982_v52 }
0x232b   : > { %11987 = vrcp.f32 %v6469_v41  ;;  %v5742_v41 = vsub.f32 1.0, %v13218_v63 }
0x232d   : > { %v11986_v3 = vpop.eup %11985 }
0x2335   : > { %v11988_v4 = vpop.eup %11987 }
0x237c   : > { %v5990_v57 = vpop.permute.xlu0 %5989 }
0x237d   : > { %v5992_v58 = vmul.f32 %v11984_v56, %v5990_v57 }
0x237f   : > { %5994 = vrot.lane.b32.xlu0 %v5992_v58, %s14106_s26 }
0x2384   : > { %v6252_v36 = vpop.permute.xlu1 %6251 }
0x2385   : > { %v6254_v8 = vmul.f32 %v11986_v3, %v6252_v36 }
0x2387   : > { %6256 = vrot.lane.b32.xlu1 %v6254_v8, %s14106_s26 }
0x2388   : > { %v5738_v18 = vpop.permute.xlu1 %5737 }
0x2389   : > { %v5740_v55 = vadd.f32 %v5738_v18, %v13211_v43  ;;  %v5748_v18 = vmul.f32 0.0, %v13218_v63 }
0x238b   : > { %11989 = vtanh.f32 %v5740_v55 }
0x238c   : > { %v6474_v62 = vpop.permute.xlu0 %6473 }
0x238d   : > { %v6476_v27 = vmul.f32 %v11988_v4, %v6474_v62 }
0x238f   : > { %6478 = vrot.lane.b32.xlu0 %v6476_v27, %s14106_s26  ;;  %v5999_v27 = vsub.f32 1.0, %v11984_v56 }
0x2395   : > { %v11990_v30 = vpop.eup %11989 }
0x2396   : > { %5744 = vrot.lane.b32.xlu1 %v11990_v30, %s14102_s5 }
0x239a   : > { %6009 = vrot.lane.b32.xlu1 %v6008_v31, %s14107_s1 }
0x239e   : > { %6271 = vrot.lane.b32.xlu1 %v6270_v49, %s14107_s1 }
0x23a2   : > { %6493 = vrot.lane.b32.xlu1 %v6492_v2, %s14107_s1 }
0x23f1   : > { %v5995_v1 = vpop.permute.xlu0 %5994 }
0x23f2   : > { %v5997_v9 = vadd.f32 %v5995_v1, %v13211_v43  ;;  %v6261_v1 = vsub.f32 1.0, %v11986_v3 }
0x23f4   : > { %11991 = vtanh.f32 %v5997_v9 }
0x23f9   : > { %v6257_v35 = vpop.permute.xlu1 %6256 }
0x23fa   : > { %v6259_v52 = vadd.f32 %v6257_v35, %v13211_v43 }
0x23fc   : > { %11993 = vtanh.f32 %v6259_v52 }
0x23fe   : > { %v11992_v53 = vpop.eup %11991 }
0x23ff   : > { %6001 = vrot.lane.b32.xlu0 %v11992_v53, %s14102_s5 }
0x2401   : > { %v6479_v57 = vpop.permute.xlu0 %6478 }
0x2402   : > { %v6481_v39 = vadd.f32 %v6479_v57, %v13211_v43  ;;  %v9903_v57 = vld [vmem:[%s12516_s18 + $0x4] sm:$0x1] }
0x2404   : > { %11995 = vtanh.f32 %v6481_v39  ;;  %v6483_v39 = vsub.f32 1.0, %v11988_v4 }
0x2406   : > { %v11994_v58 = vpop.eup %11993 }
0x2407   : > { %6263 = vrot.lane.b32.xlu0 %v11994_v58, %s14102_s5 }
0x2408   : > { %v5745_v7 = vpop.permute.xlu1 %5744 }
0x2409   : > { %v5747_v36 = vmul.f32 %v5745_v7, %v5742_v41 }
0x240b   : > { %v5749_v55 = vadd.f32 %v5748_v18, %v5747_v36 }
0x240c   : > { %v6010_v62 = vpop.permute.xlu1 %6009 }
0x240d   : > { %v6012_v30 = vmul.f32 %v11984_v56, %v6010_v62 }
0x240e   : > { %v11996_v8 = vpop.eup %11995 }
0x240f   : > { %6485 = vrot.lane.b32.xlu0 %v11996_v8, %s14102_s5 }
0x2410   : > { %v6272_v2 = vpop.permute.xlu1 %6271 }
0x2411   : > { %v6274_v35 = vmul.f32 %v11986_v3, %v6272_v2  ;;  %v13298_v3 = vld [vmem:[%s14095_s11] sm:$0x1f] }
0x2413   : > { %5752 = vrot.lane.b32.xlu0 %v5749_v55, %s14102_s5 }
0x2414   : > { %v6494_v53 = vpop.permute.xlu1 %6493 }
0x2415   : > { %v6496_v7 = vmul.f32 %v11988_v4, %v6494_v53  ;;  %v9902_v4 = vld [vmem:[%s12469_s23 + $0x4] sm:$0x1] }
0x2471   : > { %v6002_v43 = vpop.permute.xlu0 %6001 }
0x2472   : > { %v6004_v31 = vmul.f32 %v6002_v43, %v5999_v27 }
0x2474   : > { %v6013_v49 = vadd.f32 %v6012_v30, %v6004_v31 }
0x2476   : > { %6016 = vrot.lane.b32.xlu1 %v6013_v49, %s14102_s5  ;;  %v13330_v49 = vld [vmem:[%s12383_s19] sm:$0x1] }
0x2479   : > { %v6264_v9 = vpop.permute.xlu0 %6263 }
0x247a   : > { %v6266_v52 = vmul.f32 %v6264_v9, %v6261_v1 }
0x247c   : > { %v6275_v63 = vadd.f32 %v6274_v35, %v6266_v52 }
0x247e   : > { %6278 = vrot.lane.b32.xlu0 %v6275_v63, %s14102_s5 }
0x2481   : > { %v6486_v58 = vpop.permute.xlu0 %6485 }
0x2482   : > { %v6488_v41 = vmul.f32 %v6486_v58, %v6483_v39  ;;  %7139 = vperm.xlu0 %11854, %v9903_v57  }
0x2484   : > { %v6497_v56 = vadd.f32 %v6496_v7, %v6488_v41 }
0x2485   : > { %v5753_v36 = vpop.permute.xlu0 %5752 }
0x2486   : > { %10873 = vmatmul.mubr.msk.f32.vlgmr.msra.gmra.mrb[50].mxu0 %vm1272_vm3, %v5753_v36  ;;  %11857 = vset.pattern.permute.xlu0 %v12227_v48 }
0x2487   : > { %6499 = vrot.lane.b32.xlu1 %v6497_v56, %s14102_s5  ;;  %7885 = vperm.xlu0 %11857, %v9903_v57  }
0x2488   : > { %11522 = vmatpush3.bf16.msra.mxu0 %v12977_v21  ;;  %10894 = vmatprep.mubr.msk.f32.mxu0 %vm12223_vm1, %v12222_v15 }
0x2489   : > { %11523 = vmatprep.subr.bf16.mxu0 %v12225_v37 }
0x248b   : > { %7401 = vperm.xlu1 %11855, %v9903_v57   ;;  %11859 = vset.pattern.permute.xlu0 %v12231_v20 }
0x248c   : > { %11525 = vmatpush3.bf16.msra.mxu0 %v12984_v12 }
0x248d   : > { %11532 = vmatprep.subr.bf16.mxu0 %v12225_v37 }
0x248f   : > { %11856 = vset.pattern.permute.xlu1 %v12229_v47 }
0x2490   : > { %7663 = vperm.xlu1 %11856, %v9903_v57   ;;  %v13336_v57 = vld [vmem:[%s14105_s16] sm:$0x1] }
0x2494   : > { %11858 = vset.pattern.permute.xlu1 %v12232_v50 }
0x24e8   : > { %v6017_v48 = vpop.permute.xlu1 %6016 }
0x24e9   : > { %10895 = vmatmul.mubr.msk.f32.vlgmr.msra.gmra.mrb[52].mxu0 %vm1272_vm3, %v6017_v48 }
0x24ea   : > { %11534 = vmatpush3.bf16.msra.mxu0 %v12977_v21  ;;  %10916 = vmatprep.mubr.msk.f32.mxu0 %vm12223_vm1, %v12222_v15 }
0x24eb   : > { %11535 = vmatprep.subr.bf16.mxu0 %v12225_v37 }
0x24ee   : > { %11537 = vmatpush3.bf16.msra.mxu0 %v12984_v12 }
0x24ef   : > { %11544 = vmatprep.subr.bf16.mxu0 %v12225_v37 }
0x24f0   : > { %v6279_v20 = vpop.permute.xlu0 %6278 }
0x24f1   : > { %10917 = vmatmul.mubr.msk.f32.vlgmr.msra.gmra.mrb[54].mxu0 %vm1272_vm3, %v6279_v20 }
0x24f2   : > { %11546 = vmatpush3.bf16.msra.mxu0 %v12492_v38  ;;  %10938 = vmatprep.mubr.msk.f32.mxu0 %vm12223_vm1, %v12222_v15 }
0x24f3   : > { %11547 = vmatprep.subr.bf16.mxu0 %v12225_v37 }
0x24f6   : > { %11549 = vmatpush3.bf16.msra.mxu0 %v12502_v45 }
0x24f7   : > { %11556 = vmatprep.subr.bf16.mxu0 %v12225_v37 }
0x24f9   : > { %v6500_v50 = vpop.permute.xlu1 %6499 }
0x24fa   : > { %10939 = vmatmul.mubr.msk.f32.vlgmr.msra.gmra.mrb[56].mxu0 %vm1272_vm3, %v6500_v50  ;;  %10950 = vmatmul.mubr.msk.f32.vlgmr.msra.gmra.mrb[56].mxu1 %vm1272_vm3, %v6500_v50 }
0x24fb   : > { %11564 = vmatpush3.bf16.msra.mxu1 %v12869_v25  ;;  %11558 = vmatpush3.bf16.msra.mxu0 %v12867_v22 }
0x24fc   : > { %11565 = vmatprep.subr.bf16.mxu1 %v12225_v37  ;;  %11559 = vmatprep.subr.bf16.mxu0 %v12225_v37 }
0x24fd   : > { %10971 = vmatprep.mubr.msk.f32.mxu1 %vm12223_vm1, %v12222_v15  ;;  %10960 = vmatprep.mubr.msk.f32.mxu0 %vm12223_vm1, %v12222_v15 }
0x24ff   : > { %11567 = vmatpush3.bf16.msra.mxu1 %v12881_v33  ;;  %11561 = vmatpush3.bf16.msra.mxu0 %v12879_v32 }
0x2500   : > { %10993 = vmatprep.subr.mxu1 %v12222_v15  ;;  %11568 = vmatprep.subr.bf16.mxu0 %v12225_v37 }
0x2502   : > { %10972 = vmatmul.mubr.msk.f32.vlgmr.msra.gmra.mrb[58].mxu1 %vm1272_vm3, %v6500_v50  ;;  %10961 = vmatmul.mubr.msk.f32.vlgmr.msra.gmra.mrb[58].mxu0 %vm1272_vm3, %v6500_v50 }
0x2503   : > { %10994 = vmatpush3.msk.msra.mxu1 %vm1165_vm0, %v13298_v3  ;;  %10995 = vmatprep.mubr.msk.f32.mxu1 %vm12223_vm1, %v12222_v15 }
0x2504   : > { %11570 = vmatpush3.bf16.msra.mxu0 %v12895_v40  ;;  %10990 = vmatprep.mubr.msk.f32.mxu0 %vm12223_vm1, %v12222_v15 }
0x2505   : > { %11571 = vmatprep.subr.bf16.mxu0 %v12225_v37  ;;  %11580 = vmatprep.subr.bf16.mxu1 %v12225_v37 }
0x2506   : > { %10996 = vmatmul.mubr.msk.f32.vlgmr.msra.gmra.mrb[60].mxu1 %vm1161_vm2, %v9902_v4 }
0x2507   : > { %11582 = vmatpush3.bf16.msra.mxu1 %v12977_v21  ;;  %11006 = vmatprep.mubr.msk.f32.mxu1 %vm12223_vm1, %v12222_v15 }
0x2508   : > { %11573 = vmatpush3.bf16.msra.mxu0 %v12914_v51  ;;  %11583 = vmatprep.subr.bf16.mxu1 %v12225_v37 }
0x2509   : > { %11574 = vmatprep.subr.bf16.mxu0 %v12225_v37 }
0x250b   : > { %11585 = vmatpush3.bf16.msra.mxu1 %v12984_v12 }
0x250c   : > { %11576 = vmatpush3.bf16.msra.mxu0 %v12920_v54  ;;  %11592 = vmatprep.subr.bf16.mxu1 %v12225_v37 }
0x250d   : > { %11577 = vmatprep.subr.bf16.mxu0 %v12225_v37 }
0x2510   : > { %11579 = vmatpush3.bf16.msra.mxu0 %v12926_v59 }
0x2511   : > { %11586 = vmatprep.subr.bf16.mxu0 %v12225_v37 }
0x2559   : > { %v13323_v8 = vpop.f32.mrb[50].mxu0 }
0x255a   : > { %v10874_v18 = vpop.f32.mrb[51].mxu0 }
0x255b   : > { %v7140_v18 = vpop.permute.xlu0 %7139 }
0x25bc   : > { %v13325_v55 = vpop.f32.mrb[52].mxu0 }
0x25bd   : > { %v10896_v62 = vpop.f32.mrb[53].mxu0 }
0x25be   : > { %v7145_v62 = vrot.slane %v7140_v18, %v12473_v19  ;;  %v13405_v18 = vld [vmem:[%s14097_s28] sm:$0x1] }
0x25c4   : > { %v13327_v27 = vpop.f32.mrb[54].mxu0 }
0x25c5   : > { %v10918_v43 = vpop.f32.mrb[55].mxu0 }
0x25c6   : > { %v7402_v43 = vpop.permute.xlu1 %7401 }
0x25cd   : > { %v6569_v30 = vpop.f32.mrb[56].mxu0  ;;  %v6646_v31 = vpop.f32.mrb[56].mxu1 }
0x25ce   : > { %v6570_v2 = vadd.f32 %v13330_v49, %v6569_v30  ;;  %v10940_v1 = vpop.f32.mrb[57].mxu0  ;;  %v10951_v9 = vpop.f32.mrb[57].mxu1  ;;  %v6647_v20 = vadd.f32 %v6646_v31, %v2447_v34  ;;  %v7399_v34 = vld [vmem:[#allocation2 + $0x2] sm:$0x1] }
0x25cf   : > { %v7407_v1 = vrot.slane %v7402_v43, %v12473_v19  ;;  %v7664_v9 = vpop.permute.xlu1 %7663 }
0x25d0   : > { %v6573_v35 = vadd.f32 %v6570_v2, %v2438_v24 }
0x25d1   : > { %v7408_v31 = vmul.f32 %v7407_v1, %v7399_v34 }
0x25d2   : > { %v9899_v52 = vmul.f32 -1.442695, %v6573_v35 }
0x25d4   : > { %11997 = vpow2.f32 %v9899_v52  ;;  %v7669_v52 = vrot.slane %v7664_v9, %v12473_v19 }
0x25d5   : > { %v6792_v63 = vpop.f32.mrb[58].mxu1  ;;  %v6718_v53 = vpop.f32.mrb[58].mxu0 }
0x25d6   : > { %v6793_v39 = vadd.f32 %v13336_v57, %v6792_v63  ;;  %6723 = vst [vmem:[#allocation3 + $0x3] sm:$0x1] %v6718_v53  ;;  %v10973_v58 = vpop.f32.mrb[59].mxu1  ;;  %v10962_v7 = vpop.f32.mrb[59].mxu0  ;;  %v7661_v63 = vld [vmem:[#allocation2 + $0x1] sm:$0x1] }
0x25d7   : > { %v7670_v53 = vmul.f32 %v7669_v52, %v7661_v63 }
0x25d8   : > { %v6796_v41 = vmax.f32 %v6793_v39, 0.0  ;;  %v7886_v39 = vpop.permute.xlu0 %7885 }
0x25d9   : > { %v6964_v56 = vpop.f32.mrb[60].mxu1  ;;  %v7891_v7 = vrot.slane %v7886_v39, %v12473_v19 }
0x25da   : > { %10991 = vmatmul.mubr.msk.f32.vlgmr.msra.gmra.mrb[60].mxu0 %vm3852_vm6, %v6796_v41  ;;  %v10997_v36 = vpop.f32.mrb[61].mxu1  ;;  %v7883_v41 = vld [vmem:[#allocation2] sm:$0x1] }
0x25db   : > { %11588 = vmatpush3.bf16.msra.mxu0 %v12815_v14  ;;  %11017 = vmatprep.mubr.msk.f32.mxu0 %vm12223_vm1, %v12222_v15  ;;  %v7892_v36 = vmul.f32 %v7891_v7, %v7883_v41 }
0x25dc   : > { %11589 = vmatprep.subr.bf16.mxu0 %v12225_v37 }
0x25de   : > { %v11998_v24 = vpop.eup %11997 }
0x25df   : > { %v6577_v48 = vadd.f32 1.0, %v11998_v24  ;;  %11591 = vmatpush3.bf16.msra.mxu0 %v12825_v26 }
0x25e0   : > { %11598 = vmatprep.subr.bf16.mxu0 %v12225_v37 }
0x25e1   : > { %11999 = vrcp.f32 %v6577_v48 }
0x25eb   : > { %v12000_v50 = vpop.eup %11999 }
0x25ec   : > { %v6650_v4 = vmul.f32 %v12000_v50, %v6647_v20  ;;  %v13399_v50 = vld [vmem:[%s14098_s10] sm:$0x1] }
0x25ee   : > { %6651 = vst.msk [vmem:[#allocation2 + $0x3] sm:$0x1] %vm1423_vm4, %v6650_v4  ;;  %v13402_v4 = vadd.f32 %v13399_v50, %v6964_v56 }
0x25f5   : > { %v7136_v30 = vld [vmem:[#allocation2 + $0x3] sm:$0x1] }
0x25f6   : > { %v13350_v2 = vmul.f32 %v7145_v62, %v7136_v30  ;;  %v8901_v10 = vld [vmem:[#allocation2 + $0x3] sm:$0x1] }
0x25f8   : > { %11018 = vmatmul.mubr.msk.f32.vlgmr.msra.gmra.mrb[62].mxu0 %vm1272_vm3, %v13350_v2  ;;  %v13361_v35 = vadd.f32 %v7408_v31, %v13350_v2 }
0x25f9   : > { %11600 = vmatpush3.bf16.msra.mxu0 %v12815_v14  ;;  %11039 = vmatprep.mubr.msk.f32.mxu0 %vm12223_vm1, %v12222_v15 }
0x25fa   : > { %11601 = vmatprep.subr.bf16.mxu0 %v12225_v37  ;;  %v13373_v58 = vadd.f32 %v7670_v53, %v13361_v35 }
0x25fc   : > { %v13385_v24 = vadd.f32 %v7892_v36, %v13373_v58 }
0x25fd   : > { %11603 = vmatpush3.bf16.msra.mxu0 %v12825_v26 }
0x25fe   : > { %11610 = vmatprep.subr.bf16.mxu0 %v12225_v37 }
0x2600   : > { %11040 = vmatmul.mubr.msk.f32.vlgmr.msra.gmra.mrb[64].mxu0 %vm1272_vm3, %v13361_v35 }
0x2601   : > { %11612 = vmatpush3.bf16.msra.mxu0 %v12815_v14  ;;  %11061 = vmatprep.mubr.msk.f32.mxu0 %vm12223_vm1, %v12222_v15 }
0x2602   : > { %11613 = vmatprep.subr.bf16.mxu0 %v12225_v37 }
0x2605   : > { %11615 = vmatpush3.bf16.msra.mxu0 %v12825_v26 }
0x2606   : > { %11622 = vmatprep.subr.bf16.mxu0 %v12225_v37 }
0x2608   : > { %11062 = vmatmul.mubr.msk.f32.vlgmr.msra.gmra.mrb[66].mxu0 %vm1272_vm3, %v13373_v58 }
0x2609   : > { %11624 = vmatpush3.bf16.msra.mxu0 %v12815_v14  ;;  %11083 = vmatprep.mubr.msk.f32.mxu0 %vm12223_vm1, %v12222_v15 }
0x260a   : > { %11625 = vmatprep.subr.bf16.mxu0 %v12225_v37 }
0x260d   : > { %11627 = vmatpush3.bf16.msra.mxu0 %v12825_v26 }
0x260e   : > { %11634 = vmatprep.subr.bf16.mxu0 %v12225_v37 }
0x2610   : > { %11084 = vmatmul.mubr.msk.f32.vlgmr.msra.gmra.mrb[68].mxu0 %vm1272_vm3, %v13385_v24 }
0x2611   : > { %11636 = vmatpush3.bf16.msra.mxu0 %v12497_v42  ;;  %11105 = vmatprep.mubr.msk.f32.mxu0 %vm12223_vm1, %v12222_v15  ;;  %v6968_v42 = vadd.f32 %v13405_v18, %v13402_v4 }
0x2612   : > { %11637 = vmatprep.subr.bf16.mxu0 %v12225_v37 }
0x2613   : > { %v9908_v62 = vmul.f32 -1.442695, %v6968_v42 }
0x2615   : > { %11639 = vmatpush3.bf16.msra.mxu0 %v12506_v46  ;;  %12001 = vpow2.f32 %v9908_v62 }
0x2616   : > { %11646 = vmatprep.subr.bf16.mxu0 %v12225_v37 }
0x261f   : > { %v12002_v30 = vpop.eup %12001 }
0x2620   : > { %v6972_v34 = vadd.f32 1.0, %v12002_v30 }
0x2622   : > { %12003 = vrcp.f32 %v6972_v34 }
0x262c   : > { %v13414_v39 = vpop.eup %12003 }
0x262d   : > { %v6975_v7 = vmul.f32 %v13414_v39, %v12954_v5 }
0x26ad   : > { %v13396_v48 = vpop.f32.mrb[60].mxu0 }
0x26ae   : > { %v10992_v20 = vpop.f32.mrb[61].mxu0 }
0x26cb   : > { %v7217_v43 = vpop.f32.mrb[62].mxu0 }
0x26cc   : > { %v7218_v46 = vadd.f32 %v13405_v18, %v7217_v43  ;;  %v11019_v1 = vpop.f32.mrb[63].mxu0 }
0x26ce   : > { %7229 = vrot.lane.b32.xlu1 %v7218_v46, %s14106_s26  ;;  %v7221_v42 = vadd.f32 %v7218_v46, %v13402_v4 }
0x26d0   : > { %v9911_v62 = vmul.f32 -1.442695, %v7221_v42 }
0x26d2   : > { %12005 = vpow2.f32 %v9911_v62 }
0x26d3   : > { %v7479_v31 = vpop.f32.mrb[64].mxu0 }
0x26d4   : > { %v7480_v56 = vadd.f32 %v13405_v18, %v7479_v31  ;;  %v11041_v9 = vpop.f32.mrb[65].mxu0 }
0x26d6   : > { %7491 = vrot.lane.b32.xlu1 %v7480_v56, %s14106_s26  ;;  %v7483_v43 = vadd.f32 %v7480_v56, %v13402_v4 }
0x26d8   : > { %v9914_v30 = vmul.f32 -1.442695, %v7483_v43 }
0x26da   : > { %12007 = vpow2.f32 %v9914_v30 }
0x26db   : > { %v7741_v52 = vpop.f32.mrb[66].mxu0 }
0x26dc   : > { %v7742_v63 = vadd.f32 %v13405_v18, %v7741_v52  ;;  %v11063_v53 = vpop.f32.mrb[67].mxu0  ;;  %v12006_v34 = vpop.eup %12005 }
0x26dd   : > { %v7225_v9 = vadd.f32 1.0, %v12006_v34 }
0x26de   : > { %7753 = vrot.lane.b32.xlu0 %v7742_v63, %s14106_s26  ;;  %v7745_v1 = vadd.f32 %v7742_v63, %v13402_v4 }
0x26e0   : > { %v9917_v31 = vmul.f32 -1.442695, %v7745_v1 }
0x26e2   : > { %6977 = vrot.lane.b32.xlu0 %v6975_v7, %s14106_s26  ;;  %12009 = vpow2.f32 %v9917_v31 }
0x26e3   : > { %v7963_v41 = vpop.f32.mrb[68].mxu0  ;;  %12011 = vrcp.f32 %v7225_v9 }
0x26e4   : > { %v7964_v36 = vadd.f32 %v13405_v18, %v7963_v41  ;;  %v11085_v20 = vpop.f32.mrb[69].mxu0  ;;  %v12008_v53 = vpop.eup %12007 }
0x26e5   : > { %v7487_v41 = vadd.f32 1.0, %v12008_v53 }
0x26e6   : > { %7975 = vrot.lane.b32.xlu1 %v7964_v36, %s14106_s26  ;;  %v7967_v52 = vadd.f32 %v7964_v36, %v13402_v4 }
0x26e8   : > { %v9920_v7 = vmul.f32 -1.442695, %v7967_v52 }
0x26ea   : > { %12013 = vpow2.f32 %v9920_v7 }
0x26eb   : > { %12015 = vrcp.f32 %v7487_v41 }
0x26ec   : > { %v12010_v46 = vpop.eup %12009 }
0x26ed   : > { %v13426_v20 = vpop.eup %12011  ;;  %v7749_v62 = vadd.f32 1.0, %v12010_v46 }
0x26ef   : > { %12017 = vrcp.f32 %v7749_v62  ;;  %v7510_v62 = vrot.slane %v13361_v35, %v12473_v19 }
0x26f4   : > { %v12014_v63 = vpop.eup %12013 }
0x26f5   : > { %v13430_v43 = vpop.eup %12015  ;;  %v7971_v1 = vadd.f32 1.0, %v12014_v63  ;;  %v7772_v63 = vrot.slane %v13373_v58, %v12473_v19 }
0x26f7   : > { %12019 = vrcp.f32 %v7971_v1 }
0x26f9   : > { %v13434_v34 = vpop.eup %12017 }
0x2701   : > { %v13439_v7 = vpop.eup %12019 }
0x2740   : > { %v7230_v56 = vpop.permute.xlu1 %7229 }
0x2741   : > { %v7232_v42 = vmul.f32 %v13426_v20, %v7230_v56 }
0x2743   : > { %7234 = vrot.lane.b32.xlu1 %v7232_v42, %s14106_s26  ;;  %v7248_v42 = vrot.slane %v13350_v2, %v12473_v19 }
0x2748   : > { %v7492_v36 = vpop.permute.xlu1 %7491 }
0x2749   : > { %v7494_v30 = vmul.f32 %v13430_v43, %v7492_v36  ;;  %v7994_v36 = vrot.slane %v13385_v24, %v12473_v19 }
0x274b   : > { %7496 = vrot.lane.b32.xlu0 %v7494_v30, %s14106_s26 }
0x2750   : > { %v7754_v31 = vpop.permute.xlu0 %7753 }
0x2751   : > { %v7756_v9 = vmul.f32 %v13434_v34, %v7754_v31 }
0x2753   : > { %7758 = vrot.lane.b32.xlu1 %v7756_v9, %s14106_s26 }
0x2754   : > { %v6978_v52 = vpop.permute.xlu0 %6977 }
0x2755   : > { %v6980_v53 = vadd.f32 %v6978_v52, %v13402_v4 }
0x2757   : > { %12021 = vtanh.f32 %v6980_v53 }
0x2758   : > { %v7976_v41 = vpop.permute.xlu1 %7975 }
0x2759   : > { %v7978_v46 = vmul.f32 %v13439_v7, %v7976_v41 }
0x275b   : > { %7980 = vrot.lane.b32.xlu0 %v7978_v46, %s14106_s26 }
0x2761   : > { %v12022_v56 = vpop.eup %12021 }
0x2762   : > { %6984 = vrot.lane.b32.xlu1 %v12022_v56, %s14102_s5  ;;  %v6982_v56 = vsub.f32 1.0, %v13414_v39 }
0x2766   : > { %7249 = vrot.lane.b32.xlu1 %v7248_v42, %s14107_s1 }
0x276a   : > { %7511 = vrot.lane.b32.xlu1 %v7510_v62, %s14107_s1 }
0x276e   : > { %7773 = vrot.lane.b32.xlu1 %v7772_v63, %s14107_s1  ;;  %v6988_v63 = vmul.f32 0.0, %v13414_v39 }
0x2772   : > { %7995 = vrot.lane.b32.xlu1 %v7994_v36, %s14107_s1 }
0x27b5   : > { %v7235_v30 = vpop.permute.xlu1 %7234 }
0x27b6   : > { %v7237_v2 = vadd.f32 %v7235_v30, %v13402_v4 }
0x27b8   : > { %12023 = vtanh.f32 %v7237_v2  ;;  %v7239_v2 = vsub.f32 1.0, %v13426_v20 }
0x27bd   : > { %v7497_v1 = vpop.permute.xlu0 %7496 }
0x27be   : > { %v7499_v31 = vadd.f32 %v7497_v1, %v13402_v4 }
0x27c0   : > { %12025 = vtanh.f32 %v7499_v31 }
0x27c2   : > { %v12024_v35 = vpop.eup %12023 }
0x27c3   : > { %7241 = vrot.lane.b32.xlu0 %v12024_v35, %s14102_s5 }
0x27c5   : > { %v7759_v9 = vpop.permute.xlu1 %7758 }
0x27c6   : > { %v7761_v58 = vadd.f32 %v7759_v9, %v13402_v4 }
0x27c8   : > { %12027 = vtanh.f32 %v7761_v58  ;;  %v7501_v58 = vsub.f32 1.0, %v13430_v43 }
0x27ca   : > { %v12026_v52 = vpop.eup %12025 }
0x27cb   : > { %7503 = vrot.lane.b32.xlu0 %v12026_v52, %s14102_s5 }
0x27cd   : > { %v7981_v24 = vpop.permute.xlu0 %7980 }
0x27ce   : > { %v7983_v53 = vadd.f32 %v7981_v24, %v13402_v4 }
0x27d0   : > { %12029 = vtanh.f32 %v7983_v53 }
0x27d2   : > { %v12028_v41 = vpop.eup %12027 }
0x27d3   : > { %7765 = vrot.lane.b32.xlu0 %v12028_v41, %s14102_s5 }
0x27d4   : > { %v6985_v46 = vpop.permute.xlu1 %6984 }
0x27d5   : > { %v6987_v42 = vmul.f32 %v6985_v46, %v6982_v56  ;;  %v7763_v46 = vsub.f32 1.0, %v13434_v34 }
0x27d7   : > { %v6989_v36 = vadd.f32 %v6988_v63, %v6987_v42 }
0x27d8   : > { %v7250_v30 = vpop.permute.xlu1 %7249 }
0x27d9   : > { %v7252_v1 = vmul.f32 %v13426_v20, %v7250_v30  ;;  %v7985_v30 = vsub.f32 1.0, %v13439_v7 }
0x27da   : > { %v12030_v62 = vpop.eup %12029 }
0x27db   : > { %7987 = vrot.lane.b32.xlu0 %v12030_v62, %s14102_s5 }
0x27dc   : > { %v7512_v9 = vpop.permute.xlu1 %7511 }
0x27dd   : > { %v7514_v52 = vmul.f32 %v13430_v43, %v7512_v9 }
0x27df   : > { %6992 = vrot.lane.b32.xlu0 %v6989_v36, %s14102_s5  ;;  %v9926_v36 = vld [vmem:[%s12516_s18 + $0x5] sm:$0x1] }
0x27e0   : > { %v7774_v41 = vpop.permute.xlu1 %7773 }
0x27e1   : > { %v7776_v20 = vmul.f32 %v13434_v34, %v7774_v41 }
0x27e4   : > { %v7996_v63 = vpop.permute.xlu1 %7995 }
0x27e5   : > { %v7998_v43 = vmul.f32 %v13439_v7, %v7996_v63 }
0x2835   : > { %v7242_v4 = vpop.permute.xlu0 %7241 }
0x2836   : > { %v7244_v31 = vmul.f32 %v7242_v4, %v7239_v2 }
0x2838   : > { %v7253_v35 = vadd.f32 %v7252_v1, %v7244_v31 }
0x283a   : > { %7256 = vrot.lane.b32.xlu1 %v7253_v35, %s14102_s5 }
0x283d   : > { %v7504_v39 = vpop.permute.xlu0 %7503 }
0x283e   : > { %v7506_v24 = vmul.f32 %v7504_v39, %v7501_v58 }
0x2840   : > { %v7515_v53 = vadd.f32 %v7514_v52, %v7506_v24 }
0x2842   : > { %7518 = vrot.lane.b32.xlu0 %v7515_v53, %s14102_s5 }
0x2845   : > { %v7766_v56 = vpop.permute.xlu0 %7765 }
0x2846   : > { %v7768_v42 = vmul.f32 %v7766_v56, %v7763_v46 }
0x2848   : > { %v7777_v62 = vadd.f32 %v7776_v20, %v7768_v42 }
0x284a   : > { %7780 = vrot.lane.b32.xlu1 %v7777_v62, %s14102_s5 }
0x284d   : > { %v7988_v2 = vpop.permute.xlu0 %7987 }
0x284e   : > { %v7990_v4 = vmul.f32 %v7988_v2, %v7985_v30  ;;  %8641 = vperm.xlu1 %11858, %v9926_v36  }
0x2850   : > { %v7999_v1 = vadd.f32 %v7998_v43, %v7990_v4 }
0x2851   : > { %v6993_v31 = vpop.permute.xlu0 %6992 }
0x2852   : > { %11860 = vset.pattern.permute.xlu1 %v12230_v60  ;;  %8001 = vrot.lane.b32.xlu0 %v7999_v1, %s14102_s5 }
0x2853   : > { %11007 = vmatmul.mubr.msk.f32.vlgmr.msra.gmra.mrb[62].mxu1 %vm1272_vm3, %v6993_v31  ;;  %9165 = vperm.xlu1 %11860, %v9926_v36  }
0x2854   : > { %11594 = vmatpush3.bf16.msra.mxu1 %v12977_v21  ;;  %11028 = vmatprep.mubr.msk.f32.mxu1 %vm12223_vm1, %v12222_v15 }
0x2855   : > { %11595 = vmatprep.subr.bf16.mxu1 %v12225_v37 }
0x2856   : > { %8903 = vperm.xlu0 %11859, %v9926_v36  }
0x2857   : > { %11861 = vset.pattern.permute.xlu1 %v12229_v47 }
0x2858   : > { %9427 = vperm.xlu1 %11861, %v9926_v36   ;;  %11597 = vmatpush3.bf16.msra.mxu1 %v12984_v12 }
0x2859   : > { %11604 = vmatprep.subr.bf16.mxu1 %v12225_v37 }
0x285a   : > { %11862 = vset.pattern.permute.xlu0 %v12229_v47 }
0x28ac   : > { %v7257_v60 = vpop.permute.xlu1 %7256 }
0x28ad   : > { %11029 = vmatmul.mubr.msk.f32.vlgmr.msra.gmra.mrb[64].mxu1 %vm1272_vm3, %v7257_v60 }
0x28ae   : > { %11606 = vmatpush3.bf16.msra.mxu1 %v12977_v21  ;;  %11050 = vmatprep.mubr.msk.f32.mxu1 %vm12223_vm1, %v12222_v15 }
0x28af   : > { %11607 = vmatprep.subr.bf16.mxu1 %v12225_v37 }
0x28b2   : > { %11609 = vmatpush3.bf16.msra.mxu1 %v12984_v12 }
0x28b3   : > { %11616 = vmatprep.subr.bf16.mxu1 %v12225_v37 }
0x28b4   : > { %v7519_v34 = vpop.permute.xlu0 %7518 }
0x28b5   : > { %11051 = vmatmul.mubr.msk.f32.vlgmr.msra.gmra.mrb[66].mxu1 %vm1272_vm3, %v7519_v34 }
0x28b6   : > { %11618 = vmatpush3.bf16.msra.mxu1 %v12977_v21  ;;  %11072 = vmatprep.mubr.msk.f32.mxu1 %vm12223_vm1, %v12222_v15 }
0x28b7   : > { %11619 = vmatprep.subr.bf16.mxu1 %v12225_v37 }
0x28ba   : > { %11621 = vmatpush3.bf16.msra.mxu1 %v12984_v12 }
0x28bb   : > { %11628 = vmatprep.subr.bf16.mxu1 %v12225_v37 }
0x28bc   : > { %v7781_v47 = vpop.permute.xlu1 %7780 }
0x28bd   : > { %11073 = vmatmul.mubr.msk.f32.vlgmr.msra.gmra.mrb[68].mxu1 %vm1272_vm3, %v7781_v47  ;;  %v9163_v47 = vld [vmem:[#allocation2 + $0x2] sm:$0x1] }
0x28be   : > { %11630 = vmatpush3.bf16.msra.mxu1 %v12492_v38  ;;  %11094 = vmatprep.mubr.msk.f32.mxu1 %vm12223_vm1, %v12222_v15  ;;  %v9925_v38 = vld [vmem:[%s12469_s23 + $0x5] sm:$0x1] }
0x28bf   : > { %11631 = vmatprep.subr.bf16.mxu1 %v12225_v37 }
0x28c2   : > { %11633 = vmatpush3.bf16.msra.mxu1 %v12502_v45 }
0x28c3   : > { %11640 = vmatprep.subr.bf16.mxu1 %v12225_v37 }
0x28c4   : > { %v8002_v7 = vpop.permute.xlu0 %8001 }
0x28c5   : > { %11095 = vmatmul.mubr.msk.f32.vlgmr.msra.gmra.mrb[70].mxu1 %vm1272_vm3, %v8002_v7  ;;  %11106 = vmatmul.mubr.msk.f32.vlgmr.msra.gmra.mrb[70].mxu0 %vm1272_vm3, %v8002_v7 }
0x28c6   : > { %11648 = vmatpush3.bf16.msra.mxu0 %v12869_v25  ;;  %11642 = vmatpush3.bf16.msra.mxu1 %v12867_v22 }
0x28c7   : > { %11649 = vmatprep.subr.bf16.mxu0 %v12225_v37  ;;  %11643 = vmatprep.subr.bf16.mxu1 %v12225_v37 }
0x28c8   : > { %11127 = vmatprep.mubr.msk.f32.mxu0 %vm12223_vm1, %v12222_v15  ;;  %11116 = vmatprep.mubr.msk.f32.mxu1 %vm12223_vm1, %v12222_v15 }
0x28ca   : > { %11651 = vmatpush3.bf16.msra.mxu0 %v12881_v33  ;;  %11645 = vmatpush3.bf16.msra.mxu1 %v12879_v32 }
0x28cb   : > { %11149 = vmatprep.subr.mxu0 %v12222_v15  ;;  %11652 = vmatprep.subr.bf16.mxu1 %v12225_v37 }
0x28cd   : > { %11128 = vmatmul.mubr.msk.f32.vlgmr.msra.gmra.mrb[72].mxu0 %vm1272_vm3, %v8002_v7  ;;  %11117 = vmatmul.mubr.msk.f32.vlgmr.msra.gmra.mrb[72].mxu1 %vm1272_vm3, %v8002_v7  ;;  %v8642_v36 = vpop.permute.xlu1 %8641 }
0x28ce   : > { %11150 = vmatpush3.msk.msra.mxu0 %vm1165_vm0, %v13298_v3  ;;  %11151 = vmatprep.mubr.msk.f32.mxu0 %vm12223_vm1, %v12222_v15  ;;  %v8647_v30 = vrot.slane %v8642_v36, %v12473_v19 }
0x28cf   : > { %11654 = vmatpush3.bf16.msra.mxu1 %v12895_v40  ;;  %11146 = vmatprep.mubr.msk.f32.mxu1 %vm12223_vm1, %v12222_v15 }
0x28d0   : > { %11655 = vmatprep.subr.bf16.mxu1 %v12225_v37  ;;  %11664 = vmatprep.subr.bf16.mxu0 %v12225_v37 }
0x28d1   : > { %11152 = vmatmul.mubr.msk.f32.vlgmr.msra.gmra.mrb[74].mxu0 %vm1161_vm2, %v9925_v38 }
0x28d2   : > { %11666 = vmatpush3.bf16.msra.mxu0 %v12977_v21  ;;  %11162 = vmatprep.mubr.msk.f32.mxu0 %vm12223_vm1, %v12222_v15  ;;  %v9166_v31 = vpop.permute.xlu1 %9165 }
0x28d3   : > { %11657 = vmatpush3.bf16.msra.mxu1 %v12914_v51  ;;  %11667 = vmatprep.subr.bf16.mxu0 %v12225_v37  ;;  %v9171_v34 = vrot.slane %v9166_v31, %v12473_v19 }
0x28d4   : > { %11658 = vmatprep.subr.bf16.mxu1 %v12225_v37 }
0x28d5   : > { %v8904_v2 = vpop.permute.xlu0 %8903  ;;  %v9172_v7 = vmul.f32 %v9171_v34, %v9163_v47 }
0x28d6   : > { %11669 = vmatpush3.bf16.msra.mxu0 %v12984_v12  ;;  %v8909_v1 = vrot.slane %v8904_v2, %v12473_v19 }
0x28d7   : > { %11660 = vmatpush3.bf16.msra.mxu1 %v12920_v54  ;;  %11676 = vmatprep.subr.bf16.mxu0 %v12225_v37  ;;  %v9428_v38 = vpop.permute.xlu1 %9427 }
0x28d8   : > { %11661 = vmatprep.subr.bf16.mxu1 %v12225_v37 }
0x28db   : > { %11663 = vmatpush3.bf16.msra.mxu1 %v12926_v59 }
0x28dc   : > { %11670 = vmatprep.subr.bf16.mxu1 %v12225_v37 }
0x2926   : > { %v13550_v45 = vpop.f32.mrb[62].mxu1 }
0x2927   : > { %v11008_v22 = vpop.f32.mrb[63].mxu1 }
0x2980   : > { %v13552_v25 = vpop.f32.mrb[64].mxu1 }
0x2981   : > { %v11030_v32 = vpop.f32.mrb[65].mxu1 }
0x2982   : > { %v9433_v32 = vrot.slane %v9428_v38, %v12473_v19 }
0x2988   : > { %v13554_v33 = vpop.f32.mrb[66].mxu1 }
0x2989   : > { %v11052_v40 = vpop.f32.mrb[67].mxu1 }
0x298a   : > { %v9425_v40 = vld [vmem:[#allocation2 + $0x1] sm:$0x1] }
0x2990   : > { %v13556_v51 = vpop.f32.mrb[68].mxu1 }
0x2991   : > { %v11074_v54 = vpop.f32.mrb[69].mxu1 }
0x2992   : > { %v9434_v54 = vmul.f32 %v9433_v32, %v9425_v40 }
0x2998   : > { %v8071_v3 = vpop.f32.mrb[70].mxu1  ;;  %v8148_v35 = vpop.f32.mrb[70].mxu0 }
0x2999   : > { %v8072_v9 = vadd.f32 %v13330_v49, %v8071_v3  ;;  %v11096_v58 = vpop.f32.mrb[71].mxu1  ;;  %v11107_v59 = vpop.f32.mrb[71].mxu0  ;;  %v8149_v49 = vadd.f32 %v8148_v35, %v2834_v6  ;;  %v8910_v6 = vmul.f32 %v8909_v1, %v8901_v10 }
0x299b   : > { %v8075_v39 = vadd.f32 %v8072_v9, %v2825_v13 }
0x299d   : > { %v9922_v52 = vmul.f32 -1.442695, %v8075_v39 }
0x299f   : > { %12031 = vpow2.f32 %v9922_v52 }
0x29a0   : > { %v8294_v24 = vpop.f32.mrb[72].mxu0  ;;  %v8220_v53 = vpop.f32.mrb[72].mxu1 }
0x29a1   : > { %v8295_v41 = vadd.f32 %v13336_v57, %v8294_v24  ;;  %8225 = vst [vmem:[#allocation3 + $0x4] sm:$0x1] %v8220_v53  ;;  %v11129_v46 = vpop.f32.mrb[73].mxu0  ;;  %v11118_v56 = vpop.f32.mrb[73].mxu1 }
0x29a3   : > { %v8298_v20 = vmax.f32 %v8295_v41, 0.0 }
0x29a4   : > { %v8466_v42 = vpop.f32.mrb[74].mxu0 }
0x29a5   : > { %11147 = vmatmul.mubr.msk.f32.vlgmr.msra.gmra.mrb[74].mxu1 %vm3852_vm6, %v8298_v20  ;;  %v11153_v62 = vpop.f32.mrb[75].mxu0  ;;  %v13615_v9 = vadd.f32 %v13399_v50, %v8466_v42 }
0x29a6   : > { %11672 = vmatpush3.bf16.msra.mxu1 %v12815_v14  ;;  %11173 = vmatprep.mubr.msk.f32.mxu1 %vm12223_vm1, %v12222_v15 }
0x29a7   : > { %11673 = vmatprep.subr.bf16.mxu1 %v12225_v37  ;;  %v8470_v58 = vadd.f32 %v13405_v18, %v13615_v9 }
0x29a9   : > { %v12032_v0 = vpop.eup %12031  ;;  %v9931_v59 = vmul.f32 -1.442695, %v8470_v58  ;;  %v4055_v58 = vld [vmem:[#allocation3] sm:$0x1] }
0x29aa   : > { %v8079_v13 = vadd.f32 1.0, %v12032_v0  ;;  %11675 = vmatpush3.bf16.msra.mxu1 %v12825_v26 }
0x29ab   : > { %11682 = vmatprep.subr.bf16.mxu1 %v12225_v37 }
0x29ac   : > { %12033 = vrcp.f32 %v8079_v13 }
0x29ad   : > { %12035 = vpow2.f32 %v9931_v59  ;;  %v4131_v59 = vadd.f32 %v13039_v17, %v4055_v58 }
0x29b6   : > { %v12034_v57 = vpop.eup %12033 }
0x29b7   : > { %v8152_v63 = vmul.f32 %v12034_v57, %v8149_v49  ;;  %v12036_v39 = vpop.eup %12035 }
0x29b8   : > { %v8474_v52 = vadd.f32 1.0, %v12036_v39  ;;  %v13661_v39 = vld [vmem:[%s14109_s3] sm:$0x1] }
0x29b9   : > { %8153 = vst.msk [vmem:[#allocation2 + $0x4] sm:$0x1] %vm1423_vm4, %v8152_v63 }
0x29ba   : > { %12037 = vrcp.f32 %v8474_v52  ;;  %v4132_v52 = vadd.f32 %v4131_v59, %v13661_v39  ;;  %v13701_v59 = vld [vmem:[#allocation4] sm:$0x1] }
0x29c0   : > { %v8638_v43 = vld [vmem:[#allocation2 + $0x4] sm:$0x1] }
0x29c1   : > { %v13573_v4 = vmul.f32 %v8647_v30, %v8638_v43 }
0x29c3   : > { %11174 = vmatmul.mubr.msk.f32.vlgmr.msra.gmra.mrb[76].mxu1 %vm1272_vm3, %v13573_v4  ;;  %v13584_v60 = vadd.f32 %v8910_v6, %v13573_v4 }
0x29c4   : > { %11684 = vmatpush3.bf16.msra.mxu1 %v12815_v14  ;;  %11195 = vmatprep.mubr.msk.f32.mxu1 %vm12223_vm1, %v12222_v15  ;;  %v13622_v56 = vpop.eup %12037 }
0x29c5   : > { %11685 = vmatprep.subr.bf16.mxu1 %v12225_v37  ;;  %v13596_v22 = vadd.f32 %v9172_v7, %v13584_v60  ;;  %v8477_v20 = vmul.f32 %v13622_v56, %v12954_v5  ;;  %v9012_v32 = vrot.slane %v13584_v60, %v12473_v19 }
0x29c7   : > { %v13608_v3 = vadd.f32 %v9434_v54, %v13596_v22  ;;  %v9274_v54 = vrot.slane %v13596_v22, %v12473_v19 }
0x29c8   : > { %11687 = vmatpush3.bf16.msra.mxu1 %v12825_v26 }
0x29c9   : > { %11694 = vmatprep.subr.bf16.mxu1 %v12225_v37 }
0x29cb   : > { %11196 = vmatmul.mubr.msk.f32.vlgmr.msra.gmra.mrb[78].mxu1 %vm1272_vm3, %v13584_v60  ;;  %v8750_v60 = vrot.slane %v13573_v4, %v12473_v19 }
0x29cc   : > { %11696 = vmatpush3.bf16.msra.mxu1 %v12815_v14  ;;  %11217 = vmatprep.mubr.msk.f32.mxu1 %vm12223_vm1, %v12222_v15 }
0x29cd   : > { %11697 = vmatprep.subr.bf16.mxu1 %v12225_v37 }
0x29d0   : > { %11699 = vmatpush3.bf16.msra.mxu1 %v12825_v26 }
0x29d1   : > { %11706 = vmatprep.subr.bf16.mxu1 %v12225_v37 }
0x29d3   : > { %11218 = vmatmul.mubr.msk.f32.vlgmr.msra.gmra.mrb[80].mxu1 %vm1272_vm3, %v13596_v22 }
0x29d4   : > { %11708 = vmatpush3.bf16.msra.mxu1 %v12815_v14  ;;  %11239 = vmatprep.mubr.msk.f32.mxu1 %vm12223_vm1, %v12222_v15 }
0x29d5   : > { %11709 = vmatprep.subr.bf16.mxu1 %v12225_v37 }
0x29d8   : > { %11711 = vmatpush3.bf16.msra.mxu1 %v12825_v26 }
0x29db   : > { %11240 = vmatmul.mubr.msk.f32.vlgmr.msra.gmra.mrb[82].mxu1 %vm1272_vm3, %v13608_v3 }
0x2a78   : > { %v13612_v35 = vpop.f32.mrb[74].mxu1 }
0x2a79   : > { %v11148_v14 = vpop.f32.mrb[75].mxu1 }
0x2a96   : > { %v8719_v26 = vpop.f32.mrb[76].mxu1 }
0x2a97   : > { %v8720_v24 = vadd.f32 %v13405_v18, %v8719_v26  ;;  %v11175_v53 = vpop.f32.mrb[77].mxu1  ;;  %v13665_v26 = vld [vmem:[%s14110_s6] sm:$0x1] }
0x2a98   : > { %v3923_v22 = vadd.f32 %v12969_v29, %v13665_v26  ;;  %v13670_v53 = vld [vmem:[%s14111_s7] sm:$0x1] }
0x2a99   : > { %8731 = vrot.lane.b32.xlu0 %v8720_v24, %s14106_s26  ;;  %v8723_v57 = vadd.f32 %v8720_v24, %v13615_v9  ;;  %v4133_v24 = vmax.f32 %v4132_v52, 0.0 }
0x2a9a   : > { %v3927_v4 = vsel %vm3926_vm7, %v3923_v22, -inf }
0x2a9b   : > { %v9934_v63 = vmul.f32 -1.442695, %v8723_v57 }
0x2a9d   : > { %12039 = vpow2.f32 %v9934_v63 }
0x2a9e   : > { %v8981_v41 = vpop.f32.mrb[78].mxu1 }
0x2a9f   : > { %v8982_v46 = vadd.f32 %v13405_v18, %v8981_v41  ;;  %v11197_v50 = vpop.f32.mrb[79].mxu1  ;;  %v4134_v41 = vmul.f32 %v4133_v24, %v13670_v53 }
0x2aa1   : > { %8993 = vrot.lane.b32.xlu1 %v8982_v46, %s14106_s26  ;;  %v8985_v36 = vadd.f32 %v8982_v46, %v13615_v9  ;;  %v4136_v17 = vsel %vm4135_vm8, %v4134_v41, 0.0 }
0x2aa3   : > { %v9937_v30 = vmul.f32 -1.442695, %v8985_v36 }
0x2aa5   : > { %8479 = vrot.lane.b32.xlu1 %v8477_v20, %s14106_s26  ;;  %12041 = vpow2.f32 %v9937_v30 }
0x2aa6   : > { %v9243_v42 = vpop.f32.mrb[80].mxu1 }
0x2aa7   : > { %v13629_v62 = vadd.f32 %v13405_v18, %v9243_v42  ;;  %v11219_v0 = vpop.f32.mrb[81].mxu1  ;;  %v12040_v5 = vpop.eup %12039 }
0x2aa8   : > { %v8727_v2 = vadd.f32 1.0, %v12040_v5 }
0x2aa9   : > { %9255 = vrot.lane.b32.xlu0 %v13629_v62, %s14106_s26 }
0x2aaa   : > { %12043 = vrcp.f32 %v8727_v2 }
0x2aae   : > { %v9505_v13 = vpop.f32.mrb[82].mxu1 }
0x2aaf   : > { %v11241_v49 = vpop.f32.mrb[83].mxu1  ;;  %v12042_v43 = vpop.eup %12041  ;;  %v13640_v34 = vadd.f32 %v13405_v18, %v9505_v13 }
0x2ab0   : > { %v8989_v1 = vadd.f32 1.0, %v12042_v43  ;;  %v9247_v43 = vadd.f32 %v13629_v62, %v13615_v9 }
0x2ab2   : > { %12045 = vrcp.f32 %v8989_v1 }
0x2ab4   : > { %v13635_v10 = vpop.eup %12043 }
0x2abc   : > { %v13644_v47 = vpop.eup %12045 }
0x2b0b   : > { %v8732_v6 = vpop.permute.xlu0 %8731 }
0x2b0c   : > { %v8734_v31 = vmul.f32 %v13635_v10, %v8732_v6  ;;  %v9940_v6 = vmul.f32 -1.442695, %v9247_v43 }
0x2b0e   : > { %8736 = vrot.lane.b32.xlu0 %v8734_v31, %s14106_s26 }
0x2b12   : > { %9517 = vrot.lane.b32.xlu0 %v13640_v34, %s14106_s26 }
0x2b13   : > { %v8994_v7 = vpop.permute.xlu1 %8993 }
0x2b14   : > { %v8996_v38 = vmul.f32 %v13644_v47, %v8994_v7 }
0x2b16   : > { %8998 = vrot.lane.b32.xlu1 %v8996_v38, %s14106_s26  ;;  %9013 = vrot.lane.b32.xlu0 %v9012_v32, %s14107_s1  ;;  %v12153_v38 = vld [vmem:[%s12469_s23 + $0x1] sm:$0x1] }
0x2b17   : > { %v8480_v40 = vpop.permute.xlu1 %8479 }
0x2b18   : > { %v8482_v18 = vadd.f32 %v8480_v40, %v13615_v9  ;;  %v4649_v40 = vadd.f32 %v13077_v44, %v13665_v26 }
0x2b1a   : > { %12047 = vtanh.f32 %v8482_v18  ;;  %9275 = vrot.lane.b32.xlu0 %v9274_v54, %s14107_s1  ;;  %v4652_v54 = vsel %vm3926_vm7, %v4649_v40, -inf }
0x2b1b   : > { %v9256_v57 = vpop.permute.xlu0 %9255 }
0x2b24   : > { %v12048_v14 = vpop.eup %12047 }
0x2b25   : > { %8486 = vrot.lane.b32.xlu1 %v12048_v14, %s14102_s5 }
0x2b29   : > { %8751 = vrot.lane.b32.xlu1 %v8750_v60, %s14107_s1 }
0x2b4d   : > { %3928 = vmax.xlane.f32.xlu1 %v3927_v4 }
0x2b51   : > { %4137 = vadd.xlane.f32.xlu1 %v4136_v17 }
0x2b80   : > { %v13682_v63 = vpop.permute.xlu0 %8736 }
0x2b84   : > { %v13684_v36 = vpop.permute.xlu0 %9517 }
0x2b88   : > { %v13675_v46 = vpop.permute.xlu1 %8998  ;;  %v13686_v30 = vpop.permute.xlu0 %9013 }
0x2b8c   : > { %v13688_v5 = vpop.permute.xlu0 %9275 }
0x2b97   : > { %v13677_v50 = vpop.permute.xlu1 %8486 }
0x2b9b   : > { %v13679_v20 = vpop.permute.xlu1 %8751 }
0x2bda   : > { %v3929_v29 = vpop.xlane.xlu1 %3928 }
0x2bdb   : > { %v3930_v42 = vsub.f32 %v3923_v22, %v3929_v29 }
0x2bdd   : > { %v3931_v0 = vmul.f32 1.442695, %v3930_v42 }
0x2bde   : > { %v4138_v52 = vpop.xlane.xlu1 %4137 }
0x2bdf   : > { %12049 = vpow2.f32 %v3931_v0  ;;  %v4139_v44 = vadd.f32 %v4138_v52, %v13701_v59 }
0x2be1   : > { %v4140_v22 = vand.u32 2147483647, %v4139_v44 }
0x2be3   : > { %v4141_v24 = vsub.f32 0.0, %v4140_v22 }
0x2be5   : > { %v4142_v4 = vmul.f32 1.442695, %v4141_v24 }
0x2be9   : > { %v12050_v13 = vpop.eup %12049 }
0x2bea   : > { %v3933_v49 = vsel %vm3926_vm7, %v12050_v13, 0.0  ;;  %v4144_v13 = vmin.f32 %v4139_v44, 0.0 }
0x2beb   : > { %3934 = vadd.xlane.f32.xlu0 %v3933_v49 }
0x2c78   : > { %v3935_v2 = vpop.xlane.xlu0 %3934 }
0x2c79   : > { %12051 = vlog2.f32 %v3935_v2 }
0x2c7a   : > { %12053 = vpow2.f32 %v9940_v6 }
0x2c83   : > { %v12052_v1 = vpop.eup %12051 }
0x2c84   : > { %v3937_v31 = vmul.f32 0.6931472, %v12052_v1  ;;  %v12054_v14 = vpop.eup %12053 }
0x2c85   : > { %v9251_v60 = vadd.f32 1.0, %v12054_v14 }
0x2c86   : > { %v3938_v7 = vsub.f32 %v3930_v42, %v3937_v31  ;;  %v4150_v42 = vsub.f32 0.0, %v4139_v44  ;;  %v12154_v31 = vld [vmem:[%s12516_s18 + $0x1] sm:$0x1] }
0x2c87   : > { %12055 = vrcp.f32 %v9251_v60 }
0x2c88   : > { %v3939_v32 = vmul.f32 %v12153_v38, %v3938_v7  ;;  %12057 = vpow2.f32 %v4142_v4  ;;  %v4151_v49 = vmin.f32 %v4150_v42, 0.0  ;;  %v4155_v7 = vsub.f32 1.0, %v12154_v31 }
0x2c8a   : > { %v3940_v18 = vsel %vm3926_vm7, %v3939_v32, 0.0 }
0x2c8b   : > { %3941 = vadd.xlane.f32.xlu0 %v3940_v18 }
0x2c8f   : > { %4653 = vmax.xlane.f32.xlu0 %v4652_v54 }
0x2c91   : > { %v13697_v62 = vpop.eup %12055 }
0x2c92   : > { %v9258_v58 = vmul.f32 %v13697_v62, %v9256_v57  ;;  %v12058_v41 = vpop.eup %12057 }
0x2c93   : > { %v4145_v17 = vadd.f32 1.0, %v12058_v41 }
0x2c95   : > { %12059 = vlog2.f32 %v4145_v17 }
0x2c9f   : > { %v12060_v29 = vpop.eup %12059 }
0x2ca0   : > { %v4147_v0 = vmul.f32 0.6931472, %v12060_v29  ;;  %v9001_v29 = vadd.f32 %v13675_v46, %v13615_v9 }
0x2ca2   : > { %v4148_v2 = vsub.f32 %v4144_v13, %v4147_v0  ;;  %v4152_v43 = vsub.f32 %v4151_v49, %v4147_v0  ;;  %v4772_v49 = vld [vmem:[#allocation3 + $0x1] sm:$0x1] }
0x2ca4   : > { %v4149_v32 = vmax.f32 %v4148_v2, -100.0  ;;  %v4153_v18 = vmax.f32 %v4152_v43, -100.0 }
0x2ca5   : > { %9260 = vrot.lane.b32.xlu0 %v9258_v58, %s14106_s26 }
0x2ca6   : > { %v4154_v52 = vmul.f32 %v12154_v31, %v4149_v32  ;;  %v4156_v22 = vmul.f32 %v4155_v7, %v4153_v18  ;;  %v9003_v31 = vsub.f32 1.0, %v13644_v47 }
0x2ca8   : > { %v4157_v4 = vadd.f32 %v4156_v22, %v4154_v52 }
0x2d18   : > { %v3942_v57 = vpop.xlane.xlu0 %3941 }
0x2d19   : > { %v3943_v1 = vrot.slane %v3942_v57, 4 }
0x2d1b   : > { %v3944_v6 = vadd.f32 %v3943_v1, %v3942_v57  ;;  %v4848_v57 = vadd.f32 %v13155_v23, %v4772_v49 }
0x2d1c   : > { %v4654_v38 = vpop.xlane.xlu0 %4653 }
0x2d1d   : > { %v3945_v54 = vrot.slane %v3944_v6, 2  ;;  %v4655_v14 = vsub.f32 %v4649_v40, %v4654_v38  ;;  %v4849_v2 = vadd.f32 %v4848_v57, %v13661_v39  ;;  %v9016_v38 = vmul.f32 %v13644_v47, %v13686_v30 }
0x2d1e   : > { %v8490_v30 = vmul.f32 0.0, %v13622_v56 }
0x2d1f   : > { %v4656_v60 = vmul.f32 1.442695, %v4655_v14  ;;  %v3946_v58 = vadd.f32 %v3945_v54, %v3944_v6  ;;  %v4850_v43 = vmax.f32 %v4849_v2, 0.0 }
0x2d20   : > { %v9261_v42 = vpop.permute.xlu0 %9260 }
0x2d21   : > { %12061 = vpow2.f32 %v4656_v60  ;;  %v3947_v24 = vrot.slane %v3946_v58, 1  ;;  %v9263_v40 = vadd.f32 %v9261_v42, %v13615_v9  ;;  %v4851_v46 = vmul.f32 %v4850_v43, %v13670_v53 }
0x2d22   : > { %12063 = vtanh.f32 %v9001_v29 }
0x2d23   : > { %v3948_v44 = vadd.f32 %v3947_v24, %v3946_v58  ;;  %12065 = vtanh.f32 %v9263_v40  ;;  %v4852_v1 = vsel %vm4135_vm8, %v4851_v46, 0.0  ;;  %v12155_v58 = vld [vmem:[%s12469_s23 + $0x2] sm:$0x1]  ;;  %v8739_v24 = vadd.f32 %v13682_v63, %v13615_v9 }
0x2d25   : > { %11721 = vpush %v3948_v44  ;;  %v8484_v44 = vsub.f32 1.0, %v13622_v56 }
0x2d26   : > { %11723 = vpush %v4157_v4 }
0x2d27   : > { %v8489_v4 = vmul.f32 %v13677_v50, %v8484_v44  ;;  %v12233_v50 = vmov 1966171168  }
0x2d28   : > { %v4872_v49 = vunpack.c.l.s4 %v12233_v50 }
0x2d2a   : > { %v4873_v57 = vunpack.c.0.s8 %v4872_v49 }
0x2d2b   : > { %v12062_v41 = vpop.eup %12061 }
0x2d2c   : > { %v4658_v17 = vsel %vm3926_vm7, %v12062_v41, 0.0  ;;  %v12064_v0 = vpop.eup %12063  ;;  %v8491_v41 = vadd.f32 %v8490_v30, %v8489_v4 }
0x2d2d   : > { %4659 = vadd.xlane.f32.xlu1 %v4658_v17  ;;  %v12066_v13 = vpop.eup %12065 }
0x2d3e   : > { %9005 = vrot.lane.b32.xlu1 %v12064_v0, %s14102_s5 }
0x2d42   : > { %9267 = vrot.lane.b32.xlu1 %v12066_v13, %s14102_s5 }
0x2d66   : > { %4853 = vadd.xlane.f32.xlu1 %v4852_v1 }
0x2dba   : > { %v4660_v6 = vpop.xlane.xlu1 %4659 }
0x2dbb   : > { %12067 = vlog2.f32 %v4660_v6 }
0x2dbc   : > { %12069 = vtanh.f32 %v8739_v24 }
0x2dbe   : > { %v9006_v7 = vpop.permute.xlu1 %9005 }
0x2dbf   : > { %v9008_v32 = vmul.f32 %v9006_v7, %v9003_v31  ;;  %v13733_v7 = vsub.s32 %v4873_v57, %v12461_v16 }
0x2dc1   : > { %v13718_v18 = vadd.f32 %v9016_v38, %v9008_v32 }
0x2dc5   : > { %v12068_v23 = vpop.eup %12067 }
0x2dc6   : > { %v4662_v54 = vmul.f32 0.6931472, %v12068_v23  ;;  %v12070_v47 = vpop.eup %12069 }
0x2dc8   : > { %v4663_v60 = vsub.f32 %v4655_v14, %v4662_v54  ;;  %v13729_v14 = vpop.permute.xlu1 %9267 }
0x2dca   : > { %v4664_v52 = vmul.f32 %v12155_v58, %v4663_v60 }
0x2dcc   : > { %v4665_v22 = vsel %vm3926_vm7, %v4664_v52, 0.0  ;;  %v5627_v52 = vadd.f32 %v13208_v11, %v13665_v26  ;;  %v8754_v11 = vmul.f32 %v13635_v10, %v13679_v20 }
0x2dcd   : > { %4666 = vadd.xlane.f32.xlu0 %v4665_v22  ;;  %v9509_v22 = vadd.f32 %v13640_v34, %v13615_v9 }
0x2dce   : > { %v5630_v16 = vsel %vm3926_vm7, %v5627_v52, -inf }
0x2dcf   : > { %v9943_v24 = vmul.f32 -1.442695, %v9509_v22 }
0x2de3   : > { %8743 = vrot.lane.b32.xlu0 %v12070_v47, %s14102_s5 }
0x2de7   : > { %8494 = vrot.lane.b32.xlu0 %v8491_v41, %s14102_s5 }
0x2df3   : > { %v4854_v17 = vpop.xlane.xlu1 %4853 }
0x2df4   : > { %v4855_v29 = vadd.f32 %v4854_v17, %v13701_v59  ;;  %v8741_v17 = vsub.f32 1.0, %v13635_v10 }
0x2df6   : > { %v4856_v42 = vand.u32 2147483647, %v4855_v29  ;;  %v4866_v56 = vsub.f32 0.0, %v4855_v29  ;;  %v4860_v43 = vmin.f32 %v4855_v29, 0.0 }
0x2df8   : > { %v4857_v63 = vsub.f32 0.0, %v4856_v42  ;;  %v4867_v1 = vmin.f32 %v4866_v56, 0.0  ;;  %v13765_v56 = vld [vmem:[%s12516_s18 + $0x2] sm:$0x1] }
0x2df9   : > { %v4889_v57 = vsub.f32 1.0, %v13765_v56 }
0x2dfa   : > { %v4858_v40 = vmul.f32 1.442695, %v4857_v63 }
0x2dfc   : > { %12071 = vpow2.f32 %v4858_v40 }
0x2e06   : > { %v12072_v0 = vpop.eup %12071 }
0x2e07   : > { %v4861_v13 = vadd.f32 1.0, %v12072_v0 }
0x2e09   : > { %12073 = vlog2.f32 %v4861_v13 }
0x2e0a   : > { %12075 = vpow2.f32 %v9943_v24  ;;  %v9265_v24 = vsub.f32 1.0, %v13697_v62 }
0x2e13   : > { %v12074_v2 = vpop.eup %12073 }
0x2e14   : > { %v4863_v46 = vmul.f32 0.6931472, %v12074_v2  ;;  %v12076_v44 = vpop.eup %12075 }
0x2e15   : > { %v9513_v4 = vadd.f32 1.0, %v12076_v44  ;;  %v9270_v44 = vmul.f32 %v13729_v14, %v9265_v24 }
0x2e16   : > { %v4864_v6 = vsub.f32 %v4860_v43, %v4863_v46  ;;  %v4868_v31 = vsub.f32 %v4867_v1, %v4863_v46  ;;  %v5036_v1 = vld [vmem:[#allocation3] sm:$0x1] }
0x2e17   : > { %12077 = vrcp.f32 %v9513_v4  ;;  %v9278_v4 = vmul.f32 %v13697_v62, %v13688_v5 }
0x2e18   : > { %v4865_v38 = vmax.f32 %v4864_v6, -100.0  ;;  %v4869_v32 = vmax.f32 %v4868_v31, -100.0  ;;  %v5112_v6 = vadd.f32 %v13157_v28, %v5036_v1 }
0x2e1a   : > { %v4877_v23 = vrot.slane %v4865_v38, %v13733_v7  ;;  %v4897_v60 = vrot.slane %v4869_v32, %v13733_v7 }
0x2e1c   : > { %v4884_v54 = vrot.slane %v4877_v23, %v13733_v7  ;;  %v4904_v58 = vrot.slane %v4897_v60, %v13733_v7 }
0x2e1e   : > { %4885 = vrot.lane.b32.xlu0 %v4884_v54, %s14062_s8 }
0x2e21   : > { %v13751_v50 = vpop.eup %12077 }
0x2e22   : > { %4905 = vrot.lane.b32.xlu0 %v4904_v58, %s14062_s8  ;;  %v9520_v10 = vmul.f32 %v13751_v50, %v13684_v36 }
0x2e41   : > { %5631 = vmax.xlane.f32.xlu0 %v5630_v16 }
0x2e5a   : > { %v4667_v47 = vpop.xlane.xlu0 %4666 }
0x2e5b   : > { %v4668_v30 = vrot.slane %v4667_v47, 4 }
0x2e5d   : > { %v4669_v41 = vadd.f32 %v4668_v30, %v4667_v47  ;;  %v9279_v47 = vadd.f32 %v9278_v4, %v9270_v44  ;;  %v5750_v30 = vld [vmem:[#allocation3 + $0x2] sm:$0x1] }
0x2e5e   : > { %v8744_v29 = vpop.permute.xlu0 %8743 }
0x2e5f   : > { %v4670_v42 = vrot.slane %v4669_v41, 2  ;;  %v8746_v63 = vmul.f32 %v8744_v29, %v8741_v17 }
0x2e61   : > { %v8755_v40 = vadd.f32 %v8754_v11, %v8746_v63  ;;  %v4671_v0 = vadd.f32 %v4670_v42, %v4669_v41  ;;  %v5826_v41 = vadd.f32 %v13323_v8, %v5750_v30 }
0x2e62   : > { %v8495_v34 = vpop.permute.xlu0 %8494 }
0x2e63   : > { %8758 = vrot.lane.b32.xlu1 %v8755_v40, %s14102_s5  ;;  %11163 = vmatmul.mubr.msk.f32.vlgmr.msra.gmra.mrb[76].mxu0 %vm1272_vm3, %v8495_v34  ;;  %v4672_v13 = vrot.slane %v4671_v0, 1  ;;  %v5827_v17 = vadd.f32 %v5826_v41, %v13661_v39 }
0x2e64   : > { %11678 = vmatpush3.bf16.msra.mxu0 %v12977_v21  ;;  %11184 = vmatprep.mubr.msk.f32.mxu0 %vm12223_vm1, %v12222_v15 }
0x2e65   : > { %v4673_v20 = vadd.f32 %v4672_v13, %v4671_v0  ;;  %11679 = vmatprep.subr.bf16.mxu0 %v12225_v37  ;;  %v5828_v29 = vmax.f32 %v5827_v17, 0.0 }
0x2e67   : > { %11725 = vpush %v4673_v20  ;;  %9522 = vrot.lane.b32.xlu1 %v9520_v10, %s14106_s26  ;;  %s14058_s26 = smov 127   ;;  %v5829_v42 = vmul.f32 %v5828_v29, %v13670_v53 }
0x2e68   : > { %11681 = vmatpush3.bf16.msra.mxu0 %v12984_v12 }
0x2e69   : > { %11688 = vmatprep.subr.bf16.mxu0 %v12225_v37  ;;  %v5830_v63 = vsel %vm4135_vm8, %v5829_v42, 0.0 }
0x2e6b   : > { %9020 = vrot.lane.b32.xlu1 %v13718_v18, %s14102_s5  ;;  %v5113_v18 = vadd.f32 %v5112_v6, %v13661_v39 }
0x2e6d   : > { %v5114_v31 = vmax.f32 %v5113_v18, 0.0 }
0x2e6f   : > { %v5115_v38 = vmul.f32 %v5114_v31, %v13670_v53 }
0x2e71   : > { %v5116_v32 = vsel %vm4135_vm8, %v5115_v38, 0.0 }
0x2e90   : > { %v4886_v49 = vpop.permute.xlu0 %4885 }
0x2e91   : > { %v4888_v36 = vmul.f32 %v13765_v56, %v4886_v49 }
0x2e94   : > { %v4906_v2 = vpop.permute.xlu0 %4905 }
0x2e95   : > { %v4908_v43 = vmul.f32 %v4906_v2, %v4889_v57 }
0x2e97   : > { %v4909_v46 = vadd.f32 %v4908_v43, %v4888_v36 }
0x2e99   : > { %4912 = vrot.lane.b32.xlu1 %v4909_v46, %s14058_s26  ;;  %s14060_s26 = smov 2  }
0x2ebd   : > { %5117 = vadd.xlane.f32.xlu1 %v5116_v32 }
0x2ece   : > { %v5632_v23 = vpop.xlane.xlu0 %5631 }
0x2ecf   : > { %v13776_v54 = vsub.f32 %v5627_v52, %v5632_v23 }
0x2ed1   : > { %v5634_v60 = vmul.f32 1.442695, %v13776_v54 }
0x2ed3   : > { %12079 = vpow2.f32 %v5634_v60 }
0x2ed5   : > { %v8759_v58 = vpop.permute.xlu1 %8758 }
0x2ed6   : > { %11185 = vmatmul.mubr.msk.f32.vlgmr.msra.gmra.mrb[78].mxu0 %vm1272_vm3, %v8759_v58 }
0x2ed7   : > { %11690 = vmatpush3.bf16.msra.mxu0 %v12977_v21  ;;  %11206 = vmatprep.mubr.msk.f32.mxu0 %vm12223_vm1, %v12222_v15 }
0x2ed8   : > { %11691 = vmatprep.subr.bf16.mxu0 %v12225_v37 }
0x2ed9   : > { %v13784_v28 = vpop.permute.xlu1 %9522 }
0x2edb   : > { %11693 = vmatpush3.bf16.msra.mxu0 %v12984_v12 }
0x2edc   : > { %11700 = vmatprep.subr.bf16.mxu0 %v12225_v37 }
0x2edd   : > { %v12080_v52 = vpop.eup %12079  ;;  %v9021_v16 = vpop.permute.xlu1 %9020 }
0x2ede   : > { %11207 = vmatmul.mubr.msk.f32.vlgmr.msra.gmra.mrb[80].mxu0 %vm1272_vm3, %v9021_v16  ;;  %v5636_v22 = vsel %vm3926_vm7, %v12080_v52, 0.0 }
0x2edf   : > { %5637 = vadd.xlane.f32.xlu0 %v5636_v22  ;;  %11702 = vmatpush3.bf16.msra.mxu0 %v12977_v21  ;;  %v12157_v22 = vld [vmem:[%s12469_s23 + $0x3] sm:$0x1] }
0x2ee0   : > { %11703 = vmatprep.subr.bf16.mxu0 %v12225_v37  ;;  %11228 = vmatprep.mubr.msk.f32.mxu0 %vm12223_vm1, %v12222_v15 }
0x2ee3   : > { %11705 = vmatpush3.bf16.msra.mxu0 %v12984_v12 }
0x2ee4   : > { %11712 = vmatprep.subr.bf16.mxu0 %v12225_v37 }
0x2ef5   : > { %9282 = vrot.lane.b32.xlu0 %v9279_v47, %s14102_s5 }
0x2f0b   : > { %v4913_v11 = vpop.permute.xlu1 %4912 }
0x2f0c   : > { %11727 = vpush %v4913_v11 }
0x2f14   : > { %5831 = vadd.xlane.f32.xlu0 %v5830_v63 }
0x2f36   : > { %v13805_v14 = vpop.f32.mrb[76].mxu0 }
0x2f37   : > { %v11164_v40 = vpop.f32.mrb[77].mxu0 }
0x2f4a   : > { %v5118_v5 = vpop.xlane.xlu1 %5117 }
0x2f4b   : > { %v5119_v62 = vadd.f32 %v5118_v5, %v13701_v59 }
0x2f4d   : > { %v5120_v0 = vand.u32 2147483647, %v5119_v62  ;;  %v5130_v20 = vsub.f32 0.0, %v5119_v62  ;;  %v5124_v2 = vmin.f32 %v5119_v62, 0.0 }
0x2f4f   : > { %v5121_v34 = vsub.f32 0.0, %v5120_v0  ;;  %v5131_v36 = vmin.f32 %v5130_v20, 0.0 }
0x2f51   : > { %v5122_v13 = vmul.f32 1.442695, %v5121_v34 }
0x2f53   : > { %12081 = vpow2.f32 %v5122_v13 }
0x2f5d   : > { %v12082_v8 = vpop.eup %12081 }
0x2f5e   : > { %v5125_v10 = vadd.f32 1.0, %v12082_v8 }
0x2f60   : > { %12083 = vlog2.f32 %v5125_v10 }
0x2f6a   : > { %v12084_v49 = vpop.eup %12083 }
0x2f6b   : > { %v5127_v43 = vmul.f32 0.6931472, %v12084_v49 }
0x2f6c   : > { %v5638_v46 = vpop.xlane.xlu0 %5637 }
0x2f6d   : > { %12085 = vlog2.f32 %v5638_v46  ;;  %v5128_v1 = vsub.f32 %v5124_v2, %v5127_v43  ;;  %v5132_v6 = vsub.f32 %v5131_v36, %v5127_v43 }
0x2f6f   : > { %v5129_v18 = vmax.f32 %v5128_v1, -100.0  ;;  %v5133_v31 = vmax.f32 %v5132_v6, -100.0  ;;  %v13832_v6 = vld [vmem:[%s12516_s18 + $0x3] sm:$0x1] }
0x2f70   : > { %v9283_v38 = vpop.permute.xlu0 %9282 }
0x2f71   : > { %11229 = vmatmul.mubr.msk.f32.vlgmr.msra.gmra.mrb[82].mxu0 %vm1272_vm3, %v9283_v38  ;;  %v5134_v32 = vmul.f32 %v13765_v56, %v5129_v18  ;;  %v5135_v23 = vmul.f32 %v5133_v31, %v4889_v57  ;;  %v13835_v18 = vsub.f32 1.0, %v13832_v6 }
0x2f72   : > { %11714 = vmatpush3.bf16.msra.mxu0 %v12977_v21  ;;  %11250 = vmatprep.mubr.msk.f32.mxu0 %vm12223_vm1, %v12222_v15 }
0x2f73   : > { %v5136_v60 = vadd.f32 %v5135_v23, %v5134_v32  ;;  %11715 = vmatprep.subr.bf16.mxu0 %v12225_v37 }
0x2f75   : > { %11729 = vpush %v5136_v60 }
0x2f76   : > { %11717 = vmatpush3.bf16.msra.mxu0 %v12984_v12 }
0x2f77   : > { %v12086_v58 = vpop.eup %12085 }
0x2f78   : > { %v5640_v52 = vmul.f32 0.6931472, %v12086_v58 }
0x2f7a   : > { %v5641_v16 = vsub.f32 %v13776_v54, %v5640_v52 }
0x2f7c   : > { %v5642_v24 = vmul.f32 %v12157_v22, %v5641_v16  ;;  %v6014_v16 = vld [vmem:[#allocation3 + $0x1] sm:$0x1] }
0x2f7d   : > { %v6090_v22 = vadd.f32 %v13325_v55, %v6014_v16 }
0x2f7e   : > { %v5643_v56 = vsel %vm3926_vm7, %v5642_v24, 0.0 }
0x2f7f   : > { %5644 = vadd.xlane.f32.xlu1 %v5643_v56  ;;  %v6091_v24 = vadd.f32 %v6090_v22, %v13661_v39 }
0x2f81   : > { %v6092_v56 = vmax.f32 %v6091_v24, 0.0 }
0x2fa1   : > { %v5832_v57 = vpop.xlane.xlu0 %5831 }
0x2fa2   : > { %v5833_v21 = vadd.f32 %v5832_v57, %v13701_v59  ;;  %v6093_v57 = vmul.f32 %v6092_v56, %v13670_v53 }
0x2fa4   : > { %v5834_v44 = vand.u32 2147483647, %v5833_v21  ;;  %v5844_v17 = vsub.f32 0.0, %v5833_v21  ;;  %v5838_v11 = vmin.f32 %v5833_v21, 0.0  ;;  %v6867_v21 = vadd.f32 %v13396_v48, %v13665_v26 }
0x2fa6   : > { %v5835_v15 = vsub.f32 0.0, %v5834_v44  ;;  %v5845_v63 = vmin.f32 %v5844_v17, 0.0  ;;  %v6094_v44 = vsel %vm4135_vm8, %v6093_v57, 0.0 }
0x2fa8   : > { %v5836_v4 = vmul.f32 1.442695, %v5835_v15  ;;  %v6870_v15 = vsel %vm3926_vm7, %v6867_v21, -inf }
0x2fa9   : > { %v13821_v47 = vpop.f32.mrb[78].mxu0 }
0x2faa   : > { %12087 = vpow2.f32 %v5836_v4  ;;  %v11186_v37 = vpop.f32.mrb[79].mxu0 }
0x2fb1   : > { %v13823_v12 = vpop.f32.mrb[80].mxu0 }
0x2fb2   : > { %v11208_v30 = vpop.f32.mrb[81].mxu0 }
0x2fb4   : > { %v12088_v41 = vpop.eup %12087 }
0x2fb5   : > { %v5839_v54 = vadd.f32 1.0, %v12088_v41 }
0x2fb7   : > { %12089 = vlog2.f32 %v5839_v54 }
0x2fc1   : > { %v12090_v29 = vpop.eup %12089 }
0x2fc2   : > { %v5841_v42 = vmul.f32 0.6931472, %v12090_v29 }
0x2fc4   : > { %v5842_v40 = vsub.f32 %v5838_v11, %v5841_v42  ;;  %v5846_v5 = vsub.f32 %v5845_v63, %v5841_v42 }
0x2fc6   : > { %v5843_v62 = vmax.f32 %v5842_v40, -100.0  ;;  %v5847_v0 = vmax.f32 %v5846_v5, -100.0  ;;  %v9525_v5 = vadd.f32 %v13784_v28, %v13615_v9  ;;  %v9536_v9 = vrot.slane %v13608_v3, %v12473_v19  ;;  %v6990_v19 = vld [vmem:[#allocation3 + $0x3] sm:$0x1] }
0x2fc7   : > { %v7066_v16 = vadd.f32 %v13550_v45, %v6990_v19 }
0x2fc8   : > { %v5875_v34 = vrot.slane %v5847_v0, %v13733_v7  ;;  %v5855_v13 = vrot.slane %v5843_v62, %v13733_v7 }
0x2fca   : > { %v5882_v8 = vrot.slane %v5875_v34, %v13733_v7  ;;  %v5862_v10 = vrot.slane %v5855_v13, %v13733_v7 }
0x2fcc   : > { %5883 = vrot.lane.b32.xlu0 %v5882_v8, %s14060_s26  ;;  %5863 = vrot.lane.b32.xlu1 %v5862_v10, %s14060_s26  ;;  %s12237_s26 = smov 126  }
0x300c   : > { %v5645_v20 = vpop.xlane.xlu1 %5644 }
0x300d   : > { %v5646_v49 = vrot.slane %v5645_v20, 4 }
0x300f   : > { %v5647_v2 = vadd.f32 %v5646_v49, %v5645_v20 }
0x3011   : > { %v5648_v36 = vrot.slane %v5647_v2, 2 }
0x3013   : > { %v5649_v43 = vadd.f32 %v5648_v36, %v5647_v2 }
0x3015   : > { %v5650_v46 = vrot.slane %v5649_v43, 1 }
0x3017   : > { %v5651_v1 = vadd.f32 %v5650_v46, %v5649_v43 }
0x3019   : > { %11731 = vpush %v5651_v1 }
0x303e   : > { %v5884_v31 = vpop.permute.xlu0 %5883  ;;  %v5864_v38 = vpop.permute.xlu1 %5863 }
0x303f   : > { %v5886_v32 = vmul.f32 %v5884_v31, %v13835_v18  ;;  %v5866_v23 = vmul.f32 %v13832_v6, %v5864_v38 }
0x3041   : > { %v5887_v60 = vadd.f32 %v5886_v32, %v5866_v23  ;;  %v9527_v32 = vsub.f32 1.0, %v13751_v50 }
0x3043   : > { %5890 = vrot.lane.b32.xlu1 %v5887_v60, %s12237_s26 }
0x3044   : > { %v13840_v58 = vpop.f32.mrb[82].mxu0 }
0x3045   : > { %v11230_v52 = vpop.f32.mrb[83].mxu0 }
0x3067   : > { %6095 = vadd.xlane.f32.xlu1 %v6094_v44 }
0x306b   : > { %6871 = vmax.xlane.f32.xlu1 %v6870_v15 }
0x30b5   : > { %v5891_v4 = vpop.permute.xlu1 %5890 }
0x30b6   : > { %11733 = vpush %v5891_v4 }
0x30f4   : > { %v6096_v37 = vpop.xlane.xlu1 %6095 }
0x30f5   : > { %v6097_v30 = vadd.f32 %v6096_v37, %v13701_v59 }
0x30f7   : > { %v6098_v55 = vand.u32 2147483647, %v6097_v30  ;;  %v6102_v62 = vmin.f32 %v6097_v30, 0.0  ;;  %v6108_v13 = vsub.f32 0.0, %v6097_v30 }
0x30f8   : > { %v6872_v41 = vpop.xlane.xlu1 %6871 }
0x30f9   : > { %v6099_v54 = vsub.f32 0.0, %v6098_v55  ;;  %v6873_v17 = vsub.f32 %v6867_v21, %v6872_v41  ;;  %v6109_v10 = vmin.f32 %v6108_v13, 0.0  ;;  %v7067_v21 = vadd.f32 %v7066_v16, %v13661_v39 }
0x30fb   : > { %v6100_v29 = vmul.f32 1.442695, %v6099_v54  ;;  %v6874_v11 = vmul.f32 1.442695, %v6873_v17  ;;  %v7068_v4 = vmax.f32 %v7067_v21, 0.0 }
0x30fc   : > { %v6276_v54 = vld [vmem:[#allocation3] sm:$0x1] }
0x30fd   : > { %12091 = vpow2.f32 %v6100_v29  ;;  %v7069_v45 = vmul.f32 %v7068_v4, %v13670_v53  ;;  %v6352_v29 = vadd.f32 %v13327_v27, %v6276_v54 }
0x30fe   : > { %12093 = vpow2.f32 %v6874_v11 }
0x30ff   : > { %v7070_v41 = vsel %vm4135_vm8, %v7069_v45, 0.0  ;;  %v6353_v11 = vadd.f32 %v6352_v29, %v13661_v39 }
0x3107   : > { %v12092_v48 = vpop.eup %12091 }
0x3108   : > { %v12094_v26 = vpop.eup %12093  ;;  %v6103_v42 = vadd.f32 1.0, %v12092_v48  ;;  %v6354_v48 = vmax.f32 %v6353_v11, 0.0 }
0x3109   : > { %v6876_v63 = vsel %vm3926_vm7, %v12094_v26, 0.0 }
0x310a   : > { %12095 = vlog2.f32 %v6103_v42  ;;  %6877 = vadd.xlane.f32.xlu1 %v6876_v63  ;;  %v6355_v26 = vmul.f32 %v6354_v48, %v13670_v53 }
0x310b   : > { %12097 = vtanh.f32 %v9525_v5 }
0x3114   : > { %v12096_v40 = vpop.eup %12095 }
0x3115   : > { %v6105_v0 = vmul.f32 0.6931472, %v12096_v40  ;;  %v12098_v43 = vpop.eup %12097 }
0x3117   : > { %v6106_v34 = vsub.f32 %v6102_v62, %v6105_v0  ;;  %v6110_v49 = vsub.f32 %v6109_v10, %v6105_v0 }
0x3119   : > { %v6107_v8 = vmax.f32 %v6106_v34, -100.0  ;;  %v6111_v36 = vmax.f32 %v6110_v49, -100.0 }
0x311b   : > { %v6119_v20 = vrot.slane %v6107_v8, %v13733_v7  ;;  %v6138_v28 = vrot.slane %v6111_v36, %v13733_v7 }
0x311d   : > { %v6126_v2 = vrot.slane %v6119_v20, %v13733_v7  ;;  %v6145_v46 = vrot.slane %v6138_v28, %v13733_v7 }
0x311f   : > { %6127 = vrot.lane.b32.xlu0 %v6126_v2, %s14062_s8 }
0x3123   : > { %9529 = vrot.lane.b32.xlu0 %v12098_v43, %s14102_s5 }
0x3127   : > { %9537 = vrot.lane.b32.xlu0 %v9536_v9, %s14107_s1  ;;  %s14112_s1 = smov 127  }
0x312b   : > { %6146 = vrot.lane.b32.xlu0 %v6145_v46, %s14062_s8  ;;  %s14064_s8 = smov 3  }
0x3191   : > { %v6128_v1 = vpop.permute.xlu0 %6127 }
0x3192   : > { %v6130_v24 = vmul.f32 %v13832_v6, %v6128_v1 }
0x3195   : > { %v9530_v31 = vpop.permute.xlu0 %9529 }
0x3196   : > { %v9532_v60 = vmul.f32 %v9530_v31, %v9527_v32 }
0x3197   : > { %v6878_v38 = vpop.xlane.xlu1 %6877 }
0x3198   : > { %12099 = vlog2.f32 %v6878_v38 }
0x3199   : > { %v9538_v23 = vpop.permute.xlu0 %9537 }
0x319a   : > { %v9540_v52 = vmul.f32 %v13751_v50, %v9538_v23  ;;  %v12159_v50 = vld [vmem:[%s12469_s23 + $0x4] sm:$0x1] }
0x319c   : > { %v13865_v3 = vadd.f32 %v9540_v52, %v9532_v60 }
0x319d   : > { %v6147_v22 = vpop.permute.xlu0 %6146 }
0x319e   : > { %v6149_v56 = vmul.f32 %v6147_v22, %v13835_v18 }
0x31a0   : > { %v6150_v57 = vadd.f32 %v6149_v56, %v6130_v24 }
0x31a2   : > { %v12100_v44 = vpop.eup %12099  ;;  %6153 = vrot.lane.b32.xlu0 %v6150_v57, %s14112_s1 }
0x31a3   : > { %v6880_v15 = vmul.f32 0.6931472, %v12100_v44 }
0x31a5   : > { %v6881_v37 = vsub.f32 %v6873_v17, %v6880_v15  ;;  %v6356_v17 = vsel %vm4135_vm8, %v6355_v26, 0.0 }
0x31a7   : > { %v6882_v30 = vmul.f32 %v12159_v50, %v6881_v37 }
0x31a9   : > { %v6883_v55 = vsel %vm3926_vm7, %v6882_v30, 0.0 }
0x31aa   : > { %6884 = vadd.xlane.f32.xlu1 %v6883_v55 }
0x31ae   : > { %7071 = vadd.xlane.f32.xlu1 %v7070_v41 }
0x31c1   : > { %6357 = vadd.xlane.f32.xlu0 %v6356_v17  ;;  %v13891_v17 = vld [vmem:[%s12516_s18 + $0x4] sm:$0x1] }
0x3214   : > { %v6154_v42 = vpop.permute.xlu0 %6153 }
0x3215   : > { %11735 = vpush %v6154_v42  ;;  %v13894_v42 = vsub.f32 1.0, %v13891_v17 }
0x3237   : > { %v6885_v63 = vpop.xlane.xlu1 %6884 }
0x3238   : > { %v6886_v16 = vrot.slane %v6885_v63, 4 }
0x323a   : > { %v6887_v56 = vadd.f32 %v6886_v16, %v6885_v63 }
0x323b   : > { %v7072_v40 = vpop.xlane.xlu1 %7071 }
0x323c   : > { %v7073_v5 = vadd.f32 %v7072_v40, %v13701_v59  ;;  %v6888_v21 = vrot.slane %v6887_v56, 2 }
0x323e   : > { %v7074_v62 = vand.u32 2147483647, %v7073_v5  ;;  %v7084_v36 = vsub.f32 0.0, %v7073_v5  ;;  %v7078_v9 = vmin.f32 %v7073_v5, 0.0  ;;  %v6889_v50 = vadd.f32 %v6888_v21, %v6887_v56 }
0x3240   : > { %v7075_v0 = vsub.f32 0.0, %v7074_v62  ;;  %v7085_v46 = vmin.f32 %v7084_v36, 0.0  ;;  %v6890_v54 = vrot.slane %v6889_v50, 1 }
0x3242   : > { %v7076_v34 = vmul.f32 1.442695, %v7075_v0  ;;  %v6891_v26 = vadd.f32 %v6890_v54, %v6889_v50 }
0x3244   : > { %12101 = vpow2.f32 %v7076_v34 }
0x324e   : > { %v12102_v13 = vpop.eup %12101  ;;  %v6358_v27 = vpop.xlane.xlu0 %6357 }
0x324f   : > { %v7079_v8 = vadd.f32 1.0, %v12102_v13  ;;  %v6359_v10 = vadd.f32 %v6358_v27, %v13701_v59 }
0x3251   : > { %12103 = vlog2.f32 %v7079_v8  ;;  %v6360_v20 = vand.u32 2147483647, %v6359_v10  ;;  %v6370_v57 = vsub.f32 0.0, %v6359_v10  ;;  %v6364_v15 = vmin.f32 %v6359_v10, 0.0 }
0x3253   : > { %v6361_v49 = vsub.f32 0.0, %v6360_v20  ;;  %v6371_v4 = vmin.f32 %v6370_v57, 0.0 }
0x3255   : > { %v6362_v2 = vmul.f32 1.442695, %v6361_v49 }
0x3257   : > { %12105 = vpow2.f32 %v6362_v2 }
0x325b   : > { %v12104_v43 = vpop.eup %12103 }
0x325c   : > { %v7081_v28 = vmul.f32 0.6931472, %v12104_v43 }
0x325e   : > { %v7082_v1 = vsub.f32 %v7078_v9, %v7081_v28  ;;  %v7086_v31 = vsub.f32 %v7085_v46, %v7081_v28 }
0x3260   : > { %v7083_v38 = vmax.f32 %v7082_v1, -100.0  ;;  %v7087_v32 = vmax.f32 %v7086_v31, -100.0 }
0x3261   : > { %v12106_v23 = vpop.eup %12105 }
0x3262   : > { %v6365_v60 = vadd.f32 1.0, %v12106_v23  ;;  %v7115_v52 = vrot.slane %v7087_v32, %v13733_v7  ;;  %v7095_v19 = vrot.slane %v7083_v38, %v13733_v7 }
0x3264   : > { %12107 = vlog2.f32 %v6365_v60  ;;  %v7122_v22 = vrot.slane %v7115_v52, %v13733_v7  ;;  %v7102_v24 = vrot.slane %v7095_v19, %v13733_v7 }
0x3266   : > { %7123 = vrot.lane.b32.xlu0 %v7122_v22, %s14064_s8  ;;  %7103 = vrot.lane.b32.xlu1 %v7102_v24, %s14064_s8  ;;  %s14066_s8 = smov 125  }
0x326e   : > { %v12108_v44 = vpop.eup %12107 }
0x326f   : > { %v6367_v37 = vmul.f32 0.6931472, %v12108_v44 }
0x3271   : > { %v6368_v30 = vsub.f32 %v6364_v15, %v6367_v37  ;;  %v6372_v55 = vsub.f32 %v6371_v4, %v6367_v37  ;;  %v7516_v15 = vld [vmem:[#allocation3 + $0x1] sm:$0x1]  ;;  %v13917_v37 = vld [vmem:[%s14109_s3] sm:$0x1] }
0x3272   : > { %v7592_v4 = vadd.f32 %v13554_v33, %v7516_v15 }
0x3273   : > { %v6369_v45 = vmax.f32 %v6368_v30, -100.0  ;;  %v6373_v41 = vmax.f32 %v6372_v55, -100.0 }
0x3274   : > { %v7593_v50 = vadd.f32 %v13917_v37, %v7592_v4 }
0x3275   : > { %v6374_v29 = vmul.f32 %v13832_v6, %v6369_v45  ;;  %v6375_v11 = vmul.f32 %v6373_v41, %v13835_v18  ;;  %v7254_v6 = vld [vmem:[#allocation3 + $0x2] sm:$0x1] }
0x3276   : > { %v7330_v18 = vadd.f32 %v13552_v25, %v7254_v6  ;;  %v7594_v30 = vmax.f32 %v7593_v50, 0.0 }
0x3277   : > { %v6376_v48 = vadd.f32 %v6375_v11, %v6374_v29 }
0x3278   : > { %v7331_v34 = vadd.f32 %v7330_v18, %v13661_v39  ;;  %v7595_v55 = vmul.f32 %v7594_v30, %v13670_v53 }
0x3279   : > { %11737 = vpush %v6376_v48 }
0x327a   : > { %11739 = vpush %v6891_v26  ;;  %v7332_v13 = vmax.f32 %v7331_v34, 0.0  ;;  %v7596_v45 = vsel %vm4135_vm8, %v7595_v55, 0.0 }
0x327c   : > { %v7333_v27 = vmul.f32 %v7332_v13, %v13670_v53 }
0x327e   : > { %v7334_v8 = vsel %vm4135_vm8, %v7333_v27, 0.0 }
0x32d8   : > { %v7124_v63 = vpop.permute.xlu0 %7123  ;;  %v7104_v40 = vpop.permute.xlu1 %7103 }
0x32d9   : > { %v7126_v5 = vmul.f32 %v7124_v63, %v13894_v42  ;;  %v7106_v62 = vmul.f32 %v13891_v17, %v7104_v40 }
0x32db   : > { %v7127_v0 = vadd.f32 %v7126_v5, %v7106_v62 }
0x32dd   : > { %7130 = vrot.lane.b32.xlu1 %v7127_v0, %s14066_s8  ;;  %s14113_s8 = smov 2  }
0x3301   : > { %7335 = vadd.xlane.f32.xlu1 %v7334_v8 }
0x334f   : > { %v7131_v10 = vpop.permute.xlu1 %7130 }
0x3350   : > { %11741 = vpush %v7131_v10 }
0x338e   : > { %v7336_v20 = vpop.xlane.xlu1 %7335 }
0x338f   : > { %v7337_v49 = vadd.f32 %v7336_v20, %v13701_v59  ;;  %v12162_v20 = vld [vmem:[%s14110_s6] sm:$0x1] }
0x3391   : > { %v7338_v2 = vand.u32 2147483647, %v7337_v49  ;;  %v7348_v25 = vsub.f32 0.0, %v7337_v49  ;;  %v7342_v46 = vmin.f32 %v7337_v49, 0.0  ;;  %v8369_v49 = vadd.f32 %v12162_v20, %v13612_v35 }
0x3393   : > { %v7339_v36 = vsub.f32 0.0, %v7338_v2  ;;  %v7349_v31 = vmin.f32 %v7348_v25, 0.0  ;;  %v8372_v2 = vsel %vm3926_vm7, %v8369_v49, -inf }
0x3395   : > { %v7340_v43 = vmul.f32 1.442695, %v7339_v36 }
0x3397   : > { %12109 = vpow2.f32 %v7340_v43 }
0x33a1   : > { %v12110_v9 = vpop.eup %12109 }
0x33a2   : > { %v7343_v28 = vadd.f32 1.0, %v12110_v9 }
0x33a4   : > { %12111 = vlog2.f32 %v7343_v28 }
0x33ae   : > { %v12112_v39 = vpop.eup %12111 }
0x33af   : > { %v7345_v1 = vmul.f32 0.6931472, %v12112_v39 }
0x33b1   : > { %v7346_v38 = vsub.f32 %v7342_v46, %v7345_v1  ;;  %v7350_v32 = vsub.f32 %v7349_v31, %v7345_v1  ;;  %v7778_v1 = vld [vmem:[#allocation3] sm:$0x1] }
0x33b2   : > { %v7854_v31 = vadd.f32 %v13556_v51, %v7778_v1 }
0x33b3   : > { %v7347_v23 = vmax.f32 %v7346_v38, -100.0  ;;  %v7351_v60 = vmax.f32 %v7350_v32, -100.0  ;;  %v13941_v32 = vld [vmem:[%s14111_s7] sm:$0x1] }
0x33b4   : > { %v7855_v35 = vadd.f32 %v13917_v37, %v7854_v31 }
0x33b5   : > { %v7359_v52 = vrot.slane %v7347_v23, %v13733_v7  ;;  %v7378_v16 = vrot.slane %v7351_v60, %v13733_v7 }
0x33b6   : > { %v7856_v38 = vmax.f32 %v7855_v35, 0.0 }
0x33b7   : > { %v7366_v19 = vrot.slane %v7359_v52, %v13733_v7  ;;  %v7385_v22 = vrot.slane %v7378_v16, %v13733_v7 }
0x33b8   : > { %v7857_v23 = vmul.f32 %v13941_v32, %v7856_v38 }
0x33b9   : > { %7367 = vrot.lane.b32.xlu0 %v7366_v19, %s14113_s8 }
0x33ba   : > { %v7858_v60 = vsel %vm4135_vm8, %v7857_v23, 0.0 }
0x33bd   : > { %7386 = vrot.lane.b32.xlu0 %v7385_v22, %s14113_s8 }
0x342b   : > { %v7368_v24 = vpop.permute.xlu0 %7367 }
0x342c   : > { %v7370_v57 = vmul.f32 %v13891_v17, %v7368_v24 }
0x342f   : > { %v7387_v56 = vpop.permute.xlu0 %7386 }
0x3430   : > { %v7389_v21 = vmul.f32 %v7387_v56, %v13894_v42 }
0x3432   : > { %v7390_v44 = vadd.f32 %v7389_v21, %v7370_v57  ;;  %v13946_v57 = vld [vmem:[#allocation4] sm:$0x1] }
0x3434   : > { %7393 = vrot.lane.b32.xlu0 %v7390_v44, %s12237_s26 }
0x3438   : > { %9544 = vrot.lane.b32.xlu0 %v13865_v3, %s14102_s5  ;;  %s14114_s5 = smov 1  }
0x3457   : > { %7597 = vadd.xlane.f32.xlu0 %v7596_v45 }
0x34a6   : > { %v7394_v41 = vpop.permute.xlu0 %7393 }
0x34a7   : > { %11743 = vpush %v7394_v41 }
0x34aa   : > { %v9545_v54 = vpop.permute.xlu0 %9544 }
0x34ab   : > { %11251 = vmatmul.mubr.msk.f32.vlgmr.msra.gmra.mrb[84].mxu0 %vm1272_vm3, %v9545_v54 }
0x34e4   : > { %v7598_v29 = vpop.xlane.xlu0 %7597 }
0x34e5   : > { %v7599_v3 = vadd.f32 %v7598_v29, %v13701_v59 }
0x34e7   : > { %v7600_v11 = vand.u32 2147483647, %v7599_v3  ;;  %v7610_v53 = vsub.f32 0.0, %v7599_v3  ;;  %v7604_v5 = vmin.f32 %v7599_v3, 0.0 }
0x34e9   : > { %v7601_v33 = vsub.f32 0.0, %v7600_v11  ;;  %v7611_v0 = vmin.f32 %v7610_v53, 0.0 }
0x34eb   : > { %v7602_v48 = vmul.f32 1.442695, %v7601_v33 }
0x34ed   : > { %12113 = vpow2.f32 %v7602_v48 }
0x34f7   : > { %v12114_v26 = vpop.eup %12113 }
0x34f8   : > { %v7605_v63 = vadd.f32 1.0, %v12114_v26 }
0x34fa   : > { %12115 = vlog2.f32 %v7605_v63  ;;  %v8492_v63 = vld [vmem:[#allocation3 + $0x4] sm:$0x1] }
0x3504   : > { %v12116_v40 = vpop.eup %12115 }
0x3505   : > { %v7607_v62 = vmul.f32 0.6931472, %v12116_v40 }
0x3507   : > { %v7608_v6 = vsub.f32 %v7604_v5, %v7607_v62  ;;  %v7612_v18 = vsub.f32 %v7611_v0, %v7607_v62  ;;  %v8568_v5 = vadd.f32 %v13805_v14, %v8492_v63 }
0x3509   : > { %v7609_v34 = vmax.f32 %v7608_v6, -100.0  ;;  %v7613_v13 = vmax.f32 %v7612_v18, -100.0  ;;  %v8569_v0 = vadd.f32 %v13917_v37, %v8568_v5 }
0x350b   : > { %v7640_v27 = vrot.slane %v7613_v13, %v13733_v7  ;;  %v7621_v59 = vrot.slane %v7609_v34, %v13733_v7  ;;  %v8570_v34 = vmax.f32 %v8569_v0, 0.0 }
0x350d   : > { %v7647_v8 = vrot.slane %v7640_v27, %v13733_v7  ;;  %v7628_v10 = vrot.slane %v7621_v59, %v13733_v7  ;;  %v12165_v27 = vld [vmem:[%s12469_s23 + $0x5] sm:$0x1]  ;;  %s12240_s23 = smov 4  }
0x350f   : > { %7648 = vrot.lane.b32.xlu0 %v7647_v8, %s14114_s5  ;;  %7629 = vrot.lane.b32.xlu1 %v7628_v10, %s14114_s5  ;;  %v8571_v10 = vmul.f32 %v13941_v32, %v8570_v34 }
0x352e   : > { %8373 = vmax.xlane.f32.xlu0 %v8372_v2 }
0x357e   : > { %v13933_v36 = vpop.f32.mrb[84].mxu0 }
0x357f   : > { %v11252_v43 = vpop.f32.mrb[85].mxu0 }
0x3581   : > { %v7649_v9 = vpop.permute.xlu0 %7648  ;;  %v7630_v28 = vpop.permute.xlu1 %7629 }
0x3582   : > { %v7651_v25 = vmul.f32 %v7649_v9, %v13894_v42  ;;  %v7632_v39 = vmul.f32 %v13891_v17, %v7630_v28 }
0x3584   : > { %v7652_v46 = vadd.f32 %v7651_v25, %v7632_v39 }
0x3586   : > { %7655 = vrot.lane.b32.xlu1 %v7652_v46, %s14112_s1 }
0x35aa   : > { %7859 = vadd.xlane.f32.xlu1 %v7858_v60 }
0x35bb   : > { %v8374_v52 = vpop.xlane.xlu0 %8373 }
0x35bc   : > { %v8375_v19 = vsub.f32 %v8369_v49, %v8374_v52 }
0x35be   : > { %v8376_v16 = vmul.f32 1.442695, %v8375_v19 }
0x35c0   : > { %12117 = vpow2.f32 %v8376_v16 }
0x35ca   : > { %v12118_v22 = vpop.eup %12117 }
0x35cb   : > { %v8378_v24 = vsel %vm3926_vm7, %v12118_v22, 0.0 }
0x35cc   : > { %8379 = vadd.xlane.f32.xlu1 %v8378_v24 }
0x35f8   : > { %v7656_v56 = vpop.permute.xlu1 %7655 }
0x35f9   : > { %11745 = vpush %v7656_v56 }
0x3637   : > { %v7860_v51 = vpop.xlane.xlu1 %7859 }
0x3638   : > { %v7861_v21 = vadd.f32 %v13946_v57, %v7860_v51 }
0x363a   : > { %v7862_v44 = vand.u32 2147483647, %v7861_v21  ;;  %v7872_v55 = vsub.f32 0.0, %v7861_v21  ;;  %v7866_v41 = vmin.f32 %v7861_v21, 0.0 }
0x363c   : > { %v7863_v15 = vsub.f32 0.0, %v7862_v44  ;;  %v7873_v54 = vmin.f32 %v7872_v55, 0.0 }
0x363e   : > { %v7864_v4 = vmul.f32 1.442695, %v7863_v15 }
0x3640   : > { %12119 = vpow2.f32 %v7864_v4  ;;  %v8756_v4 = vld [vmem:[#allocation3 + $0x3] sm:$0x1] }
0x364a   : > { %v12120_v50 = vpop.eup %12119 }
0x364b   : > { %v7867_v30 = vadd.f32 1.0, %v12120_v50  ;;  %v8832_v50 = vadd.f32 %v13821_v47, %v8756_v4 }
0x364d   : > { %12121 = vlog2.f32 %v7867_v30  ;;  %v8833_v30 = vadd.f32 %v13917_v37, %v8832_v50 }
0x364f   : > { %v8834_v55 = vmax.f32 %v8833_v30, 0.0 }
0x3657   : > { %v12122_v45 = vpop.eup %12121 }
0x3658   : > { %v7869_v29 = vmul.f32 0.6931472, %v12122_v45  ;;  %v8835_v45 = vmul.f32 %v13941_v32, %v8834_v55  ;;  %v9280_v55 = vld [vmem:[#allocation3 + $0x1] sm:$0x1] }
0x3659   : > { %v8380_v3 = vpop.xlane.xlu1 %8379 }
0x365a   : > { %12123 = vlog2.f32 %v8380_v3  ;;  %v7870_v11 = vsub.f32 %v7866_v41, %v7869_v29  ;;  %v7874_v33 = vsub.f32 %v7873_v54, %v7869_v29  ;;  %v8836_v41 = vsel %vm4135_vm8, %v8835_v45, 0.0  ;;  %v13967_v54 = vld [vmem:[%s12516_s18 + $0x5] sm:$0x1]  ;;  %s14115_s18 = smov 3  }
0x365b   : > { %v13970_v29 = vsub.f32 1.0, %v13967_v54  ;;  %v9356_v45 = vadd.f32 %v13840_v58, %v9280_v55  ;;  %v9654_v58 = vsel %vm9653_vm9, %v12808_v61, 0.0 }
0x365c   : > { %v7871_v48 = vmax.f32 %v7870_v11, -100.0  ;;  %v7875_v26 = vmax.f32 %v7874_v33, -100.0 }
0x365e   : > { %v7876_v53 = vmul.f32 %v13891_v17, %v7871_v48  ;;  %v7877_v40 = vmul.f32 %v7875_v26, %v13894_v42  ;;  %v8572_v17 = vsel %vm4135_vm8, %v8571_v10, 0.0  ;;  %v9018_v26 = vld [vmem:[#allocation3 + $0x2] sm:$0x1] }
0x365f   : > { %v9094_v63 = vadd.f32 %v13823_v12, %v9018_v26 }
0x3660   : > { %v7878_v62 = vadd.f32 %v7877_v40, %v7876_v53 }
0x3661   : > { %v9095_v53 = vadd.f32 %v13917_v37, %v9094_v63 }
0x3662   : > { %11747 = vpush %v7878_v62 }
0x3663   : > { %v9096_v40 = vmax.f32 %v9095_v53, 0.0 }
0x3664   : > { %v12124_v6 = vpop.eup %12123 }
0x3665   : > { %v8382_v18 = vmul.f32 0.6931472, %v12124_v6  ;;  %v9097_v5 = vmul.f32 %v13941_v32, %v9096_v40 }
0x3667   : > { %v8383_v13 = vsub.f32 %v8375_v19, %v8382_v18  ;;  %v9098_v62 = vsel %vm4135_vm8, %v9097_v5, 0.0 }
0x3669   : > { %v8384_v59 = vmul.f32 %v12165_v27, %v8383_v13 }
0x366b   : > { %v8385_v8 = vsel %vm3926_vm7, %v8384_v59, 0.0 }
0x366c   : > { %8386 = vadd.xlane.f32.xlu1 %v8385_v8 }
0x3670   : > { %8573 = vadd.xlane.f32.xlu1 %v8572_v17 }
0x36f9   : > { %v8387_v42 = vpop.xlane.xlu1 %8386 }
0x36fa   : > { %v8388_v14 = vrot.slane %v8387_v42, 4 }
0x36fc   : > { %v8389_v20 = vadd.f32 %v8388_v14, %v8387_v42 }
0x36fd   : > { %v8574_v49 = vpop.xlane.xlu1 %8573 }
0x36fe   : > { %v8390_v2 = vrot.slane %v8389_v20, 2  ;;  %v8575_v43 = vadd.f32 %v13946_v57, %v8574_v49 }
0x3700   : > { %v8576_v9 = vand.u32 2147483647, %v8575_v43  ;;  %v8391_v28 = vadd.f32 %v8390_v2, %v8389_v20  ;;  %v8586_v38 = vsub.f32 0.0, %v8575_v43  ;;  %v8580_v60 = vmin.f32 %v8575_v43, 0.0 }
0x3702   : > { %v8577_v25 = vsub.f32 0.0, %v8576_v9  ;;  %v8392_v39 = vrot.slane %v8391_v28, 1  ;;  %v8587_v19 = vmin.f32 %v8586_v38, 0.0 }
0x3704   : > { %v8578_v46 = vmul.f32 1.442695, %v8577_v25  ;;  %v8393_v1 = vadd.f32 %v8392_v39, %v8391_v28 }
0x3706   : > { %12125 = vpow2.f32 %v8578_v46  ;;  %11749 = vpush %v8393_v1 }
0x3710   : > { %v12126_v31 = vpop.eup %12125 }
0x3711   : > { %v8581_v35 = vadd.f32 1.0, %v12126_v31 }
0x3713   : > { %12127 = vlog2.f32 %v8581_v35 }
0x371d   : > { %v12128_v23 = vpop.eup %12127 }
0x371e   : > { %v8583_v52 = vmul.f32 0.6931472, %v12128_v23 }
0x3720   : > { %v8584_v16 = vsub.f32 %v8580_v60, %v8583_v52  ;;  %v8588_v22 = vsub.f32 %v8587_v19, %v8583_v52 }
0x3722   : > { %v8585_v24 = vmax.f32 %v8584_v16, -100.0  ;;  %v8589_v56 = vmax.f32 %v8588_v22, -100.0 }
0x3724   : > { %v8617_v51 = vrot.slane %v8589_v56, %v13733_v7  ;;  %v8597_v21 = vrot.slane %v8585_v24, %v13733_v7 }
0x3726   : > { %v8624_v44 = vrot.slane %v8617_v51, %v13733_v7  ;;  %v8604_v15 = vrot.slane %v8597_v21, %v13733_v7 }
0x3728   : > { %8625 = vrot.lane.b32.xlu1 %v8624_v44, %s12240_s23  ;;  %8605 = vrot.lane.b32.xlu0 %v8604_v15, %s12240_s23  ;;  %s12241_s23 = smov 124  }
0x3747   : > { %8837 = vadd.xlane.f32.xlu0 %v8836_v41  ;;  %v9357_v41 = vadd.f32 %v13917_v37, %v9356_v45 }
0x379a   : > { %v8626_v3 = vpop.permute.xlu1 %8625  ;;  %v8606_v11 = vpop.permute.xlu0 %8605 }
0x379b   : > { %v8628_v33 = vmul.f32 %v8626_v3, %v13970_v29  ;;  %v8608_v48 = vmul.f32 %v13967_v54, %v8606_v11  ;;  %v9358_v3 = vmax.f32 %v9357_v41, 0.0 }
0x379d   : > { %v8629_v47 = vadd.f32 %v8628_v33, %v8608_v48  ;;  %v9359_v11 = vmul.f32 %v13941_v32, %v9358_v3 }
0x379f   : > { %8632 = vrot.lane.b32.xlu1 %v8629_v47, %s12241_s23  ;;  %v9360_v33 = vsel %vm4135_vm8, %v9359_v11, 0.0 }
0x37c3   : > { %9099 = vadd.xlane.f32.xlu1 %v9098_v62 }
0x37d4   : > { %v8838_v0 = vpop.xlane.xlu0 %8837 }
0x37d5   : > { %v8839_v6 = vadd.f32 %v13946_v57, %v8838_v0 }
0x37d7   : > { %v8840_v18 = vand.u32 2147483647, %v8839_v6  ;;  %v8850_v8 = vsub.f32 0.0, %v8839_v6  ;;  %v8844_v10 = vmin.f32 %v8839_v6, 0.0 }
0x37d9   : > { %v8841_v34 = vsub.f32 0.0, %v8840_v18  ;;  %v8851_v42 = vmin.f32 %v8850_v8, 0.0 }
0x37db   : > { %v8842_v13 = vmul.f32 1.442695, %v8841_v34 }
0x37dd   : > { %12129 = vpow2.f32 %v8842_v13 }
0x37e7   : > { %v12130_v27 = vpop.eup %12129 }
0x37e8   : > { %v8845_v59 = vadd.f32 1.0, %v12130_v27 }
0x37ea   : > { %12131 = vlog2.f32 %v8845_v59 }
0x37f4   : > { %v12132_v12 = vpop.eup %12131 }
0x37f5   : > { %v8847_v17 = vmul.f32 0.6931472, %v12132_v12 }
0x37f7   : > { %v8848_v14 = vsub.f32 %v8844_v10, %v8847_v17  ;;  %v8852_v20 = vsub.f32 %v8851_v42, %v8847_v17 }
0x37f9   : > { %v8849_v49 = vmax.f32 %v8848_v14, -100.0  ;;  %v8853_v2 = vmax.f32 %v8852_v20, -100.0 }
0x37fb   : > { %v8861_v43 = vrot.slane %v8849_v49, %v13733_v7  ;;  %v8880_v28 = vrot.slane %v8853_v2, %v13733_v7 }
0x37fd   : > { %v8868_v9 = vrot.slane %v8861_v43, %v13733_v7  ;;  %v8887_v25 = vrot.slane %v8880_v28, %v13733_v7 }
0x37ff   : > { %8869 = vrot.lane.b32.xlu1 %v8868_v9, %s14115_s18 }
0x3803   : > { %8888 = vrot.lane.b32.xlu1 %v8887_v25, %s14115_s18 }
0x3811   : > { %v8633_v39 = vpop.permute.xlu1 %8632 }
0x3812   : > { %11751 = vpush %v8633_v39 }
0x3850   : > { %v9100_v46 = vpop.xlane.xlu1 %9099 }
0x3851   : > { %v9101_v1 = vadd.f32 %v13946_v57, %v9100_v46 }
0x3853   : > { %v9102_v31 = vand.u32 2147483647, %v9101_v1  ;;  %v9112_v52 = vsub.f32 0.0, %v9101_v1  ;;  %v9106_v16 = vmin.f32 %v9101_v1, 0.0 }
0x3855   : > { %v9103_v35 = vsub.f32 0.0, %v9102_v31  ;;  %v9113_v24 = vmin.f32 %v9112_v52, 0.0 }
0x3857   : > { %v9104_v38 = vmul.f32 1.442695, %v9103_v35 }
0x3859   : > { %12133 = vpow2.f32 %v9104_v38 }
0x3863   : > { %v12134_v23 = vpop.eup %12133 }
0x3864   : > { %v9107_v60 = vadd.f32 1.0, %v12134_v23 }
0x3866   : > { %12135 = vlog2.f32 %v9107_v60 }
0x3870   : > { %v12136_v19 = vpop.eup %12135 }
0x3871   : > { %v9109_v22 = vmul.f32 0.6931472, %v12136_v19  ;;  %v8870_v48 = vpop.permute.xlu1 %8869 }
0x3872   : > { %v8872_v25 = vmul.f32 %v13967_v54, %v8870_v48 }
0x3873   : > { %v9110_v56 = vsub.f32 %v9106_v16, %v9109_v22  ;;  %v9114_v51 = vsub.f32 %v9113_v24, %v9109_v22 }
0x3875   : > { %v9111_v21 = vmax.f32 %v9110_v56, -100.0  ;;  %v9115_v44 = vmax.f32 %v9114_v51, -100.0  ;;  %v8889_v47 = vpop.permute.xlu1 %8888 }
0x3876   : > { %v8891_v9 = vmul.f32 %v8889_v47, %v13970_v29 }
0x3877   : > { %v9142_v15 = vrot.slane %v9115_v44, %v13733_v7  ;;  %v9123_v4 = vrot.slane %v9111_v21, %v13733_v7 }
0x3878   : > { %v8892_v39 = vadd.f32 %v8891_v9, %v8872_v25 }
0x3879   : > { %v9149_v50 = vrot.slane %v9142_v15, %v13733_v7  ;;  %v9130_v30 = vrot.slane %v9123_v4, %v13733_v7 }
0x387b   : > { %9150 = vrot.lane.b32.xlu1 %v9149_v50, %s14113_s8  ;;  %9131 = vrot.lane.b32.xlu0 %v9130_v30, %s14113_s8  ;;  %s14116_s8 = smov 125  }
0x389a   : > { %9361 = vadd.xlane.f32.xlu0 %v9360_v33 }
0x38ed   : > { %v9132_v26 = vpop.permute.xlu0 %9131  ;;  %v9151_v63 = vpop.permute.xlu1 %9150 }
0x38ee   : > { %v9134_v53 = vmul.f32 %v13967_v54, %v9132_v26  ;;  %v9153_v40 = vmul.f32 %v9151_v63, %v13970_v29 }
0x38f0   : > { %v9154_v5 = vadd.f32 %v9153_v40, %v9134_v53 }
0x38f2   : > { %9157 = vrot.lane.b32.xlu0 %v9154_v5, %s12237_s26  ;;  %s11722_s26 = spop %11721 }
0x3911   : > { %9655 = vadd.xlane.f32.xlu0 %v9654_v58 }
0x3927   : > { %v9362_v62 = vpop.xlane.xlu0 %9361 }
0x3928   : > { %v9363_v0 = vadd.f32 %v13946_v57, %v9362_v62 }
0x392a   : > { %v9364_v6 = vand.u32 2147483647, %v9363_v0  ;;  %v9374_v59 = vsub.f32 0.0, %v9363_v0  ;;  %v9368_v12 = vmin.f32 %v9363_v0, 0.0  ;;  %v3950_v0 = vstv %s11722_s26 }
0x392c   : > { %v9365_v18 = vsub.f32 0.0, %v9364_v6  ;;  %v9375_v17 = vmin.f32 %v9374_v59, 0.0 }
0x392e   : > { %v9366_v34 = vmul.f32 1.442695, %v9365_v18 }
0x3930   : > { %12137 = vpow2.f32 %v9366_v34 }
0x393a   : > { %v12138_v13 = vpop.eup %12137 }
0x393b   : > { %v9369_v27 = vadd.f32 1.0, %v12138_v13 }
0x393d   : > { %12139 = vlog2.f32 %v9369_v27 }
0x3947   : > { %v12140_v8 = vpop.eup %12139 }
0x3948   : > { %v9371_v10 = vmul.f32 0.6931472, %v12140_v8 }
0x394a   : > { %v9372_v42 = vsub.f32 %v9368_v12, %v9371_v10  ;;  %v9376_v14 = vsub.f32 %v9375_v17, %v9371_v10 }
0x394c   : > { %v9373_v20 = vmax.f32 %v9372_v42, -100.0  ;;  %v9377_v61 = vmax.f32 %v9376_v14, -100.0 }
0x394e   : > { %v9385_v49 = vrot.slane %v9373_v20, %v13733_v7  ;;  %v9404_v43 = vrot.slane %v9377_v61, %v13733_v7 }
0x3950   : > { %v9392_v2 = vrot.slane %v9385_v49, %v13733_v7  ;;  %v9411_v28 = vrot.slane %v9404_v43, %v13733_v7  ;;  %v9542_v7 = vld [vmem:[#allocation3] sm:$0x1] }
0x3951   : > { %v9618_v52 = vadd.f32 %v13933_v36, %v9542_v7 }
0x3952   : > { %9393 = vrot.lane.b32.xlu1 %v9392_v2, %s14114_s5 }
0x3953   : > { %v9619_v19 = vadd.f32 %v13917_v37, %v9618_v52 }
0x3955   : > { %v9620_v16 = vmax.f32 %v9619_v19, 0.0 }
0x3956   : > { %9412 = vrot.lane.b32.xlu1 %v9411_v28, %s14114_s5 }
0x3957   : > { %v9621_v22 = vmul.f32 %v13941_v32, %v9620_v16 }
0x3959   : > { %v9622_v24 = vsel %vm4135_vm8, %v9621_v22, 0.0 }
0x395a   : > { %8895 = vrot.lane.b32.xlu1 %v8892_v39, %s14116_s8 }
0x3964   : > { %v9158_v60 = vpop.permute.xlu0 %9157 }
0x399e   : > { %v9656_v30 = vpop.xlane.xlu0 %9655 }
0x399f   : > { %v9657_v55 = vrot.slane %v9656_v30, 4 }
0x39a1   : > { %v9658_v37 = vadd.f32 %v9657_v55, %v9656_v30 }
0x39a3   : > { %v9659_v32 = vrot.slane %v9658_v37, 2 }
0x39a5   : > { %v9660_v48 = vadd.f32 %v9659_v32, %v9658_v37 }
0x39a7   : > { %v9661_v53 = vrot.slane %v9660_v48, 1 }
0x39a9   : > { %v9662_v62 = vadd.f32 %v9661_v53, %v9660_v48 }
0x39c4   : > { %v9394_v46 = vpop.permute.xlu1 %9393 }
0x39c5   : > { %v9396_v31 = vmul.f32 %v13967_v54, %v9394_v46 }
0x39c8   : > { %v9413_v1 = vpop.permute.xlu1 %9412 }
0x39c9   : > { %v9415_v35 = vmul.f32 %v9413_v1, %v13970_v29 }
0x39cb   : > { %v9416_v38 = vadd.f32 %v9415_v35, %v9396_v31 }
0x39cc   : > { %v8896_v23 = vpop.permute.xlu1 %8895 }
0x39cd   : > { %9419 = vrot.lane.b32.xlu1 %v9416_v38, %s14112_s1  ;;  %11753 = vpush %v8896_v23  ;;  %s11724_s1 = spop %11723 }
0x39ce   : > { %11755 = vpush %v9158_v60  ;;  %s11726_s5 = spop %11725  ;;  %v4160_v6 = vstv %s11724_s1 }
0x39cf   : > { %s11728_s23 = spop %11727  ;;  %v4675_v18 = vstv %s11726_s5  ;;  %v4161_v34 = vadd.f32 %v4160_v6, %v3950_v0 }
0x39d0   : > { %s11730_s18 = spop %11729  ;;  %v4916_v13 = vstv %s11728_s23 }
0x39d1   : > { %v4676_v27 = vadd.f32 %v4675_v18, %v4161_v34  ;;  %s11732_s8 = spop %11731  ;;  %v5139_v59 = vstv %s11730_s18 }
0x39d2   : > { %s11734_s3 = spop %11733 }
0x39d3   : > { %s11736_s6 = spop %11735  ;;  %v5894_v12 = vstv %s11734_s3 }
0x39d4   : > { %s11738_s7 = spop %11737  ;;  %v6157_v17 = vstv %s11736_s6 }
0x39d5   : > { %v6379_v14 = vstv %s11738_s7  ;;  %s11740_s26 = spop %11739 }
0x39d6   : > { %s11742_s1 = spop %11741  ;;  %v6893_v49 = vstv %s11740_s26 }
0x39d7   : > { %s11744_s5 = spop %11743  ;;  %v7134_v2 = vstv %s11742_s1 }
0x39d8   : > { %s11746_s23 = spop %11745  ;;  %v7397_v9 = vstv %s11744_s5 }
0x39d9   : > { %s11748_s18 = spop %11747  ;;  %v7659_v25 = vstv %s11746_s23  ;;  %s9791_s23 = sshll.u32 %s14121_s0, 3 }
0x39da   : > { %s11750_s3 = spop %11749  ;;  %v7881_v46 = vstv %s11748_s18  ;;  %s1096_s18 = scalar_lea.vmem %s12403_s13, %s9791_s23 }
0x39db   : > { %s11752_s6 = spop %11751  ;;  %v8395_v31 = vstv %s11750_s3 }
0x39dc   : > { %v8636_v38 = vstv %s11752_s6 }
0x39f1   : > { %9623 = vadd.xlane.f32.xlu1 %v9622_v24 }
0x39fe   : > { %s11754_s7 = spop %11753 }
0x39ff   : > { %v8899_v60 = vstv %s11754_s7 }
0x3a3f   : > { %v9420_v56 = vpop.permute.xlu1 %9419 }
0x3a40   : > { %11757 = vpush %v9420_v56 }
0x3a7e   : > { %v9624_v51 = vpop.xlane.xlu1 %9623 }
0x3a7f   : > { %v9625_v21 = vadd.f32 %v13946_v57, %v9624_v51 }
0x3a81   : > { %v9626_v44 = vand.u32 2147483647, %v9625_v21  ;;  %v9636_v45 = vsub.f32 0.0, %v9625_v21  ;;  %v9630_v3 = vmin.f32 %v9625_v21, 0.0 }
0x3a83   : > { %v9627_v15 = vsub.f32 0.0, %v9626_v44  ;;  %v9637_v11 = vmin.f32 %v9636_v45, 0.0 }
0x3a85   : > { %v9628_v4 = vmul.f32 1.442695, %v9627_v15 }
0x3a87   : > { %12141 = vpow2.f32 %v9628_v4 }
0x3a91   : > { %v12142_v50 = vpop.eup %12141 }
0x3a92   : > { %v9631_v36 = vadd.f32 1.0, %v12142_v50 }
0x3a94   : > { %12143 = vlog2.f32 %v9631_v36 }
0x3a9e   : > { %v12144_v41 = vpop.eup %12143 }
0x3a9f   : > { %v9633_v33 = vmul.f32 0.6931472, %v12144_v41 }
0x3aa1   : > { %v9634_v47 = vsub.f32 %v9630_v3, %v9633_v33  ;;  %v9638_v26 = vsub.f32 %v9637_v11, %v9633_v33 }
0x3aa3   : > { %v9635_v57 = vmax.f32 %v9634_v47, -100.0  ;;  %v9639_v63 = vmax.f32 %v9638_v26, -100.0 }
0x3aa5   : > { %v9640_v40 = vmul.f32 %v13967_v54, %v9635_v57  ;;  %v9641_v5 = vmul.f32 %v9639_v63, %v13970_v29  ;;  %v4917_v54 = vadd.f32 %v4916_v13, %v4676_v27  ;;  %v5653_v29 = vstv %s11732_s8  ;;  %s11756_s8 = spop %11755 }
0x3aa6   : > { %s11758_s26 = spop %11757  ;;  %v9161_v19 = vstv %s11756_s8 }
0x3aa7   : > { %v9642_v58 = vadd.f32 %v9641_v5, %v9640_v40  ;;  %v5140_v8 = vadd.f32 %v5139_v59, %v4917_v54  ;;  %v9423_v16 = vstv %s11758_s26 }
0x3aa9   : > { %11759 = vpush %v9642_v58  ;;  %v5654_v10 = vadd.f32 %v5653_v29, %v5140_v8 }
0x3aaa   : > { %11761 = vpush %v9662_v62 }
0x3aab   : > { %v5895_v42 = vadd.f32 %v5894_v12, %v5654_v10 }
0x3aad   : > { %v6158_v20 = vadd.f32 %v6157_v17, %v5895_v42 }
0x3aaf   : > { %v6380_v61 = vadd.f32 %v6379_v14, %v6158_v20 }
0x3ab1   : > { %v6894_v43 = vadd.f32 %v6893_v49, %v6380_v61 }
0x3ab3   : > { %v7135_v28 = vadd.f32 %v7134_v2, %v6894_v43 }
0x3ab5   : > { %v7398_v39 = vadd.f32 %v7397_v9, %v7135_v28 }
0x3ab7   : > { %v7660_v1 = vadd.f32 %v7659_v25, %v7398_v39 }
0x3ab9   : > { %v7882_v35 = vadd.f32 %v7881_v46, %v7660_v1 }
0x3abb   : > { %v8396_v23 = vadd.f32 %v8395_v31, %v7882_v35 }
0x3abd   : > { %v8637_v7 = vadd.f32 %v8636_v38, %v8396_v23 }
0x3abf   : > { %v8900_v52 = vadd.f32 %v8899_v60, %v8637_v7 }
0x3ac1   : > { %v9162_v22 = vadd.f32 %v9161_v19, %v8900_v52 }
0x3ac3   : > { %v9424_v24 = vadd.f32 %v9423_v16, %v9162_v22 }
0x3ada   : > { %s11760_s1 = spop %11759 }
0x3adb   : > { %v9645_v56 = vstv %s11760_s1  ;;  %s11762_s5 = spop %11761 }
0x3adc   : > { %v9646_v51 = vadd.f32 %v9645_v56, %v9424_v24  ;;  %v9664_v21 = vstv %s11762_s5 }
0x3add   : > { %v9665_v44 = vmul.f32 -0.5, %v9664_v21 }
0x3ade   : > { %v9666_v15 = vsub.f32 0.0, %v9646_v51 }
0x3adf   : > { %v9667_v4 = vmul.f32 0.005, %v9665_v44 }
0x3ae1   : > { %v9668_v50 = vadd.f32 %v9667_v4, %v9666_v15 }
0x3ae3   : > { %9670 = vst [vmem:[%s1096_s18] sm:$0xff] %v9668_v50 }
0x3ae4 PF: > { %p72_p9 = scmp.ge.s32.totalorder %s12422_s4, 4   ;;  %s14117_s23 = smov %s12185_s22 }
0x3ae5   : > { %s14118_s22 = smov %s12431_s2  ;;  %s14119_s26 = smov %s12422_s4 }
0x3ae6   :  { %74 = sbr.rel (!%p72_p9) target bundleno = 57 (0x39), region = 307 }

</bundles_post_ra>
